<compile_context>
chip_gen: v7x
topology: tpu7x:2x2x1
jax: 0.10.0
libtpu: 0.0.40
codegen_flags: <defaults>
</compile_context>

<pallas_src>
import functools

import jax
import jax.numpy as jnp
from jax.experimental import pallas as pl
from jax.experimental.pallas import tpu as pltpu


HIDDEN = 1024  # fixed by the module definition


# ----------------------------------------------------------------------------
# Fused single-step kernel: all three layers in one body.
# ----------------------------------------------------------------------------
def _decoder_kernel(x_ref, w1_ref, g1_ref, be1_ref,
                    w2_ref, g2_ref, be2_ref,
                    w3_ref, b3_ref,
                    o_ref, *, eps):
    def bn_lrelu(y, gamma, beta, slope):
        # Training-mode BatchNorm1d: per-feature batch mean / biased variance.
        # Exact because the kernel sees the FULL batch.
        mean = jnp.mean(y, axis=0, keepdims=True)
        var = jnp.mean((y - mean) ** 2, axis=0, keepdims=True)
        scale = gamma * jax.lax.rsqrt(var + eps)   # fold gamma into one scale
        z = (y - mean) * scale + beta
        return jnp.where(z >= 0, z, slope * z)

    # Layer 1: Linear (bias cancelled by BN mean) -> BN -> LeakyReLU(1024)
    x = x_ref[...].astype(jnp.bfloat16)
    y1 = jnp.dot(x, w1_ref[...], preferred_element_type=jnp.float32)
    h1 = bn_lrelu(y1, g1_ref[...], be1_ref[...], 1024.0)

    # Layer 2: Linear (bias cancelled by BN mean) -> BN -> LeakyReLU(0.01)
    y2 = jnp.dot(h1.astype(jnp.bfloat16), w2_ref[...],
                 preferred_element_type=jnp.float32)
    h2 = bn_lrelu(y2, g2_ref[...], be2_ref[...], 0.01)

    # Layer 3: Linear (+ bias)
    y3 = jnp.dot(h2.astype(jnp.bfloat16), w3_ref[...],
                 preferred_element_type=jnp.float32)
    o_ref[...] = (y3 + b3_ref[...]).astype(o_ref.dtype)


# ----------------------------------------------------------------------------
# Wrapper
# ----------------------------------------------------------------------------
def point_decoder_forward(x, params, *, eps=1e-5):
    B, K = x.shape
    assert K == HIDDEN
    assert B > 1, "training-mode BatchNorm1d requires batch size > 1"

    w3 = params["w3"]
    b3 = params["b3"]
    OUT = w3.shape[1]

    # Pad the final layer to a lane-dense multiple of 256 (unmasked stores,
    # MXU-friendly columns). Zero-padded columns produce zeros, sliced off.
    OUT_pad = ((OUT + 255) // 256) * 256
    if OUT_pad != OUT:
        w3 = jnp.pad(w3, ((0, 0), (0, OUT_pad - OUT)))
        b3 = jnp.pad(b3, ((0, 0), (0, OUT_pad - OUT)))

    # Everything is resident at once (single grid step).  Derive a VMEM limit
    # with headroom so larger OUT still compiles on v5e's 16 MiB default.
    def nbytes(a):
        return int(a.size) * a.dtype.itemsize
    resident = (nbytes(x) + nbytes(params["w1"]) + nbytes(params["w2"])
                + nbytes(w3) + nbytes(b3) + 4 * HIDDEN * 4 + B * OUT_pad * 4)
    vmem_limit = int(min(max(2 * resident + (2 << 20), 16 << 20), 64 << 20))
    # TODO(synk): for very large num_points (w3 >> 10 MiB) tile the final
    # layer's output columns over a grid axis instead of full residency.

    flops = 2 * B * HIDDEN * (2 * HIDDEN + OUT_pad)
    bytes_accessed = resident + B * HIDDEN * 4

    full = lambda i: (0, 0)
    kernel = functools.partial(_decoder_kernel, eps=eps)

    out = pl.pallas_call(
        kernel,
        out_shape=jax.ShapeDtypeStruct((B, OUT_pad), jnp.float32),
        grid_spec=pltpu.PrefetchScalarGridSpec(
            num_scalar_prefetch=0,
            grid=(1,),
            in_specs=[
                pl.BlockSpec((B, HIDDEN), full),        # x
                pl.BlockSpec((HIDDEN, HIDDEN), full),   # w1 (bf16)
                pl.BlockSpec((1, HIDDEN), full),        # BN1 gamma
                pl.BlockSpec((1, HIDDEN), full),        # BN1 beta
                pl.BlockSpec((HIDDEN, HIDDEN), full),   # w2 (bf16)
                pl.BlockSpec((1, HIDDEN), full),        # BN2 gamma
                pl.BlockSpec((1, HIDDEN), full),        # BN2 beta
                pl.BlockSpec((HIDDEN, OUT_pad), full),  # w3 (bf16)
                pl.BlockSpec((1, OUT_pad), full),       # b3
            ],
            out_specs=pl.BlockSpec((B, OUT_pad), full),
        ),
        compiler_params=pltpu.CompilerParams(
            dimension_semantics=("arbitrary",),
            vmem_limit_bytes=vmem_limit),
        cost_estimate=pl.CostEstimate(
            flops=flops, transcendentals=0, bytes_accessed=bytes_accessed),
    )(x, params["w1"], params["g1"], params["be1"],
      params["w2"], params["g2"], params["be2"], w3, b3)

    return out[:, :OUT] if OUT_pad != OUT else out


# ----------------------------------------------------------------------------
# Pure-JAX reference (faithful module structure; mirrors the kernel's bf16
# matmul operands with f32 accumulation so the comparison isolates the kernel).
# ----------------------------------------------------------------------------
def point_decoder_ref(x, params, eps=1e-5):
    hi = jax.lax.Precision.HIGHEST

    def bn(y, g, b):
        mean = jnp.mean(y, axis=0, keepdims=True)
        var = jnp.mean((y - mean) ** 2, axis=0, keepdims=True)
        return g * (y - mean) * jax.lax.rsqrt(var + eps) + b

    def mm(a, w):
        a16 = a.astype(jnp.bfloat16).astype(jnp.float32)
        return jnp.dot(a16, w.astype(jnp.float32), precision=hi)

    y = mm(x, params["w1"]) + params["b1"]
    y = bn(y, params["g1"], params["be1"])
    y = jnp.where(y >= 0, y, 1024.0 * y)
    y = mm(y, params["w2"]) + params["b2"]
    y = bn(y, params["g2"], params["be2"])
    y = jnp.where(y >= 0, y, 0.01 * y)
    return mm(y, params["w3"]) + params["b3"]


# ----------------------------------------------------------------------------
# Main
# ----------------------------------------------------------------------------
if __name__ == "__main__":
    B = 8                  # batch (>1 required for training-mode BatchNorm1d)
    NUM_POINTS = 256       # small test size; num_points*3 = 768 (lane aligned)
    OUT = NUM_POINTS * 3

    key = jax.random.PRNGKey(0)
    ks = jax.random.split(key, 11)
    s = 0.02
    params = {
        # Weights stored as bf16 (streamed at half the HBM bytes).
        "w1": (s * jax.random.normal(ks[0], (HIDDEN, HIDDEN), jnp.float32)
               ).astype(jnp.bfloat16),
        "b1": s * jax.random.normal(ks[1], (1, HIDDEN), jnp.float32),
        "g1": 1.0 + s * jax.random.normal(ks[2], (1, HIDDEN), jnp.float32),
        "be1": s * jax.random.normal(ks[3], (1, HIDDEN), jnp.float32),
        "w2": (s * jax.random.normal(ks[4], (HIDDEN, HIDDEN), jnp.float32)
               ).astype(jnp.bfloat16),
        "b2": s * jax.random.normal(ks[5], (1, HIDDEN), jnp.float32),
        "g2": 1.0 + s * jax.random.normal(ks[6], (1, HIDDEN), jnp.float32),
        "be2": s * jax.random.normal(ks[7], (1, HIDDEN), jnp.float32),
        "w3": (s * jax.random.normal(ks[8], (HIDDEN, OUT), jnp.float32)
               ).astype(jnp.bfloat16),
        "b3": s * jax.random.normal(ks[9], (1, OUT), jnp.float32),
    }
    x = jax.random.normal(ks[10], (B, HIDDEN), jnp.float32)

    out = jax.block_until_ready(jax.jit(point_decoder_forward)(x, params))
    ref = jax.block_until_ready(point_decoder_ref(x, params))

    assert out.shape == (B, OUT), out.shape
    max_err = float(jnp.max(jnp.abs(out - ref)))
    assert jnp.allclose(out, ref, atol=1e-2, rtol=1e-2), max_err
    print("KERNEL_OK")
</pallas_src>

<mosaic_0001>
module attributes {stable_mosaic.version = 11 : i64} {
  func.func @_decoder_kernel(%arg0: i32, %arg1: memref<8x1024xf32, #tpu.memory_space<vmem>>, %arg2: memref<1024x1024xbf16, #tpu.memory_space<vmem>>, %arg3: memref<1x1024xf32, #tpu.memory_space<vmem>>, %arg4: memref<1x1024xf32, #tpu.memory_space<vmem>>, %arg5: memref<1024x1024xbf16, #tpu.memory_space<vmem>>, %arg6: memref<1x1024xf32, #tpu.memory_space<vmem>>, %arg7: memref<1x1024xf32, #tpu.memory_space<vmem>>, %arg8: memref<1024x768xbf16, #tpu.memory_space<vmem>>, %arg9: memref<1x768xf32, #tpu.memory_space<vmem>>, %arg10: memref<8x768xf32, #tpu.memory_space<vmem>>) attributes {dimension_semantics = [#tpu.dimension_semantics<arbitrary>], iteration_bounds = array<i64: 1>, scalar_prefetch = 0 : i64, scratch_operands = 0 : i64, tpu.core_type = #tpu.core_type<tc>, window_params = [{pipeline_mode = #tpu.pipeline_mode<synchronous>, transform_indices = @transform_0, window_bounds = array<i64: 8, 1024>}, {pipeline_mode = #tpu.pipeline_mode<synchronous>, transform_indices = @transform_1, window_bounds = array<i64: 1024, 1024>}, {pipeline_mode = #tpu.pipeline_mode<synchronous>, transform_indices = @transform_2, window_bounds = array<i64: 1, 1024>}, {pipeline_mode = #tpu.pipeline_mode<synchronous>, transform_indices = @transform_3, window_bounds = array<i64: 1, 1024>}, {pipeline_mode = #tpu.pipeline_mode<synchronous>, transform_indices = @transform_4, window_bounds = array<i64: 1024, 1024>}, {pipeline_mode = #tpu.pipeline_mode<synchronous>, transform_indices = @transform_5, window_bounds = array<i64: 1, 1024>}, {pipeline_mode = #tpu.pipeline_mode<synchronous>, transform_indices = @transform_6, window_bounds = array<i64: 1, 1024>}, {pipeline_mode = #tpu.pipeline_mode<synchronous>, transform_indices = @transform_7, window_bounds = array<i64: 1024, 768>}, {pipeline_mode = #tpu.pipeline_mode<synchronous>, transform_indices = @transform_8, window_bounds = array<i64: 1, 768>}, {pipeline_mode = #tpu.pipeline_mode<synchronous>, transform_indices = @transform_9, window_bounds = array<i64: 8, 768>}]} {
    %c0 = arith.constant 0 : index
    %c0_0 = arith.constant 0 : index
    %0 = vector.load %arg1[%c0, %c0_0] : memref<8x1024xf32, #tpu.memory_space<vmem>>, vector<8x1024xf32>
    %1 = arith.truncf %0 : vector<8x1024xf32> to vector<8x1024xbf16>
    %c0_1 = arith.constant 0 : index
    %c0_2 = arith.constant 0 : index
    %2 = vector.load %arg2[%c0_1, %c0_2] : memref<1024x1024xbf16, #tpu.memory_space<vmem>>, vector<1024x1024xbf16>
    %cst = arith.constant dense<0.000000e+00> : vector<8x1024xf32>
    %3 = tpu.matmul %1, %2, %cst {dimension_numbers = #tpu.dot_dimension_numbers<[1], [0], [0], [1], [0, 0, 1, 1], [], []>} : vector<8x1024xbf16>, vector<1024x1024xbf16>, vector<8x1024xf32> -> vector<8x1024xf32>
    %c0_3 = arith.constant 0 : index
    %c0_4 = arith.constant 0 : index
    %4 = vector.load %arg3[%c0_3, %c0_4] : memref<1x1024xf32, #tpu.memory_space<vmem>>, vector<1x1024xf32>
    %c0_5 = arith.constant 0 : index
    %c0_6 = arith.constant 0 : index
    %5 = vector.load %arg4[%c0_5, %c0_6] : memref<1x1024xf32, #tpu.memory_space<vmem>>, vector<1x1024xf32>
    %cst_7 = arith.constant dense<0.000000e+00> : vector<1024xf32>
    %6 = vector.multi_reduction <add>, %3, %cst_7 [0] : vector<8x1024xf32> to vector<1024xf32>
    %7 = vector.shape_cast %6 : vector<1024xf32> to vector<1x1024xf32>
    %cst_8 = arith.constant 8.000000e+00 : f32
    %8 = vector.broadcast %cst_8 : f32 to vector<1x1024xf32>
    %9 = arith.divf %7, %8 : vector<1x1024xf32>
    %10 = vector.broadcast %9 : vector<1x1024xf32> to vector<8x1024xf32>
    %11 = arith.subf %3, %10 : vector<8x1024xf32>
    %12 = arith.mulf %11, %11 : vector<8x1024xf32>
    %cst_9 = arith.constant dense<0.000000e+00> : vector<1024xf32>
    %13 = vector.multi_reduction <add>, %12, %cst_9 [0] : vector<8x1024xf32> to vector<1024xf32>
    %14 = vector.shape_cast %13 : vector<1024xf32> to vector<1x1024xf32>
    %cst_10 = arith.constant 8.000000e+00 : f32
    %15 = vector.broadcast %cst_10 : f32 to vector<1x1024xf32>
    %16 = arith.divf %14, %15 : vector<1x1024xf32>
    %cst_11 = arith.constant 9.99999974E-6 : f32
    %17 = vector.broadcast %cst_11 : f32 to vector<1x1024xf32>
    %18 = arith.addf %16, %17 : vector<1x1024xf32>
    %19 = math.rsqrt %18 : vector<1x1024xf32>
    %20 = arith.mulf %4, %19 : vector<1x1024xf32>
    %21 = vector.broadcast %9 : vector<1x1024xf32> to vector<8x1024xf32>
    %22 = arith.subf %3, %21 : vector<8x1024xf32>
    %23 = vector.broadcast %20 : vector<1x1024xf32> to vector<8x1024xf32>
    %24 = arith.mulf %22, %23 : vector<8x1024xf32>
    %25 = vector.broadcast %5 : vector<1x1024xf32> to vector<8x1024xf32>
    %26 = arith.addf %24, %25 : vector<8x1024xf32>
    %cst_12 = arith.constant 0.000000e+00 : f32
    %27 = vector.broadcast %cst_12 : f32 to vector<8x1024xf32>
    %28 = arith.cmpf oge, %26, %27 : vector<8x1024xf32>
    %cst_13 = arith.constant 1.024000e+03 : f32
    %29 = vector.broadcast %cst_13 : f32 to vector<8x1024xf32>
    %30 = arith.mulf %29, %26 : vector<8x1024xf32>
    %31 = arith.select %28, %26, %30 : vector<8x1024xi1>, vector<8x1024xf32>
    %32 = arith.truncf %31 : vector<8x1024xf32> to vector<8x1024xbf16>
    %c0_14 = arith.constant 0 : index
    %c0_15 = arith.constant 0 : index
    %33 = vector.load %arg5[%c0_14, %c0_15] : memref<1024x1024xbf16, #tpu.memory_space<vmem>>, vector<1024x1024xbf16>
    %cst_16 = arith.constant dense<0.000000e+00> : vector<8x1024xf32>
    %34 = tpu.matmul %32, %33, %cst_16 {dimension_numbers = #tpu.dot_dimension_numbers<[1], [0], [0], [1], [0, 0, 1, 1], [], []>} : vector<8x1024xbf16>, vector<1024x1024xbf16>, vector<8x1024xf32> -> vector<8x1024xf32>
    %c0_17 = arith.constant 0 : index
    %c0_18 = arith.constant 0 : index
    %35 = vector.load %arg6[%c0_17, %c0_18] : memref<1x1024xf32, #tpu.memory_space<vmem>>, vector<1x1024xf32>
    %c0_19 = arith.constant 0 : index
    %c0_20 = arith.constant 0 : index
    %36 = vector.load %arg7[%c0_19, %c0_20] : memref<1x1024xf32, #tpu.memory_space<vmem>>, vector<1x1024xf32>
    %cst_21 = arith.constant dense<0.000000e+00> : vector<1024xf32>
    %37 = vector.multi_reduction <add>, %34, %cst_21 [0] : vector<8x1024xf32> to vector<1024xf32>
    %38 = vector.shape_cast %37 : vector<1024xf32> to vector<1x1024xf32>
    %cst_22 = arith.constant 8.000000e+00 : f32
    %39 = vector.broadcast %cst_22 : f32 to vector<1x1024xf32>
    %40 = arith.divf %38, %39 : vector<1x1024xf32>
    %41 = vector.broadcast %40 : vector<1x1024xf32> to vector<8x1024xf32>
    %42 = arith.subf %34, %41 : vector<8x1024xf32>
    %43 = arith.mulf %42, %42 : vector<8x1024xf32>
    %cst_23 = arith.constant dense<0.000000e+00> : vector<1024xf32>
    %44 = vector.multi_reduction <add>, %43, %cst_23 [0] : vector<8x1024xf32> to vector<1024xf32>
    %45 = vector.shape_cast %44 : vector<1024xf32> to vector<1x1024xf32>
    %cst_24 = arith.constant 8.000000e+00 : f32
    %46 = vector.broadcast %cst_24 : f32 to vector<1x1024xf32>
    %47 = arith.divf %45, %46 : vector<1x1024xf32>
    %cst_25 = arith.constant 9.99999974E-6 : f32
    %48 = vector.broadcast %cst_25 : f32 to vector<1x1024xf32>
    %49 = arith.addf %47, %48 : vector<1x1024xf32>
    %50 = math.rsqrt %49 : vector<1x1024xf32>
    %51 = arith.mulf %35, %50 : vector<1x1024xf32>
    %52 = vector.broadcast %40 : vector<1x1024xf32> to vector<8x1024xf32>
    %53 = arith.subf %34, %52 : vector<8x1024xf32>
    %54 = vector.broadcast %51 : vector<1x1024xf32> to vector<8x1024xf32>
    %55 = arith.mulf %53, %54 : vector<8x1024xf32>
    %56 = vector.broadcast %36 : vector<1x1024xf32> to vector<8x1024xf32>
    %57 = arith.addf %55, %56 : vector<8x1024xf32>
    %cst_26 = arith.constant 0.000000e+00 : f32
    %58 = vector.broadcast %cst_26 : f32 to vector<8x1024xf32>
    %59 = arith.cmpf oge, %57, %58 : vector<8x1024xf32>
    %cst_27 = arith.constant 0.00999999977 : f32
    %60 = vector.broadcast %cst_27 : f32 to vector<8x1024xf32>
    %61 = arith.mulf %60, %57 : vector<8x1024xf32>
    %62 = arith.select %59, %57, %61 : vector<8x1024xi1>, vector<8x1024xf32>
    %63 = arith.truncf %62 : vector<8x1024xf32> to vector<8x1024xbf16>
    %c0_28 = arith.constant 0 : index
    %c0_29 = arith.constant 0 : index
    %64 = vector.load %arg8[%c0_28, %c0_29] : memref<1024x768xbf16, #tpu.memory_space<vmem>>, vector<1024x768xbf16>
    %cst_30 = arith.constant dense<0.000000e+00> : vector<8x768xf32>
    %65 = tpu.matmul %63, %64, %cst_30 {dimension_numbers = #tpu.dot_dimension_numbers<[1], [0], [0], [1], [0, 0, 1, 1], [], []>} : vector<8x1024xbf16>, vector<1024x768xbf16>, vector<8x768xf32> -> vector<8x768xf32>
    %c0_31 = arith.constant 0 : index
    %c0_32 = arith.constant 0 : index
    %66 = vector.load %arg9[%c0_31, %c0_32] : memref<1x768xf32, #tpu.memory_space<vmem>>, vector<1x768xf32>
    %67 = vector.broadcast %66 : vector<1x768xf32> to vector<8x768xf32>
    %68 = arith.addf %65, %67 : vector<8x768xf32>
    %c0_33 = arith.constant 0 : index
    %c0_34 = arith.constant 0 : index
    %69 = vector.load %arg10[%c0_33, %c0_34] : memref<8x768xf32, #tpu.memory_space<vmem>>, vector<8x768xf32>
    tpu.vector_store %arg10[%c0_33, %c0_34], %68 {strides = array<i32>} : memref<8x768xf32, #tpu.memory_space<vmem>>, vector<8x768xf32>,
    return
  }
  func.func @transform_0(%arg0: i32) -> (i32, i32) {
    %c0_i32 = arith.constant 0 : i32
    %c0_i32_0 = arith.constant 0 : i32
    %c0_i32_1 = arith.constant 0 : i32
    return %c0_i32, %c0_i32_0 : i32, i32
  }
  func.func @transform_1(%arg0: i32) -> (i32, i32) {
    %c0_i32 = arith.constant 0 : i32
    %c0_i32_0 = arith.constant 0 : i32
    %c0_i32_1 = arith.constant 0 : i32
    return %c0_i32, %c0_i32_0 : i32, i32
  }
  func.func @transform_2(%arg0: i32) -> (i32, i32) {
    %c0_i32 = arith.constant 0 : i32
    %c0_i32_0 = arith.constant 0 : i32
    %c0_i32_1 = arith.constant 0 : i32
    return %c0_i32, %c0_i32_0 : i32, i32
  }
  func.func @transform_3(%arg0: i32) -> (i32, i32) {
    %c0_i32 = arith.constant 0 : i32
    %c0_i32_0 = arith.constant 0 : i32
    %c0_i32_1 = arith.constant 0 : i32
    return %c0_i32, %c0_i32_0 : i32, i32
  }
  func.func @transform_4(%arg0: i32) -> (i32, i32) {
    %c0_i32 = arith.constant 0 : i32
    %c0_i32_0 = arith.constant 0 : i32
    %c0_i32_1 = arith.constant 0 : i32
    return %c0_i32, %c0_i32_0 : i32, i32
  }
  func.func @transform_5(%arg0: i32) -> (i32, i32) {
    %c0_i32 = arith.constant 0 : i32
    %c0_i32_0 = arith.constant 0 : i32
    %c0_i32_1 = arith.constant 0 : i32
    return %c0_i32, %c0_i32_0 : i32, i32
  }
  func.func @transform_6(%arg0: i32) -> (i32, i32) {
    %c0_i32 = arith.constant 0 : i32
    %c0_i32_0 = arith.constant 0 : i32
    %c0_i32_1 = arith.constant 0 : i32
    return %c0_i32, %c0_i32_0 : i32, i32
  }
  func.func @transform_7(%arg0: i32) -> (i32, i32) {
    %c0_i32 = arith.constant 0 : i32
    %c0_i32_0 = arith.constant 0 : i32
    %c0_i32_1 = arith.constant 0 : i32
    return %c0_i32, %c0_i32_0 : i32, i32
  }
  func.func @transform_8(%arg0: i32) -> (i32, i32) {
    %c0_i32 = arith.constant 0 : i32
    %c0_i32_0 = arith.constant 0 : i32
    %c0_i32_1 = arith.constant 0 : i32
    return %c0_i32, %c0_i32_0 : i32, i32
  }
  func.func @transform_9(%arg0: i32) -> (i32, i32) {
    %c0_i32 = arith.constant 0 : i32
    %c0_i32_0 = arith.constant 0 : i32
    %c0_i32_1 = arith.constant 0 : i32
    return %c0_i32, %c0_i32_0 : i32, i32
  }
}

</mosaic_0001>

<bundles_post_ra>
// kernel: point_decoder_forward.1
= control target key start
LH: loop header
LB: loop body
LE: loop exit
PB: predicated region body
PF: predicated region fallthrough
CT: control target
= control target key end

     0   :  { %14 = vsyncpa [#allocation3], 0  ;;  %s14186_s0 = inlined_call_operand.hbm [shape: f32[8,1024], index: 0, kind: input, shape index: {}]   ;;  %s14187_s1 = inlined_call_operand.hbm [shape: bf16[1024,1024], index: 1, kind: input, shape index: {}]   ;;  %s14188_s2 = inlined_call_operand.hbm [shape: f32[1,1024], index: 2, kind: input, shape index: {}]   ;;  %s14189_s3 = inlined_call_operand.hbm [shape: f32[1,1024], index: 3, kind: input, shape index: {}]   ;;  %s14190_s4 = inlined_call_operand.hbm [shape: bf16[1024,1024], index: 4, kind: input, shape index: {}]   ;;  %s14191_s5 = inlined_call_operand.hbm [shape: f32[1,1024], index: 5, kind: input, shape index: {}]   ;;  %s14192_s6 = inlined_call_operand.hbm [shape: f32[1,1024], index: 6, kind: input, shape index: {}]   ;;  %s14193_s7 = inlined_call_operand.hbm [shape: bf16[1024,768], index: 7, kind: input, shape index: {}]   ;;  %s14194_s8 = inlined_call_operand.hbm [shape: f32[1,768], index: 8, kind: input, shape index: {}]   ;;  %s14195_s9 = inlined_call_operand.hbm [shape: f32[8,768], index: 9, kind: output, shape index: {}]  }
   0x1   :  { %15 = vsyncpa [#allocation6], 0 }
   0x2   :  { %16 = vsyncpa [#allocation9], 0 }
   0x3   :  { %17 = vsyncpa [#allocation12], 0 }
   0x4   :  { %18 = vsyncpa [#allocation15], 0 }
   0x5   :  { %19 = vsyncpa [#allocation4], 0  ;;  %s13538_s30 = smov [#allocation5]   ;;  %s13306_s13 = scalar_lea.hbm %s14187_s1, 65536 }
   0x6   :  { %s35_s10 = sshll.u32 %s13538_s30, 4  ;;  %p13307_p0 = scmp.ne.s32.totalorder %s14187_s1, %s13306_s13  ;;  %s36_s10 = int_to_ptr.vmem [resolvable:$true] %s35_s10 }
   0x7   :  { %p13310_p1 = scmp.lt.u32.totalorder %s13306_s13, %s14187_s1 }
   0x9   :  { %p13312_p2 = pnand %p13310_p1, %p13307_p0 }
   0xb   :  { %13315 = shalt.err (!%p13312_p2)
}
   0xc   :  { %s13316_s18 = scalar_lea.vmem %s36_s10, 65536  ;;  %p13321_p4 = scmp.lt.s32.totalorder %s36_s10, %s36_s10 }
   0xd   :  { %p13317_p3 = scmp.ne.s32.totalorder %s36_s10, %s13316_s18  ;;  %p13322_p5 = scmp.lt.s32.totalorder %s13316_s18, %s13316_s18 }
   0xf   :  { %p13323_p6 = por %p13322_p5, %p13321_p4 }
  0x11   :  { %p13324_p7 = pnand %p13323_p6, %p13317_p3 }
  0x13   :  { %13327 = shalt.err (!%p13324_p7)
}
  0x14   :  { %s13539_s19 = smov 512   ;;  %s13540_s20 = smov 32  }
  0x15   :  { %41 = dma.hbm_to_vmem [thread:$0]  %s14187_s1, 65536, %s36_s10, [#allocation6], %s13539_s19, %s13539_s19, %s13540_s20  }
  0x16   :  { %s13541_s23 = smov [#allocation8]   ;;  %s13542_s25 = smov [#allocation11]  }
  0x17   :  { %s58_s24 = sshll.u32 %s13541_s23, 4  ;;  %s80_s26 = sshll.u32 %s13542_s25, 4  ;;  %s59_s24 = int_to_ptr.vmem [resolvable:$true] %s58_s24  ;;  %s81_s26 = int_to_ptr.vmem [resolvable:$true] %s80_s26 }
  0x18   :  { %s13328_s29 = scalar_lea.hbm %s14189_s3, 128 }
  0x19   :  { %p13329_p8 = scmp.ne.s32.totalorder %s14189_s3, %s13328_s29  ;;  %p13332_p9 = scmp.lt.u32.totalorder %s13328_s29, %s14189_s3 }
  0x1b   :  { %p13334_p10 = pnand %p13332_p9, %p13329_p8 }
  0x1d   :  { %13337 = shalt.err (!%p13334_p10)
}
  0x1e   :  { %s13338_s1 = scalar_lea.vmem %s59_s24, 128  ;;  %p13343_p12 = scmp.lt.s32.totalorder %s59_s24, %s59_s24 }
  0x1f   :  { %p13339_p11 = scmp.ne.s32.totalorder %s59_s24, %s13338_s1  ;;  %p13344_p13 = scmp.lt.s32.totalorder %s13338_s1, %s13338_s1 }
  0x21   :  { %p13345_p0 = por %p13344_p13, %p13343_p12 }
  0x23   :  { %p13346_p1 = pnand %p13345_p0, %p13339_p11 }
  0x25   :  { %13349 = shalt.err (!%p13346_p1)
}
  0x26   :  { %61 = dma.hbm_to_vmem [thread:$0]  %s14189_s3, 128, %s59_s24, [#allocation9]  }
  0x27   :  { %s13350_s17 = scalar_lea.hbm %s14191_s5, 128 }
  0x28   :  { %p13351_p2 = scmp.ne.s32.totalorder %s14191_s5, %s13350_s17  ;;  %p13354_p3 = scmp.lt.u32.totalorder %s13350_s17, %s14191_s5 }
  0x2a   :  { %p13356_p4 = pnand %p13354_p3, %p13351_p2 }
  0x2c   :  { %13359 = shalt.err (!%p13356_p4)
}
  0x2d   :  { %s13360_s25 = scalar_lea.vmem %s81_s26, 128  ;;  %p13365_p6 = scmp.lt.s32.totalorder %s81_s26, %s81_s26 }
  0x2e   :  { %p13361_p5 = scmp.ne.s32.totalorder %s81_s26, %s13360_s25  ;;  %p13366_p7 = scmp.lt.s32.totalorder %s13360_s25, %s13360_s25 }
  0x30   :  { %p13367_p8 = por %p13366_p7, %p13365_p6 }
  0x32   :  { %p13368_p9 = pnand %p13367_p8, %p13361_p5 }
  0x34   :  { %13371 = shalt.err (!%p13368_p9)
}
  0x35   :  { %83 = dma.hbm_to_vmem [thread:$0]  %s14191_s5, 128, %s81_s26, [#allocation12]  }
  0x36   :  { %s13543_s27 = smov [#allocation14]   ;;  %s13372_s11 = scalar_lea.hbm %s14193_s7, 49152 }
  0x37   :  { %s99_s28 = sshll.u32 %s13543_s27, 4  ;;  %p13373_p10 = scmp.ne.s32.totalorder %s14193_s7, %s13372_s11  ;;  %s100_s28 = int_to_ptr.vmem [resolvable:$true] %s99_s28 }
  0x38   :  { %p13376_p11 = scmp.lt.u32.totalorder %s13372_s11, %s14193_s7 }
  0x3a   :  { %p13378_p12 = pnand %p13376_p11, %p13373_p10 }
  0x3c   :  { %13381 = shalt.err (!%p13378_p12)
}
  0x3d   :  { %s13382_s14 = scalar_lea.vmem %s100_s28, 49152  ;;  %p13387_p0 = scmp.lt.s32.totalorder %s100_s28, %s100_s28 }
  0x3e   :  { %p13383_p13 = scmp.ne.s32.totalorder %s100_s28, %s13382_s14  ;;  %p13388_p1 = scmp.lt.s32.totalorder %s13382_s14, %s13382_s14 }
  0x40   :  { %p13389_p2 = por %p13388_p1, %p13387_p0 }
  0x42   :  { %p13390_p3 = pnand %p13389_p2, %p13383_p13 }
  0x44   :  { %13393 = shalt.err (!%p13390_p3)
}
  0x45   :  { %s13544_s5 = smov 384   ;;  %s13545_s26 = smov 24  }
  0x46   :  { %105 = dma.hbm_to_vmem [thread:$0]  %s14193_s7, 49152, %s100_s28, [#allocation15], %s13544_s5, %s13544_s5, %s13545_s26  }
  0x47   :  { %s13546_s17 = smov [#allocation2]   ;;  %s13547_s21 = smov [#allocation7]  }
  0x48   :  { %s26_s18 = sshll.u32 %s13546_s17, 4  ;;  %s48_s22 = sshll.u32 %s13547_s21, 4  ;;  %s27_s18 = int_to_ptr.vmem [resolvable:$true] %s26_s18  ;;  %s49_s22 = int_to_ptr.vmem [resolvable:$true] %s48_s22 }
  0x49   :  { %s13394_s3 = scalar_lea.hbm %s14186_s0, 1024 }
  0x4a   :  { %p13395_p4 = scmp.ne.s32.totalorder %s14186_s0, %s13394_s3  ;;  %p13398_p5 = scmp.lt.u32.totalorder %s13394_s3, %s14186_s0 }
  0x4c   :  { %p13400_p6 = pnand %p13398_p5, %p13395_p4 }
  0x4e   :  { %13403 = shalt.err (!%p13400_p6)
}
  0x4f   :  { %s13404_s7 = scalar_lea.vmem %s27_s18, 1024  ;;  %p13409_p8 = scmp.lt.s32.totalorder %s27_s18, %s27_s18 }
  0x50   :  { %p13405_p7 = scmp.ne.s32.totalorder %s27_s18, %s13404_s7  ;;  %p13410_p9 = scmp.lt.s32.totalorder %s13404_s7, %s13404_s7 }
  0x52   :  { %p13411_p10 = por %p13410_p9, %p13409_p8 }
  0x54   :  { %p13412_p11 = pnand %p13411_p10, %p13405_p7 }
  0x56   :  { %13415 = shalt.err (!%p13412_p11)
}
  0x57   :  { %29 = dma.hbm_to_vmem [thread:$0]  %s14186_s0, 1024, %s27_s18, [#allocation3]  }
  0x58   :  { %s13416_s1 = scalar_lea.hbm %s14188_s2, 128 }
  0x59   :  { %p13417_p12 = scmp.ne.s32.totalorder %s14188_s2, %s13416_s1  ;;  %p13420_p13 = scmp.lt.u32.totalorder %s13416_s1, %s14188_s2 }
  0x5b   :  { %p13422_p0 = pnand %p13420_p13, %p13417_p12 }
  0x5d   :  { %13425 = shalt.err (!%p13422_p0)
}
  0x5e   :  { %s13426_s15 = scalar_lea.vmem %s49_s22, 128  ;;  %p13431_p2 = scmp.lt.s32.totalorder %s49_s22, %s49_s22 }
  0x5f   :  { %p13427_p1 = scmp.ne.s32.totalorder %s49_s22, %s13426_s15  ;;  %p13432_p3 = scmp.lt.s32.totalorder %s13426_s15, %s13426_s15 }
  0x61   :  { %p13433_p4 = por %p13432_p3, %p13431_p2 }
  0x63   :  { %p13434_p5 = pnand %p13433_p4, %p13427_p1 }
  0x65   :  { %13437 = shalt.err (!%p13434_p5)
}
  0x66   :  { %51 = dma.hbm_to_vmem [thread:$0]  %s14188_s2, 128, %s49_s22, [#allocation6]  }
  0x67   :  { %s13548_s17 = smov [#allocation10]   ;;  %s13549_s21 = smov [#allocation13]  }
  0x68   :  { %s67_s18 = sshll.u32 %s13548_s17, 4  ;;  %s90_s23 = sshll.u32 %s13549_s21, 4  ;;  %s68_s18 = int_to_ptr.vmem [resolvable:$true] %s67_s18  ;;  %s91_s23 = int_to_ptr.vmem [resolvable:$true] %s90_s23 }
  0x69   :  { %s13438_s24 = scalar_lea.hbm %s14190_s4, 65536 }
  0x6a   :  { %p13439_p6 = scmp.ne.s32.totalorder %s14190_s4, %s13438_s24  ;;  %p13442_p7 = scmp.lt.u32.totalorder %s13438_s24, %s14190_s4 }
  0x6c   :  { %p13444_p8 = pnand %p13442_p7, %p13439_p6 }
  0x6e   :  { %13447 = shalt.err (!%p13444_p8)
}
  0x6f   :  { %s13448_s2 = scalar_lea.vmem %s68_s18, 65536  ;;  %p13453_p10 = scmp.lt.s32.totalorder %s68_s18, %s68_s18 }
  0x70   :  { %p13449_p9 = scmp.ne.s32.totalorder %s68_s18, %s13448_s2  ;;  %p13454_p11 = scmp.lt.s32.totalorder %s13448_s2, %s13448_s2 }
  0x72   :  { %p13455_p12 = por %p13454_p11, %p13453_p10 }
  0x74   :  { %p13456_p13 = pnand %p13455_p12, %p13449_p9 }
  0x76   :  { %13459 = shalt.err (!%p13456_p13)
}
  0x77   :  { %73 = dma.hbm_to_vmem [thread:$0]  %s14190_s4, 65536, %s68_s18, [#allocation9], %s13539_s19, %s13539_s19, %s13540_s20  }
  0x78   :  { %s13460_s13 = scalar_lea.hbm %s14192_s6, 128 }
  0x79   :  { %p13461_p0 = scmp.ne.s32.totalorder %s14192_s6, %s13460_s13  ;;  %p13464_p1 = scmp.lt.u32.totalorder %s13460_s13, %s14192_s6 }
  0x7b   :  { %p13466_p2 = pnand %p13464_p1, %p13461_p0 }
  0x7d   :  { %13469 = shalt.err (!%p13466_p2)
}
  0x7e   :  { %s13470_s26 = scalar_lea.vmem %s91_s23, 128  ;;  %p13475_p4 = scmp.lt.s32.totalorder %s91_s23, %s91_s23 }
  0x7f   :  { %p13471_p3 = scmp.ne.s32.totalorder %s91_s23, %s13470_s26  ;;  %p13476_p5 = scmp.lt.s32.totalorder %s13470_s26, %s13470_s26 }
  0x81   :  { %p13477_p6 = por %p13476_p5, %p13475_p4 }
  0x83   :  { %p13478_p7 = pnand %p13477_p6, %p13471_p3 }
  0x85   :  { %13481 = shalt.err (!%p13478_p7)
}
  0x86   :  { %93 = dma.hbm_to_vmem [thread:$0]  %s14192_s6, 128, %s91_s23, [#allocation12]  }
  0x87   :  { %s13550_s20 = smov [#allocation16]   ;;  %s13482_s17 = scalar_lea.hbm %s14194_s8, 96 }
  0x88   :  { %s112_s15 = sshll.u32 %s13550_s20, 4  ;;  %p13483_p8 = scmp.ne.s32.totalorder %s14194_s8, %s13482_s17  ;;  %s113_s15 = int_to_ptr.vmem [resolvable:$true] %s112_s15 }
  0x89   :  { %p13486_p9 = scmp.lt.u32.totalorder %s13482_s17, %s14194_s8 }
  0x8b   :  { %p13488_p10 = pnand %p13486_p9, %p13483_p8 }
  0x8d   :  { %13491 = shalt.err (!%p13488_p10)
}
  0x8e   :  { %s13492_s24 = scalar_lea.vmem %s113_s15, 96  ;;  %p13497_p12 = scmp.lt.s32.totalorder %s113_s15, %s113_s15 }
  0x8f   :  { %p13493_p11 = scmp.ne.s32.totalorder %s113_s15, %s13492_s24  ;;  %p13498_p13 = scmp.lt.s32.totalorder %s13492_s24, %s13492_s24 }
  0x91   :  { %p13499_p0 = por %p13498_p13, %p13497_p12 }
  0x93   :  { %p13500_p1 = pnand %p13499_p0, %p13493_p11 }
  0x95   :  { %13503 = shalt.err (!%p13500_p1)
}
  0x96   :  { %115 = dma.hbm_to_vmem [thread:$0]  %s14194_s8, 96, %s113_s15, [#allocation15]  }
  0x97   :  { %13526 = dma.done.wait [#allocation3], 1024  }
  0x98   :  { %13527 = vsyncadd [#allocation3], 4294966272 }
  0x99   :  { %13528 = dma.done.wait [#allocation6], 65664  }
  0x9a   :  { %13529 = vsyncadd [#allocation6], 4294901632 }
  0x9b   :  { %13530 = dma.done.wait [#allocation9], 65664  }
  0x9c   :  { %13531 = vsyncadd [#allocation9], 4294901632 }
  0x9d   :  { %13532 = dma.done.wait [#allocation12], 256  }
  0x9e   :  { %13533 = vsyncadd [#allocation12], 4294967040 }
  0x9f   :  { %13534 = dma.done.wait [#allocation15], 49248  }
  0xa0   :  { %13535 = vsyncadd [#allocation15], 4294918048  ;;  %v159_v0 = vld [vmem:[#allocation5] sm:$0xff]  ;;  %v144_v53 = vld [vmem:[#allocation2 + $0x8] sm:$0xff]  ;;  %s13552_s8 = smov [#allocation17]  }
  0xa1   :  { %v163_v1 = vld [vmem:[#allocation5 + $0x20] sm:$0xff]  ;;  %v13717_v57 = vpack.c.bf16 %v144_v53, %v144_v53  ;;  %v148_v58 = vld [vmem:[#allocation2 + $0x28] sm:$0xff]  ;;  %s11126_s27 = sshll.u32 %s13552_s8, 4  ;;  %s11127_s27 = int_to_ptr.vmem [resolvable:$true] %s11126_s27 }
  0xa2   :  { %v415_v2 = vld [vmem:[#allocation5 + $0x800] sm:$0xff]  ;;  %v11140_v3 = vcombine.high %v159_v0, %v163_v1  ;;  %v11139_v5 = vcombine.low %v159_v0, %v163_v1  ;;  %v13719_v61 = vpack.c.bf16 %v148_v58, %v148_v58  ;;  %s13504_s29 = scalar_lea.vmem %s11127_s27, 768  ;;  %p13509_p3 = scmp.lt.s32.totalorder %s11127_s27, %s11127_s27 }
  0xa3   :  { %v419_v4 = vld [vmem:[#allocation5 + $0x820] sm:$0xff]  ;;  %3263 = vmatprep.mubr.bf16.mxu1 %v13717_v57  ;;  %p13505_p2 = scmp.ne.s32.totalorder %s11127_s27, %s13504_s29  ;;  %p13510_p4 = scmp.lt.s32.totalorder %s13504_s29, %s13504_s29 }
  0xa4   :  { %v167_v6 = vld [vmem:[#allocation5 + $0x40] sm:$0xff]  ;;  %v11396_v8 = vcombine.high %v415_v2, %v419_v4  ;;  %v11395_v9 = vcombine.low %v415_v2, %v419_v4  ;;  %3231 = vmatprep.subr.bf16.mxu1 %v11140_v3  ;;  %3345 = vmatprep.mubr.bf16.mxu0 %v13719_v61 }
  0xa5   :  { %v171_v7 = vld [vmem:[#allocation5 + $0x60] sm:$0xff]  ;;  %3232 = vmatpush1.bf16.msra.mxu1 %v11139_v5  ;;  %p13511_p5 = por %p13510_p4, %p13509_p3 }
  0xa6   :  { %v11148_v10 = vcombine.high %v167_v6, %v171_v7  ;;  %v423_v11 = vld [vmem:[#allocation5 + $0x840] sm:$0xff]  ;;  %3313 = vmatprep.subr.bf16.mxu0 %v11396_v8  ;;  %v11147_v18 = vcombine.low %v167_v6, %v171_v7 }
  0xa7   :  { %v427_v12 = vld [vmem:[#allocation5 + $0x860] sm:$0xff]  ;;  %3314 = vmatpush1.bf16.msra.mxu0 %v11395_v9  ;;  %p13512_p6 = pnand %p13511_p5, %p13505_p2 }
  0xa8   :  { %v175_v13 = vld [vmem:[#allocation5 + $0x80] sm:$0xff]  ;;  %v11404_v14 = vcombine.high %v423_v11, %v427_v12  ;;  %3233 = vmatprep.subr.bf16.mxu1 %v11148_v10  ;;  %v11403_v19 = vcombine.low %v423_v11, %v427_v12 }
  0xa9   :  { %v179_v15 = vld [vmem:[#allocation5 + $0xa0] sm:$0xff]  ;;  %3234 = vmatpush1.bf16.msra.mxu1 %v11147_v18 }
  0xaa   :  { %v431_v16 = vld [vmem:[#allocation5 + $0x880] sm:$0xff]  ;;  %v11156_v20 = vcombine.high %v175_v13, %v179_v15  ;;  %3315 = vmatprep.subr.bf16.mxu0 %v11404_v14  ;;  %v11155_v26 = vcombine.low %v175_v13, %v179_v15 }
  0xab   :  { %v435_v17 = vld [vmem:[#allocation5 + $0x8a0] sm:$0xff]  ;;  %3316 = vmatpush1.bf16.msra.mxu0 %v11403_v19 }
  0xac   :  { %v11412_v21 = vcombine.high %v431_v16, %v435_v17  ;;  %v183_v22 = vld [vmem:[#allocation5 + $0xc0] sm:$0xff]  ;;  %3235 = vmatprep.subr.bf16.mxu1 %v11156_v20  ;;  %v11411_v27 = vcombine.low %v431_v16, %v435_v17 }
  0xad   :  { %v187_v23 = vld [vmem:[#allocation5 + $0xe0] sm:$0xff]  ;;  %3236 = vmatpush1.bf16.msra.mxu1 %v11155_v26 }
  0xae   :  { %v439_v24 = vld [vmem:[#allocation5 + $0x8c0] sm:$0xff]  ;;  %v11164_v28 = vcombine.high %v183_v22, %v187_v23  ;;  %3317 = vmatprep.subr.bf16.mxu0 %v11412_v21  ;;  %v11163_v34 = vcombine.low %v183_v22, %v187_v23 }
  0xaf   :  { %v443_v25 = vld [vmem:[#allocation5 + $0x8e0] sm:$0xff]  ;;  %3318 = vmatpush1.bf16.msra.mxu0 %v11411_v27 }
  0xb0   :  { %v11420_v29 = vcombine.high %v439_v24, %v443_v25  ;;  %v191_v30 = vld [vmem:[#allocation5 + $0x100] sm:$0xff]  ;;  %3237 = vmatprep.subr.bf16.mxu1 %v11164_v28  ;;  %v11419_v35 = vcombine.low %v439_v24, %v443_v25 }
  0xb1   :  { %v195_v31 = vld [vmem:[#allocation5 + $0x120] sm:$0xff]  ;;  %3238 = vmatpush1.bf16.msra.mxu1 %v11163_v34 }
  0xb2   :  { %v447_v32 = vld [vmem:[#allocation5 + $0x900] sm:$0xff]  ;;  %v11172_v36 = vcombine.high %v191_v30, %v195_v31  ;;  %3319 = vmatprep.subr.bf16.mxu0 %v11420_v29  ;;  %v11171_v42 = vcombine.low %v191_v30, %v195_v31 }
  0xb3   :  { %v451_v33 = vld [vmem:[#allocation5 + $0x920] sm:$0xff]  ;;  %3320 = vmatpush1.bf16.msra.mxu0 %v11419_v35 }
  0xb4   :  { %v11428_v37 = vcombine.high %v447_v32, %v451_v33  ;;  %v199_v38 = vld [vmem:[#allocation5 + $0x140] sm:$0xff]  ;;  %3239 = vmatprep.subr.bf16.mxu1 %v11172_v36  ;;  %v11427_v43 = vcombine.low %v447_v32, %v451_v33 }
  0xb5   :  { %v203_v39 = vld [vmem:[#allocation5 + $0x160] sm:$0xff]  ;;  %3240 = vmatpush1.bf16.msra.mxu1 %v11171_v42 }
  0xb6   :  { %v455_v40 = vld [vmem:[#allocation5 + $0x940] sm:$0xff]  ;;  %v11180_v44 = vcombine.high %v199_v38, %v203_v39  ;;  %3321 = vmatprep.subr.bf16.mxu0 %v11428_v37  ;;  %v11179_v50 = vcombine.low %v199_v38, %v203_v39 }
  0xb7   :  { %v459_v41 = vld [vmem:[#allocation5 + $0x960] sm:$0xff]  ;;  %3322 = vmatpush1.bf16.msra.mxu0 %v11427_v43 }
  0xb8   :  { %v11436_v45 = vcombine.high %v455_v40, %v459_v41  ;;  %v207_v46 = vld [vmem:[#allocation5 + $0x180] sm:$0xff]  ;;  %3241 = vmatprep.subr.bf16.mxu1 %v11180_v44  ;;  %v11435_v51 = vcombine.low %v455_v40, %v459_v41 }
  0xb9   :  { %v211_v47 = vld [vmem:[#allocation5 + $0x1a0] sm:$0xff]  ;;  %3242 = vmatpush1.bf16.msra.mxu1 %v11179_v50 }
  0xba   :  { %v463_v48 = vld [vmem:[#allocation5 + $0x980] sm:$0xff]  ;;  %v11188_v52 = vcombine.high %v207_v46, %v211_v47  ;;  %3323 = vmatprep.subr.bf16.mxu0 %v11436_v45  ;;  %v11187_v62 = vcombine.low %v207_v46, %v211_v47 }
  0xbb   :  { %v467_v49 = vld [vmem:[#allocation5 + $0x9a0] sm:$0xff]  ;;  %3324 = vmatpush1.bf16.msra.mxu0 %v11435_v51 }
  0xbc   :  { %v11444_v54 = vcombine.high %v463_v48, %v467_v49  ;;  %v215_v55 = vld [vmem:[#allocation5 + $0x1c0] sm:$0xff]  ;;  %3243 = vmatprep.subr.bf16.mxu1 %v11188_v52  ;;  %v11443_v63 = vcombine.low %v463_v48, %v467_v49 }
  0xbd   :  { %v219_v56 = vld [vmem:[#allocation5 + $0x1e0] sm:$0xff]  ;;  %3244 = vmatpush1.bf16.msra.mxu1 %v11187_v62 }
  0xbe   :  { %v471_v59 = vld [vmem:[#allocation5 + $0x9c0] sm:$0xff]  ;;  %v11196_v0 = vcombine.high %v215_v55, %v219_v56  ;;  %3325 = vmatprep.subr.bf16.mxu0 %v11444_v54  ;;  %v11195_v6 = vcombine.low %v215_v55, %v219_v56 }
  0xbf   :  { %v475_v60 = vld [vmem:[#allocation5 + $0x9e0] sm:$0xff]  ;;  %3326 = vmatpush1.bf16.msra.mxu0 %v11443_v63 }
  0xc0   :  { %v11452_v1 = vcombine.high %v471_v59, %v475_v60  ;;  %v223_v2 = vld [vmem:[#allocation5 + $0x200] sm:$0xff]  ;;  %3245 = vmatprep.subr.bf16.mxu1 %v11196_v0  ;;  %v11451_v7 = vcombine.low %v471_v59, %v475_v60 }
  0xc1   :  { %v227_v3 = vld [vmem:[#allocation5 + $0x220] sm:$0xff]  ;;  %3246 = vmatpush1.bf16.msra.mxu1 %v11195_v6 }
  0xc2   :  { %v479_v4 = vld [vmem:[#allocation5 + $0xa00] sm:$0xff]  ;;  %v11204_v8 = vcombine.high %v223_v2, %v227_v3  ;;  %3327 = vmatprep.subr.bf16.mxu0 %v11452_v1  ;;  %v11203_v14 = vcombine.low %v223_v2, %v227_v3 }
  0xc3   :  { %v483_v5 = vld [vmem:[#allocation5 + $0xa20] sm:$0xff]  ;;  %3328 = vmatpush1.bf16.msra.mxu0 %v11451_v7 }
  0xc4   :  { %v11460_v9 = vcombine.high %v479_v4, %v483_v5  ;;  %v231_v10 = vld [vmem:[#allocation5 + $0x240] sm:$0xff]  ;;  %3247 = vmatprep.subr.bf16.mxu1 %v11204_v8  ;;  %v11459_v15 = vcombine.low %v479_v4, %v483_v5 }
  0xc5   :  { %v235_v11 = vld [vmem:[#allocation5 + $0x260] sm:$0xff]  ;;  %3248 = vmatpush1.bf16.msra.mxu1 %v11203_v14 }
  0xc6   :  { %v487_v12 = vld [vmem:[#allocation5 + $0xa40] sm:$0xff]  ;;  %v11212_v16 = vcombine.high %v231_v10, %v235_v11  ;;  %3329 = vmatprep.subr.bf16.mxu0 %v11460_v9  ;;  %v11211_v22 = vcombine.low %v231_v10, %v235_v11 }
  0xc7   :  { %v491_v13 = vld [vmem:[#allocation5 + $0xa60] sm:$0xff]  ;;  %3330 = vmatpush1.bf16.msra.mxu0 %v11459_v15 }
  0xc8   :  { %v11468_v17 = vcombine.high %v487_v12, %v491_v13  ;;  %v239_v18 = vld [vmem:[#allocation5 + $0x280] sm:$0xff]  ;;  %3249 = vmatprep.subr.bf16.mxu1 %v11212_v16  ;;  %v11467_v23 = vcombine.low %v487_v12, %v491_v13 }
  0xc9   :  { %v243_v19 = vld [vmem:[#allocation5 + $0x2a0] sm:$0xff]  ;;  %3250 = vmatpush1.bf16.msra.mxu1 %v11211_v22 }
  0xca   :  { %v495_v20 = vld [vmem:[#allocation5 + $0xa80] sm:$0xff]  ;;  %v11220_v24 = vcombine.high %v239_v18, %v243_v19  ;;  %3331 = vmatprep.subr.bf16.mxu0 %v11468_v17  ;;  %v11219_v30 = vcombine.low %v239_v18, %v243_v19  ;;  %v146_v17 = vld [vmem:[#allocation2 + $0x18] sm:$0xff] }
  0xcb   :  { %v499_v21 = vld [vmem:[#allocation5 + $0xaa0] sm:$0xff]  ;;  %3332 = vmatpush1.bf16.msra.mxu0 %v11467_v23 }
  0xcc   :  { %v11476_v25 = vcombine.high %v495_v20, %v499_v21  ;;  %v247_v26 = vld [vmem:[#allocation5 + $0x2c0] sm:$0xff]  ;;  %3251 = vmatprep.subr.bf16.mxu1 %v11220_v24  ;;  %v11475_v31 = vcombine.low %v495_v20, %v499_v21  ;;  %v150_v24 = vld [vmem:[#allocation2 + $0x38] sm:$0xff] }
  0xcd   :  { %v251_v27 = vld [vmem:[#allocation5 + $0x2e0] sm:$0xff]  ;;  %3252 = vmatpush1.bf16.msra.mxu1 %v11219_v30  ;;  %v13727_v30 = vpack.c.bf16 %v146_v17, %v146_v17 }
  0xce   :  { %v503_v28 = vld [vmem:[#allocation5 + $0xac0] sm:$0xff]  ;;  %v11228_v32 = vcombine.high %v247_v26, %v251_v27  ;;  %3333 = vmatprep.subr.bf16.mxu0 %v11476_v25  ;;  %v11227_v38 = vcombine.low %v247_v26, %v251_v27 }
  0xcf   :  { %v507_v29 = vld [vmem:[#allocation5 + $0xae0] sm:$0xff]  ;;  %3334 = vmatpush1.bf16.msra.mxu0 %v11475_v31  ;;  %v13730_v31 = vpack.c.bf16 %v150_v24, %v150_v24 }
  0xd0   :  { %v11484_v33 = vcombine.high %v503_v28, %v507_v29  ;;  %v255_v34 = vld [vmem:[#allocation5 + $0x300] sm:$0xff]  ;;  %3253 = vmatprep.subr.bf16.mxu1 %v11228_v32  ;;  %v11483_v39 = vcombine.low %v503_v28, %v507_v29 }
  0xd1   :  { %v259_v35 = vld [vmem:[#allocation5 + $0x320] sm:$0xff]  ;;  %3254 = vmatpush1.bf16.msra.mxu1 %v11227_v38 }
  0xd2   :  { %v511_v36 = vld [vmem:[#allocation5 + $0xb00] sm:$0xff]  ;;  %v11236_v40 = vcombine.high %v255_v34, %v259_v35  ;;  %3335 = vmatprep.subr.bf16.mxu0 %v11484_v33  ;;  %v11235_v46 = vcombine.low %v255_v34, %v259_v35 }
  0xd3   :  { %v515_v37 = vld [vmem:[#allocation5 + $0xb20] sm:$0xff]  ;;  %3336 = vmatpush1.bf16.msra.mxu0 %v11483_v39 }
  0xd4   :  { %v11492_v41 = vcombine.high %v511_v36, %v515_v37  ;;  %v263_v42 = vld [vmem:[#allocation5 + $0x340] sm:$0xff]  ;;  %3255 = vmatprep.subr.bf16.mxu1 %v11236_v40  ;;  %v11491_v47 = vcombine.low %v511_v36, %v515_v37 }
  0xd5   :  { %v267_v43 = vld [vmem:[#allocation5 + $0x360] sm:$0xff]  ;;  %3256 = vmatpush1.bf16.msra.mxu1 %v11235_v46 }
  0xd6   :  { %v519_v44 = vld [vmem:[#allocation5 + $0xb40] sm:$0xff]  ;;  %v11244_v48 = vcombine.high %v263_v42, %v267_v43  ;;  %3337 = vmatprep.subr.bf16.mxu0 %v11492_v41  ;;  %v11243_v54 = vcombine.low %v263_v42, %v267_v43 }
  0xd7   :  { %v523_v45 = vld [vmem:[#allocation5 + $0xb60] sm:$0xff]  ;;  %3338 = vmatpush1.bf16.msra.mxu0 %v11491_v47 }
  0xd8   :  { %v11500_v49 = vcombine.high %v519_v44, %v523_v45  ;;  %v271_v50 = vld [vmem:[#allocation5 + $0x380] sm:$0xff]  ;;  %3257 = vmatprep.subr.bf16.mxu1 %v11244_v48  ;;  %v11499_v55 = vcombine.low %v519_v44, %v523_v45 }
  0xd9   :  { %v275_v51 = vld [vmem:[#allocation5 + $0x3a0] sm:$0xff]  ;;  %3258 = vmatpush1.bf16.msra.mxu1 %v11243_v54 }
  0xda   :  { %v527_v52 = vld [vmem:[#allocation5 + $0xb80] sm:$0xff]  ;;  %v11252_v56 = vcombine.high %v271_v50, %v275_v51  ;;  %3339 = vmatprep.subr.bf16.mxu0 %v11500_v49  ;;  %v11251_v0 = vcombine.low %v271_v50, %v275_v51 }
  0xdb   :  { %v531_v53 = vld [vmem:[#allocation5 + $0xba0] sm:$0xff]  ;;  %3340 = vmatpush1.bf16.msra.mxu0 %v11499_v55 }
  0xdc   :  { %v11508_v58 = vcombine.high %v527_v52, %v531_v53  ;;  %v279_v59 = vld [vmem:[#allocation5 + $0x3c0] sm:$0xff]  ;;  %3259 = vmatprep.subr.bf16.mxu1 %v11252_v56  ;;  %v11507_v2 = vcombine.low %v527_v52, %v531_v53 }
  0xdd   :  { %v283_v60 = vld [vmem:[#allocation5 + $0x3e0] sm:$0xff]  ;;  %3260 = vmatpush1.bf16.msra.mxu1 %v11251_v0 }
  0xde   :  { %v535_v62 = vld [vmem:[#allocation5 + $0xbc0] sm:$0xff]  ;;  %v11260_v3 = vcombine.high %v279_v59, %v283_v60  ;;  %3341 = vmatprep.subr.bf16.mxu0 %v11508_v58  ;;  %v11259_v10 = vcombine.low %v279_v59, %v283_v60 }
  0xdf   :  { %v539_v63 = vld [vmem:[#allocation5 + $0xbe0] sm:$0xff]  ;;  %3342 = vmatpush1.bf16.msra.mxu0 %v11507_v2 }
  0xe0   :  { %v287_v1 = vld [vmem:[#allocation5 + $0x400] sm:$0xff]  ;;  %v11516_v7 = vcombine.high %v535_v62, %v539_v63  ;;  %3261 = vmatprep.subr.bf16.mxu1 %v11260_v3  ;;  %v11515_v13 = vcombine.low %v535_v62, %v539_v63 }
  0xe1   :  { %v291_v4 = vld [vmem:[#allocation5 + $0x420] sm:$0xff]  ;;  %3262 = vmatpush1.bf16.msra.mxu1 %v11259_v10 }
  0xe2   :  { %v543_v5 = vld [vmem:[#allocation5 + $0xc00] sm:$0xff]  ;;  %v11268_v14 = vcombine.high %v287_v1, %v291_v4  ;;  %3343 = vmatprep.subr.bf16.mxu0 %v11516_v7  ;;  %v11267_v20 = vcombine.low %v287_v1, %v291_v4 }
  0xe3   :  { %v547_v6 = vld [vmem:[#allocation5 + $0xc20] sm:$0xff]  ;;  %3344 = vmatpush1.bf16.msra.mxu0 %v11515_v13 }
  0xe4   :  { %v143_v8 = vld [vmem:[#allocation2] sm:$0xff]  ;;  %v11524_v18 = vcombine.high %v543_v5, %v547_v6  ;;  %3272 = vmatprep.subr.bf16.mxu1 %v11268_v14  ;;  %v11523_v25 = vcombine.low %v543_v5, %v547_v6 }
  0xe5   :  { %v147_v9 = vld [vmem:[#allocation2 + $0x20] sm:$0xff]  ;;  %v13723_v19 = vpack.c.bf16 %v143_v8, %v143_v8 }
  0xe6   :  { %v295_v11 = vld [vmem:[#allocation5 + $0x440] sm:$0xff]  ;;  %v13725_v21 = vpack.c.bf16 %v147_v9, %v147_v9  ;;  %3354 = vmatprep.subr.bf16.mxu0 %v11524_v18 }
  0xe7   :  { %v299_v12 = vld [vmem:[#allocation5 + $0x460] sm:$0xff]  ;;  %3264 = vmatmul.mubr.bf16.vlgmr.msra.gmra.mrb[0].mxu1 %v13723_v19 }
  0xe8   :  { %v551_v15 = vld [vmem:[#allocation5 + $0xc40] sm:$0xff]  ;;  %v11276_v26 = vcombine.high %v295_v11, %v299_v12  ;;  %3273 = vmatpush1.bf16.msra.mxu1 %v11267_v20  ;;  %3346 = vmatmul.mubr.bf16.vlgmr.msra.gmra.mrb[0].mxu0 %v13725_v21  ;;  %v11275_v32 = vcombine.low %v295_v11, %v299_v12 }
  0xe9   :  { %v555_v16 = vld [vmem:[#allocation5 + $0xc60] sm:$0xff]  ;;  %3355 = vmatpush1.bf16.msra.mxu0 %v11523_v25  ;;  %3304 = vmatprep.mubr.bf16.mxu1 %v13727_v30 }
  0xea   :  { %v303_v22 = vld [vmem:[#allocation5 + $0x480] sm:$0xff]  ;;  %v11532_v29 = vcombine.high %v551_v15, %v555_v16  ;;  %3274 = vmatprep.subr.bf16.mxu1 %v11276_v26  ;;  %v11531_v35 = vcombine.low %v551_v15, %v555_v16  ;;  %3386 = vmatprep.mubr.bf16.mxu0 %v13730_v31 }
  0xeb   :  { %v307_v23 = vld [vmem:[#allocation5 + $0x4a0] sm:$0xff] }
  0xec   :  { %v559_v27 = vld [vmem:[#allocation5 + $0xc80] sm:$0xff]  ;;  %v11284_v36 = vcombine.high %v303_v22, %v307_v23  ;;  %3356 = vmatprep.subr.bf16.mxu0 %v11532_v29  ;;  %3275 = vmatpush1.bf16.msra.mxu1 %v11275_v32  ;;  %v11283_v40 = vcombine.low %v303_v22, %v307_v23 }
  0xed   :  { %v563_v28 = vld [vmem:[#allocation5 + $0xca0] sm:$0xff]  ;;  %3357 = vmatpush1.bf16.msra.mxu0 %v11531_v35 }
  0xee   :  { %v311_v33 = vld [vmem:[#allocation5 + $0x4c0] sm:$0xff]  ;;  %v11540_v39 = vcombine.high %v559_v27, %v563_v28  ;;  %3276 = vmatprep.subr.bf16.mxu1 %v11284_v36  ;;  %v11539_v43 = vcombine.low %v559_v27, %v563_v28 }
  0xef   :  { %v315_v34 = vld [vmem:[#allocation5 + $0x4e0] sm:$0xff] }
  0xf0   :  { %v567_v37 = vld [vmem:[#allocation5 + $0xcc0] sm:$0xff]  ;;  %v11292_v44 = vcombine.high %v311_v33, %v315_v34  ;;  %3358 = vmatprep.subr.bf16.mxu0 %v11540_v39  ;;  %3277 = vmatpush1.bf16.msra.mxu1 %v11283_v40  ;;  %v11291_v48 = vcombine.low %v311_v33, %v315_v34 }
  0xf1   :  { %v571_v38 = vld [vmem:[#allocation5 + $0xce0] sm:$0xff]  ;;  %3359 = vmatpush1.bf16.msra.mxu0 %v11539_v43 }
  0xf2   :  { %v319_v41 = vld [vmem:[#allocation5 + $0x500] sm:$0xff]  ;;  %v11548_v47 = vcombine.high %v567_v37, %v571_v38  ;;  %3278 = vmatprep.subr.bf16.mxu1 %v11292_v44  ;;  %v11547_v51 = vcombine.low %v567_v37, %v571_v38 }
  0xf3   :  { %v323_v42 = vld [vmem:[#allocation5 + $0x520] sm:$0xff] }
  0xf4   :  { %v575_v45 = vld [vmem:[#allocation5 + $0xd00] sm:$0xff]  ;;  %v11300_v52 = vcombine.high %v319_v41, %v323_v42  ;;  %3360 = vmatprep.subr.bf16.mxu0 %v11548_v47  ;;  %3279 = vmatpush1.bf16.msra.mxu1 %v11291_v48  ;;  %v11299_v56 = vcombine.low %v319_v41, %v323_v42 }
  0xf5   :  { %v579_v46 = vld [vmem:[#allocation5 + $0xd20] sm:$0xff]  ;;  %3361 = vmatpush1.bf16.msra.mxu0 %v11547_v51 }
  0xf6   :  { %v327_v49 = vld [vmem:[#allocation5 + $0x540] sm:$0xff]  ;;  %v11556_v55 = vcombine.high %v575_v45, %v579_v46  ;;  %3280 = vmatprep.subr.bf16.mxu1 %v11300_v52  ;;  %v11555_v60 = vcombine.low %v575_v45, %v579_v46 }
  0xf7   :  { %v331_v50 = vld [vmem:[#allocation5 + $0x560] sm:$0xff] }
  0xf8   :  { %v583_v53 = vld [vmem:[#allocation5 + $0xd40] sm:$0xff]  ;;  %v11308_v62 = vcombine.high %v327_v49, %v331_v50  ;;  %3362 = vmatprep.subr.bf16.mxu0 %v11556_v55  ;;  %3281 = vmatpush1.bf16.msra.mxu1 %v11299_v56  ;;  %v11307_v2 = vcombine.low %v327_v49, %v331_v50 }
  0xf9   :  { %v587_v54 = vld [vmem:[#allocation5 + $0xd60] sm:$0xff]  ;;  %3363 = vmatpush1.bf16.msra.mxu0 %v11555_v60 }
  0xfa   :  { %v335_v58 = vld [vmem:[#allocation5 + $0x580] sm:$0xff]  ;;  %v11564_v1 = vcombine.high %v583_v53, %v587_v54  ;;  %3282 = vmatprep.subr.bf16.mxu1 %v11308_v62  ;;  %v11563_v5 = vcombine.low %v583_v53, %v587_v54 }
  0xfb   :  { %v339_v59 = vld [vmem:[#allocation5 + $0x5a0] sm:$0xff] }
  0xfc   :  { %v591_v63 = vld [vmem:[#allocation5 + $0xd80] sm:$0xff]  ;;  %v11316_v6 = vcombine.high %v335_v58, %v339_v59  ;;  %3364 = vmatprep.subr.bf16.mxu0 %v11564_v1  ;;  %3283 = vmatpush1.bf16.msra.mxu1 %v11307_v2  ;;  %v11315_v10 = vcombine.low %v335_v58, %v339_v59 }
  0xfd   :  { %v595_v0 = vld [vmem:[#allocation5 + $0xda0] sm:$0xff]  ;;  %3365 = vmatpush1.bf16.msra.mxu0 %v11563_v5 }
  0xfe   :  { %v343_v3 = vld [vmem:[#allocation5 + $0x5c0] sm:$0xff]  ;;  %v11572_v9 = vcombine.high %v591_v63, %v595_v0  ;;  %3284 = vmatprep.subr.bf16.mxu1 %v11316_v6  ;;  %v11571_v13 = vcombine.low %v591_v63, %v595_v0 }
  0xff   :  { %v347_v4 = vld [vmem:[#allocation5 + $0x5e0] sm:$0xff] }
 0x100   :  { %v599_v7 = vld [vmem:[#allocation5 + $0xdc0] sm:$0xff]  ;;  %v11324_v14 = vcombine.high %v343_v3, %v347_v4  ;;  %3366 = vmatprep.subr.bf16.mxu0 %v11572_v9  ;;  %3285 = vmatpush1.bf16.msra.mxu1 %v11315_v10  ;;  %v11323_v18 = vcombine.low %v343_v3, %v347_v4 }
 0x101   :  { %v603_v8 = vld [vmem:[#allocation5 + $0xde0] sm:$0xff]  ;;  %3367 = vmatpush1.bf16.msra.mxu0 %v11571_v13 }
 0x102   :  { %v351_v11 = vld [vmem:[#allocation5 + $0x600] sm:$0xff]  ;;  %v11580_v17 = vcombine.high %v599_v7, %v603_v8  ;;  %3286 = vmatprep.subr.bf16.mxu1 %v11324_v14  ;;  %v11579_v23 = vcombine.low %v599_v7, %v603_v8 }
 0x103   :  { %v355_v12 = vld [vmem:[#allocation5 + $0x620] sm:$0xff] }
 0x104   :  { %v607_v15 = vld [vmem:[#allocation5 + $0xe00] sm:$0xff]  ;;  %v11332_v24 = vcombine.high %v351_v11, %v355_v12  ;;  %3368 = vmatprep.subr.bf16.mxu0 %v11580_v17  ;;  %3287 = vmatpush1.bf16.msra.mxu1 %v11323_v18  ;;  %v11331_v28 = vcombine.low %v351_v11, %v355_v12  ;;  %v160_v17 = vld [vmem:[#allocation5 + $0x8] sm:$0xff] }
 0x105   :  { %v611_v16 = vld [vmem:[#allocation5 + $0xe20] sm:$0xff]  ;;  %3369 = vmatpush1.bf16.msra.mxu0 %v11579_v23  ;;  %v164_v18 = vld [vmem:[#allocation5 + $0x28] sm:$0xff]  ;;  %v161_v23 = vld [vmem:[#allocation5 + $0x10] sm:$0xff] }
 0x106   :  { %v359_v20 = vld [vmem:[#allocation5 + $0x640] sm:$0xff]  ;;  %v11588_v27 = vcombine.high %v607_v15, %v611_v16  ;;  %3288 = vmatprep.subr.bf16.mxu1 %v11332_v24  ;;  %v11587_v33 = vcombine.low %v607_v15, %v611_v16  ;;  %v165_v24 = vld [vmem:[#allocation5 + $0x30] sm:$0xff] }
 0x107   :  { %v363_v22 = vld [vmem:[#allocation5 + $0x660] sm:$0xff] }
 0x108   :  { %v615_v25 = vld [vmem:[#allocation5 + $0xe40] sm:$0xff]  ;;  %v11340_v34 = vcombine.high %v359_v20, %v363_v22  ;;  %3370 = vmatprep.subr.bf16.mxu0 %v11588_v27  ;;  %3289 = vmatpush1.bf16.msra.mxu1 %v11331_v28  ;;  %v11339_v38 = vcombine.low %v359_v20, %v363_v22  ;;  %v149_v27 = vld [vmem:[#allocation2 + $0x30] sm:$0xff] }
 0x109   :  { %v619_v26 = vld [vmem:[#allocation5 + $0xe60] sm:$0xff]  ;;  %3371 = vmatpush1.bf16.msra.mxu0 %v11587_v33 }
 0x10a   :  { %v367_v29 = vld [vmem:[#allocation5 + $0x680] sm:$0xff]  ;;  %v11596_v37 = vcombine.high %v615_v25, %v619_v26  ;;  %3290 = vmatprep.subr.bf16.mxu1 %v11340_v34  ;;  %v11595_v41 = vcombine.low %v615_v25, %v619_v26  ;;  %v145_v26 = vld [vmem:[#allocation2 + $0x10] sm:$0xff]  ;;  %v11142_v34 = vcombine.high %v160_v17, %v164_v18 }
 0x10b   :  { %v371_v32 = vld [vmem:[#allocation5 + $0x6a0] sm:$0xff] }
 0x10c   :  { %v623_v35 = vld [vmem:[#allocation5 + $0xe80] sm:$0xff]  ;;  %v11348_v42 = vcombine.high %v367_v29, %v371_v32  ;;  %3372 = vmatprep.subr.bf16.mxu0 %v11596_v37  ;;  %3291 = vmatpush1.bf16.msra.mxu1 %v11339_v38  ;;  %v11347_v46 = vcombine.low %v367_v29, %v371_v32  ;;  %v168_v29 = vld [vmem:[#allocation5 + $0x48] sm:$0xff]  ;;  %v11144_v37 = vcombine.high %v161_v23, %v165_v24 }
 0x10d   :  { %v627_v36 = vld [vmem:[#allocation5 + $0xea0] sm:$0xff]  ;;  %3373 = vmatpush1.bf16.msra.mxu0 %v11595_v41  ;;  %v172_v32 = vld [vmem:[#allocation5 + $0x68] sm:$0xff]  ;;  %v13735_v38 = vpack.c.bf16 %v145_v26, %v145_v26  ;;  %v221_v26 = vld [vmem:[#allocation5 + $0x1f0] sm:$0xff] }
 0x10e   :  { %v375_v39 = vld [vmem:[#allocation5 + $0x6c0] sm:$0xff]  ;;  %v11604_v45 = vcombine.high %v623_v35, %v627_v36  ;;  %3292 = vmatprep.subr.bf16.mxu1 %v11348_v42  ;;  %v11603_v49 = vcombine.low %v623_v35, %v627_v36  ;;  %v169_v35 = vld [vmem:[#allocation5 + $0x50] sm:$0xff]  ;;  %v176_v41 = vld [vmem:[#allocation5 + $0x88] sm:$0xff] }
 0x10f   :  { %v379_v40 = vld [vmem:[#allocation5 + $0x6e0] sm:$0xff]  ;;  %v173_v36 = vld [vmem:[#allocation5 + $0x70] sm:$0xff]  ;;  %v180_v42 = vld [vmem:[#allocation5 + $0xa8] sm:$0xff] }
 0x110   :  { %v631_v43 = vld [vmem:[#allocation5 + $0xec0] sm:$0xff]  ;;  %v11356_v50 = vcombine.high %v375_v39, %v379_v40  ;;  %3374 = vmatprep.subr.bf16.mxu0 %v11604_v45  ;;  %3293 = vmatpush1.bf16.msra.mxu1 %v11347_v46  ;;  %v11355_v54 = vcombine.low %v375_v39, %v379_v40  ;;  %v13737_v39 = vpack.c.bf16 %v149_v27, %v149_v27  ;;  %v177_v45 = vld [vmem:[#allocation5 + $0x90] sm:$0xff] }
 0x111   :  { %v635_v44 = vld [vmem:[#allocation5 + $0xee0] sm:$0xff]  ;;  %3375 = vmatpush1.bf16.msra.mxu0 %v11603_v49  ;;  %v11141_v40 = vcombine.low %v160_v17, %v164_v18  ;;  %v181_v46 = vld [vmem:[#allocation5 + $0xb0] sm:$0xff]  ;;  %v184_v49 = vld [vmem:[#allocation5 + $0xc8] sm:$0xff] }
 0x112   :  { %v383_v47 = vld [vmem:[#allocation5 + $0x700] sm:$0xff]  ;;  %v11612_v53 = vcombine.high %v631_v43, %v635_v44  ;;  %3294 = vmatprep.subr.bf16.mxu1 %v11356_v50  ;;  %v11611_v58 = vcombine.low %v631_v43, %v635_v44  ;;  %v11150_v43 = vcombine.high %v168_v29, %v172_v32  ;;  %v11143_v44 = vcombine.low %v161_v23, %v165_v24  ;;  %v188_v50 = vld [vmem:[#allocation5 + $0xe8] sm:$0xff] }
 0x113   :  { %v387_v48 = vld [vmem:[#allocation5 + $0x720] sm:$0xff] }
 0x114   :  { %v639_v51 = vld [vmem:[#allocation5 + $0xf00] sm:$0xff]  ;;  %v11364_v59 = vcombine.high %v383_v47, %v387_v48  ;;  %3376 = vmatprep.subr.bf16.mxu0 %v11612_v53  ;;  %3295 = vmatpush1.bf16.msra.mxu1 %v11355_v54  ;;  %v11363_v0 = vcombine.low %v383_v47, %v387_v48  ;;  %v11152_v47 = vcombine.high %v169_v35, %v173_v36  ;;  %v185_v53 = vld [vmem:[#allocation5 + $0xd0] sm:$0xff] }
 0x115   :  { %v643_v52 = vld [vmem:[#allocation5 + $0xf20] sm:$0xff]  ;;  %3377 = vmatpush1.bf16.msra.mxu0 %v11611_v58  ;;  %v11149_v48 = vcombine.low %v168_v29, %v172_v32  ;;  %v189_v54 = vld [vmem:[#allocation5 + $0xf0] sm:$0xff]  ;;  %v192_v58 = vld [vmem:[#allocation5 + $0x108] sm:$0xff] }
 0x116   :  { %v391_v55 = vld [vmem:[#allocation5 + $0x740] sm:$0xff]  ;;  %v11620_v63 = vcombine.high %v639_v51, %v643_v52  ;;  %3296 = vmatprep.subr.bf16.mxu1 %v11364_v59  ;;  %v11619_v3 = vcombine.low %v639_v51, %v643_v52  ;;  %v11158_v51 = vcombine.high %v176_v41, %v180_v42  ;;  %v11151_v52 = vcombine.low %v169_v35, %v173_v36  ;;  %v196_v59 = vld [vmem:[#allocation5 + $0x128] sm:$0xff]  ;;  %v225_v35 = vld [vmem:[#allocation5 + $0x210] sm:$0xff] }
 0x117   :  { %v395_v56 = vld [vmem:[#allocation5 + $0x760] sm:$0xff]  ;;  %v224_v29 = vld [vmem:[#allocation5 + $0x208] sm:$0xff]  ;;  %v229_v36 = vld [vmem:[#allocation5 + $0x230] sm:$0xff] }
 0x118   :  { %v647_v60 = vld [vmem:[#allocation5 + $0xf40] sm:$0xff]  ;;  %v11372_v4 = vcombine.high %v391_v55, %v395_v56  ;;  %3378 = vmatprep.subr.bf16.mxu0 %v11620_v63  ;;  %3297 = vmatpush1.bf16.msra.mxu1 %v11363_v0  ;;  %v11371_v8 = vcombine.low %v391_v55, %v395_v56  ;;  %v11160_v55 = vcombine.high %v177_v45, %v181_v46  ;;  %v193_v63 = vld [vmem:[#allocation5 + $0x110] sm:$0xff]  ;;  %v228_v32 = vld [vmem:[#allocation5 + $0x228] sm:$0xff] }
 0x119   :  { %v651_v62 = vld [vmem:[#allocation5 + $0xf60] sm:$0xff]  ;;  %3379 = vmatpush1.bf16.msra.mxu0 %v11619_v3  ;;  %v11157_v56 = vcombine.low %v176_v41, %v180_v42  ;;  %v197_v0 = vld [vmem:[#allocation5 + $0x130] sm:$0xff]  ;;  %v200_v3 = vld [vmem:[#allocation5 + $0x148] sm:$0xff] }
 0x11a   :  { %v399_v1 = vld [vmem:[#allocation5 + $0x780] sm:$0xff]  ;;  %v11628_v7 = vcombine.high %v647_v60, %v651_v62  ;;  %3298 = vmatprep.subr.bf16.mxu1 %v11372_v4  ;;  %v11627_v11 = vcombine.low %v647_v60, %v651_v62  ;;  %v11166_v60 = vcombine.high %v184_v49, %v188_v50  ;;  %v11159_v62 = vcombine.low %v177_v45, %v181_v46  ;;  %v204_v4 = vld [vmem:[#allocation5 + $0x168] sm:$0xff]  ;;  %v233_v45 = vld [vmem:[#allocation5 + $0x250] sm:$0xff] }
 0x11b   :  { %v403_v2 = vld [vmem:[#allocation5 + $0x7a0] sm:$0xff]  ;;  %v11181_v18 = vcombine.low %v200_v3, %v204_v4  ;;  %v232_v41 = vld [vmem:[#allocation5 + $0x248] sm:$0xff]  ;;  %v237_v46 = vld [vmem:[#allocation5 + $0x270] sm:$0xff] }
 0x11c   :  { %v655_v5 = vld [vmem:[#allocation5 + $0xf80] sm:$0xff]  ;;  %v11380_v12 = vcombine.high %v399_v1, %v403_v2  ;;  %3380 = vmatprep.subr.bf16.mxu0 %v11628_v7  ;;  %3299 = vmatpush1.bf16.msra.mxu1 %v11371_v8  ;;  %v11379_v16 = vcombine.low %v399_v1, %v403_v2  ;;  %v11168_v1 = vcombine.high %v185_v53, %v189_v54  ;;  %v201_v7 = vld [vmem:[#allocation5 + $0x150] sm:$0xff]  ;;  %v236_v42 = vld [vmem:[#allocation5 + $0x268] sm:$0xff] }
 0x11d   :  { %v659_v6 = vld [vmem:[#allocation5 + $0xfa0] sm:$0xff]  ;;  %3381 = vmatpush1.bf16.msra.mxu0 %v11627_v11  ;;  %v11165_v2 = vcombine.low %v184_v49, %v188_v50  ;;  %v205_v8 = vld [vmem:[#allocation5 + $0x170] sm:$0xff]  ;;  %v208_v11 = vld [vmem:[#allocation5 + $0x188] sm:$0xff] }
 0x11e   :  { %v407_v9 = vld [vmem:[#allocation5 + $0x7c0] sm:$0xff]  ;;  %v11636_v15 = vcombine.high %v655_v5, %v659_v6  ;;  %3300 = vmatprep.subr.bf16.mxu1 %v11380_v12  ;;  %v11635_v20 = vcombine.low %v655_v5, %v659_v6  ;;  %v11174_v5 = vcombine.high %v192_v58, %v196_v59  ;;  %v11167_v6 = vcombine.low %v185_v53, %v189_v54  ;;  %v212_v12 = vld [vmem:[#allocation5 + $0x1a8] sm:$0xff]  ;;  %v241_v53 = vld [vmem:[#allocation5 + $0x290] sm:$0xff] }
 0x11f   :  { %v411_v10 = vld [vmem:[#allocation5 + $0x7e0] sm:$0xff]  ;;  %v11184_v17 = vcombine.high %v201_v7, %v205_v8  ;;  %v11190_v23 = vcombine.high %v208_v11, %v212_v12  ;;  %v11183_v24 = vcombine.low %v201_v7, %v205_v8  ;;  %v240_v49 = vld [vmem:[#allocation5 + $0x288] sm:$0xff]  ;;  %v245_v54 = vld [vmem:[#allocation5 + $0x2b0] sm:$0xff] }
 0x120   :  { %v663_v13 = vld [vmem:[#allocation5 + $0xfc0] sm:$0xff]  ;;  %v11388_v22 = vcombine.high %v407_v9, %v411_v10  ;;  %3382 = vmatprep.subr.bf16.mxu0 %v11636_v15  ;;  %3301 = vmatpush1.bf16.msra.mxu1 %v11379_v16  ;;  %v11387_v28 = vcombine.low %v407_v9, %v411_v10  ;;  %v11176_v9 = vcombine.high %v193_v63, %v197_v0  ;;  %v209_v15 = vld [vmem:[#allocation5 + $0x190] sm:$0xff]  ;;  %v244_v50 = vld [vmem:[#allocation5 + $0x2a8] sm:$0xff] }
 0x121   :  { %v667_v14 = vld [vmem:[#allocation5 + $0xfe0] sm:$0xff]  ;;  %3383 = vmatpush1.bf16.msra.mxu0 %v11635_v20  ;;  %v11173_v10 = vcombine.low %v192_v58, %v196_v59  ;;  %v213_v16 = vld [vmem:[#allocation5 + $0x1b0] sm:$0xff]  ;;  %v216_v20 = vld [vmem:[#allocation5 + $0x1c8] sm:$0xff] }
 0x122   :  { %v11644_v25 = vcombine.high %v663_v13, %v667_v14  ;;  %3302 = vmatprep.subr.bf16.mxu1 %v11388_v22  ;;  %v11643_v33 = vcombine.low %v663_v13, %v667_v14  ;;  %v11182_v13 = vcombine.high %v200_v3, %v204_v4  ;;  %v11175_v14 = vcombine.low %v193_v63, %v197_v0  ;;  %v220_v22 = vld [vmem:[#allocation5 + $0x1e8] sm:$0xff]  ;;  %v249_v63 = vld [vmem:[#allocation5 + $0x2d0] sm:$0xff] }
 0x123   :  { %v11192_v27 = vcombine.high %v209_v15, %v213_v16  ;;  %v248_v58 = vld [vmem:[#allocation5 + $0x2c8] sm:$0xff]  ;;  %v253_v0 = vld [vmem:[#allocation5 + $0x2f0] sm:$0xff] }
 0x124   :  { %3384 = vmatprep.subr.bf16.mxu0 %v11644_v25  ;;  %3303 = vmatpush1.bf16.msra.mxu1 %v11387_v28  ;;  %v217_v25 = vld [vmem:[#allocation5 + $0x1d0] sm:$0xff]  ;;  %v11189_v28 = vcombine.low %v208_v11, %v212_v12  ;;  %v252_v59 = vld [vmem:[#allocation5 + $0x2e8] sm:$0xff] }
 0x125   :  { %3385 = vmatpush1.bf16.msra.mxu0 %v11643_v33  ;;  %3395 = vmatprep.subr.bf16.mxu1 %v11142_v34  ;;  %v11198_v33 = vcombine.high %v216_v20, %v220_v22  ;;  %v11191_v34 = vcombine.low %v209_v15, %v213_v16  ;;  %v256_v3 = vld [vmem:[#allocation5 + $0x308] sm:$0xff]  ;;  %v257_v7 = vld [vmem:[#allocation5 + $0x310] sm:$0xff] }
 0x126   :  { %3559 = vmatprep.subr.bf16.mxu0 %v11144_v37  ;;  %v11200_v37 = vcombine.high %v217_v25, %v221_v26  ;;  %v260_v4 = vld [vmem:[#allocation5 + $0x328] sm:$0xff]  ;;  %v261_v8 = vld [vmem:[#allocation5 + $0x330] sm:$0xff] }
 0x127   :  { %3305 = vmatmul.mubr.bf16.vlgmr.msra.gmra.mrb[0].mxu1 %v13735_v38  ;;  %v264_v11 = vld [vmem:[#allocation5 + $0x348] sm:$0xff]  ;;  %v265_v15 = vld [vmem:[#allocation5 + $0x350] sm:$0xff] }
 0x128   :  { %3387 = vmatmul.mubr.bf16.vlgmr.msra.gmra.mrb[0].mxu0 %v13737_v39  ;;  %3396 = vmatpush1.bf16.msra.mxu1 %v11141_v40  ;;  %v11197_v40 = vcombine.low %v216_v20, %v220_v22  ;;  %v268_v12 = vld [vmem:[#allocation5 + $0x368] sm:$0xff]  ;;  %v269_v16 = vld [vmem:[#allocation5 + $0x370] sm:$0xff] }
 0x129   :  { %3397 = vmatprep.subr.bf16.mxu1 %v11150_v43  ;;  %3560 = vmatpush1.bf16.msra.mxu0 %v11143_v44  ;;  %v11206_v43 = vcombine.high %v224_v29, %v228_v32  ;;  %v11199_v44 = vcombine.low %v217_v25, %v221_v26  ;;  %v272_v20 = vld [vmem:[#allocation5 + $0x388] sm:$0xff]  ;;  %v273_v25 = vld [vmem:[#allocation5 + $0x390] sm:$0xff] }
 0x12a   :  { %3561 = vmatprep.subr.bf16.mxu0 %v11152_v47  ;;  %3427 = vmatprep.mubr.bf16.mxu1 %v13717_v57  ;;  %v11208_v47 = vcombine.high %v225_v35, %v229_v36  ;;  %v276_v22 = vld [vmem:[#allocation5 + $0x3a8] sm:$0xff]  ;;  %v277_v26 = vld [vmem:[#allocation5 + $0x3b0] sm:$0xff] }
 0x12b   :  { %3591 = vmatprep.mubr.bf16.mxu0 %v13717_v57 }
 0x12c   :  { %3398 = vmatpush1.bf16.msra.mxu1 %v11149_v48  ;;  %v11205_v48 = vcombine.low %v224_v29, %v228_v32  ;;  %v280_v29 = vld [vmem:[#allocation5 + $0x3c8] sm:$0xff] }
 0x12d   :  { %3399 = vmatprep.subr.bf16.mxu1 %v11158_v51  ;;  %3562 = vmatpush1.bf16.msra.mxu0 %v11151_v52  ;;  %v11214_v51 = vcombine.high %v232_v41, %v236_v42  ;;  %v11207_v52 = vcombine.low %v225_v35, %v229_v36  ;;  %v284_v32 = vld [vmem:[#allocation5 + $0x3e8] sm:$0xff]  ;;  %v281_v35 = vld [vmem:[#allocation5 + $0x3d0] sm:$0xff] }
 0x12e   :  { %3563 = vmatprep.subr.bf16.mxu0 %v11160_v55  ;;  %v11216_v55 = vcombine.high %v233_v45, %v237_v46  ;;  %v285_v36 = vld [vmem:[#allocation5 + $0x3f0] sm:$0xff] }
 0x130   :  { %3400 = vmatpush1.bf16.msra.mxu1 %v11157_v56  ;;  %v11213_v56 = vcombine.low %v232_v41, %v236_v42  ;;  %v288_v41 = vld [vmem:[#allocation5 + $0x408] sm:$0xff] }
 0x131   :  { %3401 = vmatprep.subr.bf16.mxu1 %v11166_v60  ;;  %3564 = vmatpush1.bf16.msra.mxu0 %v11159_v62  ;;  %v11222_v60 = vcombine.high %v240_v49, %v244_v50  ;;  %v11215_v62 = vcombine.low %v233_v45, %v237_v46  ;;  %v292_v42 = vld [vmem:[#allocation5 + $0x428] sm:$0xff]  ;;  %v289_v45 = vld [vmem:[#allocation5 + $0x410] sm:$0xff] }
 0x132   :  { %3565 = vmatprep.subr.bf16.mxu0 %v11168_v1  ;;  %v11224_v1 = vcombine.high %v241_v53, %v245_v54  ;;  %v293_v46 = vld [vmem:[#allocation5 + $0x430] sm:$0xff] }
 0x134   :  { %3402 = vmatpush1.bf16.msra.mxu1 %v11165_v2  ;;  %v11221_v2 = vcombine.low %v240_v49, %v244_v50  ;;  %v296_v49 = vld [vmem:[#allocation5 + $0x448] sm:$0xff] }
 0x135   :  { %3403 = vmatprep.subr.bf16.mxu1 %v11174_v5  ;;  %3566 = vmatpush1.bf16.msra.mxu0 %v11167_v6  ;;  %v11230_v5 = vcombine.high %v248_v58, %v252_v59  ;;  %v11223_v6 = vcombine.low %v241_v53, %v245_v54  ;;  %v300_v50 = vld [vmem:[#allocation5 + $0x468] sm:$0xff]  ;;  %v297_v53 = vld [vmem:[#allocation5 + $0x450] sm:$0xff] }
 0x136   :  { %3567 = vmatprep.subr.bf16.mxu0 %v11176_v9  ;;  %v11232_v9 = vcombine.high %v249_v63, %v253_v0  ;;  %v301_v54 = vld [vmem:[#allocation5 + $0x470] sm:$0xff] }
 0x138   :  { %3404 = vmatpush1.bf16.msra.mxu1 %v11173_v10  ;;  %v11229_v10 = vcombine.low %v248_v58, %v252_v59  ;;  %v304_v58 = vld [vmem:[#allocation5 + $0x488] sm:$0xff] }
 0x139   :  { %3405 = vmatprep.subr.bf16.mxu1 %v11182_v13  ;;  %3568 = vmatpush1.bf16.msra.mxu0 %v11175_v14  ;;  %v11238_v13 = vcombine.high %v256_v3, %v260_v4  ;;  %v11231_v14 = vcombine.low %v249_v63, %v253_v0  ;;  %v308_v59 = vld [vmem:[#allocation5 + $0x4a8] sm:$0xff]  ;;  %v305_v63 = vld [vmem:[#allocation5 + $0x490] sm:$0xff] }
 0x13a   :  { %3569 = vmatprep.subr.bf16.mxu0 %v11184_v17  ;;  %v11240_v17 = vcombine.high %v257_v7, %v261_v8  ;;  %v309_v0 = vld [vmem:[#allocation5 + $0x4b0] sm:$0xff] }
 0x13c   :  { %3406 = vmatpush1.bf16.msra.mxu1 %v11181_v18  ;;  %v11237_v18 = vcombine.low %v256_v3, %v260_v4  ;;  %v312_v3 = vld [vmem:[#allocation5 + $0x4c8] sm:$0xff] }
 0x13d   :  { %3407 = vmatprep.subr.bf16.mxu1 %v11190_v23  ;;  %3570 = vmatpush1.bf16.msra.mxu0 %v11183_v24  ;;  %v11246_v23 = vcombine.high %v264_v11, %v268_v12  ;;  %v11239_v24 = vcombine.low %v257_v7, %v261_v8  ;;  %v316_v4 = vld [vmem:[#allocation5 + $0x4e8] sm:$0xff]  ;;  %v313_v7 = vld [vmem:[#allocation5 + $0x4d0] sm:$0xff] }
 0x13e   :  { %3571 = vmatprep.subr.bf16.mxu0 %v11192_v27  ;;  %v11248_v27 = vcombine.high %v265_v15, %v269_v16  ;;  %v317_v8 = vld [vmem:[#allocation5 + $0x4f0] sm:$0xff] }
 0x140   :  { %3408 = vmatpush1.bf16.msra.mxu1 %v11189_v28  ;;  %v11245_v28 = vcombine.low %v264_v11, %v268_v12  ;;  %v320_v11 = vld [vmem:[#allocation5 + $0x508] sm:$0xff] }
 0x141   :  { %3409 = vmatprep.subr.bf16.mxu1 %v11198_v33  ;;  %3572 = vmatpush1.bf16.msra.mxu0 %v11191_v34  ;;  %v11254_v33 = vcombine.high %v272_v20, %v276_v22  ;;  %v11247_v34 = vcombine.low %v265_v15, %v269_v16  ;;  %v324_v12 = vld [vmem:[#allocation5 + $0x528] sm:$0xff]  ;;  %v321_v15 = vld [vmem:[#allocation5 + $0x510] sm:$0xff] }
 0x142   :  { %3573 = vmatprep.subr.bf16.mxu0 %v11200_v37  ;;  %v11256_v37 = vcombine.high %v273_v25, %v277_v26  ;;  %v325_v16 = vld [vmem:[#allocation5 + $0x530] sm:$0xff] }
 0x144   :  { %3410 = vmatpush1.bf16.msra.mxu1 %v11197_v40  ;;  %v11253_v40 = vcombine.low %v272_v20, %v276_v22  ;;  %v328_v20 = vld [vmem:[#allocation5 + $0x548] sm:$0xff] }
 0x145   :  { %3411 = vmatprep.subr.bf16.mxu1 %v11206_v43  ;;  %3574 = vmatpush1.bf16.msra.mxu0 %v11199_v44  ;;  %v11262_v43 = vcombine.high %v280_v29, %v284_v32  ;;  %v11255_v44 = vcombine.low %v273_v25, %v277_v26  ;;  %v332_v22 = vld [vmem:[#allocation5 + $0x568] sm:$0xff]  ;;  %v329_v25 = vld [vmem:[#allocation5 + $0x550] sm:$0xff] }
 0x146   :  { %3575 = vmatprep.subr.bf16.mxu0 %v11208_v47  ;;  %v11264_v47 = vcombine.high %v281_v35, %v285_v36  ;;  %v333_v26 = vld [vmem:[#allocation5 + $0x570] sm:$0xff] }
 0x148   :  { %3412 = vmatpush1.bf16.msra.mxu1 %v11205_v48  ;;  %v11261_v48 = vcombine.low %v280_v29, %v284_v32  ;;  %v336_v29 = vld [vmem:[#allocation5 + $0x588] sm:$0xff] }
 0x149   :  { %3413 = vmatprep.subr.bf16.mxu1 %v11214_v51  ;;  %3576 = vmatpush1.bf16.msra.mxu0 %v11207_v52  ;;  %v11270_v51 = vcombine.high %v288_v41, %v292_v42  ;;  %v11263_v52 = vcombine.low %v281_v35, %v285_v36  ;;  %v340_v32 = vld [vmem:[#allocation5 + $0x5a8] sm:$0xff]  ;;  %v337_v35 = vld [vmem:[#allocation5 + $0x590] sm:$0xff] }
 0x14a   :  { %3577 = vmatprep.subr.bf16.mxu0 %v11216_v55  ;;  %v11272_v55 = vcombine.high %v289_v45, %v293_v46  ;;  %v341_v36 = vld [vmem:[#allocation5 + $0x5b0] sm:$0xff] }
 0x14c   :  { %3414 = vmatpush1.bf16.msra.mxu1 %v11213_v56  ;;  %v11269_v56 = vcombine.low %v288_v41, %v292_v42  ;;  %v11318_v41 = vcombine.high %v336_v29, %v340_v32  ;;  %v344_v42 = vld [vmem:[#allocation5 + $0x5c8] sm:$0xff] }
 0x14d   :  { %3415 = vmatprep.subr.bf16.mxu1 %v11222_v60  ;;  %3578 = vmatpush1.bf16.msra.mxu0 %v11215_v62  ;;  %v11278_v60 = vcombine.high %v296_v49, %v300_v50  ;;  %v11271_v62 = vcombine.low %v289_v45, %v293_v46  ;;  %v345_v45 = vld [vmem:[#allocation5 + $0x5d0] sm:$0xff]  ;;  %v11320_v46 = vcombine.high %v337_v35, %v341_v36 }
 0x14e   :  { %3579 = vmatprep.subr.bf16.mxu0 %v11224_v1  ;;  %v11280_v1 = vcombine.high %v297_v53, %v301_v54 }
 0x150   :  { %3416 = vmatpush1.bf16.msra.mxu1 %v11221_v2  ;;  %v11277_v2 = vcombine.low %v296_v49, %v300_v50  ;;  %v352_v50 = vld [vmem:[#allocation5 + $0x608] sm:$0xff] }
 0x151   :  { %3417 = vmatprep.subr.bf16.mxu1 %v11230_v5  ;;  %3580 = vmatpush1.bf16.msra.mxu0 %v11223_v6  ;;  %v11286_v5 = vcombine.high %v304_v58, %v308_v59  ;;  %v11279_v6 = vcombine.low %v297_v53, %v301_v54  ;;  %v353_v53 = vld [vmem:[#allocation5 + $0x610] sm:$0xff] }
 0x152   :  { %3581 = vmatprep.subr.bf16.mxu0 %v11232_v9  ;;  %v11288_v9 = vcombine.high %v305_v63, %v309_v0 }
 0x154   :  { %3418 = vmatpush1.bf16.msra.mxu1 %v11229_v10  ;;  %v11285_v10 = vcombine.low %v304_v58, %v308_v59  ;;  %v360_v59 = vld [vmem:[#allocation5 + $0x648] sm:$0xff] }
 0x155   :  { %3419 = vmatprep.subr.bf16.mxu1 %v11238_v13  ;;  %3582 = vmatpush1.bf16.msra.mxu0 %v11231_v14  ;;  %v11294_v13 = vcombine.high %v312_v3, %v316_v4  ;;  %v11287_v14 = vcombine.low %v305_v63, %v309_v0  ;;  %v361_v63 = vld [vmem:[#allocation5 + $0x650] sm:$0xff] }
 0x156   :  { %3583 = vmatprep.subr.bf16.mxu0 %v11240_v17  ;;  %v11296_v17 = vcombine.high %v313_v7, %v317_v8 }
 0x158   :  { %3420 = vmatpush1.bf16.msra.mxu1 %v11237_v18  ;;  %v11293_v18 = vcombine.low %v312_v3, %v316_v4  ;;  %v368_v4 = vld [vmem:[#allocation5 + $0x688] sm:$0xff] }
 0x159   :  { %3421 = vmatprep.subr.bf16.mxu1 %v11246_v23  ;;  %3584 = vmatpush1.bf16.msra.mxu0 %v11239_v24  ;;  %v11302_v23 = vcombine.high %v320_v11, %v324_v12  ;;  %v11295_v24 = vcombine.low %v313_v7, %v317_v8  ;;  %v369_v7 = vld [vmem:[#allocation5 + $0x690] sm:$0xff] }
 0x15a   :  { %3585 = vmatprep.subr.bf16.mxu0 %v11248_v27  ;;  %v11304_v27 = vcombine.high %v321_v15, %v325_v16 }
 0x15c   :  { %3422 = vmatpush1.bf16.msra.mxu1 %v11245_v28  ;;  %v11301_v28 = vcombine.low %v320_v11, %v324_v12  ;;  %v376_v12 = vld [vmem:[#allocation5 + $0x6c8] sm:$0xff] }
 0x15d   :  { %3423 = vmatprep.subr.bf16.mxu1 %v11254_v33  ;;  %3586 = vmatpush1.bf16.msra.mxu0 %v11247_v34  ;;  %v11310_v33 = vcombine.high %v328_v20, %v332_v22  ;;  %v11303_v34 = vcombine.low %v321_v15, %v325_v16  ;;  %v377_v15 = vld [vmem:[#allocation5 + $0x6d0] sm:$0xff] }
 0x15e   :  { %3587 = vmatprep.subr.bf16.mxu0 %v11256_v37  ;;  %v11312_v37 = vcombine.high %v329_v25, %v333_v26 }
 0x160   :  { %3424 = vmatpush1.bf16.msra.mxu1 %v11253_v40  ;;  %v11309_v40 = vcombine.low %v328_v20, %v332_v22  ;;  %v384_v22 = vld [vmem:[#allocation5 + $0x708] sm:$0xff] }
 0x161   :  { %3425 = vmatprep.subr.bf16.mxu1 %v11262_v43  ;;  %3588 = vmatpush1.bf16.msra.mxu0 %v11255_v44  ;;  %v348_v43 = vld [vmem:[#allocation5 + $0x5e8] sm:$0xff]  ;;  %v11311_v44 = vcombine.low %v329_v25, %v333_v26  ;;  %v385_v25 = vld [vmem:[#allocation5 + $0x710] sm:$0xff] }
 0x162   :  { %3589 = vmatprep.subr.bf16.mxu0 %v11264_v47  ;;  %v349_v47 = vld [vmem:[#allocation5 + $0x5f0] sm:$0xff]  ;;  %v11326_v49 = vcombine.high %v344_v42, %v348_v43 }
 0x163   :  { %v11328_v54 = vcombine.high %v345_v45, %v349_v47 }
 0x164   :  { %3426 = vmatpush1.bf16.msra.mxu1 %v11261_v48  ;;  %v11317_v48 = vcombine.low %v336_v29, %v340_v32  ;;  %v392_v32 = vld [vmem:[#allocation5 + $0x748] sm:$0xff] }
 0x165   :  { %3436 = vmatprep.subr.bf16.mxu1 %v11270_v51  ;;  %3590 = vmatpush1.bf16.msra.mxu0 %v11263_v52  ;;  %v356_v51 = vld [vmem:[#allocation5 + $0x628] sm:$0xff]  ;;  %v11319_v52 = vcombine.low %v337_v35, %v341_v36  ;;  %v393_v35 = vld [vmem:[#allocation5 + $0x750] sm:$0xff] }
 0x166   :  { %3600 = vmatprep.subr.bf16.mxu0 %v11272_v55  ;;  %v357_v55 = vld [vmem:[#allocation5 + $0x630] sm:$0xff]  ;;  %v11334_v58 = vcombine.high %v352_v50, %v356_v51 }
 0x167   :  { %3428 = vmatmul.mubr.bf16.vlgmr.msra.gmra.mrb[4].mxu1 %v13723_v19  ;;  %v11336_v0 = vcombine.high %v353_v53, %v357_v55 }
 0x168   :  { %3437 = vmatpush1.bf16.msra.mxu1 %v11269_v56  ;;  %3592 = vmatmul.mubr.bf16.vlgmr.msra.gmra.mrb[4].mxu0 %v13723_v19  ;;  %v11325_v56 = vcombine.low %v344_v42, %v348_v43  ;;  %v400_v42 = vld [vmem:[#allocation5 + $0x788] sm:$0xff] }
 0x169   :  { %3438 = vmatprep.subr.bf16.mxu1 %v11278_v60  ;;  %3601 = vmatpush1.bf16.msra.mxu0 %v11271_v62  ;;  %v364_v60 = vld [vmem:[#allocation5 + $0x668] sm:$0xff]  ;;  %v11327_v62 = vcombine.low %v345_v45, %v349_v47  ;;  %v401_v45 = vld [vmem:[#allocation5 + $0x790] sm:$0xff] }
 0x16a   :  { %3602 = vmatprep.subr.bf16.mxu0 %v11280_v1  ;;  %3468 = vmatprep.mubr.bf16.mxu1 %v13727_v30  ;;  %v365_v1 = vld [vmem:[#allocation5 + $0x670] sm:$0xff]  ;;  %v11342_v3 = vcombine.high %v360_v59, %v364_v60  ;;  %v404_v43 = vld [vmem:[#allocation5 + $0x7a8] sm:$0xff] }
 0x16b   :  { %3632 = vmatprep.mubr.bf16.mxu0 %v13727_v30  ;;  %v11344_v8 = vcombine.high %v361_v63, %v365_v1  ;;  %v405_v47 = vld [vmem:[#allocation5 + $0x7b0] sm:$0xff] }
 0x16c   :  { %3439 = vmatpush1.bf16.msra.mxu1 %v11277_v2  ;;  %v11333_v2 = vcombine.low %v352_v50, %v356_v51  ;;  %v408_v50 = vld [vmem:[#allocation5 + $0x7c8] sm:$0xff] }
 0x16d   :  { %3440 = vmatprep.subr.bf16.mxu1 %v11286_v5  ;;  %3603 = vmatpush1.bf16.msra.mxu0 %v11279_v6  ;;  %v372_v5 = vld [vmem:[#allocation5 + $0x6a8] sm:$0xff]  ;;  %v11335_v6 = vcombine.low %v353_v53, %v357_v55  ;;  %v409_v53 = vld [vmem:[#allocation5 + $0x7d0] sm:$0xff] }
 0x16e   :  { %3604 = vmatprep.subr.bf16.mxu0 %v11288_v9  ;;  %v373_v9 = vld [vmem:[#allocation5 + $0x6b0] sm:$0xff]  ;;  %v11350_v11 = vcombine.high %v368_v4, %v372_v5  ;;  %v412_v51 = vld [vmem:[#allocation5 + $0x7e8] sm:$0xff] }
 0x16f   :  { %v11352_v16 = vcombine.high %v369_v7, %v373_v9  ;;  %v413_v55 = vld [vmem:[#allocation5 + $0x7f0] sm:$0xff] }
 0x170   :  { %3441 = vmatpush1.bf16.msra.mxu1 %v11285_v10  ;;  %v11341_v10 = vcombine.low %v360_v59, %v364_v60  ;;  %v11383_v59 = vcombine.low %v401_v45, %v405_v47  ;;  %v416_v60 = vld [vmem:[#allocation5 + $0x808] sm:$0xff] }
 0x171   :  { %3442 = vmatprep.subr.bf16.mxu1 %v11294_v13  ;;  %3605 = vmatpush1.bf16.msra.mxu0 %v11287_v14  ;;  %v380_v13 = vld [vmem:[#allocation5 + $0x6e8] sm:$0xff]  ;;  %v11343_v14 = vcombine.low %v361_v63, %v365_v1  ;;  %v11392_v63 = vcombine.high %v409_v53, %v413_v55  ;;  %v421_v1 = vld [vmem:[#allocation5 + $0x830] sm:$0xff] }
 0x172   :  { %3606 = vmatprep.subr.bf16.mxu0 %v11296_v17  ;;  %v381_v17 = vld [vmem:[#allocation5 + $0x6f0] sm:$0xff]  ;;  %v11358_v20 = vcombine.high %v376_v12, %v380_v13 }
 0x173   :  { %v11360_v26 = vcombine.high %v377_v15, %v381_v17 }
 0x174   :  { %3443 = vmatpush1.bf16.msra.mxu1 %v11293_v18  ;;  %v11349_v18 = vcombine.low %v368_v4, %v372_v5  ;;  %v11391_v4 = vcombine.low %v409_v53, %v413_v55  ;;  %v424_v5 = vld [vmem:[#allocation5 + $0x848] sm:$0xff]  ;;  %v469_v55 = vld [vmem:[#allocation5 + $0x9b0] sm:$0xff] }
 0x175   :  { %3444 = vmatprep.subr.bf16.mxu1 %v11302_v23  ;;  %3607 = vmatpush1.bf16.msra.mxu0 %v11295_v24  ;;  %v388_v23 = vld [vmem:[#allocation5 + $0x728] sm:$0xff]  ;;  %v11351_v24 = vcombine.low %v369_v7, %v373_v9  ;;  %v429_v9 = vld [vmem:[#allocation5 + $0x870] sm:$0xff] }
 0x176   :  { %3608 = vmatprep.subr.bf16.mxu0 %v11304_v27  ;;  %v389_v27 = vld [vmem:[#allocation5 + $0x730] sm:$0xff]  ;;  %v11366_v29 = vcombine.high %v384_v22, %v388_v23 }
 0x177   :  { %v11368_v36 = vcombine.high %v385_v25, %v389_v27 }
 0x178   :  { %3445 = vmatpush1.bf16.msra.mxu1 %v11301_v28  ;;  %v11357_v28 = vcombine.low %v376_v12, %v380_v13  ;;  %v432_v13 = vld [vmem:[#allocation5 + $0x888] sm:$0xff] }
 0x179   :  { %3446 = vmatprep.subr.bf16.mxu1 %v11310_v33  ;;  %3609 = vmatpush1.bf16.msra.mxu0 %v11303_v34  ;;  %v396_v33 = vld [vmem:[#allocation5 + $0x768] sm:$0xff]  ;;  %v11359_v34 = vcombine.low %v377_v15, %v381_v17  ;;  %v437_v17 = vld [vmem:[#allocation5 + $0x8b0] sm:$0xff] }
 0x17a   :  { %3610 = vmatprep.subr.bf16.mxu0 %v11312_v37  ;;  %v397_v37 = vld [vmem:[#allocation5 + $0x770] sm:$0xff] }
 0x17c   :  { %3447 = vmatpush1.bf16.msra.mxu1 %v11309_v40  ;;  %v11365_v40 = vcombine.low %v384_v22, %v388_v23  ;;  %v440_v23 = vld [vmem:[#allocation5 + $0x8c8] sm:$0xff] }
 0x17d   :  { %3448 = vmatprep.subr.bf16.mxu1 %v11318_v41  ;;  %3611 = vmatpush1.bf16.msra.mxu0 %v11311_v44  ;;  %v11374_v41 = vcombine.high %v392_v32, %v396_v33  ;;  %v11367_v44 = vcombine.low %v385_v25, %v389_v27  ;;  %v445_v27 = vld [vmem:[#allocation5 + $0x8f0] sm:$0xff] }
 0x17e   :  { %3612 = vmatprep.subr.bf16.mxu0 %v11320_v46  ;;  %v11376_v46 = vcombine.high %v393_v35, %v397_v37 }
 0x180   :  { %3449 = vmatpush1.bf16.msra.mxu1 %v11317_v48  ;;  %v11373_v48 = vcombine.low %v392_v32, %v396_v33  ;;  %v448_v33 = vld [vmem:[#allocation5 + $0x908] sm:$0xff] }
 0x181   :  { %3450 = vmatprep.subr.bf16.mxu1 %v11326_v49  ;;  %3613 = vmatpush1.bf16.msra.mxu0 %v11319_v52  ;;  %v11382_v49 = vcombine.high %v400_v42, %v404_v43  ;;  %v11375_v52 = vcombine.low %v393_v35, %v397_v37  ;;  %v453_v37 = vld [vmem:[#allocation5 + $0x930] sm:$0xff] }
 0x182   :  { %3614 = vmatprep.subr.bf16.mxu0 %v11328_v54  ;;  %v11384_v54 = vcombine.high %v401_v45, %v405_v47  ;;  %v461_v47 = vld [vmem:[#allocation5 + $0x970] sm:$0xff] }
 0x184   :  { %3451 = vmatpush1.bf16.msra.mxu1 %v11325_v56  ;;  %v11381_v56 = vcombine.low %v400_v42, %v404_v43  ;;  %v456_v43 = vld [vmem:[#allocation5 + $0x948] sm:$0xff] }
 0x185   :  { %3452 = vmatprep.subr.bf16.mxu1 %v11334_v58  ;;  %3615 = vmatpush1.bf16.msra.mxu0 %v11327_v62  ;;  %v11390_v58 = vcombine.high %v408_v50, %v412_v51  ;;  %v420_v62 = vld [vmem:[#allocation5 + $0x828] sm:$0xff] }
 0x186   :  { %3616 = vmatprep.subr.bf16.mxu0 %v11336_v0  ;;  %v417_v0 = vld [vmem:[#allocation5 + $0x810] sm:$0xff] }
 0x187   :  { %v11400_v7 = vcombine.high %v417_v0, %v421_v1  ;;  %v11399_v12 = vcombine.low %v417_v0, %v421_v1  ;;  %v473_v0 = vld [vmem:[#allocation5 + $0x9d0] sm:$0xff] }
 0x188   :  { %3453 = vmatpush1.bf16.msra.mxu1 %v11333_v2  ;;  %v11389_v2 = vcombine.low %v408_v50, %v412_v51  ;;  %v464_v51 = vld [vmem:[#allocation5 + $0x988] sm:$0xff]  ;;  %v477_v1 = vld [vmem:[#allocation5 + $0x9f0] sm:$0xff] }
 0x189   :  { %3454 = vmatprep.subr.bf16.mxu1 %v11342_v3  ;;  %3617 = vmatpush1.bf16.msra.mxu0 %v11335_v6  ;;  %v11398_v3 = vcombine.high %v416_v60, %v420_v62  ;;  %v428_v6 = vld [vmem:[#allocation5 + $0x868] sm:$0xff] }
 0x18a   :  { %3618 = vmatprep.subr.bf16.mxu0 %v11344_v8  ;;  %v425_v8 = vld [vmem:[#allocation5 + $0x850] sm:$0xff] }
 0x18b   :  { %v11408_v15 = vcombine.high %v425_v8, %v429_v9  ;;  %v11407_v22 = vcombine.low %v425_v8, %v429_v9  ;;  %v481_v8 = vld [vmem:[#allocation5 + $0xa10] sm:$0xff] }
 0x18c   :  { %3455 = vmatpush1.bf16.msra.mxu1 %v11341_v10  ;;  %v11397_v10 = vcombine.low %v416_v60, %v420_v62  ;;  %v472_v60 = vld [vmem:[#allocation5 + $0x9c8] sm:$0xff]  ;;  %v485_v9 = vld [vmem:[#allocation5 + $0xa30] sm:$0xff] }
 0x18d   :  { %3456 = vmatprep.subr.bf16.mxu1 %v11350_v11  ;;  %3619 = vmatpush1.bf16.msra.mxu0 %v11343_v14  ;;  %v11406_v11 = vcombine.high %v424_v5, %v428_v6  ;;  %v436_v14 = vld [vmem:[#allocation5 + $0x8a8] sm:$0xff] }
 0x18e   :  { %3620 = vmatprep.subr.bf16.mxu0 %v11352_v16  ;;  %v433_v16 = vld [vmem:[#allocation5 + $0x890] sm:$0xff]  ;;  %v476_v62 = vld [vmem:[#allocation5 + $0x9e8] sm:$0xff] }
 0x18f   :  { %v11416_v25 = vcombine.high %v433_v16, %v437_v17  ;;  %v11415_v32 = vcombine.low %v433_v16, %v437_v17  ;;  %v489_v16 = vld [vmem:[#allocation5 + $0xa50] sm:$0xff] }
 0x190   :  { %3457 = vmatpush1.bf16.msra.mxu1 %v11349_v18  ;;  %v11405_v18 = vcombine.low %v424_v5, %v428_v6  ;;  %v480_v5 = vld [vmem:[#allocation5 + $0xa08] sm:$0xff]  ;;  %v493_v17 = vld [vmem:[#allocation5 + $0xa70] sm:$0xff] }
 0x191   :  { %3458 = vmatprep.subr.bf16.mxu1 %v11358_v20  ;;  %3621 = vmatpush1.bf16.msra.mxu0 %v11351_v24  ;;  %v11414_v20 = vcombine.high %v432_v13, %v436_v14  ;;  %v444_v24 = vld [vmem:[#allocation5 + $0x8e8] sm:$0xff] }
 0x192   :  { %3622 = vmatprep.subr.bf16.mxu0 %v11360_v26  ;;  %v441_v26 = vld [vmem:[#allocation5 + $0x8d0] sm:$0xff]  ;;  %v484_v6 = vld [vmem:[#allocation5 + $0xa28] sm:$0xff] }
 0x193   :  { %v11424_v35 = vcombine.high %v441_v26, %v445_v27  ;;  %v11423_v42 = vcombine.low %v441_v26, %v445_v27  ;;  %v497_v26 = vld [vmem:[#allocation5 + $0xa90] sm:$0xff] }
 0x194   :  { %3459 = vmatpush1.bf16.msra.mxu1 %v11357_v28  ;;  %v11413_v28 = vcombine.low %v432_v13, %v436_v14  ;;  %v488_v13 = vld [vmem:[#allocation5 + $0xa48] sm:$0xff]  ;;  %v501_v27 = vld [vmem:[#allocation5 + $0xab0] sm:$0xff] }
 0x195   :  { %3460 = vmatprep.subr.bf16.mxu1 %v11366_v29  ;;  %3623 = vmatpush1.bf16.msra.mxu0 %v11359_v34  ;;  %v11422_v29 = vcombine.high %v440_v23, %v444_v24  ;;  %v452_v34 = vld [vmem:[#allocation5 + $0x928] sm:$0xff] }
 0x196   :  { %3624 = vmatprep.subr.bf16.mxu0 %v11368_v36  ;;  %v449_v36 = vld [vmem:[#allocation5 + $0x910] sm:$0xff]  ;;  %v492_v14 = vld [vmem:[#allocation5 + $0xa68] sm:$0xff] }
 0x197   :  { %v11432_v45 = vcombine.high %v449_v36, %v453_v37  ;;  %v11431_v50 = vcombine.low %v449_v36, %v453_v37  ;;  %v505_v36 = vld [vmem:[#allocation5 + $0xad0] sm:$0xff] }
 0x198   :  { %3461 = vmatpush1.bf16.msra.mxu1 %v11365_v40  ;;  %v11421_v40 = vcombine.low %v440_v23, %v444_v24  ;;  %v496_v23 = vld [vmem:[#allocation5 + $0xa88] sm:$0xff]  ;;  %v509_v37 = vld [vmem:[#allocation5 + $0xaf0] sm:$0xff] }
 0x199   :  { %3462 = vmatprep.subr.bf16.mxu1 %v11374_v41  ;;  %3625 = vmatpush1.bf16.msra.mxu0 %v11367_v44  ;;  %v11430_v41 = vcombine.high %v448_v33, %v452_v34  ;;  %v460_v44 = vld [vmem:[#allocation5 + $0x968] sm:$0xff] }
 0x19a   :  { %3626 = vmatprep.subr.bf16.mxu0 %v11376_v46  ;;  %v457_v46 = vld [vmem:[#allocation5 + $0x950] sm:$0xff]  ;;  %v500_v24 = vld [vmem:[#allocation5 + $0xaa8] sm:$0xff] }
 0x19b   :  { %v11440_v53 = vcombine.high %v457_v46, %v461_v47 }
 0x19c   :  { %3463 = vmatpush1.bf16.msra.mxu1 %v11373_v48  ;;  %v11429_v48 = vcombine.low %v448_v33, %v452_v34  ;;  %v504_v33 = vld [vmem:[#allocation5 + $0xac8] sm:$0xff] }
 0x19d   :  { %3464 = vmatprep.subr.bf16.mxu1 %v11382_v49  ;;  %3627 = vmatpush1.bf16.msra.mxu0 %v11375_v52  ;;  %v11438_v49 = vcombine.high %v456_v43, %v460_v44  ;;  %v468_v52 = vld [vmem:[#allocation5 + $0x9a8] sm:$0xff] }
 0x19e   :  { %3628 = vmatprep.subr.bf16.mxu0 %v11384_v54  ;;  %v465_v54 = vld [vmem:[#allocation5 + $0x990] sm:$0xff]  ;;  %v508_v34 = vld [vmem:[#allocation5 + $0xae8] sm:$0xff] }
 0x1a0   :  { %3465 = vmatpush1.bf16.msra.mxu1 %v11381_v56  ;;  %v11437_v56 = vcombine.low %v456_v43, %v460_v44  ;;  %v512_v43 = vld [vmem:[#allocation5 + $0xb08] sm:$0xff] }
 0x1a1   :  { %3466 = vmatprep.subr.bf16.mxu1 %v11390_v58  ;;  %3629 = vmatpush1.bf16.msra.mxu0 %v11383_v59  ;;  %v11446_v58 = vcombine.high %v464_v51, %v468_v52  ;;  %v11439_v59 = vcombine.low %v457_v46, %v461_v47  ;;  %v516_v44 = vld [vmem:[#allocation5 + $0xb28] sm:$0xff]  ;;  %v513_v46 = vld [vmem:[#allocation5 + $0xb10] sm:$0xff] }
 0x1a2   :  { %3630 = vmatprep.subr.bf16.mxu0 %v11392_v63  ;;  %v11448_v63 = vcombine.high %v465_v54, %v469_v55  ;;  %v517_v47 = vld [vmem:[#allocation5 + $0xb30] sm:$0xff] }
 0x1a4   :  { %3467 = vmatpush1.bf16.msra.mxu1 %v11389_v2  ;;  %v11445_v2 = vcombine.low %v464_v51, %v468_v52  ;;  %v520_v51 = vld [vmem:[#allocation5 + $0xb48] sm:$0xff] }
 0x1a5   :  { %3477 = vmatprep.subr.bf16.mxu1 %v11398_v3  ;;  %3631 = vmatpush1.bf16.msra.mxu0 %v11391_v4  ;;  %v11454_v3 = vcombine.high %v472_v60, %v476_v62  ;;  %v11447_v4 = vcombine.low %v465_v54, %v469_v55  ;;  %v524_v52 = vld [vmem:[#allocation5 + $0xb68] sm:$0xff]  ;;  %v521_v54 = vld [vmem:[#allocation5 + $0xb50] sm:$0xff] }
 0x1a6   :  { %3641 = vmatprep.subr.bf16.mxu0 %v11400_v7  ;;  %v11456_v7 = vcombine.high %v473_v0, %v477_v1  ;;  %v525_v55 = vld [vmem:[#allocation5 + $0xb70] sm:$0xff] }
 0x1a7   :  { %3469 = vmatmul.mubr.bf16.vlgmr.msra.gmra.mrb[4].mxu1 %v13735_v38 }
 0x1a8   :  { %3478 = vmatpush1.bf16.msra.mxu1 %v11397_v10  ;;  %3633 = vmatmul.mubr.bf16.vlgmr.msra.gmra.mrb[4].mxu0 %v13735_v38  ;;  %v11453_v10 = vcombine.low %v472_v60, %v476_v62  ;;  %v528_v60 = vld [vmem:[#allocation5 + $0xb88] sm:$0xff] }
 0x1a9   :  { %3479 = vmatprep.subr.bf16.mxu1 %v11406_v11  ;;  %3642 = vmatpush1.bf16.msra.mxu0 %v11399_v12  ;;  %v11462_v11 = vcombine.high %v480_v5, %v484_v6  ;;  %v11455_v12 = vcombine.low %v473_v0, %v477_v1  ;;  %v532_v62 = vld [vmem:[#allocation5 + $0xba8] sm:$0xff]  ;;  %v529_v0 = vld [vmem:[#allocation5 + $0xb90] sm:$0xff] }
 0x1aa   :  { %3643 = vmatprep.subr.bf16.mxu0 %v11408_v15  ;;  %3509 = vmatprep.mubr.bf16.mxu1 %v13719_v61  ;;  %v11464_v15 = vcombine.high %v481_v8, %v485_v9  ;;  %v533_v1 = vld [vmem:[#allocation5 + $0xbb0] sm:$0xff] }
 0x1ab   :  { %3673 = vmatprep.mubr.bf16.mxu0 %v13719_v61 }
 0x1ac   :  { %3480 = vmatpush1.bf16.msra.mxu1 %v11405_v18  ;;  %v11461_v18 = vcombine.low %v480_v5, %v484_v6  ;;  %v536_v5 = vld [vmem:[#allocation5 + $0xbc8] sm:$0xff] }
 0x1ad   :  { %3481 = vmatprep.subr.bf16.mxu1 %v11414_v20  ;;  %3644 = vmatpush1.bf16.msra.mxu0 %v11407_v22  ;;  %v11470_v20 = vcombine.high %v488_v13, %v492_v14  ;;  %v11463_v22 = vcombine.low %v481_v8, %v485_v9  ;;  %v540_v6 = vld [vmem:[#allocation5 + $0xbe8] sm:$0xff]  ;;  %v537_v8 = vld [vmem:[#allocation5 + $0xbd0] sm:$0xff] }
 0x1ae   :  { %3645 = vmatprep.subr.bf16.mxu0 %v11416_v25  ;;  %v11472_v25 = vcombine.high %v489_v16, %v493_v17  ;;  %v541_v9 = vld [vmem:[#allocation5 + $0xbf0] sm:$0xff] }
 0x1b0   :  { %3482 = vmatpush1.bf16.msra.mxu1 %v11413_v28  ;;  %v11469_v28 = vcombine.low %v488_v13, %v492_v14  ;;  %v544_v13 = vld [vmem:[#allocation5 + $0xc08] sm:$0xff] }
 0x1b1   :  { %3483 = vmatprep.subr.bf16.mxu1 %v11422_v29  ;;  %3646 = vmatpush1.bf16.msra.mxu0 %v11415_v32  ;;  %v11478_v29 = vcombine.high %v496_v23, %v500_v24  ;;  %v11471_v32 = vcombine.low %v489_v16, %v493_v17  ;;  %v548_v14 = vld [vmem:[#allocation5 + $0xc28] sm:$0xff]  ;;  %v545_v16 = vld [vmem:[#allocation5 + $0xc10] sm:$0xff] }
 0x1b2   :  { %3647 = vmatprep.subr.bf16.mxu0 %v11424_v35  ;;  %v11480_v35 = vcombine.high %v497_v26, %v501_v27  ;;  %v549_v17 = vld [vmem:[#allocation5 + $0xc30] sm:$0xff] }
 0x1b4   :  { %3484 = vmatpush1.bf16.msra.mxu1 %v11421_v40  ;;  %v11477_v40 = vcombine.low %v496_v23, %v500_v24  ;;  %v552_v23 = vld [vmem:[#allocation5 + $0xc48] sm:$0xff] }
 0x1b5   :  { %3485 = vmatprep.subr.bf16.mxu1 %v11430_v41  ;;  %3648 = vmatpush1.bf16.msra.mxu0 %v11423_v42  ;;  %v11486_v41 = vcombine.high %v504_v33, %v508_v34  ;;  %v11479_v42 = vcombine.low %v497_v26, %v501_v27  ;;  %v556_v24 = vld [vmem:[#allocation5 + $0xc68] sm:$0xff]  ;;  %v553_v26 = vld [vmem:[#allocation5 + $0xc50] sm:$0xff] }
 0x1b6   :  { %3649 = vmatprep.subr.bf16.mxu0 %v11432_v45  ;;  %v11488_v45 = vcombine.high %v505_v36, %v509_v37  ;;  %v557_v27 = vld [vmem:[#allocation5 + $0xc70] sm:$0xff] }
 0x1b8   :  { %3486 = vmatpush1.bf16.msra.mxu1 %v11429_v48  ;;  %v11485_v48 = vcombine.low %v504_v33, %v508_v34  ;;  %v560_v33 = vld [vmem:[#allocation5 + $0xc88] sm:$0xff] }
 0x1b9   :  { %3487 = vmatprep.subr.bf16.mxu1 %v11438_v49  ;;  %3650 = vmatpush1.bf16.msra.mxu0 %v11431_v50  ;;  %v11494_v49 = vcombine.high %v512_v43, %v516_v44  ;;  %v11487_v50 = vcombine.low %v505_v36, %v509_v37  ;;  %v564_v34 = vld [vmem:[#allocation5 + $0xca8] sm:$0xff]  ;;  %v561_v36 = vld [vmem:[#allocation5 + $0xc90] sm:$0xff] }
 0x1ba   :  { %3651 = vmatprep.subr.bf16.mxu0 %v11440_v53  ;;  %v11496_v53 = vcombine.high %v513_v46, %v517_v47  ;;  %v565_v37 = vld [vmem:[#allocation5 + $0xcb0] sm:$0xff] }
 0x1bc   :  { %3488 = vmatpush1.bf16.msra.mxu1 %v11437_v56  ;;  %v11493_v56 = vcombine.low %v512_v43, %v516_v44  ;;  %v568_v43 = vld [vmem:[#allocation5 + $0xcc8] sm:$0xff] }
 0x1bd   :  { %3489 = vmatprep.subr.bf16.mxu1 %v11446_v58  ;;  %3652 = vmatpush1.bf16.msra.mxu0 %v11439_v59  ;;  %v11502_v58 = vcombine.high %v520_v51, %v524_v52  ;;  %v11495_v59 = vcombine.low %v513_v46, %v517_v47  ;;  %v572_v44 = vld [vmem:[#allocation5 + $0xce8] sm:$0xff]  ;;  %v569_v46 = vld [vmem:[#allocation5 + $0xcd0] sm:$0xff] }
 0x1be   :  { %3653 = vmatprep.subr.bf16.mxu0 %v11448_v63  ;;  %v11504_v63 = vcombine.high %v521_v54, %v525_v55  ;;  %v573_v47 = vld [vmem:[#allocation5 + $0xcf0] sm:$0xff] }
 0x1c0   :  { %3490 = vmatpush1.bf16.msra.mxu1 %v11445_v2  ;;  %v11501_v2 = vcombine.low %v520_v51, %v524_v52  ;;  %v576_v51 = vld [vmem:[#allocation5 + $0xd08] sm:$0xff] }
 0x1c1   :  { %3491 = vmatprep.subr.bf16.mxu1 %v11454_v3  ;;  %3654 = vmatpush1.bf16.msra.mxu0 %v11447_v4  ;;  %v11510_v3 = vcombine.high %v528_v60, %v532_v62  ;;  %v11503_v4 = vcombine.low %v521_v54, %v525_v55  ;;  %v580_v52 = vld [vmem:[#allocation5 + $0xd28] sm:$0xff]  ;;  %v577_v54 = vld [vmem:[#allocation5 + $0xd10] sm:$0xff] }
 0x1c2   :  { %3655 = vmatprep.subr.bf16.mxu0 %v11456_v7  ;;  %v11512_v7 = vcombine.high %v529_v0, %v533_v1  ;;  %v581_v55 = vld [vmem:[#allocation5 + $0xd30] sm:$0xff] }
 0x1c4   :  { %3492 = vmatpush1.bf16.msra.mxu1 %v11453_v10  ;;  %v11509_v10 = vcombine.low %v528_v60, %v532_v62  ;;  %v584_v60 = vld [vmem:[#allocation5 + $0xd48] sm:$0xff] }
 0x1c5   :  { %3493 = vmatprep.subr.bf16.mxu1 %v11462_v11  ;;  %3656 = vmatpush1.bf16.msra.mxu0 %v11455_v12  ;;  %v11518_v11 = vcombine.high %v536_v5, %v540_v6  ;;  %v11511_v12 = vcombine.low %v529_v0, %v533_v1  ;;  %v588_v62 = vld [vmem:[#allocation5 + $0xd68] sm:$0xff]  ;;  %v585_v0 = vld [vmem:[#allocation5 + $0xd50] sm:$0xff] }
 0x1c6   :  { %3657 = vmatprep.subr.bf16.mxu0 %v11464_v15  ;;  %v11520_v15 = vcombine.high %v537_v8, %v541_v9  ;;  %v589_v1 = vld [vmem:[#allocation5 + $0xd70] sm:$0xff] }
 0x1c8   :  { %3494 = vmatpush1.bf16.msra.mxu1 %v11461_v18  ;;  %v11517_v18 = vcombine.low %v536_v5, %v540_v6  ;;  %v592_v5 = vld [vmem:[#allocation5 + $0xd88] sm:$0xff] }
 0x1c9   :  { %3495 = vmatprep.subr.bf16.mxu1 %v11470_v20  ;;  %3658 = vmatpush1.bf16.msra.mxu0 %v11463_v22  ;;  %v11526_v20 = vcombine.high %v544_v13, %v548_v14  ;;  %v11519_v22 = vcombine.low %v537_v8, %v541_v9  ;;  %v596_v6 = vld [vmem:[#allocation5 + $0xda8] sm:$0xff]  ;;  %v593_v8 = vld [vmem:[#allocation5 + $0xd90] sm:$0xff] }
 0x1ca   :  { %3659 = vmatprep.subr.bf16.mxu0 %v11472_v25  ;;  %v11528_v25 = vcombine.high %v545_v16, %v549_v17  ;;  %v597_v9 = vld [vmem:[#allocation5 + $0xdb0] sm:$0xff] }
 0x1cc   :  { %3496 = vmatpush1.bf16.msra.mxu1 %v11469_v28  ;;  %v11525_v28 = vcombine.low %v544_v13, %v548_v14  ;;  %v600_v14 = vld [vmem:[#allocation5 + $0xdc8] sm:$0xff] }
 0x1cd   :  { %3497 = vmatprep.subr.bf16.mxu1 %v11478_v29  ;;  %3660 = vmatpush1.bf16.msra.mxu0 %v11471_v32  ;;  %v11534_v29 = vcombine.high %v552_v23, %v556_v24  ;;  %v11527_v32 = vcombine.low %v545_v16, %v549_v17  ;;  %v11576_v16 = vcombine.high %v593_v8, %v597_v9 }
 0x1ce   :  { %3661 = vmatprep.subr.bf16.mxu0 %v11480_v35  ;;  %v11536_v35 = vcombine.high %v553_v26, %v557_v27 }
 0x1d0   :  { %3498 = vmatpush1.bf16.msra.mxu1 %v11477_v40  ;;  %v11533_v40 = vcombine.low %v552_v23, %v556_v24 }
 0x1d1   :  { %3499 = vmatprep.subr.bf16.mxu1 %v11486_v41  ;;  %3662 = vmatpush1.bf16.msra.mxu0 %v11479_v42  ;;  %v11542_v41 = vcombine.high %v560_v33, %v564_v34  ;;  %v11535_v42 = vcombine.low %v553_v26, %v557_v27  ;;  %v11573_v26 = vcombine.low %v592_v5, %v596_v6 }
 0x1d2   :  { %3663 = vmatprep.subr.bf16.mxu0 %v11488_v45  ;;  %v11544_v45 = vcombine.high %v561_v36, %v565_v37 }
 0x1d4   :  { %3500 = vmatpush1.bf16.msra.mxu1 %v11485_v48  ;;  %v11541_v48 = vcombine.low %v560_v33, %v564_v34 }
 0x1d5   :  { %3501 = vmatprep.subr.bf16.mxu1 %v11494_v49  ;;  %3664 = vmatpush1.bf16.msra.mxu0 %v11487_v50  ;;  %v11550_v49 = vcombine.high %v568_v43, %v572_v44  ;;  %v11543_v50 = vcombine.low %v561_v36, %v565_v37  ;;  %v612_v36 = vld [vmem:[#allocation5 + $0xe28] sm:$0xff] }
 0x1d6   :  { %3665 = vmatprep.subr.bf16.mxu0 %v11496_v53  ;;  %v11552_v53 = vcombine.high %v569_v46, %v573_v47 }
 0x1d8   :  { %3502 = vmatpush1.bf16.msra.mxu1 %v11493_v56  ;;  %v11549_v56 = vcombine.low %v568_v43, %v572_v44  ;;  %v613_v43 = vld [vmem:[#allocation5 + $0xe30] sm:$0xff] }
 0x1d9   :  { %3503 = vmatprep.subr.bf16.mxu1 %v11502_v58  ;;  %3666 = vmatpush1.bf16.msra.mxu0 %v11495_v59  ;;  %v11558_v58 = vcombine.high %v576_v51, %v580_v52  ;;  %v11551_v59 = vcombine.low %v569_v46, %v573_v47 }
 0x1da   :  { %3667 = vmatprep.subr.bf16.mxu0 %v11504_v63  ;;  %v11560_v63 = vcombine.high %v577_v54, %v581_v55 }
 0x1dc   :  { %3504 = vmatpush1.bf16.msra.mxu1 %v11501_v2  ;;  %v11557_v2 = vcombine.low %v576_v51, %v580_v52  ;;  %v620_v51 = vld [vmem:[#allocation5 + $0xe68] sm:$0xff] }
 0x1dd   :  { %3505 = vmatprep.subr.bf16.mxu1 %v11510_v3  ;;  %3668 = vmatpush1.bf16.msra.mxu0 %v11503_v4  ;;  %v11566_v3 = vcombine.high %v584_v60, %v588_v62  ;;  %v11559_v4 = vcombine.low %v577_v54, %v581_v55  ;;  %v617_v54 = vld [vmem:[#allocation5 + $0xe50] sm:$0xff] }
 0x1de   :  { %3669 = vmatprep.subr.bf16.mxu0 %v11512_v7  ;;  %v11568_v7 = vcombine.high %v585_v0, %v589_v1  ;;  %v621_v55 = vld [vmem:[#allocation5 + $0xe70] sm:$0xff] }
 0x1e0   :  { %3506 = vmatpush1.bf16.msra.mxu1 %v11509_v10  ;;  %v11565_v10 = vcombine.low %v584_v60, %v588_v62 }
 0x1e1   :  { %3507 = vmatprep.subr.bf16.mxu1 %v11518_v11  ;;  %3670 = vmatpush1.bf16.msra.mxu0 %v11511_v12  ;;  %v11574_v11 = vcombine.high %v592_v5, %v596_v6  ;;  %v11567_v12 = vcombine.low %v585_v0, %v589_v1  ;;  %v624_v0 = vld [vmem:[#allocation5 + $0xe88] sm:$0xff]  ;;  %v629_v5 = vld [vmem:[#allocation5 + $0xeb0] sm:$0xff] }
 0x1e2   :  { %3671 = vmatprep.subr.bf16.mxu0 %v11520_v15  ;;  %v604_v15 = vld [vmem:[#allocation5 + $0xde8] sm:$0xff] }
 0x1e3   :  { %v628_v1 = vld [vmem:[#allocation5 + $0xea8] sm:$0xff] }
 0x1e4   :  { %3508 = vmatpush1.bf16.msra.mxu1 %v11517_v18 }
 0x1e5   :  { %3518 = vmatprep.subr.bf16.mxu1 %v11526_v20  ;;  %3672 = vmatpush1.bf16.msra.mxu0 %v11519_v22  ;;  %v601_v20 = vld [vmem:[#allocation5 + $0xdd0] sm:$0xff] }
 0x1e6   :  { %3682 = vmatprep.subr.bf16.mxu0 %v11528_v25  ;;  %v605_v22 = vld [vmem:[#allocation5 + $0xdf0] sm:$0xff] }
 0x1e7   :  { %3510 = vmatmul.mubr.bf16.vlgmr.msra.gmra.mrb[4].mxu1 %v13725_v21  ;;  %v11584_v37 = vcombine.high %v601_v20, %v605_v22 }
 0x1e8   :  { %3519 = vmatpush1.bf16.msra.mxu1 %v11525_v28  ;;  %3674 = vmatmul.mubr.bf16.vlgmr.msra.gmra.mrb[4].mxu0 %v13725_v21 }
 0x1e9   :  { %3520 = vmatprep.subr.bf16.mxu1 %v11534_v29  ;;  %3683 = vmatpush1.bf16.msra.mxu0 %v11527_v32  ;;  %v11582_v29 = vcombine.high %v600_v14, %v604_v15  ;;  %v11575_v32 = vcombine.low %v593_v8, %v597_v9  ;;  %v11606_v9 = vcombine.high %v624_v0, %v628_v1 }
 0x1ea   :  { %3684 = vmatprep.subr.bf16.mxu0 %v11536_v35  ;;  %3550 = vmatprep.mubr.bf16.mxu1 %v13730_v31  ;;  %v608_v35 = vld [vmem:[#allocation5 + $0xe08] sm:$0xff] }
 0x1eb   :  { %3714 = vmatprep.mubr.bf16.mxu0 %v13730_v31  ;;  %v11590_v47 = vcombine.high %v608_v35, %v612_v36 }
 0x1ec   :  { %3521 = vmatpush1.bf16.msra.mxu1 %v11533_v40 }
 0x1ed   :  { %3522 = vmatprep.subr.bf16.mxu1 %v11542_v41  ;;  %3685 = vmatpush1.bf16.msra.mxu0 %v11535_v42  ;;  %v609_v42 = vld [vmem:[#allocation5 + $0xe10] sm:$0xff] }
 0x1ee   :  { %3686 = vmatprep.subr.bf16.mxu0 %v11544_v45  ;;  %v11581_v45 = vcombine.low %v600_v14, %v604_v15  ;;  %v11592_v52 = vcombine.high %v609_v42, %v613_v43  ;;  %v11591_v62 = vcombine.low %v609_v42, %v613_v43  ;;  %v648_v42 = vld [vmem:[#allocation5 + $0xf48] sm:$0xff] }
 0x1ef   :  { %v652_v43 = vld [vmem:[#allocation5 + $0xf68] sm:$0xff] }
 0x1f0   :  { %3523 = vmatpush1.bf16.msra.mxu1 %v11541_v48  ;;  %v11583_v48 = vcombine.low %v601_v20, %v605_v22  ;;  %v11605_v20 = vcombine.low %v624_v0, %v628_v1 }
 0x1f1   :  { %3524 = vmatprep.subr.bf16.mxu1 %v11550_v49  ;;  %3687 = vmatpush1.bf16.msra.mxu0 %v11543_v50  ;;  %v616_v50 = vld [vmem:[#allocation5 + $0xe48] sm:$0xff] }
 0x1f2   :  { %3688 = vmatprep.subr.bf16.mxu0 %v11552_v53  ;;  %v11598_v60 = vcombine.high %v616_v50, %v620_v51 }
 0x1f4   :  { %3525 = vmatpush1.bf16.msra.mxu1 %v11549_v56 }
 0x1f5   :  { %3526 = vmatprep.subr.bf16.mxu1 %v11558_v58  ;;  %3689 = vmatpush1.bf16.msra.mxu0 %v11551_v59  ;;  %v11589_v58 = vcombine.low %v608_v35, %v612_v36 }
 0x1f6   :  { %3690 = vmatprep.subr.bf16.mxu0 %v11560_v63 }
 0x1f8   :  { %3527 = vmatpush1.bf16.msra.mxu1 %v11557_v2  ;;  %v11600_v2 = vcombine.high %v617_v54, %v621_v55 }
 0x1f9   :  { %3528 = vmatprep.subr.bf16.mxu1 %v11566_v3  ;;  %3691 = vmatpush1.bf16.msra.mxu0 %v11559_v4  ;;  %v625_v4 = vld [vmem:[#allocation5 + $0xe90] sm:$0xff] }
 0x1fa   :  { %v3306_v13 = vpop.f32.mrb[0].mxu1  ;;  %3692 = vmatprep.subr.bf16.mxu0 %v11568_v7  ;;  %v11597_v7 = vcombine.low %v616_v50, %v620_v51  ;;  %v11608_v14 = vcombine.high %v625_v4, %v629_v5  ;;  %v11630_v51 = vcombine.high %v648_v42, %v652_v43 }
 0x1fb   :  { %v3388_v17 = vpop.f32.mrb[0].mxu0  ;;  %v3308_v18 = vpop.f32.mrb[1].mxu1 }
 0x1fc   :  { %v13755_v23 = vadd.f32 %v3388_v17, %v3306_v13  ;;  %v3390_v24 = vpop.f32.mrb[1].mxu0  ;;  %v3310_v25 = vpop.f32.mrb[2].mxu1  ;;  %3529 = vmatpush1.bf16.msra.mxu1 %v11565_v10  ;;  %v11599_v10 = vcombine.low %v617_v54, %v621_v55  ;;  %v636_v13 = vld [vmem:[#allocation5 + $0xee8] sm:$0xff]  ;;  %v637_v17 = vld [vmem:[#allocation5 + $0xef0] sm:$0xff] }
 0x1fd   :  { %v13757_v27 = vadd.f32 %v3390_v24, %v3308_v18  ;;  %v3311_v28 = vpop.f32.mrb[3].mxu1  ;;  %3530 = vmatprep.subr.bf16.mxu1 %v11574_v11  ;;  %3693 = vmatpush1.bf16.msra.mxu0 %v11567_v12  ;;  %v3392_v33 = vpop.f32.mrb[2].mxu0  ;;  %v632_v12 = vld [vmem:[#allocation5 + $0xec8] sm:$0xff]  ;;  %v11607_v25 = vcombine.low %v625_v4, %v629_v5 }
 0x1fe   :  { %v3889_v34 = vrot.slane %v13755_v23, 4  ;;  %3694 = vmatprep.subr.bf16.mxu0 %v11576_v16  ;;  %v3393_v40 = vpop.f32.mrb[3].mxu0  ;;  %v633_v16 = vld [vmem:[#allocation5 + $0xed0] sm:$0xff]  ;;  %v11614_v24 = vcombine.high %v632_v12, %v636_v13  ;;  %v640_v28 = vld [vmem:[#allocation5 + $0xf08] sm:$0xff] }
 0x1ff   :  { %v3895_v41 = vrot.slane %v13757_v27, 4  ;;  %v641_v33 = vld [vmem:[#allocation5 + $0xf10] sm:$0xff]  ;;  %v11615_v40 = vcombine.low %v633_v16, %v637_v17  ;;  %v656_v54 = vld [vmem:[#allocation5 + $0xf88] sm:$0xff] }
 0x200   :  { %v3890_v44 = vadd.f32 %v13755_v23, %v3889_v34  ;;  %3531 = vmatpush1.bf16.msra.mxu1 %v11573_v26  ;;  %v645_v34 = vld [vmem:[#allocation5 + $0xf30] sm:$0xff]  ;;  %v660_v55 = vld [vmem:[#allocation5 + $0xfa8] sm:$0xff] }
 0x201   :  { %v3896_v46 = vadd.f32 %v13757_v27, %v3895_v41  ;;  %3532 = vmatprep.subr.bf16.mxu1 %v11582_v29  ;;  %3695 = vmatpush1.bf16.msra.mxu0 %v11575_v32  ;;  %v644_v29 = vld [vmem:[#allocation5 + $0xf28] sm:$0xff]  ;;  %v11616_v32 = vcombine.high %v633_v16, %v637_v17  ;;  %v11638_v1 = vcombine.high %v656_v54, %v660_v55  ;;  %v162_v16 = vld [vmem:[#allocation5 + $0x18] sm:$0xff] }
 0x202   :  { %v3891_v49 = vrot.slane %v3890_v44, 2  ;;  %3696 = vmatprep.subr.bf16.mxu0 %v11584_v37  ;;  %v11622_v37 = vcombine.high %v640_v28, %v644_v29  ;;  %v664_v4 = vld [vmem:[#allocation5 + $0xfc8] sm:$0xff]  ;;  %v166_v17 = vld [vmem:[#allocation5 + $0x38] sm:$0xff] }
 0x203   :  { %v3897_v53 = vrot.slane %v3896_v46, 2  ;;  %v668_v5 = vld [vmem:[#allocation5 + $0xfe8] sm:$0xff] }
 0x204   :  { %v3892_v56 = vadd.f32 %v3891_v49, %v3890_v44  ;;  %3533 = vmatpush1.bf16.msra.mxu1 %v11581_v45  ;;  %v11624_v44 = vcombine.high %v641_v33, %v645_v34  ;;  %v11621_v49 = vcombine.low %v640_v28, %v644_v29  ;;  %v170_v29 = vld [vmem:[#allocation5 + $0x58] sm:$0xff] }
 0x205   :  { %v3898_v59 = vadd.f32 %v3897_v53, %v3896_v46  ;;  %3534 = vmatprep.subr.bf16.mxu1 %v11590_v47  ;;  %3697 = vmatpush1.bf16.msra.mxu0 %v11583_v48  ;;  %v649_v46 = vld [vmem:[#allocation5 + $0xf50] sm:$0xff] }
 0x206   :  { %v3893_v63 = vrot.slane %v3892_v56, 1  ;;  %3698 = vmatprep.subr.bf16.mxu0 %v11592_v52  ;;  %v653_v47 = vld [vmem:[#allocation5 + $0xf70] sm:$0xff]  ;;  %v11623_v52 = vcombine.low %v641_v33, %v645_v34  ;;  %v178_v34 = vld [vmem:[#allocation5 + $0x98] sm:$0xff] }
 0x207   :  { %v3899_v3 = vrot.slane %v3898_v59, 1 }
 0x208   :  { %v3894_v6 = vadd.f32 %v3893_v63, %v3892_v56  ;;  %3535 = vmatpush1.bf16.msra.mxu1 %v11589_v58  ;;  %v11632_v56 = vcombine.high %v649_v46, %v653_v47  ;;  %v11629_v63 = vcombine.low %v648_v42, %v652_v43 }
 0x209   :  { %v3900_v8 = vadd.f32 %v3899_v3, %v3898_v59  ;;  %3536 = vmatprep.subr.bf16.mxu1 %v11598_v60  ;;  %3699 = vmatpush1.bf16.msra.mxu0 %v11591_v62  ;;  %v657_v59 = vld [vmem:[#allocation5 + $0xf90] sm:$0xff] }
 0x20a   :  { %v3938_v11 = vmul.f32 0.125, %v3894_v6  ;;  %3700 = vmatprep.subr.bf16.mxu0 %v11600_v2  ;;  %v661_v60 = vld [vmem:[#allocation5 + $0xfb0] sm:$0xff]  ;;  %v11631_v2 = vcombine.low %v649_v46, %v653_v47  ;;  %v194_v46 = vld [vmem:[#allocation5 + $0x118] sm:$0xff] }
 0x20b   :  { %v3939_v15 = vmul.f32 0.125, %v3900_v8  ;;  %v11640_v6 = vcombine.high %v657_v59, %v661_v60  ;;  %v665_v8 = vld [vmem:[#allocation5 + $0xfd0] sm:$0xff]  ;;  %v198_v47 = vld [vmem:[#allocation5 + $0x138] sm:$0xff] }
 0x20c   :  { %v13764_v18 = vsub.f32 %v13755_v23, %v3938_v11  ;;  %3537 = vmatpush1.bf16.msra.mxu1 %v11597_v7  ;;  %v11637_v11 = vcombine.low %v656_v54, %v660_v55  ;;  %v214_v54 = vld [vmem:[#allocation5 + $0x1b8] sm:$0xff] }
 0x20d   :  { %v13767_v22 = vsub.f32 %v13757_v27, %v3939_v15  ;;  %3538 = vmatprep.subr.bf16.mxu1 %v11606_v9  ;;  %3701 = vmatpush1.bf16.msra.mxu0 %v11599_v10  ;;  %v11613_v27 = vcombine.low %v632_v12, %v636_v13  ;;  %v669_v9 = vld [vmem:[#allocation5 + $0xff0] sm:$0xff]  ;;  %v11646_v13 = vcombine.high %v664_v4, %v668_v5 }
 0x20e   :  { %v3954_v26 = vmul.f32 %v13764_v18, %v13764_v18  ;;  %3702 = vmatprep.subr.bf16.mxu0 %v11608_v14  ;;  %v11639_v14 = vcombine.low %v657_v59, %v661_v60  ;;  %v11647_v28 = vcombine.low %v665_v8, %v669_v9  ;;  %v222_v59 = vld [vmem:[#allocation5 + $0x1f8] sm:$0xff] }
 0x20f   :  { %v3955_v23 = vmul.f32 %v13767_v22, %v13767_v22 }
 0x210   :  { %v3962_v35 = vrot.slane %v3954_v26, 4  ;;  %3539 = vmatpush1.bf16.msra.mxu1 %v11605_v20  ;;  %v11648_v20 = vcombine.high %v665_v8, %v669_v9  ;;  %v246_v8 = vld [vmem:[#allocation5 + $0x2b8] sm:$0xff] }
 0x211   :  { %v3968_v36 = vrot.slane %v3955_v23, 4  ;;  %3540 = vmatprep.subr.bf16.mxu1 %v11614_v24  ;;  %3703 = vmatpush1.bf16.msra.mxu0 %v11607_v25  ;;  %v11645_v25 = vcombine.low %v664_v4, %v668_v5  ;;  %v238_v4 = vld [vmem:[#allocation5 + $0x278] sm:$0xff] }
 0x212   :  { %v3963_v41 = vadd.f32 %v3962_v35, %v3954_v26  ;;  %3704 = vmatprep.subr.bf16.mxu0 %v11616_v32  ;;  %v11146_v26 = vcombine.high %v162_v16, %v166_v17  ;;  %v174_v32 = vld [vmem:[#allocation5 + $0x78] sm:$0xff] }
 0x213   :  { %v3969_v45 = vadd.f32 %v3968_v36, %v3955_v23  ;;  %v11145_v23 = vcombine.low %v162_v16, %v166_v17  ;;  %v11154_v33 = vcombine.high %v170_v29, %v174_v32  ;;  %v182_v35 = vld [vmem:[#allocation5 + $0xb8] sm:$0xff] }
 0x214   :  { %v3964_v48 = vrot.slane %v3963_v41, 2  ;;  %3541 = vmatpush1.bf16.msra.mxu1 %v11613_v27  ;;  %v11153_v27 = vcombine.low %v170_v29, %v174_v32  ;;  %v11162_v36 = vcombine.high %v178_v34, %v182_v35  ;;  %v262_v16 = vld [vmem:[#allocation5 + $0x338] sm:$0xff] }
 0x215   :  { %v3970_v50 = vrot.slane %v3969_v45, 2  ;;  %3542 = vmatprep.subr.bf16.mxu1 %v11622_v37  ;;  %3705 = vmatpush1.bf16.msra.mxu0 %v11615_v40  ;;  %v186_v40 = vld [vmem:[#allocation5 + $0xd8] sm:$0xff] }
 0x216   :  { %v3965_v53 = vadd.f32 %v3964_v48, %v3963_v41  ;;  %3706 = vmatprep.subr.bf16.mxu0 %v11624_v44  ;;  %v190_v41 = vld [vmem:[#allocation5 + $0xf8] sm:$0xff]  ;;  %v11161_v44 = vcombine.low %v178_v34, %v182_v35 }
 0x217   :  { %v3971_v58 = vadd.f32 %v3970_v50, %v3969_v45  ;;  %v11170_v45 = vcombine.high %v186_v40, %v190_v41  ;;  %v11169_v48 = vcombine.low %v186_v40, %v190_v41  ;;  %v206_v50 = vld [vmem:[#allocation5 + $0x178] sm:$0xff] }
 0x218   :  { %v3966_v62 = vrot.slane %v3965_v53, 1  ;;  %3543 = vmatpush1.bf16.msra.mxu1 %v11621_v49  ;;  %v11178_v49 = vcombine.high %v194_v46, %v198_v47  ;;  %v274_v29 = vld [vmem:[#allocation5 + $0x398] sm:$0xff] }
 0x219   :  { %v3972_v0 = vrot.slane %v3971_v58, 1  ;;  %3544 = vmatprep.subr.bf16.mxu1 %v11630_v51  ;;  %3707 = vmatpush1.bf16.msra.mxu0 %v11623_v52  ;;  %v11177_v51 = vcombine.low %v194_v46, %v198_v47  ;;  %v278_v32 = vld [vmem:[#allocation5 + $0x3b8] sm:$0xff] }
 0x21a   :  { %v3967_v3 = vadd.f32 %v3966_v62, %v3965_v53  ;;  %3708 = vmatprep.subr.bf16.mxu0 %v11632_v56  ;;  %v210_v53 = vld [vmem:[#allocation5 + $0x198] sm:$0xff] }
 0x21b   :  { %v3973_v7 = vadd.f32 %v3972_v0, %v3971_v58  ;;  %v11194_v56 = vcombine.high %v210_v53, %v214_v54  ;;  %v218_v58 = vld [vmem:[#allocation5 + $0x1d8] sm:$0xff]  ;;  %v11193_v60 = vcombine.low %v210_v53, %v214_v54 }
 0x21c   :  { %v4010_v10 = vmul.f32 0.125, %v3967_v3  ;;  %3545 = vmatpush1.bf16.msra.mxu1 %v11629_v63  ;;  %v11202_v62 = vcombine.high %v218_v58, %v222_v59  ;;  %v226_v63 = vld [vmem:[#allocation5 + $0x218] sm:$0xff] }
 0x21d   :  { %v4011_v12 = vmul.f32 0.125, %v3973_v7  ;;  %3546 = vmatprep.subr.bf16.mxu1 %v11638_v1  ;;  %3709 = vmatpush1.bf16.msra.mxu0 %v11631_v2  ;;  %v230_v0 = vld [vmem:[#allocation5 + $0x238] sm:$0xff]  ;;  %v11201_v1 = vcombine.low %v218_v58, %v222_v59 }
 0x21e   :  { %v4018_v15 = vadd.f32 1e-05, %v4010_v10  ;;  %3710 = vmatprep.subr.bf16.mxu0 %v11640_v6  ;;  %v11210_v2 = vcombine.high %v226_v63, %v230_v0  ;;  %v234_v3 = vld [vmem:[#allocation5 + $0x258] sm:$0xff]  ;;  %v11209_v5 = vcombine.low %v226_v63, %v230_v0 }
 0x21f   :  { %v4019_v24 = vadd.f32 1e-05, %v4011_v12  ;;  %v11218_v6 = vcombine.high %v234_v3, %v238_v4  ;;  %v242_v7 = vld [vmem:[#allocation5 + $0x298] sm:$0xff]  ;;  %v11217_v9 = vcombine.low %v234_v3, %v238_v4 }
 0x220   :  { %13274 = vrsqrt.f32 %v4018_v15  ;;  %3547 = vmatpush1.bf16.msra.mxu1 %v11637_v11  ;;  %v11226_v10 = vcombine.high %v242_v7, %v246_v8  ;;  %v250_v11 = vld [vmem:[#allocation5 + $0x2d8] sm:$0xff] }
 0x221   :  { %13276 = vrsqrt.f32 %v4019_v24  ;;  %3548 = vmatprep.subr.bf16.mxu1 %v11646_v13  ;;  %3711 = vmatpush1.bf16.msra.mxu0 %v11639_v14  ;;  %v254_v12 = vld [vmem:[#allocation5 + $0x2f8] sm:$0xff]  ;;  %v11225_v13 = vcombine.low %v242_v7, %v246_v8 }
 0x222   :  { %3712 = vmatprep.subr.bf16.mxu0 %v11648_v20  ;;  %v11234_v14 = vcombine.high %v250_v11, %v254_v12  ;;  %v258_v15 = vld [vmem:[#allocation5 + $0x318] sm:$0xff]  ;;  %v11233_v17 = vcombine.low %v250_v11, %v254_v12 }
 0x223   :  { %v11242_v20 = vcombine.high %v258_v15, %v262_v16  ;;  %v266_v24 = vld [vmem:[#allocation5 + $0x358] sm:$0xff] }
 0x224   :  { %3549 = vmatpush1.bf16.msra.mxu1 %v11645_v25  ;;  %v270_v25 = vld [vmem:[#allocation5 + $0x378] sm:$0xff] }
 0x225   :  { %3723 = vmatprep.subr.bf16.mxu1 %v11146_v26  ;;  %3713 = vmatpush1.bf16.msra.mxu0 %v11647_v28  ;;  %v11241_v26 = vcombine.low %v258_v15, %v262_v16  ;;  %v11250_v28 = vcombine.high %v266_v24, %v270_v25  ;;  %v282_v34 = vld [vmem:[#allocation5 + $0x3d8] sm:$0xff] }
 0x226   :  { %v286_v35 = vld [vmem:[#allocation5 + $0x3f8] sm:$0xff] }
 0x227   :  { %3551 = vmatmul.mubr.bf16.vlgmr.msra.gmra.mrb[4].mxu1 %v13737_v39  ;;  %v290_v40 = vld [vmem:[#allocation5 + $0x418] sm:$0xff] }
 0x228   :  { %3724 = vmatpush1.bf16.msra.mxu1 %v11145_v23  ;;  %3715 = vmatmul.mubr.bf16.vlgmr.msra.gmra.mrb[4].mxu0 %v13737_v39  ;;  %v11249_v23 = vcombine.low %v266_v24, %v270_v25  ;;  %v294_v41 = vld [vmem:[#allocation5 + $0x438] sm:$0xff] }
 0x229   :  { %3725 = vmatprep.subr.bf16.mxu1 %v11154_v33  ;;  %3755 = vmatprep.mubr.bf16.mxu1 %v13717_v57  ;;  %v202_v57 = vld [vmem:[#allocation5 + $0x158] sm:$0xff]  ;;  %v11258_v33 = vcombine.high %v274_v29, %v278_v32 }
 0x22a   :  { %v13776_v37 = vpop.eup %13274  ;;  %v11186_v52 = vcombine.high %v202_v57, %v206_v50  ;;  %v11185_v55 = vcombine.low %v202_v57, %v206_v50  ;;  %v298_v46 = vld [vmem:[#allocation5 + $0x458] sm:$0xff] }
 0x22b   :  { %v13778_v42 = vpop.eup %13276  ;;  %v302_v47 = vld [vmem:[#allocation5 + $0x478] sm:$0xff] }
 0x22c   :  { %v4042_v43 = vcombine.low %v13776_v37, %v13778_v42  ;;  %3726 = vmatpush1.bf16.msra.mxu1 %v11153_v27  ;;  %v11257_v27 = vcombine.low %v274_v29, %v278_v32  ;;  %v306_v57 = vld [vmem:[#allocation5 + $0x498] sm:$0xff]  ;;  %v4231_v37 = vld [vmem:[#allocation10 + $0x40] sm:$0xff] }
 0x22d   :  { %3727 = vmatprep.subr.bf16.mxu1 %v11162_v36  ;;  %v11266_v36 = vcombine.high %v282_v34, %v286_v35  ;;  %v310_v50 = vld [vmem:[#allocation5 + $0x4b8] sm:$0xff]  ;;  %v4235_v42 = vld [vmem:[#allocation10 + $0x60] sm:$0xff] }
 0x22e   :  { %v314_v53 = vld [vmem:[#allocation5 + $0x4d8] sm:$0xff] }
 0x22f   :  { %v318_v54 = vld [vmem:[#allocation5 + $0x4f8] sm:$0xff] }
 0x230   :  { %3728 = vmatpush1.bf16.msra.mxu1 %v11161_v44  ;;  %v11265_v44 = vcombine.low %v282_v34, %v286_v35  ;;  %v322_v58 = vld [vmem:[#allocation5 + $0x518] sm:$0xff] }
 0x231   :  { %3729 = vmatprep.subr.bf16.mxu1 %v11170_v45  ;;  %v11274_v45 = vcombine.high %v290_v40, %v294_v41  ;;  %v326_v59 = vld [vmem:[#allocation5 + $0x538] sm:$0xff] }
 0x232   :  { %v330_v63 = vld [vmem:[#allocation5 + $0x558] sm:$0xff]  ;;  %v11305_v0 = vcombine.low %v322_v58, %v326_v59 }
 0x234   :  { %3730 = vmatpush1.bf16.msra.mxu1 %v11169_v48  ;;  %v11273_v48 = vcombine.low %v290_v40, %v294_v41 }
 0x235   :  { %3731 = vmatprep.subr.bf16.mxu1 %v11178_v49  ;;  %v11282_v49 = vcombine.high %v298_v46, %v302_v47 }
 0x238   :  { %3732 = vmatpush1.bf16.msra.mxu1 %v11177_v51  ;;  %v11281_v51 = vcombine.low %v298_v46, %v302_v47 }
 0x239   :  { %3733 = vmatprep.subr.bf16.mxu1 %v11186_v52  ;;  %v11290_v52 = vcombine.high %v306_v57, %v310_v50 }
 0x23c   :  { %3734 = vmatpush1.bf16.msra.mxu1 %v11185_v55  ;;  %v11289_v55 = vcombine.low %v306_v57, %v310_v50 }
 0x23d   :  { %3735 = vmatprep.subr.bf16.mxu1 %v11194_v56  ;;  %v11298_v56 = vcombine.high %v314_v53, %v318_v54 }
 0x240   :  { %3736 = vmatpush1.bf16.msra.mxu1 %v11193_v60  ;;  %v11297_v60 = vcombine.low %v314_v53, %v318_v54 }
 0x241   :  { %3737 = vmatprep.subr.bf16.mxu1 %v11202_v62  ;;  %v11306_v62 = vcombine.high %v322_v58, %v326_v59 }
 0x244   :  { %3738 = vmatpush1.bf16.msra.mxu1 %v11201_v1  ;;  %v338_v1 = vld [vmem:[#allocation5 + $0x598] sm:$0xff] }
 0x245   :  { %3739 = vmatprep.subr.bf16.mxu1 %v11210_v2  ;;  %v342_v2 = vld [vmem:[#allocation5 + $0x5b8] sm:$0xff] }
 0x246   :  { %v11322_v4 = vcombine.high %v338_v1, %v342_v2  ;;  %v11321_v7 = vcombine.low %v338_v1, %v342_v2 }
 0x248   :  { %3740 = vmatpush1.bf16.msra.mxu1 %v11209_v5  ;;  %v346_v5 = vld [vmem:[#allocation5 + $0x5d8] sm:$0xff] }
 0x249   :  { %3741 = vmatprep.subr.bf16.mxu1 %v11218_v6  ;;  %v350_v6 = vld [vmem:[#allocation5 + $0x5f8] sm:$0xff] }
 0x24a   :  { %v11330_v8 = vcombine.high %v346_v5, %v350_v6  ;;  %v11329_v11 = vcombine.low %v346_v5, %v350_v6 }
 0x24c   :  { %3742 = vmatpush1.bf16.msra.mxu1 %v11217_v9  ;;  %v354_v9 = vld [vmem:[#allocation5 + $0x618] sm:$0xff] }
 0x24d   :  { %3743 = vmatprep.subr.bf16.mxu1 %v11226_v10  ;;  %v358_v10 = vld [vmem:[#allocation5 + $0x638] sm:$0xff] }
 0x24e   :  { %v11338_v12 = vcombine.high %v354_v9, %v358_v10  ;;  %v11337_v15 = vcombine.low %v354_v9, %v358_v10  ;;  %v466_v9 = vld [vmem:[#allocation5 + $0x998] sm:$0xff] }
 0x24f   :  { %v470_v10 = vld [vmem:[#allocation5 + $0x9b8] sm:$0xff] }
 0x250   :  { %3744 = vmatpush1.bf16.msra.mxu1 %v11225_v13  ;;  %v362_v13 = vld [vmem:[#allocation5 + $0x658] sm:$0xff] }
 0x251   :  { %3745 = vmatprep.subr.bf16.mxu1 %v11234_v14  ;;  %v366_v14 = vld [vmem:[#allocation5 + $0x678] sm:$0xff] }
 0x252   :  { %v11346_v16 = vcombine.high %v362_v13, %v366_v14  ;;  %v11345_v24 = vcombine.low %v362_v13, %v366_v14  ;;  %v474_v13 = vld [vmem:[#allocation5 + $0x9d8] sm:$0xff] }
 0x253   :  { %v478_v14 = vld [vmem:[#allocation5 + $0x9f8] sm:$0xff] }
 0x254   :  { %3746 = vmatpush1.bf16.msra.mxu1 %v11233_v17  ;;  %v370_v17 = vld [vmem:[#allocation5 + $0x698] sm:$0xff] }
 0x255   :  { %3747 = vmatprep.subr.bf16.mxu1 %v11242_v20  ;;  %v374_v20 = vld [vmem:[#allocation5 + $0x6b8] sm:$0xff] }
 0x256   :  { %v11354_v25 = vcombine.high %v370_v17, %v374_v20  ;;  %v11353_v29 = vcombine.low %v370_v17, %v374_v20  ;;  %v482_v17 = vld [vmem:[#allocation5 + $0xa18] sm:$0xff] }
 0x257   :  { %v486_v20 = vld [vmem:[#allocation5 + $0xa38] sm:$0xff] }
 0x258   :  { %3748 = vmatpush1.bf16.msra.mxu1 %v11241_v26  ;;  %v378_v26 = vld [vmem:[#allocation5 + $0x6d8] sm:$0xff] }
 0x259   :  { %3749 = vmatprep.subr.bf16.mxu1 %v11250_v28  ;;  %v382_v28 = vld [vmem:[#allocation5 + $0x6f8] sm:$0xff] }
 0x25a   :  { %v11362_v32 = vcombine.high %v378_v26, %v382_v28  ;;  %v11361_v34 = vcombine.low %v378_v26, %v382_v28  ;;  %v490_v26 = vld [vmem:[#allocation5 + $0xa58] sm:$0xff] }
 0x25b   :  { %v494_v28 = vld [vmem:[#allocation5 + $0xa78] sm:$0xff] }
 0x25c   :  { %3750 = vmatpush1.bf16.msra.mxu1 %v11249_v23  ;;  %v386_v23 = vld [vmem:[#allocation5 + $0x718] sm:$0xff] }
 0x25d   :  { %3751 = vmatprep.subr.bf16.mxu1 %v11258_v33  ;;  %v390_v33 = vld [vmem:[#allocation5 + $0x738] sm:$0xff] }
 0x25e   :  { %v11370_v35 = vcombine.high %v386_v23, %v390_v33  ;;  %v11369_v40 = vcombine.low %v386_v23, %v390_v33  ;;  %v498_v23 = vld [vmem:[#allocation5 + $0xa98] sm:$0xff] }
 0x25f   :  { %v502_v33 = vld [vmem:[#allocation5 + $0xab8] sm:$0xff] }
 0x260   :  { %3752 = vmatpush1.bf16.msra.mxu1 %v11257_v27  ;;  %v394_v27 = vld [vmem:[#allocation5 + $0x758] sm:$0xff] }
 0x261   :  { %3753 = vmatprep.subr.bf16.mxu1 %v11266_v36  ;;  %v398_v36 = vld [vmem:[#allocation5 + $0x778] sm:$0xff] }
 0x262   :  { %v11378_v41 = vcombine.high %v394_v27, %v398_v36  ;;  %v11377_v46 = vcombine.low %v394_v27, %v398_v36  ;;  %v506_v27 = vld [vmem:[#allocation5 + $0xad8] sm:$0xff] }
 0x263   :  { %v510_v36 = vld [vmem:[#allocation5 + $0xaf8] sm:$0xff] }
 0x264   :  { %3754 = vmatpush1.bf16.msra.mxu1 %v11265_v44  ;;  %v402_v44 = vld [vmem:[#allocation5 + $0x798] sm:$0xff] }
 0x265   :  { %3764 = vmatprep.subr.bf16.mxu1 %v11274_v45  ;;  %v406_v45 = vld [vmem:[#allocation5 + $0x7b8] sm:$0xff] }
 0x266   :  { %v11386_v47 = vcombine.high %v402_v44, %v406_v45  ;;  %v11385_v57 = vcombine.low %v402_v44, %v406_v45  ;;  %v514_v44 = vld [vmem:[#allocation5 + $0xb18] sm:$0xff] }
 0x267   :  { %3756 = vmatmul.mubr.bf16.vlgmr.msra.gmra.mrb[8].mxu1 %v13723_v19  ;;  %v334_v19 = vld [vmem:[#allocation5 + $0x578] sm:$0xff] }
 0x268   :  { %3765 = vmatpush1.bf16.msra.mxu1 %v11273_v48  ;;  %3796 = vmatprep.mubr.bf16.mxu1 %v13727_v30  ;;  %v11314_v30 = vcombine.high %v330_v63, %v334_v19  ;;  %v11313_v3 = vcombine.low %v330_v63, %v334_v19  ;;  %v410_v48 = vld [vmem:[#allocation5 + $0x7d8] sm:$0xff] }
 0x269   :  { %3766 = vmatprep.subr.bf16.mxu1 %v11282_v49  ;;  %v414_v49 = vld [vmem:[#allocation5 + $0x7f8] sm:$0xff] }
 0x26a   :  { %v11394_v50 = vcombine.high %v410_v48, %v414_v49  ;;  %v11393_v53 = vcombine.low %v410_v48, %v414_v49  ;;  %v518_v45 = vld [vmem:[#allocation5 + $0xb38] sm:$0xff] }
 0x26b   :  { %v522_v48 = vld [vmem:[#allocation5 + $0xb58] sm:$0xff] }
 0x26c   :  { %3767 = vmatpush1.bf16.msra.mxu1 %v11281_v51  ;;  %v418_v51 = vld [vmem:[#allocation5 + $0x818] sm:$0xff] }
 0x26d   :  { %3768 = vmatprep.subr.bf16.mxu1 %v11290_v52  ;;  %v422_v52 = vld [vmem:[#allocation5 + $0x838] sm:$0xff] }
 0x26e   :  { %v11402_v54 = vcombine.high %v418_v51, %v422_v52  ;;  %v11401_v58 = vcombine.low %v418_v51, %v422_v52  ;;  %v526_v49 = vld [vmem:[#allocation5 + $0xb78] sm:$0xff] }
 0x26f   :  { %v530_v51 = vld [vmem:[#allocation5 + $0xb98] sm:$0xff] }
 0x270   :  { %3769 = vmatpush1.bf16.msra.mxu1 %v11289_v55  ;;  %v426_v55 = vld [vmem:[#allocation5 + $0x858] sm:$0xff] }
 0x271   :  { %3770 = vmatprep.subr.bf16.mxu1 %v11298_v56  ;;  %v430_v56 = vld [vmem:[#allocation5 + $0x878] sm:$0xff] }
 0x272   :  { %v11410_v59 = vcombine.high %v426_v55, %v430_v56  ;;  %v11409_v63 = vcombine.low %v426_v55, %v430_v56  ;;  %v534_v52 = vld [vmem:[#allocation5 + $0xbb8] sm:$0xff] }
 0x273   :  { %v538_v55 = vld [vmem:[#allocation5 + $0xbd8] sm:$0xff] }
 0x274   :  { %3771 = vmatpush1.bf16.msra.mxu1 %v11297_v60  ;;  %v434_v60 = vld [vmem:[#allocation5 + $0x898] sm:$0xff] }
 0x275   :  { %3772 = vmatprep.subr.bf16.mxu1 %v11306_v62  ;;  %v438_v62 = vld [vmem:[#allocation5 + $0x8b8] sm:$0xff] }
 0x276   :  { %v11418_v19 = vcombine.high %v434_v60, %v438_v62  ;;  %v11417_v1 = vcombine.low %v434_v60, %v438_v62  ;;  %v542_v56 = vld [vmem:[#allocation5 + $0xbf8] sm:$0xff] }
 0x277   :  { %v546_v60 = vld [vmem:[#allocation5 + $0xc18] sm:$0xff] }
 0x278   :  { %3773 = vmatpush1.bf16.msra.mxu1 %v11305_v0  ;;  %v442_v0 = vld [vmem:[#allocation5 + $0x8d8] sm:$0xff] }
 0x279   :  { %3774 = vmatprep.subr.bf16.mxu1 %v11314_v30  ;;  %v446_v30 = vld [vmem:[#allocation5 + $0x8f8] sm:$0xff] }
 0x27a   :  { %v11426_v2 = vcombine.high %v442_v0, %v446_v30  ;;  %v11425_v5 = vcombine.low %v442_v0, %v446_v30  ;;  %v550_v62 = vld [vmem:[#allocation5 + $0xc38] sm:$0xff] }
 0x27b   :  { %v554_v0 = vld [vmem:[#allocation5 + $0xc58] sm:$0xff] }
 0x27c   :  { %3775 = vmatpush1.bf16.msra.mxu1 %v11313_v3  ;;  %v450_v3 = vld [vmem:[#allocation5 + $0x918] sm:$0xff] }
 0x27d   :  { %3776 = vmatprep.subr.bf16.mxu1 %v11322_v4  ;;  %v454_v4 = vld [vmem:[#allocation5 + $0x938] sm:$0xff] }
 0x27e   :  { %v11434_v6 = vcombine.high %v450_v3, %v454_v4  ;;  %v558_v30 = vld [vmem:[#allocation5 + $0xc78] sm:$0xff] }
 0x280   :  { %3777 = vmatpush1.bf16.msra.mxu1 %v11321_v7  ;;  %v458_v7 = vld [vmem:[#allocation5 + $0x958] sm:$0xff] }
 0x281   :  { %3778 = vmatprep.subr.bf16.mxu1 %v11330_v8  ;;  %v11433_v8 = vcombine.low %v450_v3, %v454_v4  ;;  %v562_v3 = vld [vmem:[#allocation5 + $0xc98] sm:$0xff] }
 0x282   :  { %v566_v4 = vld [vmem:[#allocation5 + $0xcb8] sm:$0xff] }
 0x284   :  { %3779 = vmatpush1.bf16.msra.mxu1 %v11329_v11 }
 0x285   :  { %3780 = vmatprep.subr.bf16.mxu1 %v11338_v12  ;;  %v11450_v12 = vcombine.high %v466_v9, %v470_v10 }
 0x288   :  { %3781 = vmatpush1.bf16.msra.mxu1 %v11337_v15  ;;  %v11449_v15 = vcombine.low %v466_v9, %v470_v10  ;;  %v578_v9 = vld [vmem:[#allocation5 + $0xd18] sm:$0xff] }
 0x289   :  { %3782 = vmatprep.subr.bf16.mxu1 %v11346_v16  ;;  %v11458_v16 = vcombine.high %v474_v13, %v478_v14  ;;  %v582_v10 = vld [vmem:[#allocation5 + $0xd38] sm:$0xff] }
 0x28c   :  { %3783 = vmatpush1.bf16.msra.mxu1 %v11345_v24  ;;  %v11457_v24 = vcombine.low %v474_v13, %v478_v14  ;;  %v586_v13 = vld [vmem:[#allocation5 + $0xd58] sm:$0xff]  ;;  %v11561_v14 = vcombine.low %v578_v9, %v582_v10 }
 0x28d   :  { %3784 = vmatprep.subr.bf16.mxu1 %v11354_v25  ;;  %v11466_v25 = vcombine.high %v482_v17, %v486_v20 }
 0x290   :  { %3785 = vmatpush1.bf16.msra.mxu1 %v11353_v29  ;;  %v11465_v29 = vcombine.low %v482_v17, %v486_v20 }
 0x291   :  { %3786 = vmatprep.subr.bf16.mxu1 %v11362_v32  ;;  %v11474_v32 = vcombine.high %v490_v26, %v494_v28 }
 0x294   :  { %3787 = vmatpush1.bf16.msra.mxu1 %v11361_v34  ;;  %v11473_v34 = vcombine.low %v490_v26, %v494_v28  ;;  %v606_v26 = vld [vmem:[#allocation5 + $0xdf8] sm:$0xff] }
 0x295   :  { %3788 = vmatprep.subr.bf16.mxu1 %v11370_v35  ;;  %v11482_v35 = vcombine.high %v498_v23, %v502_v33 }
 0x298   :  { %3789 = vmatpush1.bf16.msra.mxu1 %v11369_v40  ;;  %v11481_v40 = vcombine.low %v498_v23, %v502_v33 }
 0x299   :  { %3790 = vmatprep.subr.bf16.mxu1 %v11378_v41  ;;  %v11490_v41 = vcombine.high %v506_v27, %v510_v36 }
 0x29c   :  { %3791 = vmatpush1.bf16.msra.mxu1 %v11377_v46  ;;  %v11489_v46 = vcombine.low %v506_v27, %v510_v36 }
 0x29d   :  { %3792 = vmatprep.subr.bf16.mxu1 %v11386_v47  ;;  %v11498_v47 = vcombine.high %v514_v44, %v518_v45 }
 0x2a0   :  { %3793 = vmatpush1.bf16.msra.mxu1 %v11385_v57  ;;  %v11497_v57 = vcombine.low %v514_v44, %v518_v45  ;;  %v610_v45 = vld [vmem:[#allocation5 + $0xe18] sm:$0xff] }
 0x2a1   :  { %3794 = vmatprep.subr.bf16.mxu1 %v11394_v50  ;;  %v11506_v50 = vcombine.high %v522_v48, %v526_v49 }
 0x2a4   :  { %3795 = vmatpush1.bf16.msra.mxu1 %v11393_v53  ;;  %v11505_v53 = vcombine.low %v522_v48, %v526_v49 }
 0x2a5   :  { %3805 = vmatprep.subr.bf16.mxu1 %v11402_v54  ;;  %v11514_v54 = vcombine.high %v530_v51, %v534_v52 }
 0x2a7   :  { %3797 = vmatmul.mubr.bf16.vlgmr.msra.gmra.mrb[8].mxu1 %v13735_v38  ;;  %v462_v38 = vld [vmem:[#allocation5 + $0x978] sm:$0xff] }
 0x2a8   :  { %3806 = vmatpush1.bf16.msra.mxu1 %v11401_v58  ;;  %3837 = vmatprep.mubr.bf16.mxu1 %v13719_v61  ;;  %v11442_v61 = vcombine.high %v458_v7, %v462_v38  ;;  %v11441_v11 = vcombine.low %v458_v7, %v462_v38  ;;  %v11513_v58 = vcombine.low %v530_v51, %v534_v52  ;;  %v570_v7 = vld [vmem:[#allocation5 + $0xcd8] sm:$0xff] }
 0x2a9   :  { %3807 = vmatprep.subr.bf16.mxu1 %v11410_v59  ;;  %v11522_v59 = vcombine.high %v538_v55, %v542_v56  ;;  %v574_v38 = vld [vmem:[#allocation5 + $0xcf8] sm:$0xff] }
 0x2ac   :  { %3808 = vmatpush1.bf16.msra.mxu1 %v11409_v63  ;;  %v11521_v63 = vcombine.low %v538_v55, %v542_v56 }
 0x2ad   :  { %3809 = vmatprep.subr.bf16.mxu1 %v11418_v19  ;;  %v11530_v19 = vcombine.high %v546_v60, %v550_v62 }
 0x2b0   :  { %3810 = vmatpush1.bf16.msra.mxu1 %v11417_v1  ;;  %v11529_v1 = vcombine.low %v546_v60, %v550_v62 }
 0x2b1   :  { %3811 = vmatprep.subr.bf16.mxu1 %v11426_v2  ;;  %v11538_v2 = vcombine.high %v554_v0, %v558_v30 }
 0x2b4   :  { %3812 = vmatpush1.bf16.msra.mxu1 %v11425_v5  ;;  %v11537_v5 = vcombine.low %v554_v0, %v558_v30 }
 0x2b5   :  { %3813 = vmatprep.subr.bf16.mxu1 %v11434_v6  ;;  %v11546_v6 = vcombine.high %v562_v3, %v566_v4 }
 0x2b8   :  { %3814 = vmatpush1.bf16.msra.mxu1 %v11433_v8  ;;  %v11545_v8 = vcombine.low %v562_v3, %v566_v4 }
 0x2b9   :  { %3815 = vmatprep.subr.bf16.mxu1 %v11442_v61  ;;  %v11554_v61 = vcombine.high %v570_v7, %v574_v38 }
 0x2bc   :  { %3816 = vmatpush1.bf16.msra.mxu1 %v11441_v11  ;;  %v11553_v11 = vcombine.low %v570_v7, %v574_v38 }
 0x2bd   :  { %3817 = vmatprep.subr.bf16.mxu1 %v11450_v12  ;;  %v11562_v12 = vcombine.high %v578_v9, %v582_v10 }
 0x2c0   :  { %3818 = vmatpush1.bf16.msra.mxu1 %v11449_v15  ;;  %v594_v15 = vld [vmem:[#allocation5 + $0xd98] sm:$0xff] }
 0x2c1   :  { %3819 = vmatprep.subr.bf16.mxu1 %v11458_v16  ;;  %v598_v16 = vld [vmem:[#allocation5 + $0xdb8] sm:$0xff] }
 0x2c2   :  { %v11578_v20 = vcombine.high %v594_v15, %v598_v16 }
 0x2c4   :  { %3820 = vmatpush1.bf16.msra.mxu1 %v11457_v24 }
 0x2c5   :  { %3821 = vmatprep.subr.bf16.mxu1 %v11466_v25  ;;  %v602_v25 = vld [vmem:[#allocation5 + $0xdd8] sm:$0xff] }
 0x2c8   :  { %3822 = vmatpush1.bf16.msra.mxu1 %v11465_v29 }
 0x2c9   :  { %3823 = vmatprep.subr.bf16.mxu1 %v11474_v32 }
 0x2cc   :  { %3824 = vmatpush1.bf16.msra.mxu1 %v11473_v34  ;;  %v11577_v34 = vcombine.low %v594_v15, %v598_v16 }
 0x2cd   :  { %3825 = vmatprep.subr.bf16.mxu1 %v11482_v35 }
 0x2d0   :  { %3826 = vmatpush1.bf16.msra.mxu1 %v11481_v40  ;;  %v11586_v40 = vcombine.high %v602_v25, %v606_v26 }
 0x2d1   :  { %3827 = vmatprep.subr.bf16.mxu1 %v11490_v41 }
 0x2d4   :  { %3828 = vmatpush1.bf16.msra.mxu1 %v11489_v46  ;;  %v614_v46 = vld [vmem:[#allocation5 + $0xe38] sm:$0xff] }
 0x2d5   :  { %3829 = vmatprep.subr.bf16.mxu1 %v11498_v47  ;;  %v11594_v51 = vcombine.high %v610_v45, %v614_v46 }
 0x2d8   :  { %3830 = vmatpush1.bf16.msra.mxu1 %v11497_v57  ;;  %v11585_v57 = vcombine.low %v602_v25, %v606_v26 }
 0x2d9   :  { %3831 = vmatprep.subr.bf16.mxu1 %v11506_v50 }
 0x2dc   :  { %3832 = vmatpush1.bf16.msra.mxu1 %v11505_v53  ;;  %v618_v53 = vld [vmem:[#allocation5 + $0xe58] sm:$0xff] }
 0x2dd   :  { %3833 = vmatprep.subr.bf16.mxu1 %v11514_v54  ;;  %v622_v54 = vld [vmem:[#allocation5 + $0xe78] sm:$0xff] }
 0x2de   :  { %v11602_v60 = vcombine.high %v618_v53, %v622_v54 }
 0x2e0   :  { %3834 = vmatpush1.bf16.msra.mxu1 %v11513_v58  ;;  %v11593_v58 = vcombine.low %v610_v45, %v614_v46  ;;  %v666_v46 = vld [vmem:[#allocation5 + $0xfd8] sm:$0xff] }
 0x2e1   :  { %3835 = vmatprep.subr.bf16.mxu1 %v11522_v59 }
 0x2e4   :  { %3836 = vmatpush1.bf16.msra.mxu1 %v11521_v63  ;;  %v626_v63 = vld [vmem:[#allocation5 + $0xe98] sm:$0xff] }
 0x2e5   :  { %3846 = vmatprep.subr.bf16.mxu1 %v11530_v19  ;;  %v630_v19 = vld [vmem:[#allocation5 + $0xeb8] sm:$0xff] }
 0x2e6   :  { %v11610_v3 = vcombine.high %v626_v63, %v630_v19 }
 0x2e7   :  { %3838 = vmatmul.mubr.bf16.vlgmr.msra.gmra.mrb[8].mxu1 %v13725_v21  ;;  %v590_v21 = vld [vmem:[#allocation5 + $0xd78] sm:$0xff] }
 0x2e8   :  { %3847 = vmatpush1.bf16.msra.mxu1 %v11529_v1  ;;  %3878 = vmatprep.mubr.bf16.mxu1 %v13730_v31  ;;  %v11570_v31 = vcombine.high %v586_v13, %v590_v21  ;;  %v11569_v17 = vcombine.low %v586_v13, %v590_v21  ;;  %v11601_v1 = vcombine.low %v618_v53, %v622_v54  ;;  %v4049_v53 = vlaneseq }
 0x2e9   :  { %3848 = vmatprep.subr.bf16.mxu1 %v11538_v2 }
 0x2ec   :  { %3849 = vmatpush1.bf16.msra.mxu1 %v11537_v5  ;;  %v634_v5 = vld [vmem:[#allocation5 + $0xed8] sm:$0xff] }
 0x2ed   :  { %3850 = vmatprep.subr.bf16.mxu1 %v11546_v6  ;;  %v638_v6 = vld [vmem:[#allocation5 + $0xef8] sm:$0xff] }
 0x2ee   :  { %v11618_v9 = vcombine.high %v634_v5, %v638_v6 }
 0x2f0   :  { %3851 = vmatpush1.bf16.msra.mxu1 %v11545_v8  ;;  %v11609_v8 = vcombine.low %v626_v63, %v630_v19 }
 0x2f1   :  { %3852 = vmatprep.subr.bf16.mxu1 %v11554_v61 }
 0x2f4   :  { %3853 = vmatpush1.bf16.msra.mxu1 %v11553_v11  ;;  %v642_v11 = vld [vmem:[#allocation5 + $0xf18] sm:$0xff] }
 0x2f5   :  { %3854 = vmatprep.subr.bf16.mxu1 %v11562_v12  ;;  %v646_v12 = vld [vmem:[#allocation5 + $0xf38] sm:$0xff] }
 0x2f6   :  { %v11626_v15 = vcombine.high %v642_v11, %v646_v12  ;;  %v11625_v26 = vcombine.low %v642_v11, %v646_v12  ;;  %v4239_v12 = vld [vmem:[#allocation10 + $0x80] sm:$0xff] }
 0x2f8   :  { %3855 = vmatpush1.bf16.msra.mxu1 %v11561_v14  ;;  %v11617_v14 = vcombine.low %v634_v5, %v638_v6  ;;  %v4228_v6 = vld [vmem:[#allocation10 + $0x28] sm:$0xff] }
 0x2f9   :  { %3856 = vmatprep.subr.bf16.mxu1 %v11570_v31 }
 0x2fa   :  { %v3552_v24 = vpop.f32.mrb[4].mxu1 }
 0x2fb   :  { %v3901_v28 = vrot.slane %v3552_v24, 4  ;;  %v3554_v29 = vpop.f32.mrb[5].mxu1  ;;  %v13788_v32 = vpop.f32.mrb[4].mxu0 }
 0x2fc   :  { %v3907_v23 = vrot.slane %v3554_v29, 4  ;;  %v3556_v33 = vpop.f32.mrb[6].mxu1  ;;  %3857 = vmatpush1.bf16.msra.mxu1 %v11569_v17  ;;  %v13790_v35 = vpop.f32.mrb[5].mxu0  ;;  %v650_v17 = vld [vmem:[#allocation5 + $0xf58] sm:$0xff] }
 0x2fd   :  { %v3902_v27 = vadd.f32 %v3901_v28, %v3552_v24  ;;  %v3557_v36 = vpop.f32.mrb[7].mxu1  ;;  %3858 = vmatprep.subr.bf16.mxu1 %v11578_v20  ;;  %v3720_v41 = vpop.f32.mrb[6].mxu0  ;;  %v654_v20 = vld [vmem:[#allocation5 + $0xf78] sm:$0xff] }
 0x2fe   :  { %v3908_v44 = vadd.f32 %v3907_v23, %v3554_v29  ;;  %v3721_v47 = vpop.f32.mrb[7].mxu0  ;;  %v658_v33 = vld [vmem:[#allocation5 + $0xf98] sm:$0xff] }
 0x2ff   :  { %v3903_v48 = vrot.slane %v3902_v27, 2  ;;  %v670_v47 = vld [vmem:[#allocation5 + $0xff8] sm:$0xff] }
 0x300   :  { %v3909_v49 = vrot.slane %v3908_v44, 2  ;;  %3859 = vmatpush1.bf16.msra.mxu1 %v11577_v34  ;;  %v662_v34 = vld [vmem:[#allocation5 + $0xfb8] sm:$0xff]  ;;  %v11649_v54 = vcombine.low %v666_v46, %v670_v47 }
 0x301   :  { %v3904_v50 = vadd.f32 %v3903_v48, %v3902_v27  ;;  %3860 = vmatprep.subr.bf16.mxu1 %v11586_v40  ;;  %v11633_v40 = vcombine.low %v650_v17, %v654_v20 }
 0x302   :  { %v3910_v52 = vadd.f32 %v3909_v49, %v3908_v44  ;;  %v11642_v44 = vcombine.high %v658_v33, %v662_v34 }
 0x303   :  { %v3905_v55 = vrot.slane %v3904_v50, 1 }
 0x304   :  { %v3911_v56 = vrot.slane %v3910_v52, 1  ;;  %3861 = vmatpush1.bf16.msra.mxu1 %v11585_v57  ;;  %v11641_v57 = vcombine.low %v658_v33, %v662_v34  ;;  %v4255_v34 = vld [vmem:[#allocation10 + $0x100] sm:$0xff] }
 0x305   :  { %v3906_v59 = vadd.f32 %v3905_v55, %v3904_v50  ;;  %3862 = vmatprep.subr.bf16.mxu1 %v11594_v51  ;;  %v11650_v50 = vcombine.high %v666_v46, %v670_v47  ;;  %v13551_v51 = vmov 1966171168   ;;  %v4263_v47 = vld [vmem:[#allocation10 + $0x140] sm:$0xff] }
 0x306   :  { %v3912_v62 = vadd.f32 %v3911_v56, %v3910_v52  ;;  %v4047_v52 = vunpack.c.l.s4 %v13551_v51  ;;  %v13800_v56 = vshrl.u32 %v4049_v53, 7 }
 0x307   :  { %v3940_v0 = vmul.f32 0.125, %v3906_v59 }
 0x308   :  { %v3941_v30 = vmul.f32 0.125, %v3912_v62  ;;  %3863 = vmatpush1.bf16.msra.mxu1 %v11593_v58  ;;  %v4048_v55 = vunpack.c.0.s8 %v4047_v52 }
 0x309   :  { %v13792_v2 = vsub.f32 %v3552_v24, %v3940_v0  ;;  %3864 = vmatprep.subr.bf16.mxu1 %v11602_v60 }
 0x30a   :  { %v13794_v4 = vsub.f32 %v3554_v29, %v3941_v30  ;;  %v11634_v29 = vcombine.high %v650_v17, %v654_v20  ;;  %v13803_v59 = vsub.s32 %v4048_v55, %v13800_v56  ;;  %v4223_v30 = vld [vmem:[#allocation10] sm:$0xff] }
 0x30b   :  { %v3956_v7 = vmul.f32 %v13792_v2, %v13792_v2  ;;  %v4247_v20 = vld [vmem:[#allocation10 + $0xc0] sm:$0xff] }
 0x30c   :  { %v3957_v38 = vmul.f32 %v13794_v4, %v13794_v4  ;;  %3865 = vmatpush1.bf16.msra.mxu1 %v11601_v1  ;;  %v13810_v63 = vrot.slane %v4042_v43, %v13803_v59  ;;  %v4227_v1 = vld [vmem:[#allocation10 + $0x20] sm:$0xff]  ;;  %v4232_v43 = vld [vmem:[#allocation10 + $0x48] sm:$0xff] }
 0x30d   :  { %v3974_v61 = vrot.slane %v3956_v7, 4  ;;  %3866 = vmatprep.subr.bf16.mxu1 %v11610_v3  ;;  %v4224_v3 = vld [vmem:[#allocation10 + $0x8] sm:$0xff]  ;;  %v11652_v5 = vcombine.high %v4223_v30, %v4227_v1  ;;  %v4275_v55 = vld [vmem:[#allocation10 + $0x1a0] sm:$0xff] }
 0x30e   :  { %v3980_v10 = vrot.slane %v3957_v38, 4 }
 0x30f   :  { %v3975_v13 = vadd.f32 %v3974_v61, %v3956_v7  ;;  %v11653_v7 = vcombine.low %v4224_v3, %v4228_v6  ;;  %7295 = vmatprep.subr.bf16.mxu0 %v11652_v5  ;;  %v4236_v61 = vld [vmem:[#allocation10 + $0x68] sm:$0xff]  ;;  %v4279_v5 = vld [vmem:[#allocation10 + $0x1c0] sm:$0xff] }
 0x310   :  { %v3981_v21 = vadd.f32 %v3980_v10, %v3957_v38  ;;  %3867 = vmatpush1.bf16.msra.mxu1 %v11609_v8  ;;  %v11654_v38 = vcombine.high %v4224_v3, %v4228_v6  ;;  %v11660_v8 = vcombine.high %v4231_v37, %v4235_v42  ;;  %v11661_v10 = vcombine.low %v4232_v43, %v4236_v61  ;;  %v4283_v6 = vld [vmem:[#allocation10 + $0x1e0] sm:$0xff] }
 0x311   :  { %v3976_v31 = vrot.slane %v3975_v13, 2  ;;  %3868 = vmatprep.subr.bf16.mxu1 %v11618_v9  ;;  %v11659_v9 = vcombine.low %v4231_v37, %v4235_v42  ;;  %v11662_v11 = vcombine.high %v4232_v43, %v4236_v61  ;;  %v11707_v37 = vcombine.low %v4279_v5, %v4283_v6  ;;  %v4291_v61 = vld [vmem:[#allocation10 + $0x220] sm:$0xff] }
 0x312   :  { %v3982_v16 = vrot.slane %v3981_v21, 2 }
 0x313   :  { %v3977_v24 = vadd.f32 %v3976_v31, %v3975_v13  ;;  %v4243_v13 = vld [vmem:[#allocation10 + $0xa0] sm:$0xff]  ;;  %v4244_v31 = vld [vmem:[#allocation10 + $0xa8] sm:$0xff] }
 0x314   :  { %v3983_v25 = vadd.f32 %v3982_v16, %v3981_v21  ;;  %3869 = vmatpush1.bf16.msra.mxu1 %v11617_v14  ;;  %v4240_v21 = vld [vmem:[#allocation10 + $0x88] sm:$0xff]  ;;  %v11668_v14 = vcombine.high %v4239_v12, %v4243_v13 }
 0x315   :  { %v3978_v28 = vrot.slane %v3977_v24, 1  ;;  %3870 = vmatprep.subr.bf16.mxu1 %v11626_v15  ;;  %v11667_v15 = vcombine.low %v4239_v12, %v4243_v13  ;;  %v11669_v16 = vcombine.low %v4240_v21, %v4244_v31  ;;  %v11670_v17 = vcombine.high %v4240_v21, %v4244_v31  ;;  %v4299_v31 = vld [vmem:[#allocation10 + $0x260] sm:$0xff] }
 0x316   :  { %v3984_v23 = vrot.slane %v3983_v25, 1 }
 0x317   :  { %v3979_v27 = vadd.f32 %v3978_v28, %v3977_v24  ;;  %v4251_v24 = vld [vmem:[#allocation10 + $0xe0] sm:$0xff]  ;;  %v4252_v28 = vld [vmem:[#allocation10 + $0xe8] sm:$0xff] }
 0x318   :  { %v3985_v36 = vadd.f32 %v3984_v23, %v3983_v25  ;;  %3871 = vmatpush1.bf16.msra.mxu1 %v11625_v26  ;;  %v4248_v25 = vld [vmem:[#allocation10 + $0xc8] sm:$0xff]  ;;  %v11676_v26 = vcombine.high %v4247_v20, %v4251_v24 }
 0x319   :  { %v4012_v41 = vmul.f32 0.125, %v3979_v27  ;;  %3872 = vmatprep.subr.bf16.mxu1 %v11634_v29  ;;  %v11675_v29 = vcombine.low %v4247_v20, %v4251_v24  ;;  %v11677_v23 = vcombine.low %v4248_v25, %v4252_v28  ;;  %v11678_v33 = vcombine.high %v4248_v25, %v4252_v28  ;;  %v4259_v27 = vld [vmem:[#allocation10 + $0x120] sm:$0xff] }
 0x31a   :  { %v4013_v45 = vmul.f32 0.125, %v3985_v36  ;;  %v4256_v36 = vld [vmem:[#allocation10 + $0x108] sm:$0xff]  ;;  %v4307_v28 = vld [vmem:[#allocation10 + $0x2a0] sm:$0xff] }
 0x31b   :  { %v4020_v48 = vadd.f32 1e-05, %v4012_v41  ;;  %v4260_v41 = vld [vmem:[#allocation10 + $0x128] sm:$0xff] }
 0x31c   :  { %v4021_v49 = vadd.f32 1e-05, %v4013_v45  ;;  %3873 = vmatpush1.bf16.msra.mxu1 %v11633_v40  ;;  %v11684_v40 = vcombine.high %v4255_v34, %v4259_v27  ;;  %v11685_v45 = vcombine.low %v4256_v36, %v4260_v41  ;;  %v11686_v46 = vcombine.high %v4256_v36, %v4260_v41  ;;  %v4315_v41 = vld [vmem:[#allocation10 + $0x2e0] sm:$0xff] }
 0x31d   :  { %13278 = vrsqrt.f32 %v4020_v48  ;;  %3874 = vmatprep.subr.bf16.mxu1 %v11642_v44  ;;  %v11683_v44 = vcombine.low %v4255_v34, %v4259_v27  ;;  %v4267_v48 = vld [vmem:[#allocation10 + $0x160] sm:$0xff] }
 0x31e   :  { %13280 = vrsqrt.f32 %v4021_v49  ;;  %v4264_v49 = vld [vmem:[#allocation10 + $0x148] sm:$0xff]  ;;  %v11691_v51 = vcombine.low %v4263_v47, %v4267_v48 }
 0x320   :  { %3875 = vmatpush1.bf16.msra.mxu1 %v11641_v57  ;;  %v11692_v57 = vcombine.high %v4263_v47, %v4267_v48 }
 0x321   :  { %3876 = vmatprep.subr.bf16.mxu1 %v11650_v50  ;;  %v4268_v50 = vld [vmem:[#allocation10 + $0x168] sm:$0xff] }
 0x322   :  { %v11693_v52 = vcombine.low %v4264_v49, %v4268_v50  ;;  %v11694_v53 = vcombine.high %v4264_v49, %v4268_v50  ;;  %v4323_v50 = vld [vmem:[#allocation10 + $0x320] sm:$0xff] }
 0x324   :  { %3877 = vmatpush1.bf16.msra.mxu1 %v11649_v54  ;;  %v4271_v54 = vld [vmem:[#allocation10 + $0x180] sm:$0xff] }
 0x325   :  { %7459 = vmatprep.subr.bf16.mxu1 %v11654_v38  ;;  %v4284_v38 = vld [vmem:[#allocation10 + $0x1e8] sm:$0xff] }
 0x327   :  { %v13279_v58 = vpop.eup %13278  ;;  %3879 = vmatmul.mubr.bf16.vlgmr.msra.gmra.mrb[8].mxu1 %v13737_v39  ;;  %v11651_v39 = vcombine.low %v4223_v30, %v4227_v1  ;;  %v11699_v30 = vcombine.low %v4271_v54, %v4275_v55 }
 0x328   :  { %v13281_v60 = vpop.eup %13280  ;;  %7460 = vmatpush1.bf16.msra.mxu1 %v11653_v7  ;;  %v11708_v7 = vcombine.high %v4279_v5, %v4283_v6 }
 0x329   :  { %v4043_v62 = vcombine.low %v13279_v58, %v13281_v60  ;;  %7296 = vmatpush1.bf16.msra.mxu0 %v11651_v39  ;;  %7461 = vmatprep.subr.bf16.mxu1 %v11662_v11  ;;  %v4272_v58 = vld [vmem:[#allocation10 + $0x188] sm:$0xff]  ;;  %v11700_v60 = vcombine.high %v4271_v54, %v4275_v55 }
 0x32a   :  { %7297 = vmatprep.subr.bf16.mxu0 %v11660_v8  ;;  %v4280_v39 = vld [vmem:[#allocation10 + $0x1c8] sm:$0xff]  ;;  %v4287_v8 = vld [vmem:[#allocation10 + $0x200] sm:$0xff] }
 0x32b   :  { %v13813_v19 = vrot.slane %v4043_v62, %v13803_v59  ;;  %v4276_v62 = vld [vmem:[#allocation10 + $0x1a8] sm:$0xff]  ;;  %v11709_v42 = vcombine.low %v4280_v39, %v4284_v38  ;;  %v11710_v43 = vcombine.high %v4280_v39, %v4284_v38  ;;  %v11715_v12 = vcombine.low %v4287_v8, %v4291_v61  ;;  %v4339_v38 = vld [vmem:[#allocation10 + $0x3a0] sm:$0xff] }
 0x32c   :  { %7462 = vmatpush1.bf16.msra.mxu1 %v11661_v10  ;;  %v11701_v1 = vcombine.low %v4272_v58, %v4276_v62  ;;  %v11702_v3 = vcombine.high %v4272_v58, %v4276_v62  ;;  %v11716_v10 = vcombine.high %v4287_v8, %v4291_v61  ;;  %v4292_v11 = vld [vmem:[#allocation10 + $0x228] sm:$0xff]  ;;  %v4331_v62 = vld [vmem:[#allocation10 + $0x360] sm:$0xff] }
 0x32d   :  { %v4074_v0 = vcombine.low %v13810_v63, %v13813_v19  ;;  %7298 = vmatpush1.bf16.msra.mxu0 %v11659_v9  ;;  %7463 = vmatprep.subr.bf16.mxu1 %v11670_v17  ;;  %v4288_v9 = vld [vmem:[#allocation10 + $0x208] sm:$0xff]  ;;  %v13873_v63 = vsub.s32 2, %v13800_v56  ;;  %v13876_v19 = vsub.s32 5, %v13800_v56 }
 0x32e   :  { %7299 = vmatprep.subr.bf16.mxu0 %v11668_v14  ;;  %v11717_v13 = vcombine.low %v4288_v9, %v4292_v11  ;;  %v11718_v21 = vcombine.high %v4288_v9, %v4292_v11  ;;  %v4295_v14 = vld [vmem:[#allocation10 + $0x240] sm:$0xff]  ;;  %v4300_v17 = vld [vmem:[#allocation10 + $0x268] sm:$0xff] }
 0x32f   :  { %v11723_v20 = vcombine.low %v4295_v14, %v4299_v31  ;;  %v4347_v11 = vld [vmem:[#allocation10 + $0x3e0] sm:$0xff] }
 0x330   :  { %7464 = vmatpush1.bf16.msra.mxu1 %v11669_v16  ;;  %v11724_v16 = vcombine.high %v4295_v14, %v4299_v31  ;;  %v4348_v14 = vld [vmem:[#allocation10 + $0x3e8] sm:$0xff] }
 0x331   :  { %7300 = vmatpush1.bf16.msra.mxu0 %v11667_v15  ;;  %7465 = vmatprep.subr.bf16.mxu1 %v11678_v33  ;;  %v4296_v15 = vld [vmem:[#allocation10 + $0x248] sm:$0xff] }
 0x332   :  { %7301 = vmatprep.subr.bf16.mxu0 %v11676_v26  ;;  %v11725_v24 = vcombine.low %v4296_v15, %v4300_v17  ;;  %v11726_v25 = vcombine.high %v4296_v15, %v4300_v17  ;;  %v4303_v26 = vld [vmem:[#allocation10 + $0x280] sm:$0xff]  ;;  %v4308_v33 = vld [vmem:[#allocation10 + $0x2a8] sm:$0xff] }
 0x333   :  { %v11731_v34 = vcombine.low %v4303_v26, %v4307_v28  ;;  %v13819_v17 = vld [vmem:[#allocation10 + $0x420] sm:$0xff] }
 0x334   :  { %7466 = vmatpush1.bf16.msra.mxu1 %v11677_v23  ;;  %v11732_v23 = vcombine.high %v4303_v26, %v4307_v28 }
 0x335   :  { %7302 = vmatpush1.bf16.msra.mxu0 %v11675_v29  ;;  %7467 = vmatprep.subr.bf16.mxu1 %v11686_v46  ;;  %v4304_v29 = vld [vmem:[#allocation10 + $0x288] sm:$0xff] }
 0x336   :  { %7303 = vmatprep.subr.bf16.mxu0 %v11684_v40  ;;  %v11733_v27 = vcombine.low %v4304_v29, %v4308_v33  ;;  %v11734_v36 = vcombine.high %v4304_v29, %v4308_v33  ;;  %v4311_v40 = vld [vmem:[#allocation10 + $0x2c0] sm:$0xff]  ;;  %v4316_v46 = vld [vmem:[#allocation10 + $0x2e8] sm:$0xff]  ;;  %v3919_v33 = vrot.slane %v13790_v35, 4 }
 0x337   :  { %v11739_v47 = vcombine.low %v4311_v40, %v4315_v41 }
 0x338   :  { %7468 = vmatpush1.bf16.msra.mxu1 %v11685_v45  ;;  %v11740_v45 = vcombine.high %v4311_v40, %v4315_v41 }
 0x339   :  { %7304 = vmatpush1.bf16.msra.mxu0 %v11683_v44  ;;  %7469 = vmatprep.subr.bf16.mxu1 %v11694_v53  ;;  %v4312_v44 = vld [vmem:[#allocation10 + $0x2c8] sm:$0xff] }
 0x33a   :  { %7305 = vmatprep.subr.bf16.mxu0 %v11692_v57  ;;  %v11741_v48 = vcombine.low %v4312_v44, %v4316_v46  ;;  %v11742_v49 = vcombine.high %v4312_v44, %v4316_v46  ;;  %v4319_v57 = vld [vmem:[#allocation10 + $0x300] sm:$0xff]  ;;  %v4324_v53 = vld [vmem:[#allocation10 + $0x328] sm:$0xff] }
 0x33b   :  { %v11747_v54 = vcombine.low %v4319_v57, %v4323_v50 }
 0x33c   :  { %7470 = vmatpush1.bf16.msra.mxu1 %v11693_v52  ;;  %v11748_v52 = vcombine.high %v4319_v57, %v4323_v50 }
 0x33d   :  { %7306 = vmatpush1.bf16.msra.mxu0 %v11691_v51  ;;  %7471 = vmatprep.subr.bf16.mxu1 %v11702_v3  ;;  %v4320_v51 = vld [vmem:[#allocation10 + $0x308] sm:$0xff] }
 0x33e   :  { %7307 = vmatprep.subr.bf16.mxu0 %v11700_v60  ;;  %v11749_v55 = vcombine.low %v4320_v51, %v4324_v53  ;;  %v11750_v58 = vcombine.high %v4320_v51, %v4324_v53  ;;  %v4327_v60 = vld [vmem:[#allocation10 + $0x340] sm:$0xff]  ;;  %v4332_v3 = vld [vmem:[#allocation10 + $0x368] sm:$0xff] }
 0x33f   :  { %v11755_v5 = vcombine.low %v4327_v60, %v4331_v62 }
 0x340   :  { %7472 = vmatpush1.bf16.msra.mxu1 %v11701_v1  ;;  %v11756_v1 = vcombine.high %v4327_v60, %v4331_v62 }
 0x341   :  { %7308 = vmatpush1.bf16.msra.mxu0 %v11699_v30  ;;  %7473 = vmatprep.subr.bf16.mxu1 %v11710_v43  ;;  %v4328_v30 = vld [vmem:[#allocation10 + $0x348] sm:$0xff] }
 0x342   :  { %7309 = vmatprep.subr.bf16.mxu0 %v11708_v7  ;;  %v11757_v6 = vcombine.low %v4328_v30, %v4332_v3  ;;  %v11758_v39 = vcombine.high %v4328_v30, %v4332_v3  ;;  %v4335_v7 = vld [vmem:[#allocation10 + $0x380] sm:$0xff]  ;;  %v4340_v43 = vld [vmem:[#allocation10 + $0x3a8] sm:$0xff] }
 0x343   :  { %v11763_v8 = vcombine.low %v4335_v7, %v4339_v38 }
 0x344   :  { %7474 = vmatpush1.bf16.msra.mxu1 %v11709_v42  ;;  %v11764_v42 = vcombine.high %v4335_v7, %v4339_v38 }
 0x345   :  { %7310 = vmatpush1.bf16.msra.mxu0 %v11707_v37  ;;  %7475 = vmatprep.subr.bf16.mxu1 %v11718_v21  ;;  %v4336_v37 = vld [vmem:[#allocation10 + $0x388] sm:$0xff] }
 0x346   :  { %7311 = vmatprep.subr.bf16.mxu0 %v11716_v10  ;;  %v11765_v61 = vcombine.low %v4336_v37, %v4340_v43  ;;  %v11766_v9 = vcombine.high %v4336_v37, %v4340_v43  ;;  %v4343_v10 = vld [vmem:[#allocation10 + $0x3c0] sm:$0xff] }
 0x347   :  { %v11772_v21 = vcombine.high %v4343_v10, %v4347_v11 }
 0x348   :  { %7476 = vmatpush1.bf16.msra.mxu1 %v11717_v13  ;;  %v11771_v13 = vcombine.low %v4343_v10, %v4347_v11 }
 0x349   :  { %7312 = vmatpush1.bf16.msra.mxu0 %v11715_v12  ;;  %7477 = vmatprep.subr.bf16.mxu1 %v11726_v25  ;;  %v4344_v12 = vld [vmem:[#allocation10 + $0x3c8] sm:$0xff] }
 0x34a   :  { %7313 = vmatprep.subr.bf16.mxu0 %v11724_v16  ;;  %v11773_v31 = vcombine.low %v4344_v12, %v4348_v14  ;;  %v11774_v15 = vcombine.high %v4344_v12, %v4348_v14  ;;  %v13817_v16 = vld [vmem:[#allocation10 + $0x400] sm:$0xff]  ;;  %v13825_v25 = vld [vmem:[#allocation10 + $0x428] sm:$0xff] }
 0x34b   :  { %v11779_v26 = vcombine.low %v13817_v16, %v13819_v17 }
 0x34c   :  { %7478 = vmatpush1.bf16.msra.mxu1 %v11725_v24  ;;  %v11780_v24 = vcombine.high %v13817_v16, %v13819_v17  ;;  %v4376_v16 = vld [vmem:[#allocation10 + $0x4c8] sm:$0xff] }
 0x34d   :  { %7314 = vmatpush1.bf16.msra.mxu0 %v11723_v20  ;;  %7479 = vmatprep.subr.bf16.mxu1 %v11734_v36  ;;  %v13821_v20 = vld [vmem:[#allocation10 + $0x408] sm:$0xff] }
 0x34e   :  { %7315 = vmatprep.subr.bf16.mxu0 %v11732_v23  ;;  %v11781_v28 = vcombine.low %v13821_v20, %v13825_v25  ;;  %v11782_v29 = vcombine.high %v13821_v20, %v13825_v25  ;;  %v3913_v23 = vrot.slane %v13788_v32, 4  ;;  %v4380_v17 = vld [vmem:[#allocation10 + $0x4e8] sm:$0xff] }
 0x350   :  { %7480 = vmatpush1.bf16.msra.mxu1 %v11733_v27  ;;  %v3920_v27 = vadd.f32 %v3919_v33, %v13790_v35 }
 0x351   :  { %7316 = vmatpush1.bf16.msra.mxu0 %v11731_v34  ;;  %7481 = vmatprep.subr.bf16.mxu1 %v11742_v49  ;;  %v3914_v34 = vadd.f32 %v3913_v23, %v13788_v32 }
 0x352   :  { %7317 = vmatprep.subr.bf16.mxu0 %v11740_v45  ;;  %v3921_v40 = vrot.slane %v3920_v27, 2 }
 0x353   :  { %v3915_v36 = vrot.slane %v3914_v34, 2 }
 0x354   :  { %7482 = vmatpush1.bf16.msra.mxu1 %v11741_v48  ;;  %v3922_v44 = vadd.f32 %v3921_v40, %v3920_v27 }
 0x355   :  { %7318 = vmatpush1.bf16.msra.mxu0 %v11739_v47  ;;  %7483 = vmatprep.subr.bf16.mxu1 %v11750_v58  ;;  %v3916_v41 = vadd.f32 %v3915_v36, %v3914_v34 }
 0x356   :  { %7319 = vmatprep.subr.bf16.mxu0 %v11748_v52  ;;  %v3923_v46 = vrot.slane %v3922_v44, 1 }
 0x357   :  { %v3917_v45 = vrot.slane %v3916_v41, 1 }
 0x358   :  { %7484 = vmatpush1.bf16.msra.mxu1 %v11749_v55  ;;  %v3924_v48 = vadd.f32 %v3923_v46, %v3922_v44 }
 0x359   :  { %7320 = vmatpush1.bf16.msra.mxu0 %v11747_v54  ;;  %7485 = vmatprep.subr.bf16.mxu1 %v11758_v39  ;;  %v3918_v47 = vadd.f32 %v3917_v45, %v3916_v41 }
 0x35a   :  { %7321 = vmatprep.subr.bf16.mxu0 %v11756_v1  ;;  %v3943_v57 = vmul.f32 0.125, %v3924_v48 }
 0x35b   :  { %v3942_v49 = vmul.f32 0.125, %v3918_v47 }
 0x35c   :  { %7486 = vmatpush1.bf16.msra.mxu1 %v11757_v6  ;;  %v13841_v51 = vsub.f32 %v13790_v35, %v3943_v57 }
 0x35d   :  { %7322 = vmatpush1.bf16.msra.mxu0 %v11755_v5  ;;  %7487 = vmatprep.subr.bf16.mxu1 %v11766_v9  ;;  %v13838_v50 = vsub.f32 %v13788_v32, %v3942_v49 }
 0x35e   :  { %7323 = vmatprep.subr.bf16.mxu0 %v11764_v42  ;;  %v3959_v53 = vmul.f32 %v13841_v51, %v13841_v51 }
 0x35f   :  { %v3958_v52 = vmul.f32 %v13838_v50, %v13838_v50 }
 0x360   :  { %7488 = vmatpush1.bf16.msra.mxu1 %v11765_v61  ;;  %v3992_v55 = vrot.slane %v3959_v53, 4 }
 0x361   :  { %7324 = vmatpush1.bf16.msra.mxu0 %v11763_v8  ;;  %7489 = vmatprep.subr.bf16.mxu1 %v11774_v15  ;;  %v3986_v54 = vrot.slane %v3958_v52, 4 }
 0x362   :  { %7325 = vmatprep.subr.bf16.mxu0 %v11772_v21  ;;  %v3993_v6 = vadd.f32 %v3992_v55, %v3959_v53 }
 0x363   :  { %v3987_v3 = vadd.f32 %v3986_v54, %v3958_v52 }
 0x364   :  { %7490 = vmatpush1.bf16.msra.mxu1 %v11773_v31  ;;  %v3994_v42 = vrot.slane %v3993_v6, 2 }
 0x365   :  { %7326 = vmatpush1.bf16.msra.mxu0 %v11771_v13  ;;  %7500 = vmatprep.subr.bf16.mxu1 %v11782_v29  ;;  %v3988_v38 = vrot.slane %v3987_v3, 2 }
 0x366   :  { %7336 = vmatprep.subr.bf16.mxu0 %v11780_v24  ;;  %v3995_v11 = vadd.f32 %v3994_v42, %v3993_v6  ;;  %v4082_v42 = vrot.slane %v4074_v0, %v13803_v59 }
 0x367   :  { %v3989_v9 = vadd.f32 %v3988_v38, %v3987_v3 }
 0x368   :  { %v3996_v15 = vrot.slane %v3995_v11, 1 }
 0x369   :  { %v3990_v14 = vrot.slane %v3989_v9, 1 }
 0x36a   :  { %v3997_v27 = vadd.f32 %v3996_v15, %v3995_v11  ;;  %v13864_v11 = vsub.s32 1, %v13800_v56 }
 0x36b   :  { %v3991_v33 = vadd.f32 %v3990_v14, %v3989_v9  ;;  %v13861_v9 = vld [vmem:[#allocation8] sm:$0xff] }
 0x36c   :  { %v4015_v46 = vmul.f32 0.125, %v3997_v27  ;;  %v4150_v14 = vrot.slane %v13861_v9, %v13864_v11 }
 0x36d   :  { %v4014_v44 = vmul.f32 0.125, %v3991_v33 }
 0x36e   :  { %v4023_v53 = vadd.f32 1e-05, %v4015_v46 }
 0x36f   :  { %v4022_v57 = vadd.f32 1e-05, %v4014_v44  ;;  %v4166_v44 = vrot.slane %v13861_v9, %v13876_v19 }
 0x371   :  { %13282 = vrsqrt.f32 %v4022_v57 }
 0x372   :  { %13284 = vrsqrt.f32 %v4023_v53 }
 0x37b   :  { %v13283_v3 = vpop.eup %13282 }
 0x3fa   :  { %v3880_v58 = vpop.f32.mrb[8].mxu1 }
 0x3fb   :  { %v3925_v60 = vrot.slane %v3880_v58, 4  ;;  %v3882_v62 = vpop.f32.mrb[9].mxu1 }
 0x3fc   :  { %v3931_v30 = vrot.slane %v3882_v62, 4  ;;  %v3884_v1 = vpop.f32.mrb[10].mxu1 }
 0x3fd   :  { %v3926_v5 = vadd.f32 %v3925_v60, %v3880_v58  ;;  %v3885_v32 = vpop.f32.mrb[11].mxu1 }
 0x3fe   :  { %v3932_v39 = vadd.f32 %v3931_v30, %v3882_v62 }
 0x3ff   :  { %v3927_v35 = vrot.slane %v3926_v5, 2 }
 0x400   :  { %v3933_v7 = vrot.slane %v3932_v39, 2 }
 0x401   :  { %v3928_v37 = vadd.f32 %v3927_v35, %v3926_v5  ;;  %v13285_v5 = vpop.eup %13284 }
 0x402   :  { %v3934_v43 = vadd.f32 %v3933_v7, %v3932_v39  ;;  %v4044_v6 = vcombine.low %v13283_v3, %v13285_v5 }
 0x403   :  { %v3929_v8 = vrot.slane %v3928_v37, 1 }
 0x404   :  { %v3935_v61 = vrot.slane %v3934_v43, 1  ;;  %v4066_v7 = vrot.slane %v4044_v6, %v13803_v59 }
 0x405   :  { %v3930_v10 = vadd.f32 %v3929_v8, %v3928_v37  ;;  %v3887_v8 = vld [vmem:[#allocation7] sm:$0xff] }
 0x406   :  { %v3936_v12 = vadd.f32 %v3935_v61, %v3934_v43  ;;  %v13859_v61 = vsub.s32 7, %v13800_v56 }
 0x407   :  { %v3944_v13 = vmul.f32 0.125, %v3930_v10 }
 0x408   :  { %v3945_v21 = vmul.f32 0.125, %v3936_v12  ;;  %v13867_v12 = vsub.s32 0, %v13800_v56 }
 0x409   :  { %v13847_v31 = vsub.f32 %v3880_v58, %v3944_v13  ;;  %v13870_v13 = vsub.s32 3, %v13800_v56 }
 0x40a   :  { %v3953_v24 = vsub.f32 %v3882_v62, %v3945_v21  ;;  %v4174_v21 = vrot.slane %v13861_v9, %v13859_v61  ;;  %v4146_v15 = vrot.slane %v13861_v9, %v13867_v12 }
 0x40b   :  { %v3960_v29 = vmul.f32 %v13847_v31, %v13847_v31 }
 0x40c   :  { %v3961_v23 = vmul.f32 %v3953_v24, %v3953_v24 }
 0x40d   :  { %v3998_v34 = vrot.slane %v3960_v29, 4 }
 0x40e   :  { %v4004_v36 = vrot.slane %v3961_v23, 4 }
 0x40f   :  { %v3999_v40 = vadd.f32 %v3998_v34, %v3960_v29  ;;  %v4158_v29 = vrot.slane %v13861_v9, %v13870_v13 }
 0x410   :  { %v4005_v41 = vadd.f32 %v4004_v36, %v3961_v23 }
 0x411   :  { %v4000_v45 = vrot.slane %v3999_v40, 2 }
 0x412   :  { %v4006_v47 = vrot.slane %v4005_v41, 2 }
 0x413   :  { %v4001_v48 = vadd.f32 %v4000_v45, %v3999_v40  ;;  %v4154_v40 = vrot.slane %v13861_v9, %v13873_v63 }
 0x414   :  { %v4007_v49 = vadd.f32 %v4006_v47, %v4005_v41 }
 0x415   :  { %v4002_v52 = vrot.slane %v4001_v48, 1 }
 0x416   :  { %v4008_v54 = vrot.slane %v4007_v49, 1 }
 0x417   :  { %v4003_v55 = vadd.f32 %v4002_v52, %v4001_v48 }
 0x418   :  { %v4009_v58 = vadd.f32 %v4008_v54, %v4007_v49 }
 0x419   :  { %v4016_v60 = vmul.f32 0.125, %v4003_v55 }
 0x41a   :  { %v4017_v62 = vmul.f32 0.125, %v4009_v58 }
 0x41b   :  { %v4024_v30 = vadd.f32 1e-05, %v4016_v60 }
 0x41c   :  { %v4025_v1 = vadd.f32 1e-05, %v4017_v62 }
 0x41d   :  { %13286 = vrsqrt.f32 %v4024_v30  ;;  %v4360_v30 = vld [vmem:[#allocation10 + $0x448] sm:$0xff] }
 0x41e   :  { %13288 = vrsqrt.f32 %v4025_v1  ;;  %v13916_v1 = vsub.s32 4, %v13800_v56 }
 0x427   :  { %v13287_v32 = vpop.eup %13286 }
 0x428   :  { %v13289_v39 = vpop.eup %13288 }
 0x429   :  { %v4045_v35 = vcombine.low %v13287_v32, %v13289_v39  ;;  %v4367_v39 = vld [vmem:[#allocation10 + $0x480] sm:$0xff] }
 0x42b   :  { %v4073_v38 = vrot.slane %v4045_v35, %v13803_v59 }
 0x42d   :  { %v4075_v37 = vcombine.low %v4066_v7, %v4073_v38  ;;  %v4371_v38 = vld [vmem:[#allocation10 + $0x4a0] sm:$0xff] }
 0x42f   :  { %v4089_v43 = vrot.slane %v4075_v37, %v13803_v59  ;;  %v4368_v37 = vld [vmem:[#allocation10 + $0x488] sm:$0xff] }
 0x431   :  { %v4090_v10 = vcombine.low %v4082_v42, %v4089_v43  ;;  %v4372_v42 = vld [vmem:[#allocation10 + $0x4a8] sm:$0xff]  ;;  %v13925_v43 = vsub.s32 6, %v13800_v56 }
 0x433   :  { %v13878_v0 = vmul.f32 %v4090_v10, %v3887_v8  ;;  %v4170_v25 = vrot.slane %v13861_v9, %v13925_v43 }
 0x435   :  { %v4125_v23 = vrot.slane %v13878_v0, %v13859_v61  ;;  %v4101_v33 = vrot.slane %v13878_v0, %v13864_v11  ;;  %v4097_v34 = vrot.slane %v13878_v0, %v13867_v12  ;;  %v4109_v27 = vrot.slane %v13878_v0, %v13870_v13 }
 0x436   :  { %v4105_v36 = vrot.slane %v13878_v0, %v13873_v63  ;;  %v4117_v41 = vrot.slane %v13878_v0, %v13876_v19  ;;  %v4113_v10 = vrot.slane %v13878_v0, %v13916_v1  ;;  %v4121_v20 = vrot.slane %v13878_v0, %v13925_v43 }
 0x437   :  { %v4141_v45 = vmul.f32 %v4125_v23, %v3953_v24  ;;  %v4135_v46 = vmul.f32 %v4101_v33, %v13767_v22  ;;  %v4134_v47 = vmul.f32 %v4097_v34, %v13764_v18  ;;  %v4137_v48 = vmul.f32 %v4109_v27, %v13794_v4  ;;  %v4359_v4 = vld [vmem:[#allocation10 + $0x440] sm:$0xff] }
 0x438   :  { %v4136_v49 = vmul.f32 %v4105_v36, %v13792_v2  ;;  %v4139_v57 = vmul.f32 %v4117_v41, %v13841_v51  ;;  %v4363_v2 = vld [vmem:[#allocation10 + $0x460] sm:$0xff]  ;;  %v4364_v51 = vld [vmem:[#allocation10 + $0x468] sm:$0xff]  ;;  %v4138_v33 = vmul.f32 %v4113_v10, %v13838_v50  ;;  %v11797_v27 = vcombine.low %v4368_v37, %v4372_v42 }
 0x439   :  { %v13909_v52 = vadd.f32 %v4174_v21, %v4141_v45  ;;  %v4184_v53 = vadd.f32 %v4150_v14, %v4135_v46  ;;  %v4183_v54 = vadd.f32 %v4146_v15, %v4134_v47  ;;  %v4186_v55 = vadd.f32 %v4158_v29, %v4137_v48  ;;  %v4375_v23 = vld [vmem:[#allocation10 + $0x4c0] sm:$0xff]  ;;  %v4384_v45 = vld [vmem:[#allocation10 + $0x508] sm:$0xff] }
 0x43a   :  { %v13911_v58 = vadd.f32 %v4154_v40, %v4136_v49  ;;  %v13913_v60 = vadd.f32 %v4166_v44, %v4139_v57  ;;  %v11788_v35 = vcombine.high %v4359_v4, %v4363_v2  ;;  %v11790_v7 = vcombine.high %v4360_v30, %v4364_v51  ;;  %v4379_v34 = vld [vmem:[#allocation10 + $0x4e0] sm:$0xff]  ;;  %v4388_v46 = vld [vmem:[#allocation10 + $0x528] sm:$0xff] }
 0x43b   :  { %vm4192_vm0 = vcmp.ge.f32.partialorder %v4184_v53, 0.0  ;;  %v4200_v24 = vmul.f32 1024.0, %v4184_v53  ;;  %vm4191_vm1 = vcmp.ge.f32.partialorder %v4183_v54, 0.0  ;;  %v4199_v22 = vmul.f32 1024.0, %v4183_v54  ;;  %v4383_v41 = vld [vmem:[#allocation10 + $0x500] sm:$0xff] }
 0x43c   :  { %vm4194_vm2 = vcmp.ge.f32.partialorder %v4186_v55, 0.0  ;;  %v4202_v18 = vmul.f32 1024.0, %v4186_v55  ;;  %v4162_v21 = vrot.slane %v13861_v9, %v13916_v1  ;;  %v11787_v56 = vcombine.low %v4359_v4, %v4363_v2  ;;  %v4387_v44 = vld [vmem:[#allocation10 + $0x520] sm:$0xff]  ;;  %v4400_v2 = vld [vmem:[#allocation10 + $0x588] sm:$0xff] }
 0x43d   :  { %v4208_v62 = vsel %vm4192_vm0, %v4184_v53, %v4200_v24  ;;  %v4207_v5 = vsel %vm4191_vm1, %v4183_v54, %v4199_v22  ;;  %v11789_v14 = vcombine.low %v4360_v30, %v4364_v51  ;;  %v11796_v15 = vcombine.high %v4367_v39, %v4371_v38  ;;  %v4391_v57 = vld [vmem:[#allocation10 + $0x540] sm:$0xff]  ;;  %v4392_v53 = vld [vmem:[#allocation10 + $0x548] sm:$0xff] }
 0x43e   :  { %v13918_v3 = vpack.c.bf16 %v4208_v62, %v4208_v62  ;;  %v4210_v32 = vsel %vm4194_vm2, %v4186_v55, %v4202_v18  ;;  %v13920_v6 = vpack.c.bf16 %v4207_v5, %v4207_v5  ;;  %v11798_v29 = vcombine.high %v4368_v37, %v4372_v42  ;;  %v4396_v54 = vld [vmem:[#allocation10 + $0x568] sm:$0xff]  ;;  %v4399_v4 = vld [vmem:[#allocation10 + $0x580] sm:$0xff] }
 0x43f   :  { %v13929_v8 = vpack.c.bf16 %v4210_v32, %v4210_v32  ;;  %v4140_v36 = vmul.f32 %v4121_v20, %v13847_v31  ;;  %v11804_v50 = vcombine.high %v4375_v23, %v4379_v34  ;;  %v11806_v40 = vcombine.high %v4376_v16, %v4380_v17  ;;  %v4395_v31 = vld [vmem:[#allocation10 + $0x560] sm:$0xff]  ;;  %v4404_v30 = vld [vmem:[#allocation10 + $0x5a8] sm:$0xff] }
 0x440   :  { %7327 = vmatprep.mubr.bf16.mxu0 %v13918_v3  ;;  %7491 = vmatprep.mubr.bf16.mxu1 %v13918_v3  ;;  %v11803_v9 = vcombine.low %v4375_v23, %v4379_v34  ;;  %v11805_v47 = vcombine.low %v4376_v16, %v4380_v17  ;;  %v11812_v48 = vcombine.high %v4383_v41, %v4387_v44  ;;  %v4403_v62 = vld [vmem:[#allocation10 + $0x5a0] sm:$0xff]  ;;  %v4412_v37 = vld [vmem:[#allocation10 + $0x5e8] sm:$0xff]  ;;  %vm4193_vm3 = vcmp.ge.f32.partialorder %v13911_v58, 0.0 }
 0x441   :  { %7328 = vmatmul.mubr.bf16.vlgmr.msra.gmra.mrb[8].mxu0 %v13920_v6  ;;  %7492 = vmatmul.mubr.bf16.vlgmr.msra.gmra.mrb[12].mxu1 %v13920_v6  ;;  %v13951_v0 = vadd.f32 %v4170_v25, %v4140_v36  ;;  %v11814_v49 = vcombine.high %v4384_v45, %v4388_v46  ;;  %v11811_v55 = vcombine.low %v4383_v41, %v4387_v44  ;;  %v4420_v23 = vld [vmem:[#allocation10 + $0x628] sm:$0xff]  ;;  %v4423_v20 = vld [vmem:[#allocation10 + $0x640] sm:$0xff]  ;;  %vm4196_vm4 = vcmp.ge.f32.partialorder %v13913_v60, 0.0 }
 0x442   :  { %7337 = vmatpush1.bf16.msra.mxu0 %v11779_v26  ;;  %7501 = vmatpush1.bf16.msra.mxu1 %v11781_v28  ;;  %v13948_v26 = vadd.f32 %v4162_v21, %v4138_v33  ;;  %v11795_v28 = vcombine.low %v4367_v39, %v4371_v38  ;;  %v11813_v24 = vcombine.low %v4384_v45, %v4388_v46  ;;  %v4408_v38 = vld [vmem:[#allocation10 + $0x5c8] sm:$0xff]  ;;  %v4427_v25 = vld [vmem:[#allocation10 + $0x660] sm:$0xff]  ;;  %vm4198_vm6 = vcmp.ge.f32.partialorder %v13909_v52, 0.0 }
 0x443   :  { %7368 = vmatprep.mubr.bf16.mxu0 %v13929_v8  ;;  %7532 = vmatprep.mubr.bf16.mxu1 %v13929_v8  ;;  %v11820_v22 = vcombine.high %v4391_v57, %v4395_v31  ;;  %v11822_v18 = vcombine.high %v4392_v53, %v4396_v54  ;;  %v11819_v51 = vcombine.low %v4391_v57, %v4395_v31  ;;  %v4431_v44 = vld [vmem:[#allocation10 + $0x680] sm:$0xff]  ;;  %v4432_v46 = vld [vmem:[#allocation10 + $0x688] sm:$0xff]  ;;  %vm4197_vm7 = vcmp.ge.f32.partialorder %v13951_v0, 0.0 }
 0x444   :  { %7338 = vmatprep.subr.bf16.mxu0 %v11788_v35  ;;  %7502 = vmatprep.subr.bf16.mxu1 %v11790_v7  ;;  %v11821_v5 = vcombine.low %v4392_v53, %v4396_v54  ;;  %v11828_v32 = vcombine.high %v4399_v4, %v4403_v62  ;;  %v11830_v39 = vcombine.high %v4400_v2, %v4404_v30  ;;  %v4407_v35 = vld [vmem:[#allocation10 + $0x5c0] sm:$0xff]  ;;  %v4440_v54 = vld [vmem:[#allocation10 + $0x6c8] sm:$0xff]  ;;  %vm4195_vm5 = vcmp.ge.f32.partialorder %v13948_v26, 0.0 }
 0x445   :  { %v4411_v7 = vld [vmem:[#allocation10 + $0x5e0] sm:$0xff]  ;;  %v11827_v42 = vcombine.low %v4399_v4, %v4403_v62  ;;  %v11829_v10 = vcombine.low %v4400_v2, %v4404_v30  ;;  %v11837_v34 = vcombine.low %v4408_v38, %v4412_v37  ;;  %v4448_v30 = vld [vmem:[#allocation10 + $0x708] sm:$0xff] }
 0x446   :  { %7339 = vmatpush1.bf16.msra.mxu0 %v11787_v56  ;;  %7503 = vmatpush1.bf16.msra.mxu1 %v11789_v14  ;;  %v11836_v21 = vcombine.high %v4407_v35, %v4411_v7  ;;  %v11838_v56 = vcombine.high %v4408_v38, %v4412_v37  ;;  %v4415_v14 = vld [vmem:[#allocation10 + $0x600] sm:$0xff]  ;;  %v11835_v33 = vcombine.low %v4407_v35, %v4411_v7  ;;  %v4456_v37 = vld [vmem:[#allocation10 + $0x748] sm:$0xff] }
 0x447   :  { %7340 = vmatprep.subr.bf16.mxu0 %v11796_v15  ;;  %7504 = vmatprep.subr.bf16.mxu1 %v11798_v29  ;;  %v4419_v15 = vld [vmem:[#allocation10 + $0x620] sm:$0xff]  ;;  %v4416_v29 = vld [vmem:[#allocation10 + $0x608] sm:$0xff] }
 0x448   :  { %v11844_v16 = vcombine.high %v4415_v14, %v4419_v15  ;;  %v11846_v17 = vcombine.high %v4416_v29, %v4420_v23  ;;  %v11843_v36 = vcombine.low %v4415_v14, %v4419_v15  ;;  %v4435_v45 = vld [vmem:[#allocation10 + $0x6a0] sm:$0xff] }
 0x449   :  { %v4439_v31 = vld [vmem:[#allocation10 + $0x6c0] sm:$0xff] }
 0x44a   :  { %7341 = vmatpush1.bf16.msra.mxu0 %v11795_v28  ;;  %7505 = vmatpush1.bf16.msra.mxu1 %v11797_v27  ;;  %v4424_v28 = vld [vmem:[#allocation10 + $0x648] sm:$0xff]  ;;  %v4443_v53 = vld [vmem:[#allocation10 + $0x6e0] sm:$0xff] }
 0x44b   :  { %7342 = vmatprep.subr.bf16.mxu0 %v11804_v50  ;;  %7506 = vmatprep.subr.bf16.mxu1 %v11806_v40  ;;  %v4428_v27 = vld [vmem:[#allocation10 + $0x668] sm:$0xff]  ;;  %v11845_v50 = vcombine.low %v4416_v29, %v4420_v23  ;;  %v11852_v40 = vcombine.high %v4423_v20, %v4427_v25  ;;  %v4447_v62 = vld [vmem:[#allocation10 + $0x700] sm:$0xff] }
 0x44c   :  { %v11854_v41 = vcombine.high %v4424_v28, %v4428_v27  ;;  %v4451_v2 = vld [vmem:[#allocation10 + $0x720] sm:$0xff]  ;;  %v4464_v23 = vld [vmem:[#allocation10 + $0x788] sm:$0xff] }
 0x44d   :  { %v4455_v7 = vld [vmem:[#allocation10 + $0x740] sm:$0xff] }
 0x44e   :  { %7343 = vmatpush1.bf16.msra.mxu0 %v11803_v9  ;;  %7507 = vmatpush1.bf16.msra.mxu1 %v11805_v47  ;;  %v4436_v9 = vld [vmem:[#allocation10 + $0x6a8] sm:$0xff]  ;;  %v11851_v47 = vcombine.low %v4423_v20, %v4427_v25  ;;  %v4459_v38 = vld [vmem:[#allocation10 + $0x760] sm:$0xff] }
 0x44f   :  { %7344 = vmatprep.subr.bf16.mxu0 %v11812_v48  ;;  %7508 = vmatprep.subr.bf16.mxu1 %v11814_v49  ;;  %v11853_v48 = vcombine.low %v4424_v28, %v4428_v27  ;;  %v11860_v49 = vcombine.high %v4431_v44, %v4435_v45  ;;  %v11862_v57 = vcombine.high %v4432_v46, %v4436_v9  ;;  %v4463_v15 = vld [vmem:[#allocation10 + $0x780] sm:$0xff]  ;;  %v4472_v27 = vld [vmem:[#allocation10 + $0x7c8] sm:$0xff] }
 0x450   :  { %v4467_v29 = vld [vmem:[#allocation10 + $0x7a0] sm:$0xff] }
 0x451   :  { %v4471_v25 = vld [vmem:[#allocation10 + $0x7c0] sm:$0xff] }
 0x452   :  { %7345 = vmatpush1.bf16.msra.mxu0 %v11811_v55  ;;  %7509 = vmatpush1.bf16.msra.mxu1 %v11813_v24  ;;  %v4444_v55 = vld [vmem:[#allocation10 + $0x6e8] sm:$0xff]  ;;  %v11859_v24 = vcombine.low %v4431_v44, %v4435_v45  ;;  %v4475_v28 = vld [vmem:[#allocation10 + $0x7e0] sm:$0xff] }
 0x453   :  { %7346 = vmatprep.subr.bf16.mxu0 %v11820_v22  ;;  %7510 = vmatprep.subr.bf16.mxu1 %v11822_v18  ;;  %v11861_v22 = vcombine.low %v4432_v46, %v4436_v9  ;;  %v11868_v18 = vcombine.high %v4439_v31, %v4443_v53  ;;  %v11870_v4 = vcombine.high %v4440_v54, %v4444_v55  ;;  %v4479_v45 = vld [vmem:[#allocation10 + $0x800] sm:$0xff]  ;;  %v4201_v46 = vmul.f32 1024.0, %v13911_v58 }
 0x454   :  { %v4483_v9 = vld [vmem:[#allocation10 + $0x820] sm:$0xff] }
 0x456   :  { %7347 = vmatpush1.bf16.msra.mxu0 %v11819_v51  ;;  %7511 = vmatpush1.bf16.msra.mxu1 %v11821_v5  ;;  %v4452_v51 = vld [vmem:[#allocation10 + $0x728] sm:$0xff]  ;;  %v11867_v5 = vcombine.low %v4439_v31, %v4443_v53  ;;  %v11908_v53 = vcombine.high %v4479_v45, %v4483_v9 }
 0x457   :  { %7348 = vmatprep.subr.bf16.mxu0 %v11828_v32  ;;  %7512 = vmatprep.subr.bf16.mxu1 %v11830_v39  ;;  %v11869_v32 = vcombine.low %v4440_v54, %v4444_v55  ;;  %v11876_v39 = vcombine.high %v4447_v62, %v4451_v2  ;;  %v11878_v35 = vcombine.high %v4448_v30, %v4452_v51 }
 0x458   :  { %v4209_v55 = vsel %vm4193_vm3, %v13911_v58, %v4201_v46  ;;  %v4499_v58 = vld [vmem:[#allocation10 + $0x8a0] sm:$0xff] }
 0x45a   :  { %7349 = vmatpush1.bf16.msra.mxu0 %v11827_v42  ;;  %7513 = vmatpush1.bf16.msra.mxu1 %v11829_v10  ;;  %v4460_v42 = vld [vmem:[#allocation10 + $0x768] sm:$0xff]  ;;  %v11875_v10 = vcombine.low %v4447_v62, %v4451_v2  ;;  %v11907_v2 = vcombine.low %v4479_v45, %v4483_v9 }
 0x45b   :  { %7350 = vmatprep.subr.bf16.mxu0 %v11836_v21  ;;  %7514 = vmatprep.subr.bf16.mxu1 %v11838_v56  ;;  %v11877_v21 = vcombine.low %v4448_v30, %v4452_v51  ;;  %v11884_v56 = vcombine.high %v4455_v7, %v4459_v38  ;;  %v11886_v14 = vcombine.high %v4456_v37, %v4460_v42  ;;  %v4492_v62 = vld [vmem:[#allocation10 + $0x868] sm:$0xff] }
 0x45c   :  { %v13959_v30 = vpack.c.bf16 %v4209_v55, %v4209_v55  ;;  %v4524_v45 = vld [vmem:[#allocation10 + $0x968] sm:$0xff] }
 0x45e   :  { %7351 = vmatpush1.bf16.msra.mxu0 %v11835_v33  ;;  %7515 = vmatpush1.bf16.msra.mxu1 %v11837_v34  ;;  %v4468_v33 = vld [vmem:[#allocation10 + $0x7a8] sm:$0xff]  ;;  %v11883_v34 = vcombine.low %v4455_v7, %v4459_v38 }
 0x45f   :  { %7352 = vmatprep.subr.bf16.mxu0 %v11844_v16  ;;  %7516 = vmatprep.subr.bf16.mxu1 %v11846_v17  ;;  %v11885_v16 = vcombine.low %v4456_v37, %v4460_v42  ;;  %v11892_v17 = vcombine.high %v4463_v15, %v4467_v29  ;;  %v11894_v20 = vcombine.high %v4464_v23, %v4468_v33  ;;  %v4500_v7 = vld [vmem:[#allocation10 + $0x8a8] sm:$0xff] }
 0x462   :  { %7353 = vmatpush1.bf16.msra.mxu0 %v11843_v36  ;;  %7517 = vmatpush1.bf16.msra.mxu1 %v11845_v50  ;;  %v4476_v36 = vld [vmem:[#allocation10 + $0x7e8] sm:$0xff]  ;;  %v11891_v50 = vcombine.low %v4463_v15, %v4467_v29 }
 0x463   :  { %7354 = vmatprep.subr.bf16.mxu0 %v11852_v40  ;;  %7518 = vmatprep.subr.bf16.mxu1 %v11854_v41  ;;  %v11893_v40 = vcombine.low %v4464_v23, %v4468_v33  ;;  %v11900_v41 = vcombine.high %v4471_v25, %v4475_v28  ;;  %v11902_v44 = vcombine.high %v4472_v27, %v4476_v36  ;;  %v4508_v15 = vld [vmem:[#allocation10 + $0x8e8] sm:$0xff] }
 0x464   :  { %v11901_v31 = vcombine.low %v4472_v27, %v4476_v36 }
 0x466   :  { %7355 = vmatpush1.bf16.msra.mxu0 %v11851_v47  ;;  %7519 = vmatpush1.bf16.msra.mxu1 %v11853_v48  ;;  %v4480_v47 = vld [vmem:[#allocation10 + $0x808] sm:$0xff] }
 0x467   :  { %7356 = vmatprep.subr.bf16.mxu0 %v11860_v49  ;;  %7520 = vmatprep.subr.bf16.mxu1 %v11862_v57  ;;  %v4484_v48 = vld [vmem:[#allocation10 + $0x828] sm:$0xff]  ;;  %v4204_v49 = vmul.f32 1024.0, %v13913_v60  ;;  %v11899_v57 = vcombine.low %v4471_v25, %v4475_v28 }
 0x468   :  { %v11910_v54 = vcombine.high %v4480_v47, %v4484_v48  ;;  %v11909_v51 = vcombine.low %v4480_v47, %v4484_v48  ;;  %v4516_v25 = vld [vmem:[#allocation10 + $0x928] sm:$0xff] }
 0x46a   :  { %7357 = vmatpush1.bf16.msra.mxu0 %v11859_v24  ;;  %7521 = vmatpush1.bf16.msra.mxu1 %v11861_v22  ;;  %v4487_v24 = vld [vmem:[#allocation10 + $0x840] sm:$0xff]  ;;  %v4212_v22 = vsel %vm4196_vm4, %v13913_v60, %v4204_v49  ;;  %v4496_v60 = vld [vmem:[#allocation10 + $0x888] sm:$0xff] }
 0x46b   :  { %7358 = vmatprep.subr.bf16.mxu0 %v11868_v18  ;;  %7522 = vmatprep.subr.bf16.mxu1 %v11870_v4  ;;  %v4491_v18 = vld [vmem:[#allocation10 + $0x860] sm:$0xff]  ;;  %v4488_v4 = vld [vmem:[#allocation10 + $0x848] sm:$0xff]  ;;  %v11925_v23 = vcombine.low %v4496_v60, %v4500_v7 }
 0x46c   :  { %v11915_v38 = vcombine.low %v4487_v24, %v4491_v18  ;;  %v11917_v37 = vcombine.low %v4488_v4, %v4492_v62  ;;  %v4527_v49 = vld [vmem:[#allocation10 + $0x980] sm:$0xff] }
 0x46e   :  { %7359 = vmatpush1.bf16.msra.mxu0 %v11867_v5  ;;  %7523 = vmatpush1.bf16.msra.mxu1 %v11869_v32  ;;  %v13961_v5 = vpack.c.bf16 %v4212_v22, %v4212_v22  ;;  %v11916_v32 = vcombine.high %v4487_v24, %v4491_v18  ;;  %v4535_v18 = vld [vmem:[#allocation10 + $0x9c0] sm:$0xff] }
 0x46f   :  { %7360 = vmatprep.subr.bf16.mxu0 %v11876_v39  ;;  %7524 = vmatprep.subr.bf16.mxu1 %v11878_v35  ;;  %v11918_v39 = vcombine.high %v4488_v4, %v4492_v62  ;;  %v4495_v35 = vld [vmem:[#allocation10 + $0x880] sm:$0xff]  ;;  %v4536_v62 = vld [vmem:[#allocation10 + $0x9c8] sm:$0xff] }
 0x470   :  { %v11924_v42 = vcombine.high %v4495_v35, %v4499_v58  ;;  %v11923_v29 = vcombine.low %v4495_v35, %v4499_v58  ;;  %v4539_v4 = vld [vmem:[#allocation10 + $0x9e0] sm:$0xff] }
 0x471   :  { %v4543_v58 = vld [vmem:[#allocation10 + $0xa00] sm:$0xff] }
 0x472   :  { %7361 = vmatpush1.bf16.msra.mxu0 %v11875_v10  ;;  %7525 = vmatpush1.bf16.msra.mxu1 %v11877_v21  ;;  %v11926_v10 = vcombine.high %v4496_v60, %v4500_v7  ;;  %v4503_v21 = vld [vmem:[#allocation10 + $0x8c0] sm:$0xff]  ;;  %v4544_v7 = vld [vmem:[#allocation10 + $0xa08] sm:$0xff] }
 0x473   :  { %7362 = vmatprep.subr.bf16.mxu0 %v11884_v56  ;;  %7526 = vmatprep.subr.bf16.mxu1 %v11886_v14  ;;  %v4507_v56 = vld [vmem:[#allocation10 + $0x8e0] sm:$0xff]  ;;  %v4504_v14 = vld [vmem:[#allocation10 + $0x8c8] sm:$0xff] }
 0x474   :  { %v11932_v33 = vcombine.high %v4503_v21, %v4507_v56  ;;  %v11931_v28 = vcombine.low %v4503_v21, %v4507_v56  ;;  %v11933_v27 = vcombine.low %v4504_v14, %v4508_v15  ;;  %v4547_v60 = vld [vmem:[#allocation10 + $0xa20] sm:$0xff] }
 0x475   :  { %v4551_v56 = vld [vmem:[#allocation10 + $0xa40] sm:$0xff] }
 0x476   :  { %7363 = vmatpush1.bf16.msra.mxu0 %v11883_v34  ;;  %7527 = vmatpush1.bf16.msra.mxu1 %v11885_v16  ;;  %v11934_v34 = vcombine.high %v4504_v14, %v4508_v15  ;;  %v4511_v16 = vld [vmem:[#allocation10 + $0x900] sm:$0xff]  ;;  %v4552_v15 = vld [vmem:[#allocation10 + $0xa48] sm:$0xff] }
 0x477   :  { %7364 = vmatprep.subr.bf16.mxu0 %v11892_v17  ;;  %7528 = vmatprep.subr.bf16.mxu1 %v11894_v20  ;;  %v4515_v17 = vld [vmem:[#allocation10 + $0x920] sm:$0xff]  ;;  %v4512_v20 = vld [vmem:[#allocation10 + $0x908] sm:$0xff] }
 0x478   :  { %v11940_v36 = vcombine.high %v4511_v16, %v4515_v17  ;;  %v11939_v46 = vcombine.low %v4511_v16, %v4515_v17  ;;  %v11941_v9 = vcombine.low %v4512_v20, %v4516_v25  ;;  %v4555_v14 = vld [vmem:[#allocation10 + $0xa60] sm:$0xff] }
 0x479   :  { %v4559_v17 = vld [vmem:[#allocation10 + $0xa80] sm:$0xff] }
 0x47a   :  { %7365 = vmatpush1.bf16.msra.mxu0 %v11891_v50  ;;  %7529 = vmatpush1.bf16.msra.mxu1 %v11893_v40  ;;  %v11942_v50 = vcombine.high %v4512_v20, %v4516_v25  ;;  %v4519_v40 = vld [vmem:[#allocation10 + $0x940] sm:$0xff]  ;;  %v4560_v25 = vld [vmem:[#allocation10 + $0xa88] sm:$0xff] }
 0x47b   :  { %7366 = vmatprep.subr.bf16.mxu0 %v11900_v41  ;;  %7530 = vmatprep.subr.bf16.mxu1 %v11902_v44  ;;  %v4523_v41 = vld [vmem:[#allocation10 + $0x960] sm:$0xff]  ;;  %v4520_v44 = vld [vmem:[#allocation10 + $0x948] sm:$0xff] }
 0x47c   :  { %v11948_v47 = vcombine.high %v4519_v40, %v4523_v41  ;;  %v11950_v48 = vcombine.high %v4520_v44, %v4524_v45  ;;  %v11949_v55 = vcombine.low %v4520_v44, %v4524_v45  ;;  %v4563_v20 = vld [vmem:[#allocation10 + $0xaa0] sm:$0xff]  ;;  %v4568_v45 = vld [vmem:[#allocation10 + $0xac8] sm:$0xff] }
 0x47d   :  { %v4571_v44 = vld [vmem:[#allocation10 + $0xae0] sm:$0xff] }
 0x47e   :  { %7367 = vmatpush1.bf16.msra.mxu0 %v11899_v57  ;;  %7531 = vmatpush1.bf16.msra.mxu1 %v11901_v31  ;;  %v4531_v57 = vld [vmem:[#allocation10 + $0x9a0] sm:$0xff]  ;;  %v4528_v31 = vld [vmem:[#allocation10 + $0x988] sm:$0xff] }
 0x47f   :  { %7377 = vmatprep.subr.bf16.mxu0 %v11908_v53  ;;  %7541 = vmatprep.subr.bf16.mxu1 %v11910_v54  ;;  %v4532_v53 = vld [vmem:[#allocation10 + $0x9a8] sm:$0xff]  ;;  %v11947_v54 = vcombine.low %v4519_v40, %v4523_v41  ;;  %v11956_v24 = vcombine.high %v4527_v49, %v4531_v57  ;;  %v4567_v41 = vld [vmem:[#allocation10 + $0xac0] sm:$0xff] }
 0x480   :  { %v11958_v22 = vcombine.high %v4528_v31, %v4532_v53 }
 0x481   :  { %7369 = vmatmul.mubr.bf16.vlgmr.msra.gmra.mrb[8].mxu0 %v13959_v30  ;;  %7533 = vmatmul.mubr.bf16.vlgmr.msra.gmra.mrb[12].mxu1 %v13959_v30 }
 0x482   :  { %7378 = vmatpush1.bf16.msra.mxu0 %v11907_v2  ;;  %7409 = vmatprep.mubr.bf16.mxu0 %v13961_v5  ;;  %v4540_v2 = vld [vmem:[#allocation10 + $0x9e8] sm:$0xff] }
 0x483   :  { %7542 = vmatpush1.bf16.msra.mxu1 %v11909_v51  ;;  %7573 = vmatprep.mubr.bf16.mxu1 %v13961_v5  ;;  %v11955_v51 = vcombine.low %v4527_v49, %v4531_v57  ;;  %v11966_v35 = vcombine.high %v4536_v62, %v4540_v2  ;;  %v4575_v57 = vld [vmem:[#allocation10 + $0xb00] sm:$0xff] }
 0x484   :  { %7379 = vmatprep.subr.bf16.mxu0 %v11916_v32  ;;  %7543 = vmatprep.subr.bf16.mxu1 %v11918_v39  ;;  %v11957_v32 = vcombine.low %v4528_v31, %v4532_v53  ;;  %v11964_v39 = vcombine.high %v4535_v18, %v4539_v4  ;;  %v4579_v31 = vld [vmem:[#allocation10 + $0xb20] sm:$0xff]  ;;  %v4576_v53 = vld [vmem:[#allocation10 + $0xb08] sm:$0xff] }
 0x486   :  { %7380 = vmatpush1.bf16.msra.mxu0 %v11915_v38  ;;  %v4548_v38 = vld [vmem:[#allocation10 + $0xa28] sm:$0xff] }
 0x487   :  { %7544 = vmatpush1.bf16.msra.mxu1 %v11917_v37  ;;  %7381 = vmatprep.subr.bf16.mxu0 %v11924_v42  ;;  %v11963_v37 = vcombine.low %v4535_v18, %v4539_v4  ;;  %v11965_v42 = vcombine.low %v4536_v62, %v4540_v2  ;;  %v11974_v21 = vcombine.high %v4544_v7, %v4548_v38  ;;  %v4583_v4 = vld [vmem:[#allocation10 + $0xb40] sm:$0xff]  ;;  %v4584_v2 = vld [vmem:[#allocation10 + $0xb48] sm:$0xff] }
 0x488   :  { %7545 = vmatprep.subr.bf16.mxu1 %v11926_v10  ;;  %v11972_v10 = vcombine.high %v4543_v58, %v4547_v60  ;;  %v4587_v62 = vld [vmem:[#allocation10 + $0xb60] sm:$0xff] }
 0x48a   :  { %7382 = vmatpush1.bf16.msra.mxu0 %v11923_v29  ;;  %v4556_v29 = vld [vmem:[#allocation10 + $0xa68] sm:$0xff] }
 0x48b   :  { %7546 = vmatpush1.bf16.msra.mxu1 %v11925_v23  ;;  %7383 = vmatprep.subr.bf16.mxu0 %v11932_v33  ;;  %v11971_v23 = vcombine.low %v4543_v58, %v4547_v60  ;;  %v11973_v33 = vcombine.low %v4544_v7, %v4548_v38  ;;  %v11982_v16 = vcombine.high %v4552_v15, %v4556_v29  ;;  %v4591_v60 = vld [vmem:[#allocation10 + $0xb80] sm:$0xff]  ;;  %v4592_v38 = vld [vmem:[#allocation10 + $0xb88] sm:$0xff] }
 0x48c   :  { %7547 = vmatprep.subr.bf16.mxu1 %v11934_v34  ;;  %v11980_v34 = vcombine.high %v4551_v56, %v4555_v14  ;;  %v4595_v7 = vld [vmem:[#allocation10 + $0xba0] sm:$0xff] }
 0x48e   :  { %7384 = vmatpush1.bf16.msra.mxu0 %v11931_v28  ;;  %v4564_v28 = vld [vmem:[#allocation10 + $0xaa8] sm:$0xff] }
 0x48f   :  { %7548 = vmatpush1.bf16.msra.mxu1 %v11933_v27  ;;  %7385 = vmatprep.subr.bf16.mxu0 %v11940_v36  ;;  %v11979_v27 = vcombine.low %v4551_v56, %v4555_v14  ;;  %v11981_v36 = vcombine.low %v4552_v15, %v4556_v29  ;;  %v11990_v40 = vcombine.high %v4560_v25, %v4564_v28  ;;  %v4599_v14 = vld [vmem:[#allocation10 + $0xbc0] sm:$0xff]  ;;  %v4600_v29 = vld [vmem:[#allocation10 + $0xbc8] sm:$0xff] }
 0x490   :  { %7549 = vmatprep.subr.bf16.mxu1 %v11942_v50  ;;  %v11988_v50 = vcombine.high %v4559_v17, %v4563_v20  ;;  %v4603_v15 = vld [vmem:[#allocation10 + $0xbe0] sm:$0xff] }
 0x492   :  { %7386 = vmatpush1.bf16.msra.mxu0 %v11939_v46  ;;  %v4572_v46 = vld [vmem:[#allocation10 + $0xae8] sm:$0xff] }
 0x493   :  { %7550 = vmatpush1.bf16.msra.mxu1 %v11941_v9  ;;  %7387 = vmatprep.subr.bf16.mxu0 %v11948_v47  ;;  %v11987_v9 = vcombine.low %v4559_v17, %v4563_v20  ;;  %v11989_v47 = vcombine.low %v4560_v25, %v4564_v28  ;;  %v11998_v49 = vcombine.high %v4568_v45, %v4572_v46  ;;  %v4203_v20 = vmul.f32 1024.0, %v13948_v26  ;;  %v4607_v25 = vld [vmem:[#allocation10 + $0xc00] sm:$0xff] }
 0x494   :  { %7551 = vmatprep.subr.bf16.mxu1 %v11950_v48  ;;  %v11996_v48 = vcombine.high %v4567_v41, %v4571_v44  ;;  %v4611_v28 = vld [vmem:[#allocation10 + $0xc20] sm:$0xff] }
 0x496   :  { %7388 = vmatpush1.bf16.msra.mxu0 %v11947_v54  ;;  %v4580_v54 = vld [vmem:[#allocation10 + $0xb28] sm:$0xff] }
 0x497   :  { %7552 = vmatpush1.bf16.msra.mxu1 %v11949_v55  ;;  %7389 = vmatprep.subr.bf16.mxu0 %v11956_v24  ;;  %v11995_v55 = vcombine.low %v4567_v41, %v4571_v44  ;;  %v11997_v24 = vcombine.low %v4568_v45, %v4572_v46  ;;  %v12006_v18 = vcombine.high %v4576_v53, %v4580_v54 }
 0x498   :  { %7553 = vmatprep.subr.bf16.mxu1 %v11958_v22  ;;  %v12004_v22 = vcombine.high %v4575_v57, %v4579_v31  ;;  %v12036_v44 = vcombine.high %v4607_v25, %v4611_v28  ;;  %v4211_v45 = vsel %vm4195_vm5, %v13948_v26, %v4203_v20  ;;  %v4652_v20 = vld [vmem:[#allocation10 + $0xd68] sm:$0xff] }
 0x49a   :  { %7390 = vmatpush1.bf16.msra.mxu0 %v11955_v51  ;;  %v4588_v51 = vld [vmem:[#allocation10 + $0xb68] sm:$0xff] }
 0x49b   :  { %7554 = vmatpush1.bf16.msra.mxu1 %v11957_v32  ;;  %7391 = vmatprep.subr.bf16.mxu0 %v11964_v39  ;;  %v12003_v32 = vcombine.low %v4575_v57, %v4579_v31  ;;  %v12005_v39 = vcombine.low %v4576_v53, %v4580_v54  ;;  %v12014_v58 = vcombine.high %v4584_v2, %v4588_v51  ;;  %v4616_v57 = vld [vmem:[#allocation10 + $0xc48] sm:$0xff] }
 0x49c   :  { %7555 = vmatprep.subr.bf16.mxu1 %v11966_v35  ;;  %v12012_v35 = vcombine.high %v4583_v4, %v4587_v62  ;;  %v4620_v31 = vld [vmem:[#allocation10 + $0xc68] sm:$0xff]  ;;  %v13973_v53 = vpack.c.bf16 %v4211_v45, %v4211_v45 }
 0x49e   :  { %7392 = vmatpush1.bf16.msra.mxu0 %v11963_v37  ;;  %v4596_v37 = vld [vmem:[#allocation10 + $0xba8] sm:$0xff] }
 0x49f   :  { %7556 = vmatpush1.bf16.msra.mxu1 %v11965_v42  ;;  %7393 = vmatprep.subr.bf16.mxu0 %v11972_v10  ;;  %v12011_v42 = vcombine.low %v4583_v4, %v4587_v62  ;;  %v12013_v10 = vcombine.low %v4584_v2, %v4588_v51  ;;  %v12022_v56 = vcombine.high %v4592_v38, %v4596_v37  ;;  %v4624_v4 = vld [vmem:[#allocation10 + $0xc88] sm:$0xff] }
 0x4a0   :  { %7557 = vmatprep.subr.bf16.mxu1 %v11974_v21  ;;  %v12020_v21 = vcombine.high %v4591_v60, %v4595_v7  ;;  %v4628_v62 = vld [vmem:[#allocation10 + $0xca8] sm:$0xff]  ;;  %v12045_v2 = vcombine.low %v4616_v57, %v4620_v31 }
 0x4a2   :  { %7394 = vmatpush1.bf16.msra.mxu0 %v11971_v23  ;;  %v4604_v23 = vld [vmem:[#allocation10 + $0xbe8] sm:$0xff] }
 0x4a3   :  { %7558 = vmatpush1.bf16.msra.mxu1 %v11973_v33  ;;  %7395 = vmatprep.subr.bf16.mxu0 %v11980_v34  ;;  %v12019_v33 = vcombine.low %v4591_v60, %v4595_v7  ;;  %v12021_v34 = vcombine.low %v4592_v38, %v4596_v37  ;;  %v12030_v17 = vcombine.high %v4600_v29, %v4604_v23  ;;  %v4636_v60 = vld [vmem:[#allocation10 + $0xce8] sm:$0xff] }
 0x4a4   :  { %7559 = vmatprep.subr.bf16.mxu1 %v11982_v16  ;;  %v12028_v16 = vcombine.high %v4599_v14, %v4603_v15  ;;  %v12029_v41 = vcombine.low %v4600_v29, %v4604_v23  ;;  %v12053_v38 = vcombine.low %v4624_v4, %v4628_v62 }
 0x4a6   :  { %7396 = vmatpush1.bf16.msra.mxu0 %v11979_v27  ;;  %v4608_v27 = vld [vmem:[#allocation10 + $0xc08] sm:$0xff] }
 0x4a7   :  { %7560 = vmatpush1.bf16.msra.mxu1 %v11981_v36  ;;  %7397 = vmatprep.subr.bf16.mxu0 %v11988_v50  ;;  %v4612_v36 = vld [vmem:[#allocation10 + $0xc28] sm:$0xff]  ;;  %v4206_v50 = vmul.f32 1024.0, %v13909_v52 }
 0x4a8   :  { %7561 = vmatprep.subr.bf16.mxu1 %v11990_v40  ;;  %v12027_v40 = vcombine.low %v4599_v14, %v4603_v15  ;;  %v12038_v46 = vcombine.high %v4608_v27, %v4612_v36  ;;  %v12037_v54 = vcombine.low %v4608_v27, %v4612_v36  ;;  %v4644_v14 = vld [vmem:[#allocation10 + $0xd28] sm:$0xff] }
 0x4aa   :  { %7398 = vmatpush1.bf16.msra.mxu0 %v11987_v9  ;;  %v4615_v9 = vld [vmem:[#allocation10 + $0xc40] sm:$0xff] }
 0x4ab   :  { %7562 = vmatpush1.bf16.msra.mxu1 %v11989_v47  ;;  %7399 = vmatprep.subr.bf16.mxu0 %v11996_v48  ;;  %v4619_v47 = vld [vmem:[#allocation10 + $0xc60] sm:$0xff]  ;;  %v12035_v48 = vcombine.low %v4607_v25, %v4611_v28 }
 0x4ac   :  { %7563 = vmatprep.subr.bf16.mxu1 %v11998_v49  ;;  %v4214_v49 = vsel %vm4198_vm6, %v13909_v52, %v4206_v50  ;;  %v12043_v52 = vcombine.low %v4615_v9, %v4619_v47  ;;  %v4655_v50 = vld [vmem:[#allocation10 + $0xd80] sm:$0xff] }
 0x4ad   :  { %v13976_v26 = vpack.c.bf16 %v4214_v49, %v4214_v49  ;;  %v4667_v49 = vld [vmem:[#allocation10 + $0xde0] sm:$0xff] }
 0x4ae   :  { %7400 = vmatpush1.bf16.msra.mxu0 %v11995_v55  ;;  %v12044_v55 = vcombine.high %v4615_v9, %v4619_v47 }
 0x4af   :  { %7564 = vmatpush1.bf16.msra.mxu1 %v11997_v24  ;;  %7401 = vmatprep.subr.bf16.mxu0 %v12004_v22  ;;  %v4623_v24 = vld [vmem:[#allocation10 + $0xc80] sm:$0xff] }
 0x4b0   :  { %7565 = vmatprep.subr.bf16.mxu1 %v12006_v18  ;;  %v4627_v22 = vld [vmem:[#allocation10 + $0xca0] sm:$0xff]  ;;  %v12046_v18 = vcombine.high %v4616_v57, %v4620_v31  ;;  %v4664_v57 = vld [vmem:[#allocation10 + $0xdc8] sm:$0xff] }
 0x4b1   :  { %v12052_v51 = vcombine.high %v4623_v24, %v4627_v22  ;;  %v12051_v7 = vcombine.low %v4623_v24, %v4627_v22  ;;  %v4668_v31 = vld [vmem:[#allocation10 + $0xde8] sm:$0xff] }
 0x4b2   :  { %7402 = vmatpush1.bf16.msra.mxu0 %v12003_v32  ;;  %v12054_v32 = vcombine.high %v4624_v4, %v4628_v62  ;;  %v12094_v22 = vcombine.high %v4664_v57, %v4668_v31  ;;  %v4675_v4 = vld [vmem:[#allocation10 + $0xe20] sm:$0xff]  ;;  %v4672_v62 = vld [vmem:[#allocation10 + $0xe08] sm:$0xff] }
 0x4b3   :  { %7566 = vmatpush1.bf16.msra.mxu1 %v12005_v39  ;;  %7403 = vmatprep.subr.bf16.mxu0 %v12012_v35  ;;  %v4631_v39 = vld [vmem:[#allocation10 + $0xcc0] sm:$0xff] }
 0x4b4   :  { %7567 = vmatprep.subr.bf16.mxu1 %v12014_v58  ;;  %v4635_v35 = vld [vmem:[#allocation10 + $0xce0] sm:$0xff]  ;;  %v4632_v58 = vld [vmem:[#allocation10 + $0xcc8] sm:$0xff] }
 0x4b5   :  { %v12060_v37 = vcombine.high %v4631_v39, %v4635_v35  ;;  %v12059_v15 = vcombine.low %v4631_v39, %v4635_v35  ;;  %v12061_v29 = vcombine.low %v4632_v58, %v4636_v60  ;;  %v4679_v35 = vld [vmem:[#allocation10 + $0xe40] sm:$0xff] }
 0x4b6   :  { %7404 = vmatpush1.bf16.msra.mxu0 %v12011_v42  ;;  %v12062_v42 = vcombine.high %v4632_v58, %v4636_v60  ;;  %v4683_v58 = vld [vmem:[#allocation10 + $0xe60] sm:$0xff]  ;;  %v4680_v60 = vld [vmem:[#allocation10 + $0xe48] sm:$0xff] }
 0x4b7   :  { %7568 = vmatpush1.bf16.msra.mxu1 %v12013_v10  ;;  %7405 = vmatprep.subr.bf16.mxu0 %v12020_v21  ;;  %v4639_v10 = vld [vmem:[#allocation10 + $0xd00] sm:$0xff] }
 0x4b8   :  { %7569 = vmatprep.subr.bf16.mxu1 %v12022_v56  ;;  %v4643_v21 = vld [vmem:[#allocation10 + $0xd20] sm:$0xff]  ;;  %v4640_v56 = vld [vmem:[#allocation10 + $0xd08] sm:$0xff] }
 0x4b9   :  { %v12068_v23 = vcombine.high %v4639_v10, %v4643_v21  ;;  %v12067_v25 = vcombine.low %v4639_v10, %v4643_v21  ;;  %v12069_v28 = vcombine.low %v4640_v56, %v4644_v14  ;;  %v4687_v21 = vld [vmem:[#allocation10 + $0xe80] sm:$0xff] }
 0x4ba   :  { %7406 = vmatpush1.bf16.msra.mxu0 %v12019_v33  ;;  %v12070_v33 = vcombine.high %v4640_v56, %v4644_v14  ;;  %v4691_v56 = vld [vmem:[#allocation10 + $0xea0] sm:$0xff]  ;;  %v4688_v14 = vld [vmem:[#allocation10 + $0xe88] sm:$0xff] }
 0x4bb   :  { %7570 = vmatpush1.bf16.msra.mxu1 %v12021_v34  ;;  %7407 = vmatprep.subr.bf16.mxu0 %v12028_v16  ;;  %v4647_v34 = vld [vmem:[#allocation10 + $0xd40] sm:$0xff] }
 0x4bc   :  { %7571 = vmatprep.subr.bf16.mxu1 %v12030_v17  ;;  %v4651_v16 = vld [vmem:[#allocation10 + $0xd60] sm:$0xff]  ;;  %v4648_v17 = vld [vmem:[#allocation10 + $0xd48] sm:$0xff] }
 0x4bd   :  { %v12076_v27 = vcombine.high %v4647_v34, %v4651_v16  ;;  %v12078_v36 = vcombine.high %v4648_v17, %v4652_v20  ;;  %v12075_v45 = vcombine.low %v4647_v34, %v4651_v16  ;;  %v4695_v16 = vld [vmem:[#allocation10 + $0xec0] sm:$0xff] }
 0x4be   :  { %7408 = vmatpush1.bf16.msra.mxu0 %v12027_v40  ;;  %v4659_v40 = vld [vmem:[#allocation10 + $0xda0] sm:$0xff] }
 0x4bf   :  { %7572 = vmatpush1.bf16.msra.mxu1 %v12029_v41  ;;  %7418 = vmatprep.subr.bf16.mxu0 %v12036_v44  ;;  %v4656_v41 = vld [vmem:[#allocation10 + $0xd88] sm:$0xff]  ;;  %v12084_v9 = vcombine.high %v4655_v50, %v4659_v40 }
 0x4c0   :  { %7582 = vmatprep.subr.bf16.mxu1 %v12038_v46  ;;  %v4660_v44 = vld [vmem:[#allocation10 + $0xda8] sm:$0xff]  ;;  %v12077_v46 = vcombine.low %v4648_v17, %v4652_v20  ;;  %v4699_v17 = vld [vmem:[#allocation10 + $0xee0] sm:$0xff] }
 0x4c1   :  { %7410 = vmatmul.mubr.bf16.vlgmr.msra.gmra.mrb[8].mxu0 %v13973_v53  ;;  %v12086_v47 = vcombine.high %v4656_v41, %v4660_v44  ;;  %v4696_v20 = vld [vmem:[#allocation10 + $0xec8] sm:$0xff] }
 0x4c2   :  { %7574 = vmatmul.mubr.bf16.vlgmr.msra.gmra.mrb[12].mxu1 %v13973_v53  ;;  %7419 = vmatpush1.bf16.msra.mxu0 %v12035_v48  ;;  %v4663_v48 = vld [vmem:[#allocation10 + $0xdc0] sm:$0xff] }
 0x4c3   :  { %7450 = vmatprep.mubr.bf16.mxu0 %v13976_v26  ;;  %7583 = vmatpush1.bf16.msra.mxu1 %v12037_v54  ;;  %v12083_v54 = vcombine.low %v4655_v50, %v4659_v40  ;;  %v12092_v24 = vcombine.high %v4663_v48, %v4667_v49  ;;  %v4703_v40 = vld [vmem:[#allocation10 + $0xf00] sm:$0xff] }
 0x4c4   :  { %7614 = vmatprep.mubr.bf16.mxu1 %v13976_v26  ;;  %7420 = vmatprep.subr.bf16.mxu0 %v12044_v55  ;;  %v12085_v55 = vcombine.low %v4656_v41, %v4660_v44  ;;  %v4707_v41 = vld [vmem:[#allocation10 + $0xf20] sm:$0xff]  ;;  %v4704_v44 = vld [vmem:[#allocation10 + $0xf08] sm:$0xff] }
 0x4c5   :  { %7584 = vmatprep.subr.bf16.mxu1 %v12046_v18  ;;  %v4671_v18 = vld [vmem:[#allocation10 + $0xe00] sm:$0xff] }
 0x4c6   :  { %7421 = vmatpush1.bf16.msra.mxu0 %v12043_v52  ;;  %v4676_v52 = vld [vmem:[#allocation10 + $0xe28] sm:$0xff] }
 0x4c7   :  { %7585 = vmatpush1.bf16.msra.mxu1 %v12045_v2  ;;  %7422 = vmatprep.subr.bf16.mxu0 %v12052_v51  ;;  %v12091_v2 = vcombine.low %v4663_v48, %v4667_v49  ;;  %v12093_v51 = vcombine.low %v4664_v57, %v4668_v31  ;;  %v12102_v39 = vcombine.high %v4672_v62, %v4676_v52  ;;  %v4711_v49 = vld [vmem:[#allocation10 + $0xf40] sm:$0xff]  ;;  %v4712_v31 = vld [vmem:[#allocation10 + $0xf48] sm:$0xff] }
 0x4c8   :  { %7586 = vmatprep.subr.bf16.mxu1 %v12054_v32  ;;  %v12100_v32 = vcombine.high %v4671_v18, %v4675_v4  ;;  %v4715_v57 = vld [vmem:[#allocation10 + $0xf60] sm:$0xff] }
 0x4ca   :  { %7423 = vmatpush1.bf16.msra.mxu0 %v12051_v7  ;;  %v4684_v7 = vld [vmem:[#allocation10 + $0xe68] sm:$0xff] }
 0x4cb   :  { %7587 = vmatpush1.bf16.msra.mxu1 %v12053_v38  ;;  %7424 = vmatprep.subr.bf16.mxu0 %v12060_v37  ;;  %v12099_v38 = vcombine.low %v4671_v18, %v4675_v4  ;;  %v12101_v37 = vcombine.low %v4672_v62, %v4676_v52  ;;  %v12110_v10 = vcombine.high %v4680_v60, %v4684_v7  ;;  %v4719_v4 = vld [vmem:[#allocation10 + $0xf80] sm:$0xff]  ;;  %v4720_v52 = vld [vmem:[#allocation10 + $0xf88] sm:$0xff] }
 0x4cc   :  { %7588 = vmatprep.subr.bf16.mxu1 %v12062_v42  ;;  %v12108_v42 = vcombine.high %v4679_v35, %v4683_v58  ;;  %v4723_v62 = vld [vmem:[#allocation10 + $0xfa0] sm:$0xff] }
 0x4ce   :  { %7425 = vmatpush1.bf16.msra.mxu0 %v12059_v15  ;;  %v4692_v15 = vld [vmem:[#allocation10 + $0xea8] sm:$0xff] }
 0x4cf   :  { %7589 = vmatpush1.bf16.msra.mxu1 %v12061_v29  ;;  %7426 = vmatprep.subr.bf16.mxu0 %v12068_v23  ;;  %v12107_v29 = vcombine.low %v4679_v35, %v4683_v58  ;;  %v12109_v23 = vcombine.low %v4680_v60, %v4684_v7  ;;  %v12118_v34 = vcombine.high %v4688_v14, %v4692_v15  ;;  %v4727_v58 = vld [vmem:[#allocation10 + $0xfc0] sm:$0xff]  ;;  %v4728_v7 = vld [vmem:[#allocation10 + $0xfc8] sm:$0xff] }
 0x4d0   :  { %7590 = vmatprep.subr.bf16.mxu1 %v12070_v33  ;;  %v12116_v33 = vcombine.high %v4687_v21, %v4691_v56  ;;  %v4731_v60 = vld [vmem:[#allocation10 + $0xfe0] sm:$0xff] }
 0x4d2   :  { %7427 = vmatpush1.bf16.msra.mxu0 %v12067_v25  ;;  %v4700_v25 = vld [vmem:[#allocation10 + $0xee8] sm:$0xff] }
 0x4d3   :  { %7591 = vmatpush1.bf16.msra.mxu1 %v12069_v28  ;;  %7428 = vmatprep.subr.bf16.mxu0 %v12076_v27  ;;  %v12115_v28 = vcombine.low %v4687_v21, %v4691_v56  ;;  %v12117_v27 = vcombine.low %v4688_v14, %v4692_v15  ;;  %v12126_v50 = vcombine.high %v4696_v20, %v4700_v25  ;;  %v4205_v56 = vmul.f32 1024.0, %v13951_v0  ;;  %v4225_v14 = vld [vmem:[#allocation10 + $0x10] sm:$0xff] }
 0x4d4   :  { %7592 = vmatprep.subr.bf16.mxu1 %v12078_v36  ;;  %v12124_v36 = vcombine.high %v4695_v16, %v4699_v17  ;;  %v4229_v15 = vld [vmem:[#allocation10 + $0x30] sm:$0xff] }
 0x4d6   :  { %7429 = vmatpush1.bf16.msra.mxu0 %v12075_v45  ;;  %v4708_v45 = vld [vmem:[#allocation10 + $0xf28] sm:$0xff] }
 0x4d7   :  { %7593 = vmatpush1.bf16.msra.mxu1 %v12077_v46  ;;  %7430 = vmatprep.subr.bf16.mxu0 %v12084_v9  ;;  %v12123_v46 = vcombine.low %v4695_v16, %v4699_v17  ;;  %v12125_v9 = vcombine.low %v4696_v20, %v4700_v25  ;;  %v12134_v48 = vcombine.high %v4704_v44, %v4708_v45  ;;  %v4233_v25 = vld [vmem:[#allocation10 + $0x50] sm:$0xff] }
 0x4d8   :  { %7594 = vmatprep.subr.bf16.mxu1 %v12086_v47  ;;  %v12132_v47 = vcombine.high %v4703_v40, %v4707_v41  ;;  %v11656_v16 = vcombine.high %v4225_v14, %v4229_v15  ;;  %v4213_v17 = vsel %vm4197_vm7, %v13951_v0, %v4205_v56  ;;  %v4242_v0 = vld [vmem:[#allocation10 + $0x98] sm:$0xff] }
 0x4da   :  { %7431 = vmatpush1.bf16.msra.mxu0 %v12083_v54  ;;  %v4716_v54 = vld [vmem:[#allocation10 + $0xf68] sm:$0xff] }
 0x4db   :  { %7595 = vmatpush1.bf16.msra.mxu1 %v12085_v55  ;;  %7432 = vmatprep.subr.bf16.mxu0 %v12092_v24  ;;  %v12131_v55 = vcombine.low %v4703_v40, %v4707_v41  ;;  %v12133_v24 = vcombine.low %v4704_v44, %v4708_v45  ;;  %v12142_v18 = vcombine.high %v4712_v31, %v4716_v54  ;;  %v4241_v45 = vld [vmem:[#allocation10 + $0x90] sm:$0xff] }
 0x4dc   :  { %7596 = vmatprep.subr.bf16.mxu1 %v12094_v22  ;;  %v12140_v22 = vcombine.high %v4711_v49, %v4715_v57  ;;  %v13984_v40 = vpack.c.bf16 %v4213_v17, %v4213_v17 }
 0x4de   :  { %7433 = vmatpush1.bf16.msra.mxu0 %v12091_v2  ;;  %v4724_v2 = vld [vmem:[#allocation10 + $0xfa8] sm:$0xff] }
 0x4df   :  { %7597 = vmatpush1.bf16.msra.mxu1 %v12093_v51  ;;  %7434 = vmatprep.subr.bf16.mxu0 %v12100_v32  ;;  %v12139_v51 = vcombine.low %v4711_v49, %v4715_v57  ;;  %v12141_v32 = vcombine.low %v4712_v31, %v4716_v54  ;;  %v12150_v35 = vcombine.high %v4720_v52, %v4724_v2  ;;  %v4249_v54 = vld [vmem:[#allocation10 + $0xd0] sm:$0xff] }
 0x4e0   :  { %7598 = vmatprep.subr.bf16.mxu1 %v12102_v39  ;;  %v12148_v39 = vcombine.high %v4719_v4, %v4723_v62 }
 0x4e2   :  { %7435 = vmatpush1.bf16.msra.mxu0 %v12099_v38  ;;  %v4732_v38 = vld [vmem:[#allocation10 + $0xfe8] sm:$0xff] }
 0x4e3   :  { %7599 = vmatpush1.bf16.msra.mxu1 %v12101_v37  ;;  %7436 = vmatprep.subr.bf16.mxu0 %v12108_v42  ;;  %v12147_v37 = vcombine.low %v4719_v4, %v4723_v62  ;;  %v12149_v42 = vcombine.low %v4720_v52, %v4724_v2  ;;  %v12158_v21 = vcombine.high %v4728_v7, %v4732_v38  ;;  %v4257_v2 = vld [vmem:[#allocation10 + $0x110] sm:$0xff] }
 0x4e4   :  { %7600 = vmatprep.subr.bf16.mxu1 %v12110_v10  ;;  %v12156_v10 = vcombine.high %v4727_v58, %v4731_v60 }
 0x4e6   :  { %7437 = vmatpush1.bf16.msra.mxu0 %v12107_v29  ;;  %v4226_v29 = vld [vmem:[#allocation10 + $0x18] sm:$0xff] }
 0x4e7   :  { %7601 = vmatpush1.bf16.msra.mxu1 %v12109_v23  ;;  %7438 = vmatprep.subr.bf16.mxu0 %v12116_v33  ;;  %v4230_v23 = vld [vmem:[#allocation10 + $0x38] sm:$0xff]  ;;  %v12155_v33 = vcombine.low %v4727_v58, %v4731_v60 }
 0x4e8   :  { %7602 = vmatprep.subr.bf16.mxu1 %v12118_v34  ;;  %v12157_v34 = vcombine.low %v4728_v7, %v4732_v38  ;;  %v11658_v20 = vcombine.high %v4226_v29, %v4230_v23  ;;  %v11657_v41 = vcombine.low %v4226_v29, %v4230_v23  ;;  %v4265_v7 = vld [vmem:[#allocation10 + $0x150] sm:$0xff]  ;;  %v4274_v23 = vld [vmem:[#allocation10 + $0x198] sm:$0xff] }
 0x4e9   :  { %v4269_v38 = vld [vmem:[#allocation10 + $0x170] sm:$0xff] }
 0x4ea   :  { %7439 = vmatpush1.bf16.msra.mxu0 %v12115_v28  ;;  %v4237_v28 = vld [vmem:[#allocation10 + $0x70] sm:$0xff]  ;;  %v11696_v56 = vcombine.high %v4265_v7, %v4269_v38 }
 0x4eb   :  { %7603 = vmatpush1.bf16.msra.mxu1 %v12117_v27  ;;  %7440 = vmatprep.subr.bf16.mxu0 %v12124_v36  ;;  %v11655_v27 = vcombine.low %v4225_v14, %v4229_v15  ;;  %v4234_v36 = vld [vmem:[#allocation10 + $0x58] sm:$0xff]  ;;  %v11664_v44 = vcombine.high %v4233_v25, %v4237_v28  ;;  %v4273_v15 = vld [vmem:[#allocation10 + $0x190] sm:$0xff] }
 0x4ec   :  { %7604 = vmatprep.subr.bf16.mxu1 %v12126_v50  ;;  %v4238_v50 = vld [vmem:[#allocation10 + $0x78] sm:$0xff]  ;;  %v4277_v29 = vld [vmem:[#allocation10 + $0x1b0] sm:$0xff] }
 0x4ed   :  { %v11665_v49 = vcombine.low %v4234_v36, %v4238_v50  ;;  %v11704_v17 = vcombine.high %v4273_v15, %v4277_v29 }
 0x4ee   :  { %7441 = vmatpush1.bf16.msra.mxu0 %v12123_v46  ;;  %v4245_v46 = vld [vmem:[#allocation10 + $0xb0] sm:$0xff] }
 0x4ef   :  { %7605 = vmatpush1.bf16.msra.mxu1 %v12125_v9  ;;  %7442 = vmatprep.subr.bf16.mxu0 %v12132_v47  ;;  %v11666_v9 = vcombine.high %v4234_v36, %v4238_v50  ;;  %v4246_v47 = vld [vmem:[#allocation10 + $0xb8] sm:$0xff]  ;;  %v11672_v57 = vcombine.high %v4241_v45, %v4245_v46  ;;  %v11703_v50 = vcombine.low %v4273_v15, %v4277_v29  ;;  %v4321_v15 = vld [vmem:[#allocation10 + $0x310] sm:$0xff] }
 0x4f0   :  { %7606 = vmatprep.subr.bf16.mxu1 %v12134_v48  ;;  %v11663_v48 = vcombine.low %v4233_v25, %v4237_v28  ;;  %v11674_v31 = vcombine.high %v4242_v0, %v4246_v47  ;;  %v11673_v4 = vcombine.low %v4242_v0, %v4246_v47  ;;  %v4281_v25 = vld [vmem:[#allocation10 + $0x1d0] sm:$0xff]  ;;  %v4286_v36 = vld [vmem:[#allocation10 + $0x1f8] sm:$0xff] }
 0x4f1   :  { %v4285_v28 = vld [vmem:[#allocation10 + $0x1f0] sm:$0xff]  ;;  %v4290_v0 = vld [vmem:[#allocation10 + $0x218] sm:$0xff] }
 0x4f2   :  { %7443 = vmatpush1.bf16.msra.mxu0 %v12131_v55  ;;  %v4253_v55 = vld [vmem:[#allocation10 + $0xf0] sm:$0xff]  ;;  %v4294_v47 = vld [vmem:[#allocation10 + $0x238] sm:$0xff] }
 0x4f3   :  { %7607 = vmatpush1.bf16.msra.mxu1 %v12133_v24  ;;  %7444 = vmatprep.subr.bf16.mxu0 %v12140_v22  ;;  %v4250_v24 = vld [vmem:[#allocation10 + $0xd8] sm:$0xff]  ;;  %v11680_v62 = vcombine.high %v4249_v54, %v4253_v55  ;;  %v4325_v29 = vld [vmem:[#allocation10 + $0x330] sm:$0xff] }
 0x4f4   :  { %7608 = vmatprep.subr.bf16.mxu1 %v12142_v18  ;;  %v4254_v22 = vld [vmem:[#allocation10 + $0xf8] sm:$0xff]  ;;  %v11671_v18 = vcombine.low %v4241_v45, %v4245_v46  ;;  %v4289_v46 = vld [vmem:[#allocation10 + $0x210] sm:$0xff] }
 0x4f5   :  { %v11682_v52 = vcombine.high %v4250_v24, %v4254_v22 }
 0x4f6   :  { %7445 = vmatpush1.bf16.msra.mxu0 %v12139_v51  ;;  %v4261_v51 = vld [vmem:[#allocation10 + $0x130] sm:$0xff] }
 0x4f7   :  { %7609 = vmatpush1.bf16.msra.mxu1 %v12141_v32  ;;  %7446 = vmatprep.subr.bf16.mxu0 %v12148_v39  ;;  %v4258_v32 = vld [vmem:[#allocation10 + $0x118] sm:$0xff]  ;;  %v11688_v58 = vcombine.high %v4257_v2, %v4261_v51 }
 0x4f8   :  { %7610 = vmatprep.subr.bf16.mxu1 %v12150_v35  ;;  %v4262_v39 = vld [vmem:[#allocation10 + $0x138] sm:$0xff]  ;;  %v11681_v35 = vcombine.low %v4250_v24, %v4254_v22 }
 0x4f9   :  { %v11690_v60 = vcombine.high %v4258_v32, %v4262_v39  ;;  %v4298_v24 = vld [vmem:[#allocation10 + $0x258] sm:$0xff] }
 0x4fa   :  { %7447 = vmatpush1.bf16.msra.mxu0 %v12147_v37  ;;  %v4266_v37 = vld [vmem:[#allocation10 + $0x158] sm:$0xff] }
 0x4fb   :  { %7611 = vmatpush1.bf16.msra.mxu1 %v12149_v42  ;;  %7448 = vmatprep.subr.bf16.mxu0 %v12156_v10  ;;  %v4270_v42 = vld [vmem:[#allocation10 + $0x178] sm:$0xff]  ;;  %v11687_v10 = vcombine.low %v4257_v2, %v4261_v51  ;;  %v4305_v2 = vld [vmem:[#allocation10 + $0x290] sm:$0xff] }
 0x4fc   :  { %7612 = vmatprep.subr.bf16.mxu1 %v12158_v21  ;;  %v11689_v21 = vcombine.low %v4258_v32, %v4262_v39  ;;  %v11698_v14 = vcombine.high %v4266_v37, %v4270_v42  ;;  %v4302_v22 = vld [vmem:[#allocation10 + $0x278] sm:$0xff]  ;;  %v4309_v51 = vld [vmem:[#allocation10 + $0x2b0] sm:$0xff] }
 0x4fd   :  { %v4306_v32 = vld [vmem:[#allocation10 + $0x298] sm:$0xff] }
 0x4fe   :  { %7449 = vmatpush1.bf16.msra.mxu0 %v12155_v33  ;;  %v4278_v33 = vld [vmem:[#allocation10 + $0x1b8] sm:$0xff] }
 0x4ff   :  { %7613 = vmatpush1.bf16.msra.mxu1 %v12157_v34  ;;  %7623 = vmatprep.subr.bf16.mxu0 %v11656_v16  ;;  %v11695_v34 = vcombine.low %v4265_v7, %v4269_v38  ;;  %v11697_v16 = vcombine.low %v4266_v37, %v4270_v42  ;;  %v4310_v39 = vld [vmem:[#allocation10 + $0x2b8] sm:$0xff]  ;;  %v4313_v7 = vld [vmem:[#allocation10 + $0x2d0] sm:$0xff] }
 0x500   :  { %7787 = vmatprep.subr.bf16.mxu1 %v11658_v20  ;;  %v11706_v20 = vcombine.high %v4274_v23, %v4278_v33  ;;  %v4317_v38 = vld [vmem:[#allocation10 + $0x2f0] sm:$0xff]  ;;  %v4314_v37 = vld [vmem:[#allocation10 + $0x2d8] sm:$0xff] }
 0x501   :  { %7451 = vmatmul.mubr.bf16.vlgmr.msra.gmra.mrb[8].mxu0 %v13984_v40  ;;  %v4318_v42 = vld [vmem:[#allocation10 + $0x2f8] sm:$0xff] }
 0x502   :  { %7615 = vmatmul.mubr.bf16.vlgmr.msra.gmra.mrb[12].mxu1 %v13984_v40  ;;  %7624 = vmatpush1.bf16.msra.mxu0 %v11655_v27  ;;  %v4282_v27 = vld [vmem:[#allocation10 + $0x1d8] sm:$0xff] }
 0x503   :  { %7655 = vmatprep.mubr.bf16.mxu0 %v13918_v3  ;;  %7788 = vmatpush1.bf16.msra.mxu1 %v11657_v41  ;;  %v11705_v41 = vcombine.low %v4274_v23, %v4278_v33  ;;  %v11714_v45 = vcombine.high %v4282_v27, %v4286_v36  ;;  %v4322_v23 = vld [vmem:[#allocation10 + $0x318] sm:$0xff] }
 0x504   :  { %7819 = vmatprep.mubr.bf16.mxu1 %v13918_v3  ;;  %7625 = vmatprep.subr.bf16.mxu0 %v11664_v44  ;;  %v11679_v3 = vcombine.low %v4249_v54, %v4253_v55  ;;  %v11712_v44 = vcombine.high %v4281_v25, %v4285_v28  ;;  %v4297_v54 = vld [vmem:[#allocation10 + $0x250] sm:$0xff]  ;;  %v4326_v33 = vld [vmem:[#allocation10 + $0x338] sm:$0xff] }
 0x505   :  { %7789 = vmatprep.subr.bf16.mxu1 %v11666_v9  ;;  %v4293_v9 = vld [vmem:[#allocation10 + $0x230] sm:$0xff] }
 0x506   :  { %7626 = vmatpush1.bf16.msra.mxu0 %v11663_v48  ;;  %v11711_v48 = vcombine.low %v4281_v25, %v4285_v28  ;;  %v4301_v55 = vld [vmem:[#allocation10 + $0x270] sm:$0xff] }
 0x507   :  { %7790 = vmatpush1.bf16.msra.mxu1 %v11665_v49  ;;  %7627 = vmatprep.subr.bf16.mxu0 %v11672_v57  ;;  %v11713_v49 = vcombine.low %v4282_v27, %v4286_v36  ;;  %v11720_v57 = vcombine.high %v4289_v46, %v4293_v9  ;;  %v4329_v25 = vld [vmem:[#allocation10 + $0x350] sm:$0xff]  ;;  %v4330_v27 = vld [vmem:[#allocation10 + $0x358] sm:$0xff] }
 0x508   :  { %7791 = vmatprep.subr.bf16.mxu1 %v11674_v31  ;;  %v11722_v31 = vcombine.high %v4290_v0, %v4294_v47  ;;  %v4333_v28 = vld [vmem:[#allocation10 + $0x370] sm:$0xff]  ;;  %v4334_v36 = vld [vmem:[#allocation10 + $0x378] sm:$0xff] }
 0x50a   :  { %7628 = vmatpush1.bf16.msra.mxu0 %v11671_v18  ;;  %v11719_v18 = vcombine.low %v4289_v46, %v4293_v9  ;;  %v4337_v46 = vld [vmem:[#allocation10 + $0x390] sm:$0xff] }
 0x50b   :  { %7792 = vmatpush1.bf16.msra.mxu1 %v11673_v4  ;;  %7629 = vmatprep.subr.bf16.mxu0 %v11680_v62  ;;  %v11721_v4 = vcombine.low %v4290_v0, %v4294_v47  ;;  %v11728_v62 = vcombine.high %v4297_v54, %v4301_v55  ;;  %v4341_v9 = vld [vmem:[#allocation10 + $0x3b0] sm:$0xff]  ;;  %v4338_v0 = vld [vmem:[#allocation10 + $0x398] sm:$0xff] }
 0x50c   :  { %7793 = vmatprep.subr.bf16.mxu1 %v11682_v52  ;;  %v11730_v52 = vcombine.high %v4298_v24, %v4302_v22  ;;  %v4342_v47 = vld [vmem:[#allocation10 + $0x3b8] sm:$0xff] }
 0x50e   :  { %7630 = vmatpush1.bf16.msra.mxu0 %v11679_v3  ;;  %v11727_v3 = vcombine.low %v4297_v54, %v4301_v55  ;;  %v4345_v54 = vld [vmem:[#allocation10 + $0x3d0] sm:$0xff] }
 0x50f   :  { %7794 = vmatpush1.bf16.msra.mxu1 %v11681_v35  ;;  %7631 = vmatprep.subr.bf16.mxu0 %v11688_v58  ;;  %v11729_v35 = vcombine.low %v4298_v24, %v4302_v22  ;;  %v11736_v58 = vcombine.high %v4305_v2, %v4309_v51  ;;  %v4349_v55 = vld [vmem:[#allocation10 + $0x3f0] sm:$0xff]  ;;  %v4346_v24 = vld [vmem:[#allocation10 + $0x3d8] sm:$0xff] }
 0x510   :  { %7795 = vmatprep.subr.bf16.mxu1 %v11690_v60  ;;  %v11738_v60 = vcombine.high %v4306_v32, %v4310_v39  ;;  %v4350_v22 = vld [vmem:[#allocation10 + $0x3f8] sm:$0xff] }
 0x512   :  { %7632 = vmatpush1.bf16.msra.mxu0 %v11687_v10  ;;  %v11735_v10 = vcombine.low %v4305_v2, %v4309_v51  ;;  %v4353_v2 = vld [vmem:[#allocation10 + $0x410] sm:$0xff] }
 0x513   :  { %7796 = vmatpush1.bf16.msra.mxu1 %v11689_v21  ;;  %7633 = vmatprep.subr.bf16.mxu0 %v11696_v56  ;;  %v11737_v21 = vcombine.low %v4306_v32, %v4310_v39  ;;  %v11744_v56 = vcombine.high %v4313_v7, %v4317_v38  ;;  %v4357_v51 = vld [vmem:[#allocation10 + $0x430] sm:$0xff]  ;;  %v4354_v32 = vld [vmem:[#allocation10 + $0x418] sm:$0xff] }
 0x514   :  { %7797 = vmatprep.subr.bf16.mxu1 %v11698_v14  ;;  %v11746_v14 = vcombine.high %v4314_v37, %v4318_v42  ;;  %v4358_v39 = vld [vmem:[#allocation10 + $0x438] sm:$0xff] }
 0x516   :  { %7634 = vmatpush1.bf16.msra.mxu0 %v11695_v34  ;;  %v11743_v34 = vcombine.low %v4313_v7, %v4317_v38  ;;  %v4361_v7 = vld [vmem:[#allocation10 + $0x450] sm:$0xff] }
 0x517   :  { %7798 = vmatpush1.bf16.msra.mxu1 %v11697_v16  ;;  %7635 = vmatprep.subr.bf16.mxu0 %v11704_v17  ;;  %v11745_v16 = vcombine.low %v4314_v37, %v4318_v42  ;;  %v11752_v17 = vcombine.high %v4321_v15, %v4325_v29  ;;  %v4365_v38 = vld [vmem:[#allocation10 + $0x470] sm:$0xff]  ;;  %v11783_v37 = vcombine.low %v4353_v2, %v4357_v51  ;;  %v4362_v42 = vld [vmem:[#allocation10 + $0x458] sm:$0xff] }
 0x518   :  { %7799 = vmatprep.subr.bf16.mxu1 %v11706_v20  ;;  %v11754_v20 = vcombine.high %v4322_v23, %v4326_v33 }
 0x51a   :  { %7636 = vmatpush1.bf16.msra.mxu0 %v11703_v50  ;;  %v11751_v50 = vcombine.low %v4321_v15, %v4325_v29  ;;  %v4373_v15 = vld [vmem:[#allocation10 + $0x4b0] sm:$0xff] }
 0x51b   :  { %7800 = vmatpush1.bf16.msra.mxu1 %v11705_v41  ;;  %7637 = vmatprep.subr.bf16.mxu0 %v11712_v44  ;;  %v11753_v41 = vcombine.low %v4322_v23, %v4326_v33  ;;  %v11760_v44 = vcombine.high %v4329_v25, %v4333_v28  ;;  %v4370_v23 = vld [vmem:[#allocation10 + $0x498] sm:$0xff] }
 0x51c   :  { %7801 = vmatprep.subr.bf16.mxu1 %v11714_v45  ;;  %v11762_v45 = vcombine.high %v4330_v27, %v4334_v36  ;;  %v4374_v33 = vld [vmem:[#allocation10 + $0x4b8] sm:$0xff] }
 0x51e   :  { %7638 = vmatpush1.bf16.msra.mxu0 %v11711_v48  ;;  %v11759_v48 = vcombine.low %v4329_v25, %v4333_v28  ;;  %v4377_v25 = vld [vmem:[#allocation10 + $0x4d0] sm:$0xff] }
 0x51f   :  { %7802 = vmatpush1.bf16.msra.mxu1 %v11713_v49  ;;  %7639 = vmatprep.subr.bf16.mxu0 %v11720_v57  ;;  %v11761_v49 = vcombine.low %v4330_v27, %v4334_v36  ;;  %v11768_v57 = vcombine.high %v4337_v46, %v4341_v9  ;;  %v4381_v28 = vld [vmem:[#allocation10 + $0x4f0] sm:$0xff]  ;;  %v4378_v27 = vld [vmem:[#allocation10 + $0x4d8] sm:$0xff] }
 0x520   :  { %7803 = vmatprep.subr.bf16.mxu1 %v11722_v31  ;;  %v11770_v31 = vcombine.high %v4338_v0, %v4342_v47  ;;  %v4382_v36 = vld [vmem:[#allocation10 + $0x4f8] sm:$0xff] }
 0x522   :  { %7640 = vmatpush1.bf16.msra.mxu0 %v11719_v18  ;;  %v11767_v18 = vcombine.low %v4337_v46, %v4341_v9  ;;  %v4389_v46 = vld [vmem:[#allocation10 + $0x530] sm:$0xff]  ;;  %v4386_v9 = vld [vmem:[#allocation10 + $0x518] sm:$0xff] }
 0x523   :  { %7804 = vmatpush1.bf16.msra.mxu1 %v11721_v4  ;;  %7641 = vmatprep.subr.bf16.mxu0 %v11728_v62  ;;  %v11769_v4 = vcombine.low %v4338_v0, %v4342_v47  ;;  %v11776_v62 = vcombine.high %v4345_v54, %v4349_v55  ;;  %v4390_v0 = vld [vmem:[#allocation10 + $0x538] sm:$0xff]  ;;  %v11809_v47 = vcombine.low %v4378_v27, %v4382_v36 }
 0x524   :  { %7805 = vmatprep.subr.bf16.mxu1 %v11730_v52  ;;  %v11778_v52 = vcombine.high %v4346_v24, %v4350_v22 }
 0x526   :  { %7642 = vmatpush1.bf16.msra.mxu0 %v11727_v3  ;;  %v11775_v3 = vcombine.low %v4345_v54, %v4349_v55  ;;  %v4394_v54 = vld [vmem:[#allocation10 + $0x558] sm:$0xff] }
 0x527   :  { %7806 = vmatpush1.bf16.msra.mxu1 %v11729_v35  ;;  %7643 = vmatprep.subr.bf16.mxu0 %v11736_v58  ;;  %v11777_v35 = vcombine.low %v4346_v24, %v4350_v22  ;;  %v11784_v58 = vcombine.high %v4353_v2, %v4357_v51  ;;  %v4398_v55 = vld [vmem:[#allocation10 + $0x578] sm:$0xff]  ;;  %v11817_v22 = vcombine.low %v4386_v9, %v4390_v0 }
 0x528   :  { %7807 = vmatprep.subr.bf16.mxu1 %v11738_v60  ;;  %v11786_v60 = vcombine.high %v4354_v32, %v4358_v39  ;;  %v4402_v2 = vld [vmem:[#allocation10 + $0x598] sm:$0xff] }
 0x529   :  { %v4406_v51 = vld [vmem:[#allocation10 + $0x5b8] sm:$0xff] }
 0x52a   :  { %7644 = vmatpush1.bf16.msra.mxu0 %v11735_v10  ;;  %v4366_v10 = vld [vmem:[#allocation10 + $0x478] sm:$0xff] }
 0x52b   :  { %7808 = vmatpush1.bf16.msra.mxu1 %v11737_v21  ;;  %7645 = vmatprep.subr.bf16.mxu0 %v11744_v56  ;;  %v11785_v21 = vcombine.low %v4354_v32, %v4358_v39  ;;  %v11792_v56 = vcombine.high %v4361_v7, %v4365_v38  ;;  %v11794_v29 = vcombine.high %v4362_v42, %v4366_v10 }
 0x52c   :  { %7809 = vmatprep.subr.bf16.mxu1 %v11746_v14  ;;  %v4369_v14 = vld [vmem:[#allocation10 + $0x490] sm:$0xff]  ;;  %v11825_v39 = vcombine.low %v4394_v54, %v4398_v55 }
 0x52e   :  { %7646 = vmatpush1.bf16.msra.mxu0 %v11743_v34  ;;  %v11791_v34 = vcombine.low %v4361_v7, %v4365_v38  ;;  %v4410_v7 = vld [vmem:[#allocation10 + $0x5d8] sm:$0xff] }
 0x52f   :  { %7810 = vmatpush1.bf16.msra.mxu1 %v11745_v16  ;;  %7647 = vmatprep.subr.bf16.mxu0 %v11752_v17  ;;  %v11793_v16 = vcombine.low %v4362_v42, %v4366_v10  ;;  %v11800_v17 = vcombine.high %v4369_v14, %v4373_v15  ;;  %v4414_v38 = vld [vmem:[#allocation10 + $0x5f8] sm:$0xff]  ;;  %v11833_v42 = vcombine.low %v4402_v2, %v4406_v51 }
 0x530   :  { %7811 = vmatprep.subr.bf16.mxu1 %v11754_v20  ;;  %v11802_v20 = vcombine.high %v4370_v23, %v4374_v33 }
 0x532   :  { %7648 = vmatpush1.bf16.msra.mxu0 %v11751_v50  ;;  %v11799_v50 = vcombine.low %v4369_v14, %v4373_v15  ;;  %v4421_v14 = vld [vmem:[#allocation10 + $0x630] sm:$0xff]  ;;  %v4418_v15 = vld [vmem:[#allocation10 + $0x618] sm:$0xff] }
 0x533   :  { %7812 = vmatpush1.bf16.msra.mxu1 %v11753_v41  ;;  %7649 = vmatprep.subr.bf16.mxu0 %v11760_v44  ;;  %v11808_v41 = vcombine.high %v4377_v25, %v4381_v28  ;;  %v11810_v44 = vcombine.high %v4378_v27, %v4382_v36 }
 0x534   :  { %7813 = vmatprep.subr.bf16.mxu1 %v11762_v45  ;;  %v4385_v45 = vld [vmem:[#allocation10 + $0x510] sm:$0xff] }
 0x535   :  { %v11815_v24 = vcombine.low %v4385_v45, %v4389_v46 }
 0x536   :  { %7650 = vmatpush1.bf16.msra.mxu0 %v11759_v48  ;;  %v11816_v48 = vcombine.high %v4385_v45, %v4389_v46  ;;  %v4434_v45 = vld [vmem:[#allocation10 + $0x698] sm:$0xff] }
 0x537   :  { %7814 = vmatpush1.bf16.msra.mxu1 %v11761_v49  ;;  %7651 = vmatprep.subr.bf16.mxu0 %v11768_v57  ;;  %v11818_v49 = vcombine.high %v4386_v9, %v4390_v0  ;;  %v4393_v57 = vld [vmem:[#allocation10 + $0x550] sm:$0xff]  ;;  %v4438_v46 = vld [vmem:[#allocation10 + $0x6b8] sm:$0xff] }
 0x538   :  { %7815 = vmatprep.subr.bf16.mxu1 %v11770_v31  ;;  %v4397_v31 = vld [vmem:[#allocation10 + $0x570] sm:$0xff] }
 0x539   :  { %v11823_v32 = vcombine.low %v4393_v57, %v4397_v31 }
 0x53a   :  { %7652 = vmatpush1.bf16.msra.mxu0 %v11767_v18  ;;  %v11824_v18 = vcombine.high %v4393_v57, %v4397_v31  ;;  %v4442_v57 = vld [vmem:[#allocation10 + $0x6d8] sm:$0xff] }
 0x53b   :  { %7816 = vmatpush1.bf16.msra.mxu1 %v11769_v4  ;;  %7653 = vmatprep.subr.bf16.mxu0 %v11776_v62  ;;  %v11826_v4 = vcombine.high %v4394_v54, %v4398_v55  ;;  %v4401_v62 = vld [vmem:[#allocation10 + $0x590] sm:$0xff]  ;;  %v4446_v31 = vld [vmem:[#allocation10 + $0x6f8] sm:$0xff]  ;;  %v11865_v55 = vcombine.low %v4434_v45, %v4438_v46 }
 0x53c   :  { %7817 = vmatprep.subr.bf16.mxu1 %v11778_v52  ;;  %v4405_v52 = vld [vmem:[#allocation10 + $0x5b0] sm:$0xff] }
 0x53e   :  { %7654 = vmatpush1.bf16.msra.mxu0 %v11775_v3  ;;  %v11832_v3 = vcombine.high %v4401_v62, %v4405_v52 }
 0x53f   :  { %7818 = vmatpush1.bf16.msra.mxu1 %v11777_v35  ;;  %7664 = vmatprep.subr.bf16.mxu0 %v11784_v58  ;;  %v11834_v35 = vcombine.high %v4402_v2, %v4406_v51  ;;  %v4409_v58 = vld [vmem:[#allocation10 + $0x5d0] sm:$0xff]  ;;  %v11873_v51 = vcombine.low %v4442_v57, %v4446_v31 }
 0x540   :  { %7828 = vmatprep.subr.bf16.mxu1 %v11786_v60  ;;  %v4413_v60 = vld [vmem:[#allocation10 + $0x5f0] sm:$0xff] }
 0x541   :  { %7656 = vmatmul.mubr.bf16.vlgmr.msra.gmra.mrb[12].mxu0 %v13920_v6  ;;  %v11840_v10 = vcombine.high %v4409_v58, %v4413_v60 }
 0x542   :  { %7820 = vmatmul.mubr.bf16.vlgmr.msra.gmra.mrb[16].mxu1 %v13920_v6  ;;  %7665 = vmatpush1.bf16.msra.mxu0 %v11783_v37  ;;  %v11801_v6 = vcombine.low %v4370_v23, %v4374_v33  ;;  %v11831_v37 = vcombine.low %v4401_v62, %v4405_v52  ;;  %v11839_v23 = vcombine.low %v4409_v58, %v4413_v60  ;;  %v4450_v62 = vld [vmem:[#allocation10 + $0x718] sm:$0xff] }
 0x543   :  { %7696 = vmatprep.mubr.bf16.mxu0 %v13929_v8  ;;  %7829 = vmatpush1.bf16.msra.mxu1 %v11785_v21  ;;  %v11842_v21 = vcombine.high %v4410_v7, %v4414_v38  ;;  %v11841_v33 = vcombine.low %v4410_v7, %v4414_v38  ;;  %v4454_v52 = vld [vmem:[#allocation10 + $0x738] sm:$0xff] }
 0x544   :  { %7860 = vmatprep.mubr.bf16.mxu1 %v13929_v8  ;;  %7666 = vmatprep.subr.bf16.mxu0 %v11792_v56  ;;  %v11807_v8 = vcombine.low %v4377_v25, %v4381_v28  ;;  %v4417_v56 = vld [vmem:[#allocation10 + $0x610] sm:$0xff]  ;;  %v4426_v25 = vld [vmem:[#allocation10 + $0x658] sm:$0xff]  ;;  %v11881_v38 = vcombine.low %v4450_v62, %v4454_v52 }
 0x545   :  { %7830 = vmatprep.subr.bf16.mxu1 %v11794_v29  ;;  %v4422_v29 = vld [vmem:[#allocation10 + $0x638] sm:$0xff]  ;;  %v11847_v27 = vcombine.low %v4417_v56, %v4421_v14 }
 0x546   :  { %7667 = vmatpush1.bf16.msra.mxu0 %v11791_v34  ;;  %v11848_v34 = vcombine.high %v4417_v56, %v4421_v14  ;;  %v4430_v28 = vld [vmem:[#allocation10 + $0x678] sm:$0xff]  ;;  %v11849_v36 = vcombine.low %v4418_v15, %v4422_v29 }
 0x547   :  { %7831 = vmatpush1.bf16.msra.mxu1 %v11793_v16  ;;  %7668 = vmatprep.subr.bf16.mxu0 %v11800_v17  ;;  %v11850_v16 = vcombine.high %v4418_v15, %v4422_v29  ;;  %v4425_v17 = vld [vmem:[#allocation10 + $0x650] sm:$0xff]  ;;  %v11857_v0 = vcombine.low %v4426_v25, %v4430_v28  ;;  %v4458_v58 = vld [vmem:[#allocation10 + $0x758] sm:$0xff] }
 0x548   :  { %7832 = vmatprep.subr.bf16.mxu1 %v11802_v20  ;;  %v4429_v20 = vld [vmem:[#allocation10 + $0x670] sm:$0xff]  ;;  %v4462_v60 = vld [vmem:[#allocation10 + $0x778] sm:$0xff] }
 0x549   :  { %v11855_v9 = vcombine.low %v4425_v17, %v4429_v20  ;;  %v4466_v56 = vld [vmem:[#allocation10 + $0x798] sm:$0xff]  ;;  %v11889_v29 = vcombine.low %v4458_v58, %v4462_v60 }
 0x54a   :  { %7669 = vmatpush1.bf16.msra.mxu0 %v11799_v50  ;;  %v11856_v50 = vcombine.high %v4425_v17, %v4429_v20  ;;  %v4470_v14 = vld [vmem:[#allocation10 + $0x7b8] sm:$0xff] }
 0x54b   :  { %7833 = vmatpush1.bf16.msra.mxu1 %v11801_v6  ;;  %7670 = vmatprep.subr.bf16.mxu0 %v11808_v41  ;;  %v11858_v6 = vcombine.high %v4426_v25, %v4430_v28  ;;  %v4433_v41 = vld [vmem:[#allocation10 + $0x690] sm:$0xff]  ;;  %v4474_v17 = vld [vmem:[#allocation10 + $0x7d8] sm:$0xff]  ;;  %v11897_v28 = vcombine.low %v4466_v56, %v4470_v14 }
 0x54c   :  { %7834 = vmatprep.subr.bf16.mxu1 %v11810_v44  ;;  %v4437_v44 = vld [vmem:[#allocation10 + $0x6b0] sm:$0xff]  ;;  %v4478_v20 = vld [vmem:[#allocation10 + $0x7f8] sm:$0xff] }
 0x54d   :  { %v11863_v54 = vcombine.low %v4433_v41, %v4437_v44 }
 0x54e   :  { %7671 = vmatpush1.bf16.msra.mxu0 %v11807_v8  ;;  %v11864_v8 = vcombine.high %v4433_v41, %v4437_v44  ;;  %v4482_v41 = vld [vmem:[#allocation10 + $0x818] sm:$0xff] }
 0x54f   :  { %7835 = vmatpush1.bf16.msra.mxu1 %v11809_v47  ;;  %7672 = vmatprep.subr.bf16.mxu0 %v11816_v48  ;;  %v11866_v47 = vcombine.high %v4434_v45, %v4438_v46  ;;  %v4441_v48 = vld [vmem:[#allocation10 + $0x6d0] sm:$0xff]  ;;  %v4486_v44 = vld [vmem:[#allocation10 + $0x838] sm:$0xff]  ;;  %v11905_v46 = vcombine.low %v4474_v17, %v4478_v20 }
 0x550   :  { %7836 = vmatprep.subr.bf16.mxu1 %v11818_v49  ;;  %v4445_v49 = vld [vmem:[#allocation10 + $0x6f0] sm:$0xff] }
 0x551   :  { %v11871_v2 = vcombine.low %v4441_v48, %v4445_v49 }
 0x552   :  { %7673 = vmatpush1.bf16.msra.mxu0 %v11815_v24  ;;  %v11872_v24 = vcombine.high %v4441_v48, %v4445_v49  ;;  %v4490_v49 = vld [vmem:[#allocation10 + $0x858] sm:$0xff] }
 0x553   :  { %7837 = vmatpush1.bf16.msra.mxu1 %v11817_v22  ;;  %7674 = vmatprep.subr.bf16.mxu0 %v11824_v18  ;;  %v11874_v22 = vcombine.high %v4442_v57, %v4446_v31  ;;  %v4449_v18 = vld [vmem:[#allocation10 + $0x710] sm:$0xff]  ;;  %v4494_v57 = vld [vmem:[#allocation10 + $0x878] sm:$0xff]  ;;  %v11913_v31 = vcombine.low %v4482_v41, %v4486_v44 }
 0x554   :  { %7838 = vmatprep.subr.bf16.mxu1 %v11826_v4  ;;  %v4453_v4 = vld [vmem:[#allocation10 + $0x730] sm:$0xff] }
 0x555   :  { %v11879_v7 = vcombine.low %v4449_v18, %v4453_v4 }
 0x556   :  { %7675 = vmatpush1.bf16.msra.mxu0 %v11823_v32  ;;  %v11880_v32 = vcombine.high %v4449_v18, %v4453_v4  ;;  %v4498_v18 = vld [vmem:[#allocation10 + $0x898] sm:$0xff] }
 0x557   :  { %7839 = vmatpush1.bf16.msra.mxu1 %v11825_v39  ;;  %7676 = vmatprep.subr.bf16.mxu0 %v11832_v3  ;;  %v11882_v39 = vcombine.high %v4450_v62, %v4454_v52  ;;  %v4457_v3 = vld [vmem:[#allocation10 + $0x750] sm:$0xff]  ;;  %v4502_v4 = vld [vmem:[#allocation10 + $0x8b8] sm:$0xff]  ;;  %v11921_v52 = vcombine.low %v4490_v49, %v4494_v57 }
 0x558   :  { %7840 = vmatprep.subr.bf16.mxu1 %v11834_v35  ;;  %v4461_v35 = vld [vmem:[#allocation10 + $0x770] sm:$0xff] }
 0x559   :  { %v11887_v15 = vcombine.low %v4457_v3, %v4461_v35 }
 0x55a   :  { %7677 = vmatpush1.bf16.msra.mxu0 %v11831_v37  ;;  %v11888_v37 = vcombine.high %v4457_v3, %v4461_v35  ;;  %v4506_v3 = vld [vmem:[#allocation10 + $0x8d8] sm:$0xff] }
 0x55b   :  { %7841 = vmatpush1.bf16.msra.mxu1 %v11833_v42  ;;  %7678 = vmatprep.subr.bf16.mxu0 %v11840_v10  ;;  %v11890_v42 = vcombine.high %v4458_v58, %v4462_v60  ;;  %v4465_v10 = vld [vmem:[#allocation10 + $0x790] sm:$0xff]  ;;  %v4510_v35 = vld [vmem:[#allocation10 + $0x8f8] sm:$0xff] }
 0x55c   :  { %7842 = vmatprep.subr.bf16.mxu1 %v11842_v21  ;;  %v4469_v21 = vld [vmem:[#allocation10 + $0x7b0] sm:$0xff] }
 0x55d   :  { %v11895_v25 = vcombine.low %v4465_v10, %v4469_v21 }
 0x55e   :  { %7679 = vmatpush1.bf16.msra.mxu0 %v11839_v23  ;;  %v11896_v23 = vcombine.high %v4465_v10, %v4469_v21  ;;  %v4518_v10 = vld [vmem:[#allocation10 + $0x938] sm:$0xff]  ;;  %v11937_v21 = vcombine.low %v4506_v3, %v4510_v35 }
 0x55f   :  { %7843 = vmatpush1.bf16.msra.mxu1 %v11841_v33  ;;  %7680 = vmatprep.subr.bf16.mxu0 %v11848_v34  ;;  %v11898_v33 = vcombine.high %v4466_v56, %v4470_v14  ;;  %v4473_v34 = vld [vmem:[#allocation10 + $0x7d0] sm:$0xff] }
 0x560   :  { %7844 = vmatprep.subr.bf16.mxu1 %v11850_v16  ;;  %v4477_v16 = vld [vmem:[#allocation10 + $0x7f0] sm:$0xff] }
 0x561   :  { %v11903_v45 = vcombine.low %v4473_v34, %v4477_v16 }
 0x562   :  { %7681 = vmatpush1.bf16.msra.mxu0 %v11847_v27  ;;  %v11904_v27 = vcombine.high %v4473_v34, %v4477_v16 }
 0x563   :  { %7845 = vmatpush1.bf16.msra.mxu1 %v11849_v36  ;;  %7682 = vmatprep.subr.bf16.mxu0 %v11856_v50  ;;  %v11906_v36 = vcombine.high %v4474_v17, %v4478_v20  ;;  %v4481_v50 = vld [vmem:[#allocation10 + $0x810] sm:$0xff] }
 0x564   :  { %7846 = vmatprep.subr.bf16.mxu1 %v11858_v6  ;;  %v4485_v6 = vld [vmem:[#allocation10 + $0x830] sm:$0xff] }
 0x565   :  { %v11911_v48 = vcombine.low %v4481_v50, %v4485_v6 }
 0x566   :  { %7683 = vmatpush1.bf16.msra.mxu0 %v11855_v9  ;;  %v11912_v9 = vcombine.high %v4481_v50, %v4485_v6 }
 0x567   :  { %7847 = vmatpush1.bf16.msra.mxu1 %v11857_v0  ;;  %7684 = vmatprep.subr.bf16.mxu0 %v11864_v8  ;;  %v11914_v0 = vcombine.high %v4482_v41, %v4486_v44  ;;  %v4489_v8 = vld [vmem:[#allocation10 + $0x850] sm:$0xff] }
 0x568   :  { %7848 = vmatprep.subr.bf16.mxu1 %v11866_v47  ;;  %v4493_v47 = vld [vmem:[#allocation10 + $0x870] sm:$0xff] }
 0x569   :  { %v11919_v62 = vcombine.low %v4489_v8, %v4493_v47 }
 0x56a   :  { %7685 = vmatpush1.bf16.msra.mxu0 %v11863_v54  ;;  %v11920_v54 = vcombine.high %v4489_v8, %v4493_v47 }
 0x56b   :  { %7849 = vmatpush1.bf16.msra.mxu1 %v11865_v55  ;;  %7686 = vmatprep.subr.bf16.mxu0 %v11872_v24  ;;  %v4497_v55 = vld [vmem:[#allocation10 + $0x890] sm:$0xff] }
 0x56c   :  { %7850 = vmatprep.subr.bf16.mxu1 %v11874_v22  ;;  %v4501_v24 = vld [vmem:[#allocation10 + $0x8b0] sm:$0xff]  ;;  %v11922_v22 = vcombine.high %v4490_v49, %v4494_v57 }
 0x56d   :  { %v11927_v58 = vcombine.low %v4497_v55, %v4501_v24  ;;  %v4545_v57 = vld [vmem:[#allocation10 + $0xa10] sm:$0xff] }
 0x56e   :  { %7687 = vmatpush1.bf16.msra.mxu0 %v11871_v2  ;;  %v11928_v2 = vcombine.high %v4497_v55, %v4501_v24  ;;  %v4550_v55 = vld [vmem:[#allocation10 + $0xa38] sm:$0xff] }
 0x56f   :  { %7851 = vmatpush1.bf16.msra.mxu1 %v11873_v51  ;;  %7688 = vmatprep.subr.bf16.mxu0 %v11880_v32  ;;  %v11930_v51 = vcombine.high %v4498_v18, %v4502_v4  ;;  %v4505_v32 = vld [vmem:[#allocation10 + $0x8d0] sm:$0xff] }
 0x570   :  { %7852 = vmatprep.subr.bf16.mxu1 %v11882_v39  ;;  %v4509_v39 = vld [vmem:[#allocation10 + $0x8f0] sm:$0xff] }
 0x571   :  { %v11936_v60 = vcombine.high %v4505_v32, %v4509_v39 }
 0x572   :  { %7689 = vmatpush1.bf16.msra.mxu0 %v11879_v7  ;;  %v11938_v7 = vcombine.high %v4506_v3, %v4510_v35 }
 0x573   :  { %7853 = vmatpush1.bf16.msra.mxu1 %v11881_v38  ;;  %7690 = vmatprep.subr.bf16.mxu0 %v11888_v37  ;;  %v4513_v38 = vld [vmem:[#allocation10 + $0x910] sm:$0xff] }
 0x574   :  { %7854 = vmatprep.subr.bf16.mxu1 %v11890_v42  ;;  %v4517_v37 = vld [vmem:[#allocation10 + $0x930] sm:$0xff]  ;;  %v4514_v42 = vld [vmem:[#allocation10 + $0x918] sm:$0xff] }
 0x575   :  { %v11944_v56 = vcombine.high %v4513_v38, %v4517_v37  ;;  %v11946_v14 = vcombine.high %v4514_v42, %v4518_v10  ;;  %v11943_v34 = vcombine.low %v4513_v38, %v4517_v37  ;;  %v11945_v16 = vcombine.low %v4514_v42, %v4518_v10 }
 0x576   :  { %7691 = vmatpush1.bf16.msra.mxu0 %v11887_v15  ;;  %v4521_v15 = vld [vmem:[#allocation10 + $0x950] sm:$0xff] }
 0x577   :  { %7855 = vmatpush1.bf16.msra.mxu1 %v11889_v29  ;;  %7692 = vmatprep.subr.bf16.mxu0 %v11896_v23  ;;  %v4525_v29 = vld [vmem:[#allocation10 + $0x970] sm:$0xff]  ;;  %v4522_v23 = vld [vmem:[#allocation10 + $0x958] sm:$0xff] }
 0x578   :  { %7856 = vmatprep.subr.bf16.mxu1 %v11898_v33  ;;  %v4526_v33 = vld [vmem:[#allocation10 + $0x978] sm:$0xff]  ;;  %v11952_v17 = vcombine.high %v4521_v15, %v4525_v29  ;;  %v11951_v50 = vcombine.low %v4521_v15, %v4525_v29 }
 0x579   :  { %v11954_v20 = vcombine.high %v4522_v23, %v4526_v33  ;;  %v11953_v6 = vcombine.low %v4522_v23, %v4526_v33 }
 0x57a   :  { %7693 = vmatpush1.bf16.msra.mxu0 %v11895_v25  ;;  %v4529_v25 = vld [vmem:[#allocation10 + $0x990] sm:$0xff] }
 0x57b   :  { %7857 = vmatpush1.bf16.msra.mxu1 %v11897_v28  ;;  %7694 = vmatprep.subr.bf16.mxu0 %v11904_v27  ;;  %v4533_v28 = vld [vmem:[#allocation10 + $0x9b0] sm:$0xff]  ;;  %v4530_v27 = vld [vmem:[#allocation10 + $0x998] sm:$0xff] }
 0x57c   :  { %7858 = vmatprep.subr.bf16.mxu1 %v11906_v36  ;;  %v4534_v36 = vld [vmem:[#allocation10 + $0x9b8] sm:$0xff]  ;;  %v11960_v41 = vcombine.high %v4529_v25, %v4533_v28  ;;  %v11959_v8 = vcombine.low %v4529_v25, %v4533_v28 }
 0x57d   :  { %v11962_v44 = vcombine.high %v4530_v27, %v4534_v36  ;;  %v11961_v47 = vcombine.low %v4530_v27, %v4534_v36 }
 0x57e   :  { %7695 = vmatpush1.bf16.msra.mxu0 %v11903_v45  ;;  %v4537_v45 = vld [vmem:[#allocation10 + $0x9d0] sm:$0xff] }
 0x57f   :  { %7859 = vmatpush1.bf16.msra.mxu1 %v11905_v46  ;;  %7705 = vmatprep.subr.bf16.mxu0 %v11912_v9  ;;  %v4541_v46 = vld [vmem:[#allocation10 + $0x9f0] sm:$0xff]  ;;  %v4538_v9 = vld [vmem:[#allocation10 + $0x9d8] sm:$0xff] }
 0x580   :  { %7869 = vmatprep.subr.bf16.mxu1 %v11914_v0  ;;  %v4542_v0 = vld [vmem:[#allocation10 + $0x9f8] sm:$0xff]  ;;  %v11967_v24 = vcombine.low %v4537_v45, %v4541_v46 }
 0x581   :  { %7697 = vmatmul.mubr.bf16.vlgmr.msra.gmra.mrb[12].mxu0 %v13959_v30  ;;  %v11970_v49 = vcombine.high %v4538_v9, %v4542_v0 }
 0x582   :  { %7861 = vmatmul.mubr.bf16.vlgmr.msra.gmra.mrb[16].mxu1 %v13959_v30  ;;  %7706 = vmatpush1.bf16.msra.mxu0 %v11911_v48  ;;  %v11929_v30 = vcombine.low %v4498_v18, %v4502_v4  ;;  %v11968_v48 = vcombine.high %v4537_v45, %v4541_v46 }
 0x583   :  { %7737 = vmatprep.mubr.bf16.mxu0 %v13961_v5  ;;  %7870 = vmatpush1.bf16.msra.mxu1 %v11913_v31  ;;  %v4549_v31 = vld [vmem:[#allocation10 + $0xa30] sm:$0xff] }
 0x584   :  { %7901 = vmatprep.mubr.bf16.mxu1 %v13961_v5  ;;  %7707 = vmatprep.subr.bf16.mxu0 %v11920_v54  ;;  %v11935_v5 = vcombine.low %v4505_v32, %v4509_v39  ;;  %v4546_v54 = vld [vmem:[#allocation10 + $0xa18] sm:$0xff]  ;;  %v11976_v18 = vcombine.high %v4545_v57, %v4549_v31  ;;  %v11975_v32 = vcombine.low %v4545_v57, %v4549_v31 }
 0x585   :  { %7871 = vmatprep.subr.bf16.mxu1 %v11922_v22  ;;  %v11969_v22 = vcombine.low %v4538_v9, %v4542_v0  ;;  %v11978_v4 = vcombine.high %v4546_v54, %v4550_v55  ;;  %v11977_v39 = vcombine.low %v4546_v54, %v4550_v55 }
 0x586   :  { %7708 = vmatpush1.bf16.msra.mxu0 %v11919_v62  ;;  %v4553_v62 = vld [vmem:[#allocation10 + $0xa50] sm:$0xff] }
 0x587   :  { %7872 = vmatpush1.bf16.msra.mxu1 %v11921_v52  ;;  %7709 = vmatprep.subr.bf16.mxu0 %v11928_v2  ;;  %v4557_v52 = vld [vmem:[#allocation10 + $0xa70] sm:$0xff]  ;;  %v4554_v2 = vld [vmem:[#allocation10 + $0xa58] sm:$0xff] }
 0x588   :  { %7873 = vmatprep.subr.bf16.mxu1 %v11930_v51  ;;  %v4558_v51 = vld [vmem:[#allocation10 + $0xa78] sm:$0xff]  ;;  %v11984_v3 = vcombine.high %v4553_v62, %v4557_v52  ;;  %v11983_v38 = vcombine.low %v4553_v62, %v4557_v52 }
 0x589   :  { %v11986_v35 = vcombine.high %v4554_v2, %v4558_v51  ;;  %v11985_v37 = vcombine.low %v4554_v2, %v4558_v51 }
 0x58a   :  { %7710 = vmatpush1.bf16.msra.mxu0 %v11927_v58  ;;  %v4561_v58 = vld [vmem:[#allocation10 + $0xa90] sm:$0xff] }
 0x58b   :  { %7874 = vmatpush1.bf16.msra.mxu1 %v11929_v30  ;;  %7711 = vmatprep.subr.bf16.mxu0 %v11936_v60  ;;  %v4565_v30 = vld [vmem:[#allocation10 + $0xab0] sm:$0xff]  ;;  %v4562_v60 = vld [vmem:[#allocation10 + $0xa98] sm:$0xff] }
 0x58c   :  { %7875 = vmatprep.subr.bf16.mxu1 %v11938_v7  ;;  %v4566_v7 = vld [vmem:[#allocation10 + $0xab8] sm:$0xff]  ;;  %v11992_v42 = vcombine.high %v4561_v58, %v4565_v30  ;;  %v11991_v15 = vcombine.low %v4561_v58, %v4565_v30 }
 0x58d   :  { %v11994_v10 = vcombine.high %v4562_v60, %v4566_v7  ;;  %v11993_v29 = vcombine.low %v4562_v60, %v4566_v7 }
 0x58e   :  { %7712 = vmatpush1.bf16.msra.mxu0 %v11935_v5  ;;  %v4569_v5 = vld [vmem:[#allocation10 + $0xad0] sm:$0xff] }
 0x58f   :  { %7876 = vmatpush1.bf16.msra.mxu1 %v11937_v21  ;;  %7713 = vmatprep.subr.bf16.mxu0 %v11944_v56  ;;  %v4573_v21 = vld [vmem:[#allocation10 + $0xaf0] sm:$0xff]  ;;  %v4570_v56 = vld [vmem:[#allocation10 + $0xad8] sm:$0xff] }
 0x590   :  { %7877 = vmatprep.subr.bf16.mxu1 %v11946_v14  ;;  %v4574_v14 = vld [vmem:[#allocation10 + $0xaf8] sm:$0xff]  ;;  %v12000_v23 = vcombine.high %v4569_v5, %v4573_v21  ;;  %v11999_v25 = vcombine.low %v4569_v5, %v4573_v21 }
 0x591   :  { %v12002_v33 = vcombine.high %v4570_v56, %v4574_v14  ;;  %v12001_v28 = vcombine.low %v4570_v56, %v4574_v14  ;;  %v4622_v5 = vld [vmem:[#allocation10 + $0xc78] sm:$0xff]  ;;  %v4625_v14 = vld [vmem:[#allocation10 + $0xc90] sm:$0xff] }
 0x592   :  { %7714 = vmatpush1.bf16.msra.mxu0 %v11943_v34  ;;  %v4577_v34 = vld [vmem:[#allocation10 + $0xb10] sm:$0xff] }
 0x593   :  { %7878 = vmatpush1.bf16.msra.mxu1 %v11945_v16  ;;  %7715 = vmatprep.subr.bf16.mxu0 %v11952_v17  ;;  %v4581_v16 = vld [vmem:[#allocation10 + $0xb30] sm:$0xff]  ;;  %v4578_v17 = vld [vmem:[#allocation10 + $0xb18] sm:$0xff] }
 0x594   :  { %7879 = vmatprep.subr.bf16.mxu1 %v11954_v20  ;;  %v4582_v20 = vld [vmem:[#allocation10 + $0xb38] sm:$0xff]  ;;  %v12008_v27 = vcombine.high %v4577_v34, %v4581_v16  ;;  %v12007_v45 = vcombine.low %v4577_v34, %v4581_v16 }
 0x595   :  { %v12010_v36 = vcombine.high %v4578_v17, %v4582_v20  ;;  %v12009_v46 = vcombine.low %v4578_v17, %v4582_v20 }
 0x596   :  { %7716 = vmatpush1.bf16.msra.mxu0 %v11951_v50  ;;  %v4585_v50 = vld [vmem:[#allocation10 + $0xb50] sm:$0xff] }
 0x597   :  { %7880 = vmatpush1.bf16.msra.mxu1 %v11953_v6  ;;  %7717 = vmatprep.subr.bf16.mxu0 %v11960_v41  ;;  %v4589_v6 = vld [vmem:[#allocation10 + $0xb70] sm:$0xff]  ;;  %v4586_v41 = vld [vmem:[#allocation10 + $0xb58] sm:$0xff] }
 0x598   :  { %7881 = vmatprep.subr.bf16.mxu1 %v11962_v44  ;;  %v4590_v44 = vld [vmem:[#allocation10 + $0xb78] sm:$0xff]  ;;  %v12016_v9 = vcombine.high %v4585_v50, %v4589_v6  ;;  %v12015_v57 = vcombine.low %v4585_v50, %v4589_v6 }
 0x599   :  { %v12018_v0 = vcombine.high %v4586_v41, %v4590_v44  ;;  %v12017_v31 = vcombine.low %v4586_v41, %v4590_v44  ;;  %v4641_v44 = vld [vmem:[#allocation10 + $0xd10] sm:$0xff] }
 0x59a   :  { %7718 = vmatpush1.bf16.msra.mxu0 %v11959_v8  ;;  %v4593_v8 = vld [vmem:[#allocation10 + $0xb90] sm:$0xff] }
 0x59b   :  { %7882 = vmatpush1.bf16.msra.mxu1 %v11961_v47  ;;  %7719 = vmatprep.subr.bf16.mxu0 %v11968_v48  ;;  %v4597_v47 = vld [vmem:[#allocation10 + $0xbb0] sm:$0xff]  ;;  %v4594_v48 = vld [vmem:[#allocation10 + $0xb98] sm:$0xff] }
 0x59c   :  { %7883 = vmatprep.subr.bf16.mxu1 %v11970_v49  ;;  %v4598_v49 = vld [vmem:[#allocation10 + $0xbb8] sm:$0xff]  ;;  %v12024_v54 = vcombine.high %v4593_v8, %v4597_v47  ;;  %v12023_v62 = vcombine.low %v4593_v8, %v4597_v47 }
 0x59d   :  { %v12026_v55 = vcombine.high %v4594_v48, %v4598_v49  ;;  %v12025_v52 = vcombine.low %v4594_v48, %v4598_v49  ;;  %v4649_v48 = vld [vmem:[#allocation10 + $0xd50] sm:$0xff] }
 0x59e   :  { %7720 = vmatpush1.bf16.msra.mxu0 %v11967_v24  ;;  %v4601_v24 = vld [vmem:[#allocation10 + $0xbd0] sm:$0xff] }
 0x59f   :  { %7884 = vmatpush1.bf16.msra.mxu1 %v11969_v22  ;;  %7721 = vmatprep.subr.bf16.mxu0 %v11976_v18  ;;  %v4605_v22 = vld [vmem:[#allocation10 + $0xbf0] sm:$0xff]  ;;  %v4602_v18 = vld [vmem:[#allocation10 + $0xbd8] sm:$0xff] }
 0x5a0   :  { %7885 = vmatprep.subr.bf16.mxu1 %v11978_v4  ;;  %v4606_v4 = vld [vmem:[#allocation10 + $0xbf8] sm:$0xff]  ;;  %v12032_v2 = vcombine.high %v4601_v24, %v4605_v22  ;;  %v12031_v58 = vcombine.low %v4601_v24, %v4605_v22  ;;  %v4653_v49 = vld [vmem:[#allocation10 + $0xd70] sm:$0xff] }
 0x5a1   :  { %v12034_v51 = vcombine.high %v4602_v18, %v4606_v4  ;;  %v12033_v30 = vcombine.low %v4602_v18, %v4606_v4  ;;  %v12080_v24 = vcombine.high %v4649_v48, %v4653_v49  ;;  %v4657_v18 = vld [vmem:[#allocation10 + $0xd90] sm:$0xff] }
 0x5a2   :  { %7722 = vmatpush1.bf16.msra.mxu0 %v11975_v32  ;;  %v4609_v32 = vld [vmem:[#allocation10 + $0xc10] sm:$0xff] }
 0x5a3   :  { %7886 = vmatpush1.bf16.msra.mxu1 %v11977_v39  ;;  %7723 = vmatprep.subr.bf16.mxu0 %v11984_v3  ;;  %v4613_v39 = vld [vmem:[#allocation10 + $0xc30] sm:$0xff]  ;;  %v4610_v3 = vld [vmem:[#allocation10 + $0xc18] sm:$0xff] }
 0x5a4   :  { %7887 = vmatprep.subr.bf16.mxu1 %v11986_v35  ;;  %v4614_v35 = vld [vmem:[#allocation10 + $0xc38] sm:$0xff]  ;;  %v12040_v60 = vcombine.high %v4609_v32, %v4613_v39  ;;  %v4661_v4 = vld [vmem:[#allocation10 + $0xdb0] sm:$0xff] }
 0x5a5   :  { %v12042_v7 = vcombine.high %v4610_v3, %v4614_v35  ;;  %v12041_v21 = vcombine.low %v4610_v3, %v4614_v35  ;;  %v4665_v35 = vld [vmem:[#allocation10 + $0xdd0] sm:$0xff] }
 0x5a6   :  { %7724 = vmatpush1.bf16.msra.mxu0 %v11983_v38  ;;  %v4617_v38 = vld [vmem:[#allocation10 + $0xc50] sm:$0xff] }
 0x5a7   :  { %7888 = vmatpush1.bf16.msra.mxu1 %v11985_v37  ;;  %7725 = vmatprep.subr.bf16.mxu0 %v11992_v42  ;;  %v4621_v37 = vld [vmem:[#allocation10 + $0xc70] sm:$0xff]  ;;  %v12039_v42 = vcombine.low %v4609_v32, %v4613_v39  ;;  %v12088_v32 = vcombine.high %v4657_v18, %v4661_v4 }
 0x5a8   :  { %7889 = vmatprep.subr.bf16.mxu1 %v11994_v10  ;;  %v4618_v10 = vld [vmem:[#allocation10 + $0xc58] sm:$0xff]  ;;  %v12048_v56 = vcombine.high %v4617_v38, %v4621_v37  ;;  %v12047_v34 = vcombine.low %v4617_v38, %v4621_v37 }
 0x5a9   :  { %v12049_v16 = vcombine.low %v4618_v10, %v4622_v5  ;;  %v4666_v38 = vld [vmem:[#allocation10 + $0xdd8] sm:$0xff] }
 0x5aa   :  { %7726 = vmatpush1.bf16.msra.mxu0 %v11991_v15  ;;  %v4629_v15 = vld [vmem:[#allocation10 + $0xcb0] sm:$0xff]  ;;  %v4670_v37 = vld [vmem:[#allocation10 + $0xdf8] sm:$0xff] }
 0x5ab   :  { %7890 = vmatpush1.bf16.msra.mxu1 %v11993_v29  ;;  %7727 = vmatprep.subr.bf16.mxu0 %v12000_v23  ;;  %v12050_v29 = vcombine.high %v4618_v10, %v4622_v5  ;;  %v4626_v23 = vld [vmem:[#allocation10 + $0xc98] sm:$0xff]  ;;  %v12056_v17 = vcombine.high %v4625_v14, %v4629_v15  ;;  %v12055_v50 = vcombine.low %v4625_v14, %v4629_v15 }
 0x5ac   :  { %7891 = vmatprep.subr.bf16.mxu1 %v12002_v33  ;;  %v4630_v33 = vld [vmem:[#allocation10 + $0xcb8] sm:$0xff] }
 0x5ad   :  { %v12058_v20 = vcombine.high %v4626_v23, %v4630_v33 }
 0x5ae   :  { %7728 = vmatpush1.bf16.msra.mxu0 %v11999_v25  ;;  %v4633_v25 = vld [vmem:[#allocation10 + $0xcd0] sm:$0xff] }
 0x5af   :  { %7892 = vmatpush1.bf16.msra.mxu1 %v12001_v28  ;;  %7729 = vmatprep.subr.bf16.mxu0 %v12008_v27  ;;  %v4637_v28 = vld [vmem:[#allocation10 + $0xcf0] sm:$0xff]  ;;  %v4634_v27 = vld [vmem:[#allocation10 + $0xcd8] sm:$0xff] }
 0x5b0   :  { %7893 = vmatprep.subr.bf16.mxu1 %v12010_v36  ;;  %v4638_v36 = vld [vmem:[#allocation10 + $0xcf8] sm:$0xff]  ;;  %v12064_v6 = vcombine.high %v4633_v25, %v4637_v28 }
 0x5b1   :  { %v12066_v41 = vcombine.high %v4634_v27, %v4638_v36 }
 0x5b2   :  { %7730 = vmatpush1.bf16.msra.mxu0 %v12007_v45  ;;  %v4645_v45 = vld [vmem:[#allocation10 + $0xd30] sm:$0xff] }
 0x5b3   :  { %7894 = vmatpush1.bf16.msra.mxu1 %v12009_v46  ;;  %7731 = vmatprep.subr.bf16.mxu0 %v12016_v9  ;;  %v4642_v46 = vld [vmem:[#allocation10 + $0xd18] sm:$0xff]  ;;  %v12072_v8 = vcombine.high %v4641_v44, %v4645_v45 }
 0x5b4   :  { %7895 = vmatprep.subr.bf16.mxu1 %v12018_v0  ;;  %v4646_v9 = vld [vmem:[#allocation10 + $0xd38] sm:$0xff]  ;;  %v12065_v0 = vcombine.low %v4634_v27, %v4638_v36  ;;  %v4677_v27 = vld [vmem:[#allocation10 + $0xe30] sm:$0xff] }
 0x5b5   :  { %v12074_v47 = vcombine.high %v4642_v46, %v4646_v9 }
 0x5b6   :  { %7732 = vmatpush1.bf16.msra.mxu0 %v12015_v57  ;;  %v4650_v57 = vld [vmem:[#allocation10 + $0xd58] sm:$0xff] }
 0x5b7   :  { %7896 = vmatpush1.bf16.msra.mxu1 %v12017_v31  ;;  %7733 = vmatprep.subr.bf16.mxu0 %v12024_v54  ;;  %v4654_v31 = vld [vmem:[#allocation10 + $0xd78] sm:$0xff]  ;;  %v12071_v54 = vcombine.low %v4641_v44, %v4645_v45 }
 0x5b8   :  { %7897 = vmatprep.subr.bf16.mxu1 %v12026_v55  ;;  %v12073_v55 = vcombine.low %v4642_v46, %v4646_v9  ;;  %v12082_v22 = vcombine.high %v4650_v57, %v4654_v31 }
 0x5ba   :  { %7734 = vmatpush1.bf16.msra.mxu0 %v12023_v62  ;;  %v4658_v62 = vld [vmem:[#allocation10 + $0xd98] sm:$0xff] }
 0x5bb   :  { %7898 = vmatpush1.bf16.msra.mxu1 %v12025_v52  ;;  %7735 = vmatprep.subr.bf16.mxu0 %v12032_v2  ;;  %v4662_v52 = vld [vmem:[#allocation10 + $0xdb8] sm:$0xff]  ;;  %v12079_v2 = vcombine.low %v4649_v48, %v4653_v49  ;;  %v4681_v49 = vld [vmem:[#allocation10 + $0xe50] sm:$0xff] }
 0x5bc   :  { %7899 = vmatprep.subr.bf16.mxu1 %v12034_v51  ;;  %v12081_v51 = vcombine.low %v4650_v57, %v4654_v31  ;;  %v12090_v3 = vcombine.high %v4658_v62, %v4662_v52  ;;  %v4685_v57 = vld [vmem:[#allocation10 + $0xe70] sm:$0xff] }
 0x5be   :  { %7736 = vmatpush1.bf16.msra.mxu0 %v12031_v58  ;;  %v4669_v58 = vld [vmem:[#allocation10 + $0xdf0] sm:$0xff] }
 0x5bf   :  { %7900 = vmatpush1.bf16.msra.mxu1 %v12033_v30  ;;  %7746 = vmatprep.subr.bf16.mxu0 %v12040_v60  ;;  %v12095_v45 = vcombine.low %v4665_v35, %v4669_v58 }
 0x5c0   :  { %7910 = vmatprep.subr.bf16.mxu1 %v12042_v7 }
 0x5c1   :  { %7738 = vmatmul.mubr.bf16.vlgmr.msra.gmra.mrb[12].mxu0 %v13973_v53 }
 0x5c2   :  { %7902 = vmatmul.mubr.bf16.vlgmr.msra.gmra.mrb[16].mxu1 %v13973_v53  ;;  %7747 = vmatpush1.bf16.msra.mxu0 %v12039_v42  ;;  %v12057_v53 = vcombine.low %v4626_v23, %v4630_v33  ;;  %v12089_v33 = vcombine.low %v4658_v62, %v4662_v52 }
 0x5c3   :  { %7778 = vmatprep.mubr.bf16.mxu0 %v13976_v26  ;;  %7911 = vmatpush1.bf16.msra.mxu1 %v12041_v21 }
 0x5c4   :  { %7942 = vmatprep.mubr.bf16.mxu1 %v13976_v26  ;;  %7748 = vmatprep.subr.bf16.mxu0 %v12048_v56  ;;  %v12063_v26 = vcombine.low %v4633_v25, %v4637_v28  ;;  %v12087_v56 = vcombine.low %v4657_v18, %v4661_v4  ;;  %v12098_v25 = vcombine.high %v4666_v38, %v4670_v37  ;;  %v4673_v28 = vld [vmem:[#allocation10 + $0xe10] sm:$0xff] }
 0x5c5   :  { %7912 = vmatprep.subr.bf16.mxu1 %v12050_v29  ;;  %v12103_v4 = vcombine.low %v4673_v28, %v4677_v27 }
 0x5c6   :  { %7749 = vmatpush1.bf16.msra.mxu0 %v12047_v34  ;;  %v12096_v34 = vcombine.high %v4665_v35, %v4669_v58  ;;  %v4689_v58 = vld [vmem:[#allocation10 + $0xe90] sm:$0xff] }
 0x5c7   :  { %7913 = vmatpush1.bf16.msra.mxu1 %v12049_v16  ;;  %7750 = vmatprep.subr.bf16.mxu0 %v12056_v17 }
 0x5c8   :  { %7914 = vmatprep.subr.bf16.mxu1 %v12058_v20 }
 0x5ca   :  { %7751 = vmatpush1.bf16.msra.mxu0 %v12055_v50 }
 0x5cb   :  { %7915 = vmatpush1.bf16.msra.mxu1 %v12057_v53  ;;  %7752 = vmatprep.subr.bf16.mxu0 %v12064_v6  ;;  %v4674_v53 = vld [vmem:[#allocation10 + $0xe18] sm:$0xff] }
 0x5cc   :  { %7916 = vmatprep.subr.bf16.mxu1 %v12066_v41  ;;  %v4678_v6 = vld [vmem:[#allocation10 + $0xe38] sm:$0xff] }
 0x5cd   :  { %v12106_v48 = vcombine.high %v4674_v53, %v4678_v6 }
 0x5ce   :  { %7753 = vmatpush1.bf16.msra.mxu0 %v12063_v26  ;;  %v12097_v26 = vcombine.low %v4666_v38, %v4670_v37 }
 0x5cf   :  { %7917 = vmatpush1.bf16.msra.mxu1 %v12065_v0  ;;  %7754 = vmatprep.subr.bf16.mxu0 %v12072_v8  ;;  %v12104_v0 = vcombine.high %v4673_v28, %v4677_v27  ;;  %v4698_v27 = vld [vmem:[#allocation10 + $0xed8] sm:$0xff] }
 0x5d0   :  { %7918 = vmatprep.subr.bf16.mxu1 %v12074_v47 }
 0x5d2   :  { %7755 = vmatpush1.bf16.msra.mxu0 %v12071_v54 }
 0x5d3   :  { %7919 = vmatpush1.bf16.msra.mxu1 %v12073_v55  ;;  %7756 = vmatprep.subr.bf16.mxu0 %v12080_v24  ;;  %v4682_v55 = vld [vmem:[#allocation10 + $0xe58] sm:$0xff] }
 0x5d4   :  { %v14002_v39 = vpop.f32.mrb[8].mxu0  ;;  %7920 = vmatprep.subr.bf16.mxu1 %v12082_v22  ;;  %v4686_v24 = vld [vmem:[#allocation10 + $0xe78] sm:$0xff] }
 0x5d5   :  { %v7953_v30 = vrot.slane %v14002_v39, 4  ;;  %v14005_v60 = vpop.f32.mrb[12].mxu1  ;;  %v14007_v7 = vpop.f32.mrb[9].mxu0  ;;  %v12114_v35 = vcombine.high %v4682_v55, %v4686_v24 }
 0x5d6   :  { %v7965_v42 = vrot.slane %v14005_v60, 4  ;;  %v7959_v10 = vrot.slane %v14007_v7, 4  ;;  %v14011_v5 = vpop.f32.mrb[13].mxu1  ;;  %v7456_v21 = vpop.f32.mrb[10].mxu0  ;;  %7757 = vmatpush1.bf16.msra.mxu0 %v12079_v2  ;;  %v12105_v2 = vcombine.low %v4674_v53, %v4678_v6 }
 0x5d7   :  { %v7954_v14 = vadd.f32 %v7953_v30, %v14002_v39  ;;  %v7971_v15 = vrot.slane %v14011_v5, 4  ;;  %v7620_v29 = vpop.f32.mrb[14].mxu1  ;;  %7921 = vmatpush1.bf16.msra.mxu1 %v12081_v51  ;;  %v7457_v23 = vpop.f32.mrb[11].mxu0  ;;  %7758 = vmatprep.subr.bf16.mxu0 %v12088_v32  ;;  %v12112_v51 = vcombine.high %v4681_v49, %v4685_v57  ;;  %v4693_v30 = vld [vmem:[#allocation10 + $0xeb0] sm:$0xff] }
 0x5d8   :  { %v7966_v16 = vadd.f32 %v7965_v42, %v14005_v60  ;;  %v7960_v17 = vadd.f32 %v7959_v10, %v14007_v7  ;;  %v7621_v20 = vpop.f32.mrb[15].mxu1  ;;  %7922 = vmatprep.subr.bf16.mxu1 %v12090_v3  ;;  %v4690_v42 = vld [vmem:[#allocation10 + $0xe98] sm:$0xff]  ;;  %v12113_v23 = vcombine.low %v4682_v55, %v4686_v24 }
 0x5d9   :  { %v7955_v36 = vrot.slane %v7954_v14, 2  ;;  %v7972_v50 = vadd.f32 %v7971_v15, %v14011_v5  ;;  %v4694_v10 = vld [vmem:[#allocation10 + $0xeb8] sm:$0xff]  ;;  %v4697_v20 = vld [vmem:[#allocation10 + $0xed0] sm:$0xff] }
 0x5da   :  { %v7967_v41 = vrot.slane %v7966_v16, 2  ;;  %v7961_v44 = vrot.slane %v7960_v17, 2  ;;  %7759 = vmatpush1.bf16.msra.mxu0 %v12087_v56 }
 0x5db   :  { %v7956_v46 = vadd.f32 %v7955_v36, %v7954_v14  ;;  %v7973_v9 = vrot.slane %v7972_v50, 2  ;;  %7923 = vmatpush1.bf16.msra.mxu1 %v12089_v33  ;;  %7760 = vmatprep.subr.bf16.mxu0 %v12096_v34  ;;  %v12111_v14 = vcombine.low %v4681_v49, %v4685_v57  ;;  %v12120_v33 = vcombine.high %v4689_v58, %v4693_v30  ;;  %v4702_v36 = vld [vmem:[#allocation10 + $0xef8] sm:$0xff] }
 0x5dc   :  { %v7968_v8 = vadd.f32 %v7967_v41, %v7966_v16  ;;  %v7962_v47 = vadd.f32 %v7961_v44, %v7960_v17  ;;  %7924 = vmatprep.subr.bf16.mxu1 %v12098_v25  ;;  %v12122_v17 = vcombine.high %v4690_v42, %v4694_v10  ;;  %v4701_v25 = vld [vmem:[#allocation10 + $0xef0] sm:$0xff]  ;;  %v12121_v41 = vcombine.low %v4690_v42, %v4694_v10 }
 0x5dd   :  { %v7957_v31 = vrot.slane %v7956_v46, 1  ;;  %v7974_v54 = vadd.f32 %v7973_v9, %v7972_v50  ;;  %v12128_v44 = vcombine.high %v4697_v20, %v4701_v25  ;;  %v4705_v9 = vld [vmem:[#allocation10 + $0xf10] sm:$0xff]  ;;  %v12129_v24 = vcombine.low %v4698_v27, %v4702_v36 }
 0x5de   :  { %v7969_v22 = vrot.slane %v7968_v8, 1  ;;  %v7963_v18 = vrot.slane %v7962_v47, 1  ;;  %7761 = vmatpush1.bf16.msra.mxu0 %v12095_v45 }
 0x5df   :  { %v7958_v62 = vadd.f32 %v7957_v31, %v7956_v46  ;;  %v7975_v52 = vrot.slane %v7974_v54, 1  ;;  %7925 = vmatpush1.bf16.msra.mxu1 %v12097_v26  ;;  %7762 = vmatprep.subr.bf16.mxu0 %v12104_v0  ;;  %v12130_v46 = vcombine.high %v4698_v27, %v4702_v36  ;;  %v4709_v26 = vld [vmem:[#allocation10 + $0xf30] sm:$0xff]  ;;  %v12127_v31 = vcombine.low %v4697_v20, %v4701_v25  ;;  %v4722_v25 = vld [vmem:[#allocation10 + $0xf98] sm:$0xff] }
 0x5e0   :  { %v7970_v32 = vadd.f32 %v7969_v22, %v7968_v8  ;;  %v7964_v3 = vadd.f32 %v7963_v18, %v7962_v47  ;;  %7926 = vmatprep.subr.bf16.mxu1 %v12106_v48  ;;  %v4706_v47 = vld [vmem:[#allocation10 + $0xf18] sm:$0xff]  ;;  %v12136_v22 = vcombine.high %v4705_v9, %v4709_v26 }
 0x5e1   :  { %v8001_v38 = vmul.f32 0.125, %v7958_v62  ;;  %v7976_v37 = vadd.f32 %v7975_v52, %v7974_v54  ;;  %v4710_v48 = vld [vmem:[#allocation10 + $0xf38] sm:$0xff]  ;;  %v4713_v52 = vld [vmem:[#allocation10 + $0xf50] sm:$0xff] }
 0x5e2   :  { %v8003_v21 = vmul.f32 0.125, %v7970_v32  ;;  %v8002_v56 = vmul.f32 0.125, %v7964_v3  ;;  %7763 = vmatpush1.bf16.msra.mxu0 %v12103_v4  ;;  %v12138_v62 = vcombine.high %v4706_v47, %v4710_v48  ;;  %v4714_v3 = vld [vmem:[#allocation10 + $0xf58] sm:$0xff]  ;;  %v12137_v10 = vcombine.low %v4706_v47, %v4710_v48 }
 0x5e3   :  { %v14019_v15 = vsub.f32 %v14002_v39, %v8001_v38  ;;  %v8004_v29 = vmul.f32 0.125, %v7976_v37  ;;  %7927 = vmatpush1.bf16.msra.mxu1 %v12105_v2  ;;  %7764 = vmatprep.subr.bf16.mxu0 %v12112_v51  ;;  %v4717_v2 = vld [vmem:[#allocation10 + $0xf70] sm:$0xff]  ;;  %v12135_v38 = vcombine.low %v4705_v9, %v4709_v26 }
 0x5e4   :  { %v14022_v34 = vsub.f32 %v14005_v60, %v8003_v21  ;;  %v14025_v16 = vsub.f32 %v14007_v7, %v8002_v56  ;;  %7928 = vmatprep.subr.bf16.mxu1 %v12114_v35  ;;  %v12119_v7 = vcombine.low %v4689_v58, %v4693_v30  ;;  %v4718_v35 = vld [vmem:[#allocation10 + $0xf78] sm:$0xff]  ;;  %v12144_v21 = vcombine.high %v4713_v52, %v4717_v2 }
 0x5e5   :  { %v8017_v28 = vmul.f32 %v14019_v15, %v14019_v15  ;;  %v14030_v39 = vsub.f32 %v14011_v5, %v8004_v29  ;;  %v12146_v29 = vcombine.high %v4714_v3, %v4718_v35 }
 0x5e6   :  { %v8019_v50 = vmul.f32 %v14022_v34, %v14022_v34  ;;  %v8018_v60 = vmul.f32 %v14025_v16, %v14025_v16  ;;  %7765 = vmatpush1.bf16.msra.mxu0 %v12111_v14 }
 0x5e7   :  { %v8025_v53 = vrot.slane %v8017_v28, 4  ;;  %v8020_v6 = vmul.f32 %v14030_v39, %v14030_v39  ;;  %7929 = vmatpush1.bf16.msra.mxu1 %v12113_v23  ;;  %7766 = vmatprep.subr.bf16.mxu0 %v12120_v33  ;;  %v4721_v23 = vld [vmem:[#allocation10 + $0xf90] sm:$0xff] }
 0x5e8   :  { %v8037_v5 = vrot.slane %v8019_v50, 4  ;;  %v8031_v45 = vrot.slane %v8018_v60, 4  ;;  %7930 = vmatprep.subr.bf16.mxu1 %v12122_v17  ;;  %v4725_v33 = vld [vmem:[#allocation10 + $0xfb0] sm:$0xff] }
 0x5e9   :  { %v8026_v0 = vadd.f32 %v8025_v53, %v8017_v28  ;;  %v8043_v8 = vrot.slane %v8020_v6, 4  ;;  %v4726_v28 = vld [vmem:[#allocation10 + $0xfb8] sm:$0xff]  ;;  %v12145_v53 = vcombine.low %v4714_v3, %v4718_v35 }
 0x5ea   :  { %v8038_v49 = vadd.f32 %v8037_v5, %v8019_v50  ;;  %v8032_v57 = vadd.f32 %v8031_v45, %v8018_v60  ;;  %7767 = vmatpush1.bf16.msra.mxu0 %v12119_v7  ;;  %v12143_v50 = vcombine.low %v4713_v52, %v4717_v2  ;;  %v12154_v5 = vcombine.high %v4722_v25, %v4726_v28  ;;  %v4729_v45 = vld [vmem:[#allocation10 + $0xfd0] sm:$0xff] }
 0x5eb   :  { %v8027_v54 = vrot.slane %v8026_v0, 2  ;;  %v8044_v55 = vadd.f32 %v8043_v8, %v8020_v6  ;;  %7931 = vmatpush1.bf16.msra.mxu1 %v12121_v41  ;;  %7768 = vmatprep.subr.bf16.mxu0 %v12128_v44  ;;  %v12152_v6 = vcombine.high %v4721_v23, %v4725_v33  ;;  %v4734_v8 = vld [vmem:[#allocation10 + $0xff8] sm:$0xff] }
 0x5ec   :  { %v8039_v18 = vrot.slane %v8038_v49, 2  ;;  %v8033_v4 = vrot.slane %v8032_v57, 2  ;;  %7932 = vmatprep.subr.bf16.mxu1 %v12130_v46  ;;  %v4733_v46 = vld [vmem:[#allocation10 + $0xff0] sm:$0xff] }
 0x5ed   :  { %v8028_v51 = vadd.f32 %v8027_v54, %v8026_v0  ;;  %v8045_v32 = vrot.slane %v8044_v55, 2  ;;  %v4730_v0 = vld [vmem:[#allocation10 + $0xfd8] sm:$0xff]  ;;  %v12160_v54 = vcombine.high %v4729_v45, %v4733_v46 }
 0x5ee   :  { %v8040_v58 = vadd.f32 %v8039_v18, %v8038_v49  ;;  %v8034_v30 = vadd.f32 %v8033_v4, %v8032_v57  ;;  %7769 = vmatpush1.bf16.msra.mxu0 %v12127_v31  ;;  %v12151_v49 = vcombine.low %v4721_v23, %v4725_v33  ;;  %v12153_v31 = vcombine.low %v4722_v25, %v4726_v28  ;;  %v12713_v23 = vld [vmem:[#allocation14 + $0x68] ss:$24 sps:$4 sm:$0xff]   ;;  %v12718_v33 = vld [vmem:[#allocation14 + $0x94] ss:$24 sps:$4 sm:$0xff]   ;;  %v12719_v25 = vld [vmem:[#allocation14 + $0x98] ss:$24 sps:$4 sm:$0xff]  }
 0x5ef   :  { %v8029_v37 = vrot.slane %v8028_v51, 1  ;;  %v8046_v42 = vadd.f32 %v8045_v32, %v8044_v55  ;;  %7933 = vmatpush1.bf16.msra.mxu1 %v12129_v24  ;;  %7770 = vmatprep.subr.bf16.mxu0 %v12136_v22  ;;  %v12162_v55 = vcombine.high %v4730_v0, %v4734_v8  ;;  %v12159_v24 = vcombine.low %v4729_v45, %v4733_v46  ;;  %v12724_v28 = vld [vmem:[#allocation14 + $0xc4] ss:$24 sps:$4 sm:$0xff]   ;;  %v12737_v45 = vld [vmem:[#allocation14 + $0x128] ss:$24 sps:$4 sm:$0xff]  }
 0x5f0   :  { %v8041_v56 = vrot.slane %v8040_v58, 1  ;;  %v8035_v14 = vrot.slane %v8034_v30, 1  ;;  %7934 = vmatprep.subr.bf16.mxu1 %v12138_v62  ;;  %v12161_v22 = vcombine.low %v4730_v0, %v4734_v8  ;;  %v12742_v46 = vld [vmem:[#allocation14 + $0x154] ss:$24 sps:$4 sm:$0xff]   ;;  %v12743_v0 = vld [vmem:[#allocation14 + $0x158] ss:$24 sps:$4 sm:$0xff]  }
 0x5f1   :  { %v8030_v17 = vadd.f32 %v8029_v37, %v8028_v51  ;;  %v8047_v20 = vrot.slane %v8046_v42, 1  ;;  %v12701_v37 = vld [vmem:[#allocation14 + $0x8] ss:$24 sps:$4 sm:$0xff]   ;;  %v12748_v8 = vld [vmem:[#allocation14 + $0x184] ss:$24 sps:$4 sm:$0xff]  }
 0x5f2   :  { %v8042_v27 = vadd.f32 %v8041_v56, %v8040_v58  ;;  %v8036_v36 = vadd.f32 %v8035_v14, %v8034_v30  ;;  %7771 = vmatpush1.bf16.msra.mxu0 %v12135_v38  ;;  %v12700_v58 = vld [vmem:[#allocation14 + $0x4] ss:$24 sps:$4 sm:$0xff]   ;;  %v12698_v38 = vld [vmem:[#allocation14] ss:$24 sps:$4 sm:$0xff]  }
 0x5f3   :  { %v8073_v60 = vmul.f32 0.125, %v8030_v17  ;;  %v8048_v7 = vadd.f32 %v8047_v20, %v8046_v42  ;;  %7935 = vmatpush1.bf16.msra.mxu1 %v12137_v10  ;;  %7772 = vmatprep.subr.bf16.mxu0 %v12144_v21  ;;  %v12703_v30 = vld [vmem:[#allocation14 + $0xc] ss:$24 sps:$4 sm:$0xff]   ;;  %v12709_v42 = vld [vmem:[#allocation14 + $0x3c] ss:$24 sps:$4 sm:$0xff]  }
 0x5f4   :  { %v8075_v41 = vmul.f32 0.125, %v8042_v27  ;;  %v8074_v44 = vmul.f32 0.125, %v8036_v36  ;;  %7936 = vmatprep.subr.bf16.mxu1 %v12146_v29  ;;  %v12704_v10 = vld [vmem:[#allocation14 + $0x30] ss:$24 sps:$4 sm:$0xff]   ;;  %v12712_v56 = vld [vmem:[#allocation14 + $0x64] ss:$24 sps:$4 sm:$0xff]  }
 0x5f5   :  { %v8081_v9 = vadd.f32 1e-05, %v8073_v60  ;;  %v8076_v26 = vmul.f32 0.125, %v8048_v7  ;;  %v12707_v21 = vld [vmem:[#allocation14 + $0x38] ss:$24 sps:$4 sm:$0xff]  }
 0x5f6   :  { %v8083_v47 = vadd.f32 1e-05, %v8075_v41  ;;  %v8082_v48 = vadd.f32 1e-05, %v8074_v44  ;;  %7773 = vmatpush1.bf16.msra.mxu0 %v12143_v50  ;;  %v12715_v14 = vld [vmem:[#allocation14 + $0x6c] ss:$24 sps:$4 sm:$0xff]  }
 0x5f7   :  { %13290 = vrsqrt.f32 %v8081_v9  ;;  %v8084_v57 = vadd.f32 1e-05, %v8076_v26  ;;  %7937 = vmatpush1.bf16.msra.mxu1 %v12145_v53  ;;  %7774 = vmatprep.subr.bf16.mxu0 %v12152_v6  ;;  %v12710_v29 = vld [vmem:[#allocation14 + $0x60] ss:$24 sps:$4 sm:$0xff]   ;;  %v12721_v17 = vld [vmem:[#allocation14 + $0x9c] ss:$24 sps:$4 sm:$0xff]  }
 0x5f8   :  { %13292 = vrsqrt.f32 %v8083_v47  ;;  %7938 = vmatprep.subr.bf16.mxu1 %v12154_v5  ;;  %v12716_v20 = vld [vmem:[#allocation14 + $0x90] ss:$24 sps:$4 sm:$0xff]   ;;  %v12727_v27 = vld [vmem:[#allocation14 + $0xcc] ss:$24 sps:$4 sm:$0xff]   ;;  %v12722_v36 = vld [vmem:[#allocation14 + $0xc0] ss:$24 sps:$4 sm:$0xff]  }
 0x5f9   :  { %13294 = vrsqrt.f32 %v8082_v48  ;;  %v12725_v50 = vld [vmem:[#allocation14 + $0xc8] ss:$24 sps:$4 sm:$0xff]   ;;  %v12730_v60 = vld [vmem:[#allocation14 + $0xf4] ss:$24 sps:$4 sm:$0xff]   ;;  %v12731_v6 = vld [vmem:[#allocation14 + $0xf8] ss:$24 sps:$4 sm:$0xff]  }
 0x5fa   :  { %13296 = vrsqrt.f32 %v8084_v57  ;;  %7775 = vmatpush1.bf16.msra.mxu0 %v12151_v49  ;;  %v12733_v7 = vld [vmem:[#allocation14 + $0xfc] ss:$24 sps:$4 sm:$0xff]   ;;  %v12728_v53 = vld [vmem:[#allocation14 + $0xf0] ss:$24 sps:$4 sm:$0xff]   ;;  %v12739_v44 = vld [vmem:[#allocation14 + $0x12c] ss:$24 sps:$4 sm:$0xff]  }
 0x5fb   :  { %7939 = vmatpush1.bf16.msra.mxu1 %v12153_v31  ;;  %7776 = vmatprep.subr.bf16.mxu0 %v12160_v54  ;;  %v12736_v41 = vld [vmem:[#allocation14 + $0x124] ss:$24 sps:$4 sm:$0xff]   ;;  %v12734_v5 = vld [vmem:[#allocation14 + $0x120] ss:$24 sps:$4 sm:$0xff]   ;;  %v12740_v26 = vld [vmem:[#allocation14 + $0x150] ss:$24 sps:$4 sm:$0xff]  }
 0x5fc   :  { %7940 = vmatprep.subr.bf16.mxu1 %v12162_v55  ;;  %v12745_v9 = vld [vmem:[#allocation14 + $0x15c] ss:$24 sps:$4 sm:$0xff]   ;;  %v12746_v47 = vld [vmem:[#allocation14 + $0x180] ss:$24 sps:$4 sm:$0xff]   ;;  %v12751_v49 = vld [vmem:[#allocation14 + $0x18c] ss:$24 sps:$4 sm:$0xff]  }
 0x5fd   :  { %v12749_v48 = vld [vmem:[#allocation14 + $0x188] ss:$24 sps:$4 sm:$0xff]   ;;  %v12754_v57 = vld [vmem:[#allocation14 + $0x1b4] ss:$24 sps:$4 sm:$0xff]   ;;  %v12755_v55 = vld [vmem:[#allocation14 + $0x1b8] ss:$24 sps:$4 sm:$0xff]  }
 0x5fe   :  { %7777 = vmatpush1.bf16.msra.mxu0 %v12159_v24  ;;  %v12757_v31 = vld [vmem:[#allocation14 + $0x1bc] ss:$24 sps:$4 sm:$0xff]   ;;  %v12752_v54 = vld [vmem:[#allocation14 + $0x1b0] ss:$24 sps:$4 sm:$0xff]  }
 0x5ff   :  { %7941 = vmatpush1.bf16.msra.mxu1 %v12161_v22  ;;  %10622 = vmatprep.subr.bf16.mxu0 %v12700_v58  ;;  %v12760_v24 = vld [vmem:[#allocation14 + $0x1e4] ss:$24 sps:$4 sm:$0xff]   ;;  %v12770_v58 = vld [vmem:[#allocation14 + $0x240] ss:$24 sps:$4 sm:$0xff]  }
 0x600   :  { %10786 = vmatprep.subr.bf16.mxu1 %v12703_v30  ;;  %v12763_v22 = vld [vmem:[#allocation14 + $0x1ec] ss:$24 sps:$4 sm:$0xff]  }
 0x601   :  { %v13291_v18 = vpop.eup %13290  ;;  %7779 = vmatmul.mubr.bf16.vlgmr.msra.gmra.mrb[12].mxu0 %v13984_v40  ;;  %v12772_v30 = vld [vmem:[#allocation14 + $0x244] ss:$24 sps:$4 sm:$0xff]  }
 0x602   :  { %v13293_v4 = vpop.eup %13292  ;;  %7943 = vmatmul.mubr.bf16.vlgmr.msra.gmra.mrb[16].mxu1 %v13984_v40  ;;  %10623 = vmatpush1.bf16.msra.mxu0 %v12698_v38  ;;  %v12706_v40 = vld [vmem:[#allocation14 + $0x34] ss:$24 sps:$4 sm:$0xff]   ;;  %v12773_v38 = vld [vmem:[#allocation14 + $0x248] ss:$24 sps:$4 sm:$0xff]  }
 0x603   :  { %v13295_v62 = vpop.eup %13294  ;;  %10787 = vmatpush1.bf16.msra.mxu1 %v12701_v37  ;;  %10624 = vmatprep.subr.bf16.mxu0 %v12706_v40  ;;  %v12775_v37 = vld [vmem:[#allocation14 + $0x24c] ss:$24 sps:$4 sm:$0xff]  }
 0x604   :  { %v13297_v52 = vpop.eup %13296  ;;  %v8105_v2 = vcombine.low %v13291_v18, %v13295_v62  ;;  %10788 = vmatprep.subr.bf16.mxu1 %v12709_v42  ;;  %v12758_v18 = vld [vmem:[#allocation14 + $0x1e0] ss:$24 sps:$4 sm:$0xff]   ;;  %v12766_v62 = vld [vmem:[#allocation14 + $0x214] ss:$24 sps:$4 sm:$0xff]  }
 0x605   :  { %v8106_v51 = vcombine.low %v13293_v4, %v13297_v52  ;;  %v12761_v4 = vld [vmem:[#allocation14 + $0x1e8] ss:$24 sps:$4 sm:$0xff]   ;;  %v12769_v52 = vld [vmem:[#allocation14 + $0x21c] ss:$24 sps:$4 sm:$0xff]  }
 0x606   :  { %v14041_v32 = vrot.slane %v8105_v2, %v13803_v59  ;;  %10625 = vmatpush1.bf16.msra.mxu0 %v12704_v10  ;;  %v12764_v2 = vld [vmem:[#allocation14 + $0x210] ss:$24 sps:$4 sm:$0xff]   ;;  %v12778_v40 = vld [vmem:[#allocation14 + $0x274] ss:$24 sps:$4 sm:$0xff]  }
 0x607   :  { %v14044_v3 = vrot.slane %v8106_v51, %v13803_v59  ;;  %10789 = vmatpush1.bf16.msra.mxu1 %v12707_v21  ;;  %10626 = vmatprep.subr.bf16.mxu0 %v12712_v56  ;;  %v12767_v51 = vld [vmem:[#allocation14 + $0x218] ss:$24 sps:$4 sm:$0xff]   ;;  %v12781_v42 = vld [vmem:[#allocation14 + $0x27c] ss:$24 sps:$4 sm:$0xff]  }
 0x608   :  { %10790 = vmatprep.subr.bf16.mxu1 %v12715_v14  ;;  %v12776_v10 = vld [vmem:[#allocation14 + $0x270] ss:$24 sps:$4 sm:$0xff]   ;;  %v12784_v56 = vld [vmem:[#allocation14 + $0x2a4] ss:$24 sps:$4 sm:$0xff]  }
 0x609   :  { %v8137_v35 = vcombine.low %v14041_v32, %v14044_v3  ;;  %v12779_v21 = vld [vmem:[#allocation14 + $0x278] ss:$24 sps:$4 sm:$0xff]   ;;  %v12787_v14 = vld [vmem:[#allocation14 + $0x2ac] ss:$24 sps:$4 sm:$0xff]  }
 0x60a   :  { %10627 = vmatpush1.bf16.msra.mxu0 %v12710_v29  ;;  %v12782_v29 = vld [vmem:[#allocation14 + $0x2a0] ss:$24 sps:$4 sm:$0xff]  }
 0x60b   :  { %10791 = vmatpush1.bf16.msra.mxu1 %v12713_v23  ;;  %10628 = vmatprep.subr.bf16.mxu0 %v12718_v33  ;;  %v12785_v23 = vld [vmem:[#allocation14 + $0x2a8] ss:$24 sps:$4 sm:$0xff]   ;;  %v12790_v33 = vld [vmem:[#allocation14 + $0x2d4] ss:$24 sps:$4 sm:$0xff]  }
 0x60c   :  { %10792 = vmatprep.subr.bf16.mxu1 %v12721_v17  ;;  %v12793_v17 = vld [vmem:[#allocation14 + $0x2dc] ss:$24 sps:$4 sm:$0xff]  }
 0x60e   :  { %10629 = vmatpush1.bf16.msra.mxu0 %v12716_v20  ;;  %v12788_v20 = vld [vmem:[#allocation14 + $0x2d0] ss:$24 sps:$4 sm:$0xff]  }
 0x60f   :  { %10793 = vmatpush1.bf16.msra.mxu1 %v12719_v25  ;;  %10630 = vmatprep.subr.bf16.mxu0 %v12724_v28  ;;  %v12791_v25 = vld [vmem:[#allocation14 + $0x2d8] ss:$24 sps:$4 sm:$0xff]   ;;  %v12796_v28 = vld [vmem:[#allocation14 + $0x304] ss:$24 sps:$4 sm:$0xff]  }
 0x610   :  { %10794 = vmatprep.subr.bf16.mxu1 %v12727_v27  ;;  %v12799_v27 = vld [vmem:[#allocation14 + $0x30c] ss:$24 sps:$4 sm:$0xff]  }
 0x612   :  { %10631 = vmatpush1.bf16.msra.mxu0 %v12722_v36 }
 0x613   :  { %10795 = vmatpush1.bf16.msra.mxu1 %v12725_v50  ;;  %10632 = vmatprep.subr.bf16.mxu0 %v12730_v60 }
 0x614   :  { %10796 = vmatprep.subr.bf16.mxu1 %v12733_v7 }
 0x616   :  { %10633 = vmatpush1.bf16.msra.mxu0 %v12728_v53 }
 0x617   :  { %10797 = vmatpush1.bf16.msra.mxu1 %v12731_v6  ;;  %10634 = vmatprep.subr.bf16.mxu0 %v12736_v41 }
 0x618   :  { %10798 = vmatprep.subr.bf16.mxu1 %v12739_v44 }
 0x61a   :  { %10635 = vmatpush1.bf16.msra.mxu0 %v12734_v5 }
 0x61b   :  { %10799 = vmatpush1.bf16.msra.mxu1 %v12737_v45  ;;  %10636 = vmatprep.subr.bf16.mxu0 %v12742_v46 }
 0x61c   :  { %10800 = vmatprep.subr.bf16.mxu1 %v12745_v9 }
 0x61e   :  { %10637 = vmatpush1.bf16.msra.mxu0 %v12740_v26 }
 0x61f   :  { %10801 = vmatpush1.bf16.msra.mxu1 %v12743_v0  ;;  %10638 = vmatprep.subr.bf16.mxu0 %v12748_v8 }
 0x620   :  { %10802 = vmatprep.subr.bf16.mxu1 %v12751_v49 }
 0x622   :  { %10639 = vmatpush1.bf16.msra.mxu0 %v12746_v47 }
 0x623   :  { %10803 = vmatpush1.bf16.msra.mxu1 %v12749_v48  ;;  %10640 = vmatprep.subr.bf16.mxu0 %v12754_v57 }
 0x624   :  { %10804 = vmatprep.subr.bf16.mxu1 %v12757_v31 }
 0x626   :  { %10641 = vmatpush1.bf16.msra.mxu0 %v12752_v54 }
 0x627   :  { %10805 = vmatpush1.bf16.msra.mxu1 %v12755_v55  ;;  %10642 = vmatprep.subr.bf16.mxu0 %v12760_v24 }
 0x628   :  { %10806 = vmatprep.subr.bf16.mxu1 %v12763_v22 }
 0x62a   :  { %10643 = vmatpush1.bf16.msra.mxu0 %v12758_v18 }
 0x62b   :  { %10807 = vmatpush1.bf16.msra.mxu1 %v12761_v4  ;;  %10644 = vmatprep.subr.bf16.mxu0 %v12766_v62 }
 0x62c   :  { %10808 = vmatprep.subr.bf16.mxu1 %v12769_v52 }
 0x62e   :  { %10645 = vmatpush1.bf16.msra.mxu0 %v12764_v2 }
 0x62f   :  { %10809 = vmatpush1.bf16.msra.mxu1 %v12767_v51  ;;  %10646 = vmatprep.subr.bf16.mxu0 %v12772_v30 }
 0x630   :  { %10810 = vmatprep.subr.bf16.mxu1 %v12775_v37 }
 0x632   :  { %10647 = vmatpush1.bf16.msra.mxu0 %v12770_v58 }
 0x633   :  { %10811 = vmatpush1.bf16.msra.mxu1 %v12773_v38  ;;  %10648 = vmatprep.subr.bf16.mxu0 %v12778_v40 }
 0x634   :  { %10812 = vmatprep.subr.bf16.mxu1 %v12781_v42 }
 0x636   :  { %10649 = vmatpush1.bf16.msra.mxu0 %v12776_v10 }
 0x637   :  { %10813 = vmatpush1.bf16.msra.mxu1 %v12779_v21  ;;  %10650 = vmatprep.subr.bf16.mxu0 %v12784_v56 }
 0x638   :  { %10814 = vmatprep.subr.bf16.mxu1 %v12787_v14 }
 0x63a   :  { %10651 = vmatpush1.bf16.msra.mxu0 %v12782_v29 }
 0x63b   :  { %10815 = vmatpush1.bf16.msra.mxu1 %v12785_v23  ;;  %10652 = vmatprep.subr.bf16.mxu0 %v12790_v33 }
 0x63c   :  { %10816 = vmatprep.subr.bf16.mxu1 %v12793_v17 }
 0x63e   :  { %10653 = vmatpush1.bf16.msra.mxu0 %v12788_v20 }
 0x63f   :  { %10817 = vmatpush1.bf16.msra.mxu1 %v12791_v25  ;;  %10663 = vmatprep.subr.bf16.mxu0 %v12796_v28 }
 0x640   :  { %10827 = vmatprep.subr.bf16.mxu1 %v12799_v27 }
 0x6d4   :  { %v7780_v36 = vpop.f32.mrb[12].mxu0 }
 0x6d5   :  { %v7977_v50 = vrot.slane %v7780_v36, 4  ;;  %v7944_v60 = vpop.f32.mrb[16].mxu1  ;;  %v7782_v7 = vpop.f32.mrb[13].mxu0 }
 0x6d6   :  { %v7989_v53 = vrot.slane %v7944_v60, 4  ;;  %v7983_v6 = vrot.slane %v7782_v7, 4  ;;  %v7946_v41 = vpop.f32.mrb[17].mxu1  ;;  %v7784_v44 = vpop.f32.mrb[14].mxu0 }
 0x6d7   :  { %v7978_v5 = vadd.f32 %v7977_v50, %v7780_v36  ;;  %v7995_v45 = vrot.slane %v7946_v41, 4  ;;  %v7948_v46 = vpop.f32.mrb[18].mxu1  ;;  %v7785_v9 = vpop.f32.mrb[15].mxu0 }
 0x6d8   :  { %v7990_v26 = vadd.f32 %v7989_v53, %v7944_v60  ;;  %v7984_v0 = vadd.f32 %v7983_v6, %v7782_v7  ;;  %v7949_v8 = vpop.f32.mrb[19].mxu1 }
 0x6d9   :  { %v7979_v47 = vrot.slane %v7978_v5, 2  ;;  %v7996_v48 = vadd.f32 %v7995_v45, %v7946_v41 }
 0x6da   :  { %v7991_v49 = vrot.slane %v7990_v26, 2  ;;  %v7985_v57 = vrot.slane %v7984_v0, 2 }
 0x6db   :  { %v7980_v31 = vadd.f32 %v7979_v47, %v7978_v5  ;;  %v7997_v54 = vrot.slane %v7996_v48, 2 }
 0x6dc   :  { %v7992_v55 = vadd.f32 %v7991_v49, %v7990_v26  ;;  %v7986_v24 = vadd.f32 %v7985_v57, %v7984_v0 }
 0x6dd   :  { %v7981_v22 = vrot.slane %v7980_v31, 1  ;;  %v7998_v18 = vadd.f32 %v7997_v54, %v7996_v48 }
 0x6de   :  { %v7993_v4 = vrot.slane %v7992_v55, 1  ;;  %v7987_v62 = vrot.slane %v7986_v24, 1 }
 0x6df   :  { %v7982_v52 = vadd.f32 %v7981_v22, %v7980_v31  ;;  %v7999_v2 = vrot.slane %v7998_v18, 1 }
 0x6e0   :  { %v7994_v51 = vadd.f32 %v7993_v4, %v7992_v55  ;;  %v7988_v58 = vadd.f32 %v7987_v62, %v7986_v24 }
 0x6e1   :  { %v8005_v30 = vmul.f32 0.125, %v7982_v52  ;;  %v8000_v38 = vadd.f32 %v7999_v2, %v7998_v18 }
 0x6e2   :  { %v8007_v37 = vmul.f32 0.125, %v7994_v51  ;;  %v8006_v40 = vmul.f32 0.125, %v7988_v58 }
 0x6e3   :  { %v14048_v42 = vsub.f32 %v7780_v36, %v8005_v30  ;;  %v8008_v10 = vmul.f32 0.125, %v8000_v38 }
 0x6e4   :  { %v14050_v21 = vsub.f32 %v7944_v60, %v8007_v37  ;;  %v14052_v56 = vsub.f32 %v7782_v7, %v8006_v40 }
 0x6e5   :  { %v8021_v14 = vmul.f32 %v14048_v42, %v14048_v42  ;;  %v14056_v29 = vsub.f32 %v7946_v41, %v8008_v10 }
 0x6e6   :  { %v8023_v23 = vmul.f32 %v14050_v21, %v14050_v21  ;;  %v8022_v33 = vmul.f32 %v14052_v56, %v14052_v56 }
 0x6e7   :  { %v8049_v17 = vrot.slane %v8021_v14, 4  ;;  %v8024_v20 = vmul.f32 %v14056_v29, %v14056_v29 }
 0x6e8   :  { %v8061_v25 = vrot.slane %v8023_v23, 4  ;;  %v8055_v28 = vrot.slane %v8022_v33, 4 }
 0x6e9   :  { %v8050_v27 = vadd.f32 %v8049_v17, %v8021_v14  ;;  %v8067_v36 = vrot.slane %v8024_v20, 4 }
 0x6ea   :  { %v8062_v50 = vadd.f32 %v8061_v25, %v8023_v23  ;;  %v8056_v60 = vadd.f32 %v8055_v28, %v8022_v33  ;;  %v8145_v23 = vrot.slane %v8137_v35, %v13803_v59  ;;  %v7952_v33 = vld [vmem:[#allocation13] sm:$0xff] }
 0x6eb   :  { %v8051_v7 = vrot.slane %v8050_v27, 2  ;;  %v8068_v53 = vadd.f32 %v8067_v36, %v8024_v20  ;;  %v7951_v20 = vld [vmem:[#allocation11] sm:$0xff]  ;;  %v8237_v28 = vrot.slane %v7952_v33, %v13859_v61  ;;  %v8213_v36 = vrot.slane %v7952_v33, %v13864_v11 }
 0x6ec   :  { %v8063_v6 = vrot.slane %v8062_v50, 2  ;;  %v8057_v41 = vrot.slane %v8056_v60, 2  ;;  %v8225_v32 = vrot.slane %v7952_v33, %v13916_v1  ;;  %v8233_v3 = vrot.slane %v7952_v33, %v13925_v43 }
 0x6ed   :  { %v8052_v44 = vadd.f32 %v8051_v7, %v8050_v27  ;;  %v8069_v5 = vrot.slane %v8068_v53, 2  ;;  %v8217_v7 = vrot.slane %v7952_v33, %v13873_v63 }
 0x6ee   :  { %v8064_v45 = vadd.f32 %v8063_v6, %v8062_v50  ;;  %v8058_v46 = vadd.f32 %v8057_v41, %v8056_v60  ;;  %v8209_v50 = vrot.slane %v7952_v33, %v13867_v12  ;;  %v8221_v60 = vrot.slane %v7952_v33, %v13870_v13 }
 0x6ef   :  { %v8053_v9 = vrot.slane %v8052_v44, 1  ;;  %v8070_v26 = vadd.f32 %v8069_v5, %v8068_v53  ;;  %v8229_v53 = vrot.slane %v7952_v33, %v13876_v19  ;;  %v12812_v33 = vld [vmem:[#allocation14 + $0x390] ss:$24 sps:$4 sm:$0xff]  }
 0x6f0   :  { %v8065_v0 = vrot.slane %v8064_v45, 1  ;;  %v8059_v8 = vrot.slane %v8058_v46, 1 }
 0x6f1   :  { %v8054_v47 = vadd.f32 %v8053_v9, %v8052_v44  ;;  %v8071_v48 = vrot.slane %v8070_v26, 1 }
 0x6f2   :  { %v8066_v49 = vadd.f32 %v8065_v0, %v8064_v45  ;;  %v8060_v57 = vadd.f32 %v8059_v8, %v8058_v46 }
 0x6f3   :  { %v8077_v31 = vmul.f32 0.125, %v8054_v47  ;;  %v8072_v54 = vadd.f32 %v8071_v48, %v8070_v26 }
 0x6f4   :  { %v8079_v55 = vmul.f32 0.125, %v8066_v49  ;;  %v8078_v24 = vmul.f32 0.125, %v8060_v57 }
 0x6f5   :  { %v8085_v22 = vadd.f32 1e-05, %v8077_v31  ;;  %v8080_v18 = vmul.f32 0.125, %v8072_v54 }
 0x6f6   :  { %v8087_v4 = vadd.f32 1e-05, %v8079_v55  ;;  %v8086_v62 = vadd.f32 1e-05, %v8078_v24 }
 0x6f7   :  { %13298 = vrsqrt.f32 %v8085_v22  ;;  %v8088_v52 = vadd.f32 1e-05, %v8080_v18  ;;  %v12794_v22 = vld [vmem:[#allocation14 + $0x300] ss:$24 sps:$4 sm:$0xff]  }
 0x6f8   :  { %13300 = vrsqrt.f32 %v8087_v4  ;;  %v12797_v18 = vld [vmem:[#allocation14 + $0x308] ss:$24 sps:$4 sm:$0xff]  }
 0x6f9   :  { %13302 = vrsqrt.f32 %v8086_v62 }
 0x6fa   :  { %13304 = vrsqrt.f32 %v8088_v52  ;;  %v12802_v52 = vld [vmem:[#allocation14 + $0x334] ss:$24 sps:$4 sm:$0xff]  }
 0x701   :  { %v13299_v2 = vpop.eup %13298 }
 0x702   :  { %v13301_v51 = vpop.eup %13300 }
 0x703   :  { %v13303_v58 = vpop.eup %13302 }
 0x704   :  { %v13305_v30 = vpop.eup %13304  ;;  %v8107_v38 = vcombine.low %v13299_v2, %v13303_v58  ;;  %v12805_v2 = vld [vmem:[#allocation14 + $0x33c] ss:$24 sps:$4 sm:$0xff]   ;;  %v12800_v58 = vld [vmem:[#allocation14 + $0x330] ss:$24 sps:$4 sm:$0xff]  }
 0x705   :  { %v8108_v37 = vcombine.low %v13301_v51, %v13305_v30  ;;  %v12803_v30 = vld [vmem:[#allocation14 + $0x338] ss:$24 sps:$4 sm:$0xff]  }
 0x706   :  { %v8129_v40 = vrot.slane %v8107_v38, %v13803_v59  ;;  %v12808_v38 = vld [vmem:[#allocation14 + $0x364] ss:$24 sps:$4 sm:$0xff]  }
 0x707   :  { %v8136_v10 = vrot.slane %v8108_v37, %v13803_v59  ;;  %v12811_v37 = vld [vmem:[#allocation14 + $0x36c] ss:$24 sps:$4 sm:$0xff]  }
 0x709   :  { %v8138_v14 = vcombine.low %v8129_v40, %v8136_v10  ;;  %v12806_v40 = vld [vmem:[#allocation14 + $0x360] ss:$24 sps:$4 sm:$0xff]  }
 0x70a   :  { %v12809_v10 = vld [vmem:[#allocation14 + $0x368] ss:$24 sps:$4 sm:$0xff]  }
 0x70b   :  { %v8152_v17 = vrot.slane %v8138_v14, %v13803_v59  ;;  %v12814_v14 = vld [vmem:[#allocation14 + $0x394] ss:$24 sps:$4 sm:$0xff]  }
 0x70d   :  { %v8153_v25 = vcombine.low %v8145_v23, %v8152_v17  ;;  %v12817_v23 = vld [vmem:[#allocation14 + $0x39c] ss:$24 sps:$4 sm:$0xff]   ;;  %v12815_v17 = vld [vmem:[#allocation14 + $0x398] ss:$24 sps:$4 sm:$0xff]  }
 0x70f   :  { %v8155_v27 = vmul.f32 %v8153_v25, %v7951_v20  ;;  %v12820_v20 = vld [vmem:[#allocation14 + $0x3c4] ss:$24 sps:$4 sm:$0xff]  }
 0x710   :  { %v12823_v25 = vld [vmem:[#allocation14 + $0x3cc] ss:$24 sps:$4 sm:$0xff]  }
 0x711   :  { %v8188_v59 = vrot.slane %v8155_v27, %v13859_v61  ;;  %v8164_v35 = vrot.slane %v8155_v27, %v13864_v11  ;;  %v8160_v6 = vrot.slane %v8155_v27, %v13867_v12  ;;  %v8172_v41 = vrot.slane %v8155_v27, %v13870_v13 }
 0x712   :  { %v8168_v44 = vrot.slane %v8155_v27, %v13873_v63  ;;  %v8180_v5 = vrot.slane %v8155_v27, %v13876_v19  ;;  %v8176_v45 = vrot.slane %v8155_v27, %v13916_v1  ;;  %v8184_v46 = vrot.slane %v8155_v27, %v13925_v43  ;;  %v12821_v27 = vld [vmem:[#allocation14 + $0x3c8] ss:$24 sps:$4 sm:$0xff]  }
 0x713   :  { %v8204_v9 = vmul.f32 %v8188_v59, %v14056_v29  ;;  %v8198_v26 = vmul.f32 %v8164_v35, %v14025_v16  ;;  %v8197_v61 = vmul.f32 %v8160_v6, %v14019_v15  ;;  %v8200_v0 = vmul.f32 %v8172_v41, %v14030_v39  ;;  %v12833_v59 = vld [vmem:[#allocation14 + $0x428] ss:$24 sps:$4 sm:$0xff]   ;;  %v12838_v35 = vld [vmem:[#allocation14 + $0x454] ss:$24 sps:$4 sm:$0xff]  }
 0x714   :  { %v8199_v8 = vmul.f32 %v8168_v44, %v14022_v34  ;;  %v8202_v47 = vmul.f32 %v8180_v5, %v14052_v56  ;;  %v8201_v48 = vmul.f32 %v8176_v45, %v14048_v42  ;;  %v8203_v49 = vmul.f32 %v8184_v46, %v14050_v21  ;;  %v12841_v6 = vld [vmem:[#allocation14 + $0x45c] ss:$24 sps:$4 sm:$0xff]   ;;  %v12836_v41 = vld [vmem:[#allocation14 + $0x450] ss:$24 sps:$4 sm:$0xff]   ;;  %v12847_v45 = vld [vmem:[#allocation14 + $0x48c] ss:$24 sps:$4 sm:$0xff]  }
 0x715   :  { %v14095_v57 = vadd.f32 %v8237_v28, %v8204_v9  ;;  %v8247_v31 = vadd.f32 %v8213_v36, %v8198_v26  ;;  %v8246_v43 = vadd.f32 %v8209_v50, %v8197_v61  ;;  %v8249_v54 = vadd.f32 %v8221_v60, %v8200_v0  ;;  %v12818_v28 = vld [vmem:[#allocation14 + $0x3c0] ss:$24 sps:$4 sm:$0xff]   ;;  %v12826_v36 = vld [vmem:[#allocation14 + $0x3f4] ss:$24 sps:$4 sm:$0xff]   ;;  %v12824_v60 = vld [vmem:[#allocation14 + $0x3f0] ss:$24 sps:$4 sm:$0xff]  }
 0x716   :  { %v14097_v29 = vadd.f32 %v8217_v7, %v8199_v8  ;;  %v14099_v16 = vadd.f32 %v8229_v53, %v8202_v47  ;;  %v14101_v15 = vadd.f32 %v8225_v32, %v8201_v48  ;;  %v14103_v39 = vadd.f32 %v8233_v3, %v8203_v49  ;;  %v12829_v50 = vld [vmem:[#allocation14 + $0x3fc] ss:$24 sps:$4 sm:$0xff]   ;;  %v12827_v7 = vld [vmem:[#allocation14 + $0x3f8] ss:$24 sps:$4 sm:$0xff]   ;;  %v12835_v32 = vld [vmem:[#allocation14 + $0x42c] ss:$24 sps:$4 sm:$0xff]  }
 0x717   :  { %vm8255_vm8 = vcmp.ge.f32.partialorder %v8247_v31, 0.0  ;;  %v8263_v34 = vmul.f32 0.01, %v8247_v31  ;;  %vm8254_vm9 = vcmp.ge.f32.partialorder %v8246_v43, 0.0  ;;  %v8262_v56 = vmul.f32 0.01, %v8246_v43 }
 0x718   :  { %vm8257_vm10 = vcmp.ge.f32.partialorder %v8249_v54, 0.0  ;;  %v8265_v42 = vmul.f32 0.01, %v8249_v54  ;;  %v12832_v53 = vld [vmem:[#allocation14 + $0x424] ss:$24 sps:$4 sm:$0xff]   ;;  %vm8256_vm11 = vcmp.ge.f32.partialorder %v14097_v29, 0.0 }
 0x719   :  { %v8271_v21 = vsel %vm8255_vm8, %v8247_v31, %v8263_v34  ;;  %v8270_v55 = vsel %vm8254_vm9, %v8246_v43, %v8262_v56  ;;  %v12830_v3 = vld [vmem:[#allocation14 + $0x420] ss:$24 sps:$4 sm:$0xff]   ;;  %v12844_v5 = vld [vmem:[#allocation14 + $0x484] ss:$24 sps:$4 sm:$0xff]   ;;  %v12850_v26 = vld [vmem:[#allocation14 + $0x4b4] ss:$24 sps:$4 sm:$0xff]  }
 0x71a   :  { %v14105_v24 = vpack.c.bf16 %v8271_v21, %v8271_v21  ;;  %v14107_v4 = vpack.c.bf16 %v8270_v55, %v8270_v55  ;;  %v8273_v62 = vsel %vm8257_vm10, %v8249_v54, %v8265_v42  ;;  %v12839_v44 = vld [vmem:[#allocation14 + $0x458] ss:$24 sps:$4 sm:$0xff]   ;;  %v12845_v9 = vld [vmem:[#allocation14 + $0x488] ss:$24 sps:$4 sm:$0xff]   ;;  %v12853_v61 = vld [vmem:[#allocation14 + $0x4bc] ss:$24 sps:$4 sm:$0xff]  }
 0x71b   :  { %v14113_v51 = vpack.c.bf16 %v8273_v62, %v8273_v62  ;;  %v12842_v46 = vld [vmem:[#allocation14 + $0x480] ss:$24 sps:$4 sm:$0xff]   ;;  %v12848_v0 = vld [vmem:[#allocation14 + $0x4b0] ss:$24 sps:$4 sm:$0xff]   ;;  %v12856_v47 = vld [vmem:[#allocation14 + $0x4e4] ss:$24 sps:$4 sm:$0xff]  }
 0x71c   :  { %10654 = vmatprep.mubr.bf16.mxu0 %v14105_v24  ;;  %10818 = vmatprep.mubr.bf16.mxu1 %v14105_v24  ;;  %v12851_v8 = vld [vmem:[#allocation14 + $0x4b8] ss:$24 sps:$4 sm:$0xff]   ;;  %v12859_v48 = vld [vmem:[#allocation14 + $0x4ec] ss:$24 sps:$4 sm:$0xff]   ;;  %v12857_v31 = vld [vmem:[#allocation14 + $0x4e8] ss:$24 sps:$4 sm:$0xff]  }
 0x71d   :  { %10655 = vmatmul.mubr.bf16.vlgmr.msra.gmra.mrb[16].mxu0 %v14107_v4  ;;  %10819 = vmatmul.mubr.bf16.vlgmr.msra.gmra.mrb[20].mxu1 %v14107_v4  ;;  %v12854_v49 = vld [vmem:[#allocation14 + $0x4e0] ss:$24 sps:$4 sm:$0xff]   ;;  %v12862_v43 = vld [vmem:[#allocation14 + $0x514] ss:$24 sps:$4 sm:$0xff]   ;;  %v12860_v34 = vld [vmem:[#allocation14 + $0x510] ss:$24 sps:$4 sm:$0xff]  }
 0x71e   :  { %10664 = vmatpush1.bf16.msra.mxu0 %v12794_v22  ;;  %10828 = vmatpush1.bf16.msra.mxu1 %v12797_v18  ;;  %v12865_v54 = vld [vmem:[#allocation14 + $0x51c] ss:$24 sps:$4 sm:$0xff]   ;;  %v12863_v56 = vld [vmem:[#allocation14 + $0x518] ss:$24 sps:$4 sm:$0xff]   ;;  %v12871_v21 = vld [vmem:[#allocation14 + $0x54c] ss:$24 sps:$4 sm:$0xff]  }
 0x71f   :  { %10695 = vmatprep.mubr.bf16.mxu0 %v14113_v51  ;;  %10859 = vmatprep.mubr.bf16.mxu1 %v14113_v51  ;;  %v12868_v42 = vld [vmem:[#allocation14 + $0x544] ss:$24 sps:$4 sm:$0xff]   ;;  %v12866_v55 = vld [vmem:[#allocation14 + $0x540] ss:$24 sps:$4 sm:$0xff]   ;;  %v12874_v18 = vld [vmem:[#allocation14 + $0x574] ss:$24 sps:$4 sm:$0xff]  }
 0x720   :  { %10665 = vmatprep.subr.bf16.mxu0 %v12802_v52  ;;  %10829 = vmatprep.subr.bf16.mxu1 %v12805_v2  ;;  %v12869_v22 = vld [vmem:[#allocation14 + $0x548] ss:$24 sps:$4 sm:$0xff]   ;;  %v12877_v62 = vld [vmem:[#allocation14 + $0x57c] ss:$24 sps:$4 sm:$0xff]   ;;  %v12875_v2 = vld [vmem:[#allocation14 + $0x578] ss:$24 sps:$4 sm:$0xff]  }
 0x721   :  { %v12872_v52 = vld [vmem:[#allocation14 + $0x570] ss:$24 sps:$4 sm:$0xff]   ;;  %vm8259_vm12 = vcmp.ge.f32.partialorder %v14099_v16, 0.0  ;;  %vm8258_vm13 = vcmp.ge.f32.partialorder %v14101_v15, 0.0  ;;  %vm8261_vm14 = vcmp.ge.f32.partialorder %v14095_v57, 0.0  ;;  %vm8260_vm15 = vcmp.ge.f32.partialorder %v14103_v39, 0.0 }
 0x722   :  { %10666 = vmatpush1.bf16.msra.mxu0 %v12800_v58  ;;  %10830 = vmatpush1.bf16.msra.mxu1 %v12803_v30  ;;  %v12880_v58 = vld [vmem:[#allocation14 + $0x5a4] ss:$24 sps:$4 sm:$0xff]  }
 0x723   :  { %10667 = vmatprep.subr.bf16.mxu0 %v12808_v38  ;;  %10831 = vmatprep.subr.bf16.mxu1 %v12811_v37  ;;  %v12883_v30 = vld [vmem:[#allocation14 + $0x5ac] ss:$24 sps:$4 sm:$0xff]   ;;  %v12878_v38 = vld [vmem:[#allocation14 + $0x5a0] ss:$24 sps:$4 sm:$0xff]  }
 0x724   :  { %v12881_v37 = vld [vmem:[#allocation14 + $0x5a8] ss:$24 sps:$4 sm:$0xff]  }
 0x726   :  { %10668 = vmatpush1.bf16.msra.mxu0 %v12806_v40  ;;  %10832 = vmatpush1.bf16.msra.mxu1 %v12809_v10  ;;  %v12886_v40 = vld [vmem:[#allocation14 + $0x5d4] ss:$24 sps:$4 sm:$0xff]  }
 0x727   :  { %10669 = vmatprep.subr.bf16.mxu0 %v12814_v14  ;;  %10833 = vmatprep.subr.bf16.mxu1 %v12817_v23  ;;  %v12889_v10 = vld [vmem:[#allocation14 + $0x5dc] ss:$24 sps:$4 sm:$0xff]   ;;  %v8264_v14 = vmul.f32 0.01, %v14097_v29  ;;  %v8267_v23 = vmul.f32 0.01, %v14099_v16 }
 0x72a   :  { %10670 = vmatpush1.bf16.msra.mxu0 %v12812_v33  ;;  %10834 = vmatpush1.bf16.msra.mxu1 %v12815_v17  ;;  %v12884_v33 = vld [vmem:[#allocation14 + $0x5d0] ss:$24 sps:$4 sm:$0xff]  }
 0x72b   :  { %10671 = vmatprep.subr.bf16.mxu0 %v12820_v20  ;;  %10835 = vmatprep.subr.bf16.mxu1 %v12823_v25  ;;  %v12887_v17 = vld [vmem:[#allocation14 + $0x5d8] ss:$24 sps:$4 sm:$0xff]   ;;  %v12892_v20 = vld [vmem:[#allocation14 + $0x604] ss:$24 sps:$4 sm:$0xff]  }
 0x72c   :  { %v12895_v25 = vld [vmem:[#allocation14 + $0x60c] ss:$24 sps:$4 sm:$0xff]  }
 0x72e   :  { %10672 = vmatpush1.bf16.msra.mxu0 %v12818_v28  ;;  %10836 = vmatpush1.bf16.msra.mxu1 %v12821_v27  ;;  %v8272_v28 = vsel %vm8256_vm11, %v14097_v29, %v8264_v14  ;;  %v8275_v27 = vsel %vm8259_vm12, %v14099_v16, %v8267_v23  ;;  %v12896_v29 = vld [vmem:[#allocation14 + $0x630] ss:$24 sps:$4 sm:$0xff]   ;;  %v12958_v14 = vld [vmem:[#allocation14 + $0x814] ss:$24 sps:$4 sm:$0xff]  }
 0x72f   :  { %10673 = vmatprep.subr.bf16.mxu0 %v12826_v36  ;;  %10837 = vmatprep.subr.bf16.mxu1 %v12829_v50  ;;  %v12890_v36 = vld [vmem:[#allocation14 + $0x600] ss:$24 sps:$4 sm:$0xff]   ;;  %v14123_v50 = vpack.c.bf16 %v8272_v28, %v8272_v28  ;;  %v12961_v23 = vld [vmem:[#allocation14 + $0x81c] ss:$24 sps:$4 sm:$0xff]  }
 0x730   :  { %v12899_v16 = vld [vmem:[#allocation14 + $0x638] ss:$24 sps:$4 sm:$0xff]  }
 0x731   :  { %v12962_v28 = vld [vmem:[#allocation14 + $0x840] ss:$24 sps:$4 sm:$0xff]  }
 0x732   :  { %10674 = vmatpush1.bf16.msra.mxu0 %v12824_v60  ;;  %10838 = vmatpush1.bf16.msra.mxu1 %v12827_v7  ;;  %v12893_v60 = vld [vmem:[#allocation14 + $0x608] ss:$24 sps:$4 sm:$0xff]   ;;  %v14125_v7 = vpack.c.bf16 %v8275_v27, %v8275_v27 }
 0x733   :  { %10675 = vmatprep.subr.bf16.mxu0 %v12832_v53  ;;  %10839 = vmatprep.subr.bf16.mxu1 %v12835_v32  ;;  %v12898_v53 = vld [vmem:[#allocation14 + $0x634] ss:$24 sps:$4 sm:$0xff]   ;;  %v12965_v27 = vld [vmem:[#allocation14 + $0x848] ss:$24 sps:$4 sm:$0xff]  }
 0x734   :  { %v12901_v32 = vld [vmem:[#allocation14 + $0x63c] ss:$24 sps:$4 sm:$0xff]  }
 0x736   :  { %10676 = vmatpush1.bf16.msra.mxu0 %v12830_v3  ;;  %10840 = vmatpush1.bf16.msra.mxu1 %v12833_v59  ;;  %v12904_v3 = vld [vmem:[#allocation14 + $0x664] ss:$24 sps:$4 sm:$0xff]  }
 0x737   :  { %10677 = vmatprep.subr.bf16.mxu0 %v12838_v35  ;;  %10841 = vmatprep.subr.bf16.mxu1 %v12841_v6  ;;  %v12907_v59 = vld [vmem:[#allocation14 + $0x66c] ss:$24 sps:$4 sm:$0xff]   ;;  %v12902_v35 = vld [vmem:[#allocation14 + $0x660] ss:$24 sps:$4 sm:$0xff]  }
 0x738   :  { %v12905_v6 = vld [vmem:[#allocation14 + $0x668] ss:$24 sps:$4 sm:$0xff]  }
 0x73a   :  { %10678 = vmatpush1.bf16.msra.mxu0 %v12836_v41  ;;  %10842 = vmatpush1.bf16.msra.mxu1 %v12839_v44  ;;  %v12910_v41 = vld [vmem:[#allocation14 + $0x694] ss:$24 sps:$4 sm:$0xff]  }
 0x73b   :  { %10679 = vmatprep.subr.bf16.mxu0 %v12844_v5  ;;  %10843 = vmatprep.subr.bf16.mxu1 %v12847_v45  ;;  %v12913_v44 = vld [vmem:[#allocation14 + $0x69c] ss:$24 sps:$4 sm:$0xff]   ;;  %v12908_v5 = vld [vmem:[#allocation14 + $0x690] ss:$24 sps:$4 sm:$0xff]  }
 0x73c   :  { %v12911_v45 = vld [vmem:[#allocation14 + $0x698] ss:$24 sps:$4 sm:$0xff]  }
 0x73e   :  { %10680 = vmatpush1.bf16.msra.mxu0 %v12842_v46  ;;  %10844 = vmatpush1.bf16.msra.mxu1 %v12845_v9  ;;  %v12916_v46 = vld [vmem:[#allocation14 + $0x6c4] ss:$24 sps:$4 sm:$0xff]  }
 0x73f   :  { %10681 = vmatprep.subr.bf16.mxu0 %v12850_v26  ;;  %10845 = vmatprep.subr.bf16.mxu1 %v12853_v61  ;;  %v12919_v9 = vld [vmem:[#allocation14 + $0x6cc] ss:$24 sps:$4 sm:$0xff]   ;;  %v12914_v26 = vld [vmem:[#allocation14 + $0x6c0] ss:$24 sps:$4 sm:$0xff]  }
 0x740   :  { %v12917_v61 = vld [vmem:[#allocation14 + $0x6c8] ss:$24 sps:$4 sm:$0xff]  }
 0x742   :  { %10682 = vmatpush1.bf16.msra.mxu0 %v12848_v0  ;;  %10846 = vmatpush1.bf16.msra.mxu1 %v12851_v8  ;;  %v12922_v0 = vld [vmem:[#allocation14 + $0x6f4] ss:$24 sps:$4 sm:$0xff]  }
 0x743   :  { %10683 = vmatprep.subr.bf16.mxu0 %v12856_v47  ;;  %10847 = vmatprep.subr.bf16.mxu1 %v12859_v48  ;;  %v12925_v8 = vld [vmem:[#allocation14 + $0x6fc] ss:$24 sps:$4 sm:$0xff]   ;;  %v12920_v47 = vld [vmem:[#allocation14 + $0x6f0] ss:$24 sps:$4 sm:$0xff]  }
 0x744   :  { %v12923_v48 = vld [vmem:[#allocation14 + $0x6f8] ss:$24 sps:$4 sm:$0xff]  }
 0x746   :  { %10684 = vmatpush1.bf16.msra.mxu0 %v12854_v49  ;;  %10848 = vmatpush1.bf16.msra.mxu1 %v12857_v31  ;;  %v12928_v49 = vld [vmem:[#allocation14 + $0x724] ss:$24 sps:$4 sm:$0xff]  }
 0x747   :  { %10685 = vmatprep.subr.bf16.mxu0 %v12862_v43  ;;  %10849 = vmatprep.subr.bf16.mxu1 %v12865_v54  ;;  %v12931_v31 = vld [vmem:[#allocation14 + $0x72c] ss:$24 sps:$4 sm:$0xff]   ;;  %v12926_v43 = vld [vmem:[#allocation14 + $0x720] ss:$24 sps:$4 sm:$0xff]  }
 0x748   :  { %v12929_v54 = vld [vmem:[#allocation14 + $0x728] ss:$24 sps:$4 sm:$0xff]  }
 0x74a   :  { %10686 = vmatpush1.bf16.msra.mxu0 %v12860_v34  ;;  %10850 = vmatpush1.bf16.msra.mxu1 %v12863_v56  ;;  %v12934_v34 = vld [vmem:[#allocation14 + $0x754] ss:$24 sps:$4 sm:$0xff]  }
 0x74b   :  { %10687 = vmatprep.subr.bf16.mxu0 %v12868_v42  ;;  %10851 = vmatprep.subr.bf16.mxu1 %v12871_v21  ;;  %v12937_v56 = vld [vmem:[#allocation14 + $0x75c] ss:$24 sps:$4 sm:$0xff]   ;;  %v12932_v42 = vld [vmem:[#allocation14 + $0x750] ss:$24 sps:$4 sm:$0xff]  }
 0x74c   :  { %v12935_v21 = vld [vmem:[#allocation14 + $0x758] ss:$24 sps:$4 sm:$0xff]  }
 0x74e   :  { %10688 = vmatpush1.bf16.msra.mxu0 %v12866_v55  ;;  %10852 = vmatpush1.bf16.msra.mxu1 %v12869_v22  ;;  %v12940_v55 = vld [vmem:[#allocation14 + $0x784] ss:$24 sps:$4 sm:$0xff]  }
 0x74f   :  { %10689 = vmatprep.subr.bf16.mxu0 %v12874_v18  ;;  %10853 = vmatprep.subr.bf16.mxu1 %v12877_v62  ;;  %v12943_v22 = vld [vmem:[#allocation14 + $0x78c] ss:$24 sps:$4 sm:$0xff]   ;;  %v12938_v18 = vld [vmem:[#allocation14 + $0x780] ss:$24 sps:$4 sm:$0xff]  }
 0x750   :  { %v12941_v62 = vld [vmem:[#allocation14 + $0x788] ss:$24 sps:$4 sm:$0xff]  }
 0x752   :  { %10690 = vmatpush1.bf16.msra.mxu0 %v12872_v52  ;;  %10854 = vmatpush1.bf16.msra.mxu1 %v12875_v2  ;;  %v12946_v52 = vld [vmem:[#allocation14 + $0x7b4] ss:$24 sps:$4 sm:$0xff]  }
 0x753   :  { %10691 = vmatprep.subr.bf16.mxu0 %v12880_v58  ;;  %10855 = vmatprep.subr.bf16.mxu1 %v12883_v30  ;;  %v12949_v2 = vld [vmem:[#allocation14 + $0x7bc] ss:$24 sps:$4 sm:$0xff]   ;;  %v12944_v58 = vld [vmem:[#allocation14 + $0x7b0] ss:$24 sps:$4 sm:$0xff]  }
 0x754   :  { %v12947_v30 = vld [vmem:[#allocation14 + $0x7b8] ss:$24 sps:$4 sm:$0xff]  }
 0x756   :  { %10692 = vmatpush1.bf16.msra.mxu0 %v12878_v38  ;;  %10856 = vmatpush1.bf16.msra.mxu1 %v12881_v37  ;;  %v12952_v38 = vld [vmem:[#allocation14 + $0x7e4] ss:$24 sps:$4 sm:$0xff]  }
 0x757   :  { %10693 = vmatprep.subr.bf16.mxu0 %v12886_v40  ;;  %10857 = vmatprep.subr.bf16.mxu1 %v12889_v10  ;;  %v12955_v37 = vld [vmem:[#allocation14 + $0x7ec] ss:$24 sps:$4 sm:$0xff]   ;;  %v12950_v40 = vld [vmem:[#allocation14 + $0x7e0] ss:$24 sps:$4 sm:$0xff]  }
 0x758   :  { %v12953_v10 = vld [vmem:[#allocation14 + $0x7e8] ss:$24 sps:$4 sm:$0xff]  }
 0x75a   :  { %10694 = vmatpush1.bf16.msra.mxu0 %v12884_v33  ;;  %10858 = vmatpush1.bf16.msra.mxu1 %v12887_v17  ;;  %v12956_v33 = vld [vmem:[#allocation14 + $0x810] ss:$24 sps:$4 sm:$0xff]  }
 0x75b   :  { %10704 = vmatprep.subr.bf16.mxu0 %v12892_v20  ;;  %10868 = vmatprep.subr.bf16.mxu1 %v12895_v25  ;;  %v12959_v17 = vld [vmem:[#allocation14 + $0x818] ss:$24 sps:$4 sm:$0xff]   ;;  %v12964_v20 = vld [vmem:[#allocation14 + $0x844] ss:$24 sps:$4 sm:$0xff]  }
 0x75c   :  { %v12967_v25 = vld [vmem:[#allocation14 + $0x84c] ss:$24 sps:$4 sm:$0xff]  }
 0x75d   :  { %10696 = vmatmul.mubr.bf16.vlgmr.msra.gmra.mrb[16].mxu0 %v14123_v50  ;;  %10860 = vmatmul.mubr.bf16.vlgmr.msra.gmra.mrb[20].mxu1 %v14123_v50 }
 0x75e   :  { %10705 = vmatpush1.bf16.msra.mxu0 %v12890_v36  ;;  %10736 = vmatprep.mubr.bf16.mxu0 %v14125_v7  ;;  %v12970_v36 = vld [vmem:[#allocation14 + $0x874] ss:$24 sps:$4 sm:$0xff]  }
 0x75f   :  { %10869 = vmatpush1.bf16.msra.mxu1 %v12893_v60  ;;  %10900 = vmatprep.mubr.bf16.mxu1 %v14125_v7  ;;  %v12973_v60 = vld [vmem:[#allocation14 + $0x87c] ss:$24 sps:$4 sm:$0xff]  }
 0x760   :  { %10706 = vmatprep.subr.bf16.mxu0 %v12898_v53  ;;  %10870 = vmatprep.subr.bf16.mxu1 %v12901_v32  ;;  %v12968_v53 = vld [vmem:[#allocation14 + $0x870] ss:$24 sps:$4 sm:$0xff]  }
 0x761   :  { %v12971_v32 = vld [vmem:[#allocation14 + $0x878] ss:$24 sps:$4 sm:$0xff]  }
 0x762   :  { %10707 = vmatpush1.bf16.msra.mxu0 %v12896_v29  ;;  %v12976_v29 = vld [vmem:[#allocation14 + $0x8a4] ss:$24 sps:$4 sm:$0xff]  }
 0x763   :  { %10871 = vmatpush1.bf16.msra.mxu1 %v12899_v16  ;;  %10708 = vmatprep.subr.bf16.mxu0 %v12904_v3  ;;  %v12979_v16 = vld [vmem:[#allocation14 + $0x8ac] ss:$24 sps:$4 sm:$0xff]   ;;  %v12974_v3 = vld [vmem:[#allocation14 + $0x8a0] ss:$24 sps:$4 sm:$0xff]  }
 0x764   :  { %10872 = vmatprep.subr.bf16.mxu1 %v12907_v59  ;;  %v12977_v59 = vld [vmem:[#allocation14 + $0x8a8] ss:$24 sps:$4 sm:$0xff]  }
 0x766   :  { %10709 = vmatpush1.bf16.msra.mxu0 %v12902_v35  ;;  %v12982_v35 = vld [vmem:[#allocation14 + $0x8d4] ss:$24 sps:$4 sm:$0xff]  }
 0x767   :  { %10873 = vmatpush1.bf16.msra.mxu1 %v12905_v6  ;;  %10710 = vmatprep.subr.bf16.mxu0 %v12910_v41  ;;  %v12985_v6 = vld [vmem:[#allocation14 + $0x8dc] ss:$24 sps:$4 sm:$0xff]   ;;  %v8266_v41 = vmul.f32 0.01, %v14101_v15 }
 0x768   :  { %10874 = vmatprep.subr.bf16.mxu1 %v12913_v44  ;;  %v12980_v44 = vld [vmem:[#allocation14 + $0x8d0] ss:$24 sps:$4 sm:$0xff]  }
 0x76a   :  { %10711 = vmatpush1.bf16.msra.mxu0 %v12908_v5  ;;  %v8269_v5 = vmul.f32 0.01, %v14095_v57 }
 0x76b   :  { %10875 = vmatpush1.bf16.msra.mxu1 %v12911_v45  ;;  %10712 = vmatprep.subr.bf16.mxu0 %v12916_v46  ;;  %v12983_v45 = vld [vmem:[#allocation14 + $0x8d8] ss:$24 sps:$4 sm:$0xff]   ;;  %v12988_v46 = vld [vmem:[#allocation14 + $0x904] ss:$24 sps:$4 sm:$0xff]  }
 0x76c   :  { %10876 = vmatprep.subr.bf16.mxu1 %v12919_v9  ;;  %v8274_v9 = vsel %vm8258_vm13, %v14101_v15, %v8266_v41  ;;  %v12992_v15 = vld [vmem:[#allocation14 + $0x930] ss:$24 sps:$4 sm:$0xff]   ;;  %v13054_v41 = vld [vmem:[#allocation14 + $0xb14] ss:$24 sps:$4 sm:$0xff]  }
 0x76e   :  { %10713 = vmatpush1.bf16.msra.mxu0 %v12914_v26  ;;  %v12991_v26 = vld [vmem:[#allocation14 + $0x90c] ss:$24 sps:$4 sm:$0xff]  }
 0x76f   :  { %10877 = vmatpush1.bf16.msra.mxu1 %v12917_v61  ;;  %10714 = vmatprep.subr.bf16.mxu0 %v12922_v0  ;;  %v12986_v61 = vld [vmem:[#allocation14 + $0x900] ss:$24 sps:$4 sm:$0xff]   ;;  %v8277_v0 = vsel %vm8261_vm14, %v14095_v57, %v8269_v5  ;;  %v13052_v5 = vld [vmem:[#allocation14 + $0xb10] ss:$24 sps:$4 sm:$0xff]  }
 0x770   :  { %10878 = vmatprep.subr.bf16.mxu1 %v12925_v8  ;;  %v14137_v8 = vpack.c.bf16 %v8274_v9, %v8274_v9  ;;  %v12995_v57 = vld [vmem:[#allocation14 + $0x938] ss:$24 sps:$4 sm:$0xff]   ;;  %v13063_v9 = vld [vmem:[#allocation14 + $0xb4c] ss:$24 sps:$4 sm:$0xff]  }
 0x772   :  { %10715 = vmatpush1.bf16.msra.mxu0 %v12920_v47  ;;  %v12989_v47 = vld [vmem:[#allocation14 + $0x908] ss:$24 sps:$4 sm:$0xff]  }
 0x773   :  { %10879 = vmatpush1.bf16.msra.mxu1 %v12923_v48  ;;  %10716 = vmatprep.subr.bf16.mxu0 %v12928_v49  ;;  %v12994_v48 = vld [vmem:[#allocation14 + $0x934] ss:$24 sps:$4 sm:$0xff]   ;;  %v14140_v49 = vpack.c.bf16 %v8277_v0, %v8277_v0 }
 0x774   :  { %10880 = vmatprep.subr.bf16.mxu1 %v12931_v31  ;;  %v12997_v31 = vld [vmem:[#allocation14 + $0x93c] ss:$24 sps:$4 sm:$0xff]  }
 0x775   :  { %v13066_v0 = vld [vmem:[#allocation14 + $0xb74] ss:$24 sps:$4 sm:$0xff]  }
 0x776   :  { %10717 = vmatpush1.bf16.msra.mxu0 %v12926_v43  ;;  %v13000_v43 = vld [vmem:[#allocation14 + $0x964] ss:$24 sps:$4 sm:$0xff]  }
 0x777   :  { %10881 = vmatpush1.bf16.msra.mxu1 %v12929_v54  ;;  %10718 = vmatprep.subr.bf16.mxu0 %v12934_v34  ;;  %v13003_v54 = vld [vmem:[#allocation14 + $0x96c] ss:$24 sps:$4 sm:$0xff]   ;;  %v12998_v34 = vld [vmem:[#allocation14 + $0x960] ss:$24 sps:$4 sm:$0xff]  }
 0x778   :  { %10882 = vmatprep.subr.bf16.mxu1 %v12937_v56  ;;  %v13001_v56 = vld [vmem:[#allocation14 + $0x968] ss:$24 sps:$4 sm:$0xff]  }
 0x77a   :  { %10719 = vmatpush1.bf16.msra.mxu0 %v12932_v42  ;;  %v13006_v42 = vld [vmem:[#allocation14 + $0x994] ss:$24 sps:$4 sm:$0xff]  }
 0x77b   :  { %10883 = vmatpush1.bf16.msra.mxu1 %v12935_v21  ;;  %10720 = vmatprep.subr.bf16.mxu0 %v12940_v55  ;;  %v13009_v21 = vld [vmem:[#allocation14 + $0x99c] ss:$24 sps:$4 sm:$0xff]   ;;  %v13004_v55 = vld [vmem:[#allocation14 + $0x990] ss:$24 sps:$4 sm:$0xff]  }
 0x77c   :  { %10884 = vmatprep.subr.bf16.mxu1 %v12943_v22  ;;  %v13007_v22 = vld [vmem:[#allocation14 + $0x998] ss:$24 sps:$4 sm:$0xff]  }
 0x77e   :  { %10721 = vmatpush1.bf16.msra.mxu0 %v12938_v18  ;;  %v13012_v18 = vld [vmem:[#allocation14 + $0x9c4] ss:$24 sps:$4 sm:$0xff]  }
 0x77f   :  { %10885 = vmatpush1.bf16.msra.mxu1 %v12941_v62  ;;  %10722 = vmatprep.subr.bf16.mxu0 %v12946_v52  ;;  %v13015_v62 = vld [vmem:[#allocation14 + $0x9cc] ss:$24 sps:$4 sm:$0xff]   ;;  %v13010_v52 = vld [vmem:[#allocation14 + $0x9c0] ss:$24 sps:$4 sm:$0xff]  }
 0x780   :  { %10886 = vmatprep.subr.bf16.mxu1 %v12949_v2  ;;  %v13013_v2 = vld [vmem:[#allocation14 + $0x9c8] ss:$24 sps:$4 sm:$0xff]  }
 0x782   :  { %10723 = vmatpush1.bf16.msra.mxu0 %v12944_v58  ;;  %v13018_v58 = vld [vmem:[#allocation14 + $0x9f4] ss:$24 sps:$4 sm:$0xff]  }
 0x783   :  { %10887 = vmatpush1.bf16.msra.mxu1 %v12947_v30  ;;  %10724 = vmatprep.subr.bf16.mxu0 %v12952_v38  ;;  %v13021_v30 = vld [vmem:[#allocation14 + $0x9fc] ss:$24 sps:$4 sm:$0xff]   ;;  %v13016_v38 = vld [vmem:[#allocation14 + $0x9f0] ss:$24 sps:$4 sm:$0xff]  }
 0x784   :  { %10888 = vmatprep.subr.bf16.mxu1 %v12955_v37  ;;  %v13019_v37 = vld [vmem:[#allocation14 + $0x9f8] ss:$24 sps:$4 sm:$0xff]  }
 0x786   :  { %10725 = vmatpush1.bf16.msra.mxu0 %v12950_v40  ;;  %v13024_v40 = vld [vmem:[#allocation14 + $0xa24] ss:$24 sps:$4 sm:$0xff]  }
 0x787   :  { %10889 = vmatpush1.bf16.msra.mxu1 %v12953_v10  ;;  %10726 = vmatprep.subr.bf16.mxu0 %v12958_v14  ;;  %v13027_v10 = vld [vmem:[#allocation14 + $0xa2c] ss:$24 sps:$4 sm:$0xff]   ;;  %v13022_v14 = vld [vmem:[#allocation14 + $0xa20] ss:$24 sps:$4 sm:$0xff]  }
 0x788   :  { %10890 = vmatprep.subr.bf16.mxu1 %v12961_v23  ;;  %v13025_v23 = vld [vmem:[#allocation14 + $0xa28] ss:$24 sps:$4 sm:$0xff]  }
 0x78a   :  { %10727 = vmatpush1.bf16.msra.mxu0 %v12956_v33  ;;  %v13030_v33 = vld [vmem:[#allocation14 + $0xa54] ss:$24 sps:$4 sm:$0xff]  }
 0x78b   :  { %10891 = vmatpush1.bf16.msra.mxu1 %v12959_v17  ;;  %10728 = vmatprep.subr.bf16.mxu0 %v12964_v20  ;;  %v13033_v17 = vld [vmem:[#allocation14 + $0xa5c] ss:$24 sps:$4 sm:$0xff]   ;;  %v13028_v20 = vld [vmem:[#allocation14 + $0xa50] ss:$24 sps:$4 sm:$0xff]  }
 0x78c   :  { %10892 = vmatprep.subr.bf16.mxu1 %v12967_v25  ;;  %v13031_v25 = vld [vmem:[#allocation14 + $0xa58] ss:$24 sps:$4 sm:$0xff]  }
 0x78e   :  { %10729 = vmatpush1.bf16.msra.mxu0 %v12962_v28  ;;  %v13036_v28 = vld [vmem:[#allocation14 + $0xa84] ss:$24 sps:$4 sm:$0xff]  }
 0x78f   :  { %10893 = vmatpush1.bf16.msra.mxu1 %v12965_v27  ;;  %10730 = vmatprep.subr.bf16.mxu0 %v12970_v36  ;;  %v13039_v27 = vld [vmem:[#allocation14 + $0xa8c] ss:$24 sps:$4 sm:$0xff]   ;;  %v13034_v36 = vld [vmem:[#allocation14 + $0xa80] ss:$24 sps:$4 sm:$0xff]  }
 0x790   :  { %10894 = vmatprep.subr.bf16.mxu1 %v12973_v60  ;;  %v13037_v60 = vld [vmem:[#allocation14 + $0xa88] ss:$24 sps:$4 sm:$0xff]  }
 0x792   :  { %10731 = vmatpush1.bf16.msra.mxu0 %v12968_v53  ;;  %v13042_v53 = vld [vmem:[#allocation14 + $0xab4] ss:$24 sps:$4 sm:$0xff]  }
 0x793   :  { %10895 = vmatpush1.bf16.msra.mxu1 %v12971_v32  ;;  %10732 = vmatprep.subr.bf16.mxu0 %v12976_v29  ;;  %v13045_v32 = vld [vmem:[#allocation14 + $0xabc] ss:$24 sps:$4 sm:$0xff]   ;;  %v13040_v29 = vld [vmem:[#allocation14 + $0xab0] ss:$24 sps:$4 sm:$0xff]  }
 0x794   :  { %10896 = vmatprep.subr.bf16.mxu1 %v12979_v16  ;;  %v13043_v16 = vld [vmem:[#allocation14 + $0xab8] ss:$24 sps:$4 sm:$0xff]  }
 0x796   :  { %10733 = vmatpush1.bf16.msra.mxu0 %v12974_v3  ;;  %v13048_v3 = vld [vmem:[#allocation14 + $0xae4] ss:$24 sps:$4 sm:$0xff]  }
 0x797   :  { %10897 = vmatpush1.bf16.msra.mxu1 %v12977_v59  ;;  %10734 = vmatprep.subr.bf16.mxu0 %v12982_v35  ;;  %v13051_v59 = vld [vmem:[#allocation14 + $0xaec] ss:$24 sps:$4 sm:$0xff]   ;;  %v13046_v35 = vld [vmem:[#allocation14 + $0xae0] ss:$24 sps:$4 sm:$0xff]  }
 0x798   :  { %10898 = vmatprep.subr.bf16.mxu1 %v12985_v6  ;;  %v13049_v6 = vld [vmem:[#allocation14 + $0xae8] ss:$24 sps:$4 sm:$0xff]  }
 0x79a   :  { %10735 = vmatpush1.bf16.msra.mxu0 %v12980_v44  ;;  %v13057_v44 = vld [vmem:[#allocation14 + $0xb1c] ss:$24 sps:$4 sm:$0xff]  }
 0x79b   :  { %10899 = vmatpush1.bf16.msra.mxu1 %v12983_v45  ;;  %10745 = vmatprep.subr.bf16.mxu0 %v12988_v46  ;;  %v13055_v45 = vld [vmem:[#allocation14 + $0xb18] ss:$24 sps:$4 sm:$0xff]   ;;  %v13060_v46 = vld [vmem:[#allocation14 + $0xb44] ss:$24 sps:$4 sm:$0xff]  }
 0x79c   :  { %10909 = vmatprep.subr.bf16.mxu1 %v12991_v26  ;;  %v13058_v26 = vld [vmem:[#allocation14 + $0xb40] ss:$24 sps:$4 sm:$0xff]  }
 0x79d   :  { %10737 = vmatmul.mubr.bf16.vlgmr.msra.gmra.mrb[16].mxu0 %v14137_v8 }
 0x79e   :  { %10901 = vmatmul.mubr.bf16.vlgmr.msra.gmra.mrb[20].mxu1 %v14137_v8  ;;  %10746 = vmatpush1.bf16.msra.mxu0 %v12986_v61  ;;  %v13061_v61 = vld [vmem:[#allocation14 + $0xb48] ss:$24 sps:$4 sm:$0xff]  }
 0x79f   :  { %10777 = vmatprep.mubr.bf16.mxu0 %v14140_v49  ;;  %10910 = vmatpush1.bf16.msra.mxu1 %v12989_v47  ;;  %v13069_v47 = vld [vmem:[#allocation14 + $0xb7c] ss:$24 sps:$4 sm:$0xff]  }
 0x7a0   :  { %10941 = vmatprep.mubr.bf16.mxu1 %v14140_v49  ;;  %10747 = vmatprep.subr.bf16.mxu0 %v12994_v48  ;;  %v13064_v48 = vld [vmem:[#allocation14 + $0xb70] ss:$24 sps:$4 sm:$0xff]  }
 0x7a1   :  { %10911 = vmatprep.subr.bf16.mxu1 %v12997_v31  ;;  %v13067_v31 = vld [vmem:[#allocation14 + $0xb78] ss:$24 sps:$4 sm:$0xff]  }
 0x7a2   :  { %10748 = vmatpush1.bf16.msra.mxu0 %v12992_v15  ;;  %v13072_v15 = vld [vmem:[#allocation14 + $0xba4] ss:$24 sps:$4 sm:$0xff]  }
 0x7a3   :  { %10912 = vmatpush1.bf16.msra.mxu1 %v12995_v57  ;;  %10749 = vmatprep.subr.bf16.mxu0 %v13000_v43  ;;  %v13075_v57 = vld [vmem:[#allocation14 + $0xbac] ss:$24 sps:$4 sm:$0xff]   ;;  %v13070_v43 = vld [vmem:[#allocation14 + $0xba0] ss:$24 sps:$4 sm:$0xff]  }
 0x7a4   :  { %10913 = vmatprep.subr.bf16.mxu1 %v13003_v54  ;;  %v13073_v54 = vld [vmem:[#allocation14 + $0xba8] ss:$24 sps:$4 sm:$0xff]  }
 0x7a6   :  { %10750 = vmatpush1.bf16.msra.mxu0 %v12998_v34  ;;  %v13078_v34 = vld [vmem:[#allocation14 + $0xbd4] ss:$24 sps:$4 sm:$0xff]  }
 0x7a7   :  { %10914 = vmatpush1.bf16.msra.mxu1 %v13001_v56  ;;  %10751 = vmatprep.subr.bf16.mxu0 %v13006_v42  ;;  %v13081_v56 = vld [vmem:[#allocation14 + $0xbdc] ss:$24 sps:$4 sm:$0xff]   ;;  %v8268_v42 = vmul.f32 0.01, %v14103_v39 }
 0x7a8   :  { %10915 = vmatprep.subr.bf16.mxu1 %v13009_v21  ;;  %v13076_v21 = vld [vmem:[#allocation14 + $0xbd0] ss:$24 sps:$4 sm:$0xff]  }
 0x7aa   :  { %10752 = vmatpush1.bf16.msra.mxu0 %v13004_v55  ;;  %v13079_v55 = vld [vmem:[#allocation14 + $0xbd8] ss:$24 sps:$4 sm:$0xff]  }
 0x7ab   :  { %10916 = vmatpush1.bf16.msra.mxu1 %v13007_v22  ;;  %10753 = vmatprep.subr.bf16.mxu0 %v13012_v18  ;;  %v13084_v22 = vld [vmem:[#allocation14 + $0x14] ss:$24 sps:$4 sm:$0xff]   ;;  %v8276_v18 = vsel %vm8260_vm15, %v14103_v39, %v8268_v42  ;;  %v13093_v39 = vld [vmem:[#allocation14 + $0xa4] ss:$24 sps:$4 sm:$0xff]   ;;  %v13154_v42 = vld [vmem:[#allocation14 + $0x490] ss:$24 sps:$4 sm:$0xff]  }
 0x7ac   :  { %10917 = vmatprep.subr.bf16.mxu1 %v13015_v62  ;;  %v13082_v62 = vld [vmem:[#allocation14 + $0x10] ss:$24 sps:$4 sm:$0xff]  }
 0x7ae   :  { %10754 = vmatpush1.bf16.msra.mxu0 %v13010_v52  ;;  %v14148_v52 = vpack.c.bf16 %v8276_v18, %v8276_v18  ;;  %v13160_v18 = vld [vmem:[#allocation14 + $0x4f0] ss:$24 sps:$4 sm:$0xff]  }
 0x7af   :  { %10918 = vmatpush1.bf16.msra.mxu1 %v13013_v2  ;;  %10755 = vmatprep.subr.bf16.mxu0 %v13018_v58  ;;  %v13087_v2 = vld [vmem:[#allocation14 + $0x44] ss:$24 sps:$4 sm:$0xff]   ;;  %v13085_v58 = vld [vmem:[#allocation14 + $0x40] ss:$24 sps:$4 sm:$0xff]  }
 0x7b0   :  { %10919 = vmatprep.subr.bf16.mxu1 %v13021_v30  ;;  %v13090_v30 = vld [vmem:[#allocation14 + $0x74] ss:$24 sps:$4 sm:$0xff]  }
 0x7b2   :  { %10756 = vmatpush1.bf16.msra.mxu0 %v13016_v38  ;;  %v13088_v38 = vld [vmem:[#allocation14 + $0x70] ss:$24 sps:$4 sm:$0xff]  }
 0x7b3   :  { %10920 = vmatpush1.bf16.msra.mxu1 %v13019_v37  ;;  %10757 = vmatprep.subr.bf16.mxu0 %v13024_v40  ;;  %v13091_v37 = vld [vmem:[#allocation14 + $0xa0] ss:$24 sps:$4 sm:$0xff]   ;;  %v13096_v40 = vld [vmem:[#allocation14 + $0xd4] ss:$24 sps:$4 sm:$0xff]  }
 0x7b4   :  { %10921 = vmatprep.subr.bf16.mxu1 %v13027_v10  ;;  %v13094_v10 = vld [vmem:[#allocation14 + $0xd0] ss:$24 sps:$4 sm:$0xff]  }
 0x7b6   :  { %10758 = vmatpush1.bf16.msra.mxu0 %v13022_v14  ;;  %v13099_v14 = vld [vmem:[#allocation14 + $0x104] ss:$24 sps:$4 sm:$0xff]  }
 0x7b7   :  { %10922 = vmatpush1.bf16.msra.mxu1 %v13025_v23  ;;  %10759 = vmatprep.subr.bf16.mxu0 %v13030_v33  ;;  %v13097_v23 = vld [vmem:[#allocation14 + $0x100] ss:$24 sps:$4 sm:$0xff]   ;;  %v13102_v33 = vld [vmem:[#allocation14 + $0x134] ss:$24 sps:$4 sm:$0xff]  }
 0x7b8   :  { %10923 = vmatprep.subr.bf16.mxu1 %v13033_v17  ;;  %v13105_v17 = vld [vmem:[#allocation14 + $0x164] ss:$24 sps:$4 sm:$0xff]  }
 0x7ba   :  { %10760 = vmatpush1.bf16.msra.mxu0 %v13028_v20  ;;  %v13103_v20 = vld [vmem:[#allocation14 + $0x160] ss:$24 sps:$4 sm:$0xff]  }
 0x7bb   :  { %10924 = vmatpush1.bf16.msra.mxu1 %v13031_v25  ;;  %10761 = vmatprep.subr.bf16.mxu0 %v13036_v28  ;;  %v13108_v25 = vld [vmem:[#allocation14 + $0x194] ss:$24 sps:$4 sm:$0xff]   ;;  %v13106_v28 = vld [vmem:[#allocation14 + $0x190] ss:$24 sps:$4 sm:$0xff]  }
 0x7bc   :  { %10925 = vmatprep.subr.bf16.mxu1 %v13039_v27  ;;  %v13111_v27 = vld [vmem:[#allocation14 + $0x1c4] ss:$24 sps:$4 sm:$0xff]  }
 0x7be   :  { %10762 = vmatpush1.bf16.msra.mxu0 %v13034_v36  ;;  %v13109_v36 = vld [vmem:[#allocation14 + $0x1c0] ss:$24 sps:$4 sm:$0xff]  }
 0x7bf   :  { %10926 = vmatpush1.bf16.msra.mxu1 %v13037_v60  ;;  %10763 = vmatprep.subr.bf16.mxu0 %v13042_v53  ;;  %v13114_v60 = vld [vmem:[#allocation14 + $0x1f4] ss:$24 sps:$4 sm:$0xff]   ;;  %v13112_v53 = vld [vmem:[#allocation14 + $0x1f0] ss:$24 sps:$4 sm:$0xff]  }
 0x7c0   :  { %10927 = vmatprep.subr.bf16.mxu1 %v13045_v32  ;;  %v13117_v32 = vld [vmem:[#allocation14 + $0x224] ss:$24 sps:$4 sm:$0xff]  }
 0x7c2   :  { %10764 = vmatpush1.bf16.msra.mxu0 %v13040_v29  ;;  %v13115_v29 = vld [vmem:[#allocation14 + $0x220] ss:$24 sps:$4 sm:$0xff]  }
 0x7c3   :  { %10928 = vmatpush1.bf16.msra.mxu1 %v13043_v16  ;;  %10765 = vmatprep.subr.bf16.mxu0 %v13048_v3  ;;  %v13120_v16 = vld [vmem:[#allocation14 + $0x254] ss:$24 sps:$4 sm:$0xff]   ;;  %v13118_v3 = vld [vmem:[#allocation14 + $0x250] ss:$24 sps:$4 sm:$0xff]  }
 0x7c4   :  { %10929 = vmatprep.subr.bf16.mxu1 %v13051_v59  ;;  %v13123_v59 = vld [vmem:[#allocation14 + $0x284] ss:$24 sps:$4 sm:$0xff]  }
 0x7c6   :  { %10766 = vmatpush1.bf16.msra.mxu0 %v13046_v35  ;;  %v13121_v35 = vld [vmem:[#allocation14 + $0x280] ss:$24 sps:$4 sm:$0xff]  }
 0x7c7   :  { %10930 = vmatpush1.bf16.msra.mxu1 %v13049_v6  ;;  %10767 = vmatprep.subr.bf16.mxu0 %v13054_v41  ;;  %v13126_v6 = vld [vmem:[#allocation14 + $0x2b4] ss:$24 sps:$4 sm:$0xff]   ;;  %v13124_v41 = vld [vmem:[#allocation14 + $0x2b0] ss:$24 sps:$4 sm:$0xff]  }
 0x7c8   :  { %10931 = vmatprep.subr.bf16.mxu1 %v13057_v44  ;;  %v13129_v44 = vld [vmem:[#allocation14 + $0x2e4] ss:$24 sps:$4 sm:$0xff]  }
 0x7ca   :  { %10768 = vmatpush1.bf16.msra.mxu0 %v13052_v5  ;;  %v13127_v5 = vld [vmem:[#allocation14 + $0x2e0] ss:$24 sps:$4 sm:$0xff]  }
 0x7cb   :  { %10932 = vmatpush1.bf16.msra.mxu1 %v13055_v45  ;;  %10769 = vmatprep.subr.bf16.mxu0 %v13060_v46  ;;  %v13132_v45 = vld [vmem:[#allocation14 + $0x314] ss:$24 sps:$4 sm:$0xff]   ;;  %v13130_v46 = vld [vmem:[#allocation14 + $0x310] ss:$24 sps:$4 sm:$0xff]  }
 0x7cc   :  { %10933 = vmatprep.subr.bf16.mxu1 %v13063_v9  ;;  %v13135_v9 = vld [vmem:[#allocation14 + $0x344] ss:$24 sps:$4 sm:$0xff]  }
 0x7ce   :  { %10770 = vmatpush1.bf16.msra.mxu0 %v13058_v26  ;;  %v13133_v26 = vld [vmem:[#allocation14 + $0x340] ss:$24 sps:$4 sm:$0xff]  }
 0x7cf   :  { %10934 = vmatpush1.bf16.msra.mxu1 %v13061_v61  ;;  %10771 = vmatprep.subr.bf16.mxu0 %v13066_v0  ;;  %v13138_v61 = vld [vmem:[#allocation14 + $0x374] ss:$24 sps:$4 sm:$0xff]   ;;  %v13136_v0 = vld [vmem:[#allocation14 + $0x370] ss:$24 sps:$4 sm:$0xff]  }
 0x7d0   :  { %10935 = vmatprep.subr.bf16.mxu1 %v13069_v47  ;;  %v13141_v47 = vld [vmem:[#allocation14 + $0x3a4] ss:$24 sps:$4 sm:$0xff]  }
 0x7d2   :  { %10772 = vmatpush1.bf16.msra.mxu0 %v13064_v48  ;;  %v13139_v48 = vld [vmem:[#allocation14 + $0x3a0] ss:$24 sps:$4 sm:$0xff]  }
 0x7d3   :  { %10936 = vmatpush1.bf16.msra.mxu1 %v13067_v31  ;;  %10773 = vmatprep.subr.bf16.mxu0 %v13072_v15  ;;  %v13144_v31 = vld [vmem:[#allocation14 + $0x3d4] ss:$24 sps:$4 sm:$0xff]   ;;  %v13142_v15 = vld [vmem:[#allocation14 + $0x3d0] ss:$24 sps:$4 sm:$0xff]  }
 0x7d4   :  { %10937 = vmatprep.subr.bf16.mxu1 %v13075_v57  ;;  %v13147_v57 = vld [vmem:[#allocation14 + $0x404] ss:$24 sps:$4 sm:$0xff]  }
 0x7d6   :  { %10774 = vmatpush1.bf16.msra.mxu0 %v13070_v43  ;;  %v13150_v43 = vld [vmem:[#allocation14 + $0x434] ss:$24 sps:$4 sm:$0xff]  }
 0x7d7   :  { %10938 = vmatpush1.bf16.msra.mxu1 %v13073_v54  ;;  %10775 = vmatprep.subr.bf16.mxu0 %v13078_v34  ;;  %v13153_v54 = vld [vmem:[#allocation14 + $0x464] ss:$24 sps:$4 sm:$0xff]   ;;  %v13151_v34 = vld [vmem:[#allocation14 + $0x460] ss:$24 sps:$4 sm:$0xff]  }
 0x7d8   :  { %10939 = vmatprep.subr.bf16.mxu1 %v13081_v56  ;;  %v13156_v56 = vld [vmem:[#allocation14 + $0x494] ss:$24 sps:$4 sm:$0xff]  }
 0x7da   :  { %10776 = vmatpush1.bf16.msra.mxu0 %v13076_v21  ;;  %v13159_v21 = vld [vmem:[#allocation14 + $0x4c4] ss:$24 sps:$4 sm:$0xff]  }
 0x7db   :  { %10940 = vmatpush1.bf16.msra.mxu1 %v13079_v55  ;;  %10950 = vmatprep.subr.bf16.mxu0 %v13084_v22  ;;  %v13157_v55 = vld [vmem:[#allocation14 + $0x4c0] ss:$24 sps:$4 sm:$0xff]   ;;  %v13162_v22 = vld [vmem:[#allocation14 + $0x4f4] ss:$24 sps:$4 sm:$0xff]  }
 0x7dd   :  { %10778 = vmatmul.mubr.bf16.vlgmr.msra.gmra.mrb[16].mxu0 %v14148_v52 }
 0x7de   :  { %10942 = vmatmul.mubr.bf16.vlgmr.msra.gmra.mrb[20].mxu1 %v14148_v52  ;;  %10951 = vmatpush1.bf16.msra.mxu0 %v13082_v62  ;;  %v13165_v62 = vld [vmem:[#allocation14 + $0x524] ss:$24 sps:$4 sm:$0xff]  }
 0x7df   :  { %10982 = vmatprep.mubr.bf16.mxu0 %v14105_v24  ;;  %10952 = vmatprep.subr.bf16.mxu0 %v13087_v2  ;;  %v13100_v24 = vld [vmem:[#allocation14 + $0x130] ss:$24 sps:$4 sm:$0xff]   ;;  %v13163_v2 = vld [vmem:[#allocation14 + $0x520] ss:$24 sps:$4 sm:$0xff]  }
 0x7e2   :  { %10953 = vmatpush1.bf16.msra.mxu0 %v13085_v58  ;;  %v13168_v58 = vld [vmem:[#allocation14 + $0x554] ss:$24 sps:$4 sm:$0xff]  }
 0x7e3   :  { %10954 = vmatprep.subr.bf16.mxu0 %v13090_v30  ;;  %v13166_v30 = vld [vmem:[#allocation14 + $0x550] ss:$24 sps:$4 sm:$0xff]  }
 0x7e6   :  { %10955 = vmatpush1.bf16.msra.mxu0 %v13088_v38  ;;  %v13171_v38 = vld [vmem:[#allocation14 + $0x584] ss:$24 sps:$4 sm:$0xff]  }
 0x7e7   :  { %10956 = vmatprep.subr.bf16.mxu0 %v13093_v39  ;;  %v13169_v39 = vld [vmem:[#allocation14 + $0x580] ss:$24 sps:$4 sm:$0xff]  }
 0x7ea   :  { %10957 = vmatpush1.bf16.msra.mxu0 %v13091_v37  ;;  %v13174_v37 = vld [vmem:[#allocation14 + $0x5b4] ss:$24 sps:$4 sm:$0xff]  }
 0x7eb   :  { %10958 = vmatprep.subr.bf16.mxu0 %v13096_v40  ;;  %v13172_v40 = vld [vmem:[#allocation14 + $0x5b0] ss:$24 sps:$4 sm:$0xff]  }
 0x7ee   :  { %10959 = vmatpush1.bf16.msra.mxu0 %v13094_v10  ;;  %v13177_v10 = vld [vmem:[#allocation14 + $0x5e4] ss:$24 sps:$4 sm:$0xff]  }
 0x7ef   :  { %10960 = vmatprep.subr.bf16.mxu0 %v13099_v14  ;;  %v13175_v14 = vld [vmem:[#allocation14 + $0x5e0] ss:$24 sps:$4 sm:$0xff]  }
 0x7f2   :  { %10961 = vmatpush1.bf16.msra.mxu0 %v13097_v23  ;;  %v13180_v23 = vld [vmem:[#allocation14 + $0x614] ss:$24 sps:$4 sm:$0xff]  }
 0x7f3   :  { %10962 = vmatprep.subr.bf16.mxu0 %v13102_v33  ;;  %v13178_v33 = vld [vmem:[#allocation14 + $0x610] ss:$24 sps:$4 sm:$0xff]  }
 0x7f6   :  { %10963 = vmatpush1.bf16.msra.mxu0 %v13100_v24  ;;  %v13183_v24 = vld [vmem:[#allocation14 + $0x644] ss:$24 sps:$4 sm:$0xff]  }
 0x7f7   :  { %10964 = vmatprep.subr.bf16.mxu0 %v13105_v17  ;;  %v13181_v17 = vld [vmem:[#allocation14 + $0x640] ss:$24 sps:$4 sm:$0xff]  }
 0x7fa   :  { %10965 = vmatpush1.bf16.msra.mxu0 %v13103_v20  ;;  %v13186_v20 = vld [vmem:[#allocation14 + $0x674] ss:$24 sps:$4 sm:$0xff]  }
 0x7fb   :  { %10966 = vmatprep.subr.bf16.mxu0 %v13108_v25  ;;  %v13184_v25 = vld [vmem:[#allocation14 + $0x670] ss:$24 sps:$4 sm:$0xff]  }
 0x7fe   :  { %10967 = vmatpush1.bf16.msra.mxu0 %v13106_v28  ;;  %v13189_v28 = vld [vmem:[#allocation14 + $0x6a4] ss:$24 sps:$4 sm:$0xff]  }
 0x7ff   :  { %10968 = vmatprep.subr.bf16.mxu0 %v13111_v27  ;;  %v13187_v27 = vld [vmem:[#allocation14 + $0x6a0] ss:$24 sps:$4 sm:$0xff]  }
 0x802   :  { %10969 = vmatpush1.bf16.msra.mxu0 %v13109_v36  ;;  %v13192_v36 = vld [vmem:[#allocation14 + $0x6d4] ss:$24 sps:$4 sm:$0xff]  }
 0x803   :  { %10970 = vmatprep.subr.bf16.mxu0 %v13114_v60  ;;  %v13190_v60 = vld [vmem:[#allocation14 + $0x6d0] ss:$24 sps:$4 sm:$0xff]  }
 0x806   :  { %10971 = vmatpush1.bf16.msra.mxu0 %v13112_v53  ;;  %v13195_v53 = vld [vmem:[#allocation14 + $0x704] ss:$24 sps:$4 sm:$0xff]  }
 0x807   :  { %10972 = vmatprep.subr.bf16.mxu0 %v13117_v32  ;;  %v13198_v32 = vld [vmem:[#allocation14 + $0x734] ss:$24 sps:$4 sm:$0xff]  }
 0x80a   :  { %10973 = vmatpush1.bf16.msra.mxu0 %v13115_v29  ;;  %v13201_v29 = vld [vmem:[#allocation14 + $0x764] ss:$24 sps:$4 sm:$0xff]  }
 0x80b   :  { %10974 = vmatprep.subr.bf16.mxu0 %v13120_v16  ;;  %v13199_v16 = vld [vmem:[#allocation14 + $0x760] ss:$24 sps:$4 sm:$0xff]  }
 0x80e   :  { %10975 = vmatpush1.bf16.msra.mxu0 %v13118_v3  ;;  %v13204_v3 = vld [vmem:[#allocation14 + $0x794] ss:$24 sps:$4 sm:$0xff]  }
 0x80f   :  { %10976 = vmatprep.subr.bf16.mxu0 %v13123_v59  ;;  %v13202_v59 = vld [vmem:[#allocation14 + $0x790] ss:$24 sps:$4 sm:$0xff]  }
 0x812   :  { %10977 = vmatpush1.bf16.msra.mxu0 %v13121_v35  ;;  %v13207_v35 = vld [vmem:[#allocation14 + $0x7c4] ss:$24 sps:$4 sm:$0xff]  }
 0x813   :  { %10978 = vmatprep.subr.bf16.mxu0 %v13126_v6  ;;  %v13205_v6 = vld [vmem:[#allocation14 + $0x7c0] ss:$24 sps:$4 sm:$0xff]  }
 0x816   :  { %10979 = vmatpush1.bf16.msra.mxu0 %v13124_v41  ;;  %v13210_v41 = vld [vmem:[#allocation14 + $0x7f4] ss:$24 sps:$4 sm:$0xff]  }
 0x817   :  { %10980 = vmatprep.subr.bf16.mxu0 %v13129_v44  ;;  %v13208_v44 = vld [vmem:[#allocation14 + $0x7f0] ss:$24 sps:$4 sm:$0xff]  }
 0x81a   :  { %10981 = vmatpush1.bf16.msra.mxu0 %v13127_v5  ;;  %v13213_v5 = vld [vmem:[#allocation14 + $0x824] ss:$24 sps:$4 sm:$0xff]  }
 0x81b   :  { %10991 = vmatprep.subr.bf16.mxu0 %v13132_v45  ;;  %v13211_v45 = vld [vmem:[#allocation14 + $0x820] ss:$24 sps:$4 sm:$0xff]  }
 0x81d   :  { %10983 = vmatmul.mubr.bf16.vlgmr.msra.gmra.mrb[20].mxu0 %v14107_v4  ;;  %v13145_v4 = vld [vmem:[#allocation14 + $0x400] ss:$24 sps:$4 sm:$0xff]  }
 0x81e   :  { %10992 = vmatpush1.bf16.msra.mxu0 %v13130_v46  ;;  %11023 = vmatprep.mubr.bf16.mxu0 %v14113_v51  ;;  %v13148_v51 = vld [vmem:[#allocation14 + $0x430] ss:$24 sps:$4 sm:$0xff]   ;;  %v13216_v46 = vld [vmem:[#allocation14 + $0x854] ss:$24 sps:$4 sm:$0xff]  }
 0x81f   :  { %10993 = vmatprep.subr.bf16.mxu0 %v13135_v9  ;;  %v13214_v9 = vld [vmem:[#allocation14 + $0x850] ss:$24 sps:$4 sm:$0xff]  }
 0x822   :  { %10994 = vmatpush1.bf16.msra.mxu0 %v13133_v26  ;;  %v13219_v26 = vld [vmem:[#allocation14 + $0x884] ss:$24 sps:$4 sm:$0xff]  }
 0x823   :  { %10995 = vmatprep.subr.bf16.mxu0 %v13138_v61  ;;  %v13217_v61 = vld [vmem:[#allocation14 + $0x880] ss:$24 sps:$4 sm:$0xff]  }
 0x826   :  { %10996 = vmatpush1.bf16.msra.mxu0 %v13136_v0  ;;  %v13222_v0 = vld [vmem:[#allocation14 + $0x8b4] ss:$24 sps:$4 sm:$0xff]  }
 0x827   :  { %10997 = vmatprep.subr.bf16.mxu0 %v13141_v47  ;;  %v13220_v47 = vld [vmem:[#allocation14 + $0x8b0] ss:$24 sps:$4 sm:$0xff]  }
 0x82a   :  { %10998 = vmatpush1.bf16.msra.mxu0 %v13139_v48  ;;  %v13225_v48 = vld [vmem:[#allocation14 + $0x8e4] ss:$24 sps:$4 sm:$0xff]  }
 0x82b   :  { %10999 = vmatprep.subr.bf16.mxu0 %v13144_v31  ;;  %v13223_v31 = vld [vmem:[#allocation14 + $0x8e0] ss:$24 sps:$4 sm:$0xff]  }
 0x82e   :  { %11000 = vmatpush1.bf16.msra.mxu0 %v13142_v15  ;;  %v13228_v15 = vld [vmem:[#allocation14 + $0x914] ss:$24 sps:$4 sm:$0xff]  }
 0x82f   :  { %11001 = vmatprep.subr.bf16.mxu0 %v13147_v57  ;;  %v13226_v57 = vld [vmem:[#allocation14 + $0x910] ss:$24 sps:$4 sm:$0xff]  }
 0x832   :  { %11002 = vmatpush1.bf16.msra.mxu0 %v13145_v4  ;;  %v13231_v4 = vld [vmem:[#allocation14 + $0x944] ss:$24 sps:$4 sm:$0xff]  }
 0x833   :  { %11003 = vmatprep.subr.bf16.mxu0 %v13150_v43  ;;  %v13229_v43 = vld [vmem:[#allocation14 + $0x940] ss:$24 sps:$4 sm:$0xff]  }
 0x836   :  { %11004 = vmatpush1.bf16.msra.mxu0 %v13148_v51  ;;  %v13234_v51 = vld [vmem:[#allocation14 + $0x974] ss:$24 sps:$4 sm:$0xff]  }
 0x837   :  { %11005 = vmatprep.subr.bf16.mxu0 %v13153_v54  ;;  %v13232_v54 = vld [vmem:[#allocation14 + $0x970] ss:$24 sps:$4 sm:$0xff]  }
 0x83a   :  { %11006 = vmatpush1.bf16.msra.mxu0 %v13151_v34  ;;  %v13237_v34 = vld [vmem:[#allocation14 + $0x9a4] ss:$24 sps:$4 sm:$0xff]  }
 0x83b   :  { %11007 = vmatprep.subr.bf16.mxu0 %v13156_v56  ;;  %v13235_v56 = vld [vmem:[#allocation14 + $0x9a0] ss:$24 sps:$4 sm:$0xff]  }
 0x83e   :  { %11008 = vmatpush1.bf16.msra.mxu0 %v13154_v42  ;;  %v13240_v42 = vld [vmem:[#allocation14 + $0x9d4] ss:$24 sps:$4 sm:$0xff]  }
 0x83f   :  { %11009 = vmatprep.subr.bf16.mxu0 %v13159_v21  ;;  %v13238_v21 = vld [vmem:[#allocation14 + $0x9d0] ss:$24 sps:$4 sm:$0xff]  }
 0x842   :  { %11010 = vmatpush1.bf16.msra.mxu0 %v13157_v55  ;;  %v14159_v55 = vld [vmem:[#allocation16] sm:$0x3f] }
 0x843   :  { %11011 = vmatprep.subr.bf16.mxu0 %v13162_v22  ;;  %v8683_v22 = vrot.slane %v14159_v55, %v13873_v63 }
 0x846   :  { %11012 = vmatpush1.bf16.msra.mxu0 %v13160_v18  ;;  %v8679_v18 = vrot.slane %v14159_v55, %v13864_v11 }
 0x847   :  { %11013 = vmatprep.subr.bf16.mxu0 %v13165_v62  ;;  %v13241_v62 = vld [vmem:[#allocation14 + $0xa00] ss:$24 sps:$4 sm:$0xff]  }
 0x84a   :  { %11014 = vmatpush1.bf16.msra.mxu0 %v13163_v2  ;;  %v8687_v2 = vrot.slane %v14159_v55, %v13870_v13 }
 0x84b   :  { %11015 = vmatprep.subr.bf16.mxu0 %v13168_v58  ;;  %v13246_v58 = vld [vmem:[#allocation14 + $0xa34] ss:$24 sps:$4 sm:$0xff]  }
 0x84e   :  { %11016 = vmatpush1.bf16.msra.mxu0 %v13166_v30 }
 0x84f   :  { %11017 = vmatprep.subr.bf16.mxu0 %v13171_v38 }
 0x852   :  { %11018 = vmatpush1.bf16.msra.mxu0 %v13169_v39 }
 0x853   :  { %11019 = vmatprep.subr.bf16.mxu0 %v13174_v37 }
 0x856   :  { %11020 = vmatpush1.bf16.msra.mxu0 %v13172_v40 }
 0x857   :  { %11021 = vmatprep.subr.bf16.mxu0 %v13177_v10 }
 0x85a   :  { %11022 = vmatpush1.bf16.msra.mxu0 %v13175_v14 }
 0x85b   :  { %11032 = vmatprep.subr.bf16.mxu0 %v13180_v23  ;;  %v13244_v23 = vld [vmem:[#allocation14 + $0xa30] ss:$24 sps:$4 sm:$0xff]  }
 0x85d   :  { %11024 = vmatmul.mubr.bf16.vlgmr.msra.gmra.mrb[20].mxu0 %v14123_v50  ;;  %v13193_v50 = vld [vmem:[#allocation14 + $0x700] ss:$24 sps:$4 sm:$0xff]  }
 0x85e   :  { %11033 = vmatpush1.bf16.msra.mxu0 %v13178_v33  ;;  %11064 = vmatprep.mubr.bf16.mxu0 %v14125_v7  ;;  %v13196_v7 = vld [vmem:[#allocation14 + $0x730] ss:$24 sps:$4 sm:$0xff]  }
 0x85f   :  { %11034 = vmatprep.subr.bf16.mxu0 %v13183_v24  ;;  %v13249_v24 = vld [vmem:[#allocation14 + $0xa64] ss:$24 sps:$4 sm:$0xff]  }
 0x862   :  { %11035 = vmatpush1.bf16.msra.mxu0 %v13181_v17  ;;  %v13247_v17 = vld [vmem:[#allocation14 + $0xa60] ss:$24 sps:$4 sm:$0xff]  }
 0x863   :  { %11036 = vmatprep.subr.bf16.mxu0 %v13186_v20  ;;  %v13252_v20 = vld [vmem:[#allocation14 + $0xa94] ss:$24 sps:$4 sm:$0xff]  }
 0x866   :  { %11037 = vmatpush1.bf16.msra.mxu0 %v13184_v25  ;;  %v13250_v25 = vld [vmem:[#allocation14 + $0xa90] ss:$24 sps:$4 sm:$0xff]  }
 0x867   :  { %11038 = vmatprep.subr.bf16.mxu0 %v13189_v28  ;;  %v13255_v28 = vld [vmem:[#allocation14 + $0xac4] ss:$24 sps:$4 sm:$0xff]  }
 0x86a   :  { %11039 = vmatpush1.bf16.msra.mxu0 %v13187_v27  ;;  %v13253_v27 = vld [vmem:[#allocation14 + $0xac0] ss:$24 sps:$4 sm:$0xff]  }
 0x86b   :  { %11040 = vmatprep.subr.bf16.mxu0 %v13192_v36  ;;  %v13258_v36 = vld [vmem:[#allocation14 + $0xaf4] ss:$24 sps:$4 sm:$0xff]  }
 0x86e   :  { %11041 = vmatpush1.bf16.msra.mxu0 %v13190_v60  ;;  %v13256_v60 = vld [vmem:[#allocation14 + $0xaf0] ss:$24 sps:$4 sm:$0xff]  }
 0x86f   :  { %11042 = vmatprep.subr.bf16.mxu0 %v13195_v53  ;;  %v13261_v53 = vld [vmem:[#allocation14 + $0xb24] ss:$24 sps:$4 sm:$0xff]  }
 0x872   :  { %11043 = vmatpush1.bf16.msra.mxu0 %v13193_v50  ;;  %v13259_v50 = vld [vmem:[#allocation14 + $0xb20] ss:$24 sps:$4 sm:$0xff]  }
 0x873   :  { %11044 = vmatprep.subr.bf16.mxu0 %v13198_v32  ;;  %v13264_v32 = vld [vmem:[#allocation14 + $0xb54] ss:$24 sps:$4 sm:$0xff]  }
 0x876   :  { %11045 = vmatpush1.bf16.msra.mxu0 %v13196_v7  ;;  %v13262_v7 = vld [vmem:[#allocation14 + $0xb50] ss:$24 sps:$4 sm:$0xff]  }
 0x877   :  { %11046 = vmatprep.subr.bf16.mxu0 %v13201_v29  ;;  %v13267_v29 = vld [vmem:[#allocation14 + $0xb84] ss:$24 sps:$4 sm:$0xff]  }
 0x87a   :  { %11047 = vmatpush1.bf16.msra.mxu0 %v13199_v16  ;;  %v13265_v16 = vld [vmem:[#allocation14 + $0xb80] ss:$24 sps:$4 sm:$0xff]  }
 0x87b   :  { %11048 = vmatprep.subr.bf16.mxu0 %v13204_v3  ;;  %v13270_v3 = vld [vmem:[#allocation14 + $0xbb4] ss:$24 sps:$4 sm:$0xff]  }
 0x87e   :  { %11049 = vmatpush1.bf16.msra.mxu0 %v13202_v59  ;;  %v13268_v59 = vld [vmem:[#allocation14 + $0xbb0] ss:$24 sps:$4 sm:$0xff]  }
 0x87f   :  { %11050 = vmatprep.subr.bf16.mxu0 %v13207_v35  ;;  %v13273_v35 = vld [vmem:[#allocation14 + $0xbe4] ss:$24 sps:$4 sm:$0xff]  }
 0x882   :  { %11051 = vmatpush1.bf16.msra.mxu0 %v13205_v6  ;;  %v13271_v6 = vld [vmem:[#allocation14 + $0xbe0] ss:$24 sps:$4 sm:$0xff]  }
 0x883   :  { %11052 = vmatprep.subr.bf16.mxu0 %v13210_v41  ;;  %v8691_v41 = vrot.slane %v14159_v55, %v13916_v1 }
 0x886   :  { %11053 = vmatpush1.bf16.msra.mxu0 %v13208_v44  ;;  %v8695_v44 = vrot.slane %v14159_v55, %v13876_v19 }
 0x887   :  { %11054 = vmatprep.subr.bf16.mxu0 %v13213_v5 }
 0x88a   :  { %11055 = vmatpush1.bf16.msra.mxu0 %v13211_v45 }
 0x88b   :  { %11056 = vmatprep.subr.bf16.mxu0 %v13216_v46 }
 0x88e   :  { %11057 = vmatpush1.bf16.msra.mxu0 %v13214_v9 }
 0x88f   :  { %11058 = vmatprep.subr.bf16.mxu0 %v13219_v26 }
 0x892   :  { %11059 = vmatpush1.bf16.msra.mxu0 %v13217_v61 }
 0x893   :  { %11060 = vmatprep.subr.bf16.mxu0 %v13222_v0 }
 0x896   :  { %11061 = vmatpush1.bf16.msra.mxu0 %v13220_v47 }
 0x897   :  { %11062 = vmatprep.subr.bf16.mxu0 %v13225_v48 }
 0x89a   :  { %11063 = vmatpush1.bf16.msra.mxu0 %v13223_v31 }
 0x89b   :  { %11073 = vmatprep.subr.bf16.mxu0 %v13228_v15 }
 0x89d   :  { %11065 = vmatmul.mubr.bf16.vlgmr.msra.gmra.mrb[20].mxu0 %v14137_v8  ;;  %v13243_v8 = vld [vmem:[#allocation14 + $0xa04] ss:$24 sps:$4 sm:$0xff]  }
 0x89e   :  { %11074 = vmatpush1.bf16.msra.mxu0 %v13226_v57  ;;  %11105 = vmatprep.mubr.bf16.mxu0 %v14140_v49  ;;  %v8675_v49 = vrot.slane %v14159_v55, %v13867_v12 }
 0x89f   :  { %11075 = vmatprep.subr.bf16.mxu0 %v13231_v4 }
 0x8a2   :  { %11076 = vmatpush1.bf16.msra.mxu0 %v13229_v43 }
 0x8a3   :  { %11077 = vmatprep.subr.bf16.mxu0 %v13234_v51 }
 0x8a6   :  { %11078 = vmatpush1.bf16.msra.mxu0 %v13232_v54 }
 0x8a7   :  { %11079 = vmatprep.subr.bf16.mxu0 %v13237_v34 }
 0x8aa   :  { %11080 = vmatpush1.bf16.msra.mxu0 %v13235_v56 }
 0x8ab   :  { %11081 = vmatprep.subr.bf16.mxu0 %v13240_v42 }
 0x8ae   :  { %11082 = vmatpush1.bf16.msra.mxu0 %v13238_v21 }
 0x8af   :  { %11083 = vmatprep.subr.bf16.mxu0 %v13243_v8 }
 0x8b0   :  { %v10779_v30 = vpop.f32.mrb[16].mxu0 }
 0x8b1   :  { %v12549_v38 = vadd.f32 %v10779_v30, %v8675_v49  ;;  %v10943_v39 = vpop.f32.mrb[20].mxu1  ;;  %v10781_v37 = vpop.f32.mrb[17].mxu0 }
 0x8b2   :  { %v12551_v40 = vadd.f32 %v10943_v39, %v8683_v22  ;;  %v12550_v10 = vadd.f32 %v10781_v37, %v8679_v18  ;;  %v10945_v12 = vpop.f32.mrb[21].mxu1  ;;  %v10783_v14 = vpop.f32.mrb[18].mxu0  ;;  %11084 = vmatpush1.bf16.msra.mxu0 %v13241_v62 }
 0x8b3   :  { %11114 = vst [vmem:[#allocation17] sm:$0xff] %v12549_v38  ;;  %v12552_v63 = vadd.f32 %v10945_v12, %v8687_v2  ;;  %v10947_v33 = vpop.f32.mrb[22].mxu1  ;;  %v10784_v11 = vpop.f32.mrb[19].mxu0  ;;  %11085 = vmatprep.subr.bf16.mxu0 %v13246_v58 }
 0x8b4   :  { %11116 = vst [vmem:[#allocation17 + $0x10] sm:$0xff] %v12551_v40  ;;  %11115 = vst [vmem:[#allocation17 + $0x8] sm:$0xff] %v12550_v10  ;;  %v10948_v13 = vpop.f32.mrb[23].mxu1 }
 0x8b5   :  { %11117 = vst [vmem:[#allocation17 + $0x18] sm:$0xff] %v12552_v63 }
 0x8b6   :  { %11086 = vmatpush1.bf16.msra.mxu0 %v13244_v23 }
 0x8b7   :  { %11087 = vmatprep.subr.bf16.mxu0 %v13249_v24 }
 0x8ba   :  { %11088 = vmatpush1.bf16.msra.mxu0 %v13247_v17 }
 0x8bb   :  { %11089 = vmatprep.subr.bf16.mxu0 %v13252_v20 }
 0x8be   :  { %11090 = vmatpush1.bf16.msra.mxu0 %v13250_v25 }
 0x8bf   :  { %11091 = vmatprep.subr.bf16.mxu0 %v13255_v28 }
 0x8c2   :  { %11092 = vmatpush1.bf16.msra.mxu0 %v13253_v27 }
 0x8c3   :  { %11093 = vmatprep.subr.bf16.mxu0 %v13258_v36 }
 0x8c6   :  { %11094 = vmatpush1.bf16.msra.mxu0 %v13256_v60 }
 0x8c7   :  { %11095 = vmatprep.subr.bf16.mxu0 %v13261_v53 }
 0x8ca   :  { %11096 = vmatpush1.bf16.msra.mxu0 %v13259_v50 }
 0x8cb   :  { %11097 = vmatprep.subr.bf16.mxu0 %v13264_v32 }
 0x8ce   :  { %11098 = vmatpush1.bf16.msra.mxu0 %v13262_v7 }
 0x8cf   :  { %11099 = vmatprep.subr.bf16.mxu0 %v13267_v29 }
 0x8d2   :  { %11100 = vmatpush1.bf16.msra.mxu0 %v13265_v16 }
 0x8d3   :  { %11101 = vmatprep.subr.bf16.mxu0 %v13270_v3 }
 0x8d6   :  { %11102 = vmatpush1.bf16.msra.mxu0 %v13268_v59 }
 0x8d7   :  { %11103 = vmatprep.subr.bf16.mxu0 %v13273_v35 }
 0x8da   :  { %11104 = vmatpush1.bf16.msra.mxu0 %v13271_v6 }
 0x8dd   :  { %11106 = vmatmul.mubr.bf16.vlgmr.msra.gmra.mrb[20].mxu0 %v14148_v52 }
 0x9b0   :  { %v11107_v5 = vpop.f32.mrb[20].mxu0 }
 0x9b1   :  { %v12553_v45 = vadd.f32 %v11107_v5, %v8691_v41  ;;  %v11109_v46 = vpop.f32.mrb[21].mxu0 }
 0x9b2   :  { %v12554_v9 = vadd.f32 %v11109_v46, %v8695_v44  ;;  %v11111_v26 = vpop.f32.mrb[22].mxu0 }
 0x9b3   :  { %11118 = vst [vmem:[#allocation17 + $0x20] sm:$0xff] %v12553_v45  ;;  %v11112_v61 = vpop.f32.mrb[23].mxu0 }
 0x9b4   :  { %11119 = vst [vmem:[#allocation17 + $0x28] sm:$0xff] %v12554_v9 }
 0x9b5   :  { %13515 = shalt.err (!%p13512_p6)
}
 0x9b6   :  { %s13516_s2 = scalar_lea.hbm %s14195_s9, 768 }
 0x9b7   :  { %p13517_p7 = scmp.ne.s32.totalorder %s14195_s9, %s13516_s2  ;;  %p13520_p8 = scmp.lt.u32.totalorder %s13516_s2, %s14195_s9 }
 0x9b9   :  { %p13522_p9 = pnand %p13520_p8, %p13517_p7 }
 0x9bb   :  { %13525 = shalt.err (!%p13522_p9)
}
 0x9bc   :  { %11129 = dma.vmem_to_hbm [thread:$0]  %s11127_s27, 768, %s14195_s9, [#allocation4]  }
 0x9bd   :  { %13536 = dma.done.wait [#allocation4], 768  }
 0x9be   :  { %13537 = vsyncadd [#allocation4], 4294966528 }
 0x9bf   :  { %11133 = vsyncpa [#allocation3], 1 }
 0x9c0   :  { %11134 = vsyncpa [#allocation6], 1 }
 0x9c1   :  { %11135 = vsyncpa [#allocation9], 1 }
 0x9c2   :  { %11136 = vsyncpa [#allocation12], 1 }
 0x9c3   :  { %11137 = vsyncpa [#allocation15], 1 }
 0x9c4   :  { %11138 = vsyncpa [#allocation4], 1 }

</bundles_post_ra>
